<compile_context>
chip_gen: v7x
topology: tpu7x:2x2x1
jax: 0.10.0
libtpu: 0.0.40
codegen_flags: <defaults>
</compile_context>

<pallas_src>
import functools
import math

import jax
import jax.numpy as jnp
from jax import lax
from jax.experimental import pallas as pl
from jax.experimental.pallas import tpu as pltpu


_K = 4     # conv kernel size used by the default AcDiscriminator arch ('C4-*-2')
_S = 2     # conv stride
_PAD = 1   # 'same' padding for K=4, taken as (K-1)//2
# TODO(synk): kernels are specialized for the K=4 / stride=2 convs of the default
#             arch; other C-specs (and P/R/U/FC/norm layers) would need variants.


# =============================================================================
# Small capability / sizing helpers.
# =============================================================================
@functools.lru_cache(maxsize=None)
def _vmem_cap_bytes():
    """Per-generation scoped-VMEM cap: ~56 MiB on v7x (64 MiB physical VMEM),
    ~112 MiB on v5e/v6e (128 MiB) -- leaves headroom for compiler scratch."""
    try:
        phys = int(pltpu.get_tpu_info().vmem_capacity_bytes)
    except Exception:
        phys = 128 << 20
    return int(min(phys - (phys >> 3), 112 << 20))


@functools.lru_cache(maxsize=None)
def _buffered_one_supported():
    """Probe pl.Buffered(1) (single-buffered grid-invariant inputs)."""
    try:
        with jax.ensure_compile_time_eval():
            def k(x_ref, o_ref):
                o_ref[...] = x_ref[...] * 2.0
            out = pl.pallas_call(
                k,
                out_shape=jax.ShapeDtypeStruct((16, 128), jnp.float32),
                grid=(2,),
                in_specs=[pl.BlockSpec((8, 128), lambda i: (0, 0),
                                       pipeline_mode=pl.Buffered(buffer_count=1))],
                out_specs=pl.BlockSpec((8, 128), lambda i: (i, 0)),
            )(jnp.ones((8, 128), jnp.float32))
            return bool(jnp.all(out == 2.0))
    except Exception:
        return False


def _const_spec(shape):
    """BlockSpec for a grid-invariant input (weights/bias): single-buffered when
    the runtime supports it (frees VMEM for bigger batch chunks)."""
    nd = len(shape)
    if _buffered_one_supported():
        return pl.BlockSpec(shape, lambda i, _n=nd: (0,) * _n,
                            pipeline_mode=pl.Buffered(buffer_count=1))
    return pl.BlockSpec(shape, lambda i, _n=nd: (0,) * _n)


def _pick_nb(N, Ho, Wo, per_sample_bytes, budget_bytes):
    """Samples folded into one grid step: enough for MXU M >= 256 when possible,
    capped by VMEM and so that >=2 parallel grid steps remain (v7x: 2 cores)."""
    want = max(1, -(-256 // max(Ho * Wo, 1)))
    cap_vmem = max(1, budget_bytes // max(per_sample_bytes, 1))
    cap_steps = max(1, N // 2) if N > 1 else 1
    nb = int(max(1, min(N, want, cap_vmem, cap_steps)))
    while N % nb:
        nb -= 1
    return nb


# =============================================================================
# Layout helpers (XLA side; layer-1 prep and test-only inverse).
# =============================================================================
def image_to_phase_input(x_nhwc, cin_pad):
    """'same' (pad=1) spatial pad + channel pad + (H,W) stride-phase deinterleave.
    Returns bf16 (N, 4, H/2+1, (W/2+1)*cin_pad); phase index = 2*rowphase+colphase."""
    N, H, W, C = x_nhwc.shape
    assert H % 2 == 0 and W % 2 == 0
    xb = x_nhwc.astype(jnp.bfloat16)
    xp = jnp.pad(xb, ((0, 0), (_PAD, _PAD), (_PAD, _PAD), (0, cin_pad - C)))
    HP, WP = H + 2 * _PAD, W + 2 * _PAD
    t = xp.reshape(N, HP // 2, 2, WP // 2, 2, cin_pad).transpose(0, 2, 4, 1, 3, 5)
    return t.reshape(N, _S * _S, HP // 2, (WP // 2) * cin_pad)


def phase_to_dense(xph, H, W, C):
    """Test helper: invert the phase layout back to the unpadded (N,H,W,C) map."""
    N = xph.shape[0]
    HPh = xph.shape[2]
    WPh = xph.shape[3] // C
    t = xph.reshape(N, 2, 2, HPh, WPh, C).transpose(0, 3, 1, 4, 2, 5)
    t = t.reshape(N, 2 * HPh, 2 * WPh, C)
    return t[:, _PAD:_PAD + H, _PAD:_PAD + W, :]


# =============================================================================
# Conv2d(k=4, s=2, pad=1) [+ bias] [+ ReLU], phase-layout in / phase-layout out.
# =============================================================================
def _conv4x4s2_kernel(x_ref, w_ref, b_ref, o_ref, *, NB, HPh, WPh, Cin,
                      Ho, Wo, Cout, WPh2, apply_relu):
    """One grid step = NB whole feature maps.

    x_ref : (NB, 4, HPh, WPh*Cin)    phase-deinterleaved padded input (bf16)
    w_ref : (16, Cin, Cout)          weights, taps ordered kh*4+kw (bf16)
    b_ref : (1, Cout)                bias (f32)
    o_ref : (NB, 4, HPh2, WPh2*Cout) next layer's phase-deinterleaved padded
                                     input (bf16); spatial padding written as 0.
    """
    HPh2 = Ho // 2 + 1
    M = NB * Ho * Wo

    # Load each phase plane once and split its lanes into (WPh, Cin) so every tap
    # below is a contiguous slice (no per-tap stack/concat copies).
    xs = [x_ref[:, p].reshape(NB, HPh, WPh, Cin) for p in range(_S * _S)]

    acc = jnp.zeros((M, Cout), jnp.float32)
    for kh in range(_K):                          # 16 taps -> 16 MXU dots, M=NB*Ho*Wo
        qh, ph = kh // _S, kh % _S
        for kw in range(_K):
            qw, pw = kw // _S, kw % _S
            lhs = xs[ph * _S + pw][:, qh:qh + Ho, qw:qw + Wo, :].reshape(M, Cin)
            acc = acc + jnp.dot(lhs, w_ref[kh * _K + kw],
                                preferred_element_type=jnp.float32)

    acc = acc + b_ref[...]                        # bias + activation once, in f32
    if apply_relu:
        acc = jnp.maximum(acc, 0.0)
    y = acc.reshape(NB, Ho, Wo, Cout).astype(o_ref.dtype)

    # Emit the output directly as the next layer's 'same'-padded (pad=1),
    # stride-phase-deinterleaved input; padding rows/cols are written as zeros.
    y5 = y.reshape(NB, Ho // 2, 2, Wo, Cout)
    zrow = jnp.zeros((NB, 1, Wo // 2, Cout), y.dtype)
    for ph2 in range(_S):
        rows = y5[:, :, 1 - ph2]                  # row parity feeding this phase
        r5 = rows.reshape(NB, Ho // 2, Wo // 2, 2, Cout)
        for pw2 in range(_S):
            v = r5[:, :, :, 1 - pw2, :]           # (NB, Ho//2, Wo//2, Cout)
            if ph2 == 0:
                v = jnp.concatenate([zrow, v], axis=1)     # top pad row
            else:
                v = jnp.concatenate([v, zrow], axis=1)     # bottom pad row
            left = 1 - pw2
            right = WPh2 - left - Wo // 2
            parts = []
            if left:
                parts.append(jnp.zeros((NB, HPh2, left, Cout), y.dtype))
            parts.append(v)
            if right:
                parts.append(jnp.zeros((NB, HPh2, right, Cout), y.dtype))
            v = jnp.concatenate(parts, axis=2) if len(parts) > 1 else v
            o_ref[:, ph2 * _S + pw2] = v.reshape(NB, HPh2, WPh2 * Cout)


def conv4x4_s2_phase(xph, w_hwio, b, *, H, W, apply_relu):
    """'same'(pad=1) 4x4 stride-2 conv + bias (+ReLU) on the phase layout."""
    N = xph.shape[0]
    Kh, Kw, Cin, Cout = w_hwio.shape
    assert Kh == _K and Kw == _K, 'kernel specialized for k=4, stride=2 convs'
    assert H % 4 == 0 and W % 4 == 0, 'spatial dims must stay divisible by 4'
    HPh = H // 2 + 1
    assert xph.shape[1] == _S * _S and xph.shape[2] == HPh
    assert xph.shape[3] % Cin == 0
    WPh = xph.shape[3] // Cin
    assert WPh >= W // 2 + 1
    Ho, Wo = H // 2, W // 2
    HPh2 = Ho // 2 + 1
    # Round the stored plane width so each output row is a whole number of
    # 128-lane vregs (unmasked, lane-dense stores; extra columns are zeros).
    lane_unit = 128 // math.gcd(Cout, 128)
    WPh2 = -(-(Wo // 2 + 1) // lane_unit) * lane_unit

    in_bytes = _S * _S * HPh * WPh * Cin * 2
    out_bytes = _S * _S * HPh2 * WPh2 * Cout * 2
    NB = _pick_nb(N, Ho, Wo, 2 * (in_bytes + out_bytes), _vmem_cap_bytes() // 4)
    grid = (N // NB,)

    wk = w_hwio.astype(jnp.bfloat16).reshape(_K * _K, Cin, Cout)
    b2 = b.reshape(1, Cout).astype(jnp.float32)

    single = _buffered_one_supported()
    w_bytes = (_K * _K * Cin * Cout * 2 + 4 * Cout) * (1 if single else 2)
    tmp_bytes = NB * (2 * in_bytes + 2 * out_bytes + Ho * Wo * (2 * Cin + 6 * Cout))
    need = 2 * NB * (in_bytes + out_bytes) + w_bytes + tmp_bytes
    vmem_limit = int(min(_vmem_cap_bytes(), max(8 << 20, int(need * 1.5))))

    kernel = functools.partial(_conv4x4s2_kernel, NB=NB, HPh=HPh, WPh=WPh,
                               Cin=Cin, Ho=Ho, Wo=Wo, Cout=Cout, WPh2=WPh2,
                               apply_relu=apply_relu)
    return pl.pallas_call(
        kernel,
        out_shape=jax.ShapeDtypeStruct((N, _S * _S, HPh2, WPh2 * Cout),
                                       jnp.bfloat16),
        grid=grid,
        in_specs=[
            pl.BlockSpec((NB, _S * _S, HPh, WPh * Cin), lambda i: (i, 0, 0, 0)),
            _const_spec((_K * _K, Cin, Cout)),   # grid-invariant -> single buffer
            _const_spec((1, Cout)),
        ],
        out_specs=pl.BlockSpec((NB, _S * _S, HPh2, WPh2 * Cout),
                               lambda i: (i, 0, 0, 0)),
        compiler_params=pltpu.CompilerParams(
            dimension_semantics=("parallel",),
            vmem_limit_bytes=vmem_limit),
    )(xph, wk, b2)


# =============================================================================
# Head: GlobalAvgPool + Linear(D,1024) + real/obj heads + cross-entropy.
# =============================================================================
def _head_kernel(feats_ref, w1_ref, b1_ref, wr_ref, br_ref, wo_ref, bo_ref, y_ref,
                 real_ref, loss_ref, *, Ho, Wo, WPh, D):
    N = feats_ref.shape[0]
    lanes = feats_ref.shape[3]
    # GlobalAvgPool over the phase-deinterleaved padded map: padding is zero, so
    # the sum over everything equals the sum over the Ho*Wo valid pixels.
    x = feats_ref[...].reshape(N, -1, lanes).astype(jnp.float32)
    s = jnp.sum(x, axis=1)                                    # (N, WPh*D)
    vec = s[:, 0:D]
    for j in range(1, WPh):
        vec = vec + s[:, j * D:(j + 1) * D]
    vec = vec * (1.0 / float(Ho * Wo))
    h = jnp.dot(vec.astype(jnp.bfloat16), w1_ref[...],
                preferred_element_type=jnp.float32) + b1_ref[...]
    # real head (1024 -> 1): VPU multiply + lane reduction, no 1-column matmul.
    real_ref[...] = jnp.sum(h * wr_ref[...], axis=1, keepdims=True) + br_ref[...]
    logits = jnp.dot(h.astype(jnp.bfloat16), wo_ref[...],
                     preferred_element_type=jnp.float32) + bo_ref[...]
    m = jnp.max(logits, axis=1, keepdims=True)
    lse = m + jnp.log(jnp.sum(jnp.exp(logits - m), axis=1, keepdims=True))
    cls = lax.broadcasted_iota(jnp.int32, logits.shape, 1)
    # NOTE: assumes labels in [0, num_objects); out-of-range labels pick 0.
    picked = jnp.sum(jnp.where(cls == y_ref[...], logits, 0.0),
                     axis=1, keepdims=True)
    # NOTE: mean over the full batch -- the head runs as one grid step over all N.
    loss_ref[...] = jnp.sum(lse - picked, axis=0, keepdims=True) / N


def head_pallas(feats_ph, Ho, Wo, w1, b1, wr, br, wobj, bobj, y):
    N = feats_ph.shape[0]
    D, hidden = w1.shape
    WPh = feats_ph.shape[3] // D
    num_obj = wobj.shape[1]
    nobj_p = max(128, -(-num_obj // 128) * 128)     # classes padded to 128 lanes

    w1b = w1.astype(jnp.bfloat16)
    wob = jnp.pad(wobj.astype(jnp.bfloat16), ((0, 0), (0, nobj_p - num_obj)))
    bob = jnp.pad(bobj.reshape(1, num_obj).astype(jnp.float32),
                  ((0, 0), (0, nobj_p - num_obj)), constant_values=-1e9)
    b1f = b1.reshape(1, hidden).astype(jnp.float32)
    wrf = wr.reshape(1, hidden).astype(jnp.float32)
    brf = br.reshape(1, 1).astype(jnp.float32)
    y2 = y.reshape(N, 1).astype(jnp.int32)

    kernel = functools.partial(_head_kernel, Ho=Ho, Wo=Wo, WPh=WPh, D=D)

    def full(shape):
        nd = len(shape)
        return pl.BlockSpec(shape, lambda i, _n=nd: (0,) * _n)

    real, loss = pl.pallas_call(
        kernel,
        out_shape=(jax.ShapeDtypeStruct((N, 1), jnp.float32),
                   jax.ShapeDtypeStruct((1, 1), jnp.float32)),
        grid=(1,),
        in_specs=[full(feats_ph.shape), full((D, hidden)), full((1, hidden)),
                  full((1, hidden)), full((1, 1)), full((hidden, nobj_p)),
                  full((1, nobj_p)), full((N, 1))],
        out_specs=(full((N, 1)), full((1, 1))),
        compiler_params=pltpu.CompilerParams(
            dimension_semantics=("arbitrary",),
            vmem_limit_bytes=32 << 20),
    )(feats_ph, w1b, b1f, wrf, brf, wob, bob, y2)
    return real, loss[0, 0]


# =============================================================================
# Module-level parameter init + forward (glue).
# =============================================================================
def parse_arch(arch):
    specs = []
    for s in arch.split(','):
        s = s.strip()
        if s[0] == 'I':
            specs.append(('I', int(s[1:])))
        elif s[0] == 'C':
            vals = [int(v) for v in s[1:].split('-')]
            K, C = vals[0], vals[1]
            stride = vals[2] if len(vals) == 3 else 1
            specs.append(('C', K, C, stride))
        else:
            # TODO(synk): build_cnn 'R'/'U'/'P'/'FC' layer specs are not
            # implemented (unused by the default AcDiscriminator arch).
            raise NotImplementedError(f'unsupported arch spec {s!r}')
    return specs


def init_ac_discriminator_params(key, vocab, arch, input_nc=3, hidden=1024):
    num_objects = len(vocab['object_idx_to_name'])
    specs = parse_arch(arch)
    keys = iter(jax.random.split(key, 2 * len(specs) + 8))
    convs = []
    cur_c = input_nc
    for spec in specs:
        if spec[0] == 'I':
            cur_c = spec[1]
            continue
        _, K, C, stride = spec
        assert K == _K and stride == _S, 'kernel specialized for k=4, stride=2 convs'
        w = jax.random.normal(next(keys), (K, K, cur_c, C), jnp.float32) / math.sqrt(K * K * cur_c)
        b = jax.random.normal(next(keys), (C,), jnp.float32) * 0.01
        convs.append((w, b))
        cur_c = C
    D = cur_c
    return {
        'convs': convs,
        'w1': jax.random.normal(next(keys), (D, hidden), jnp.float32) / math.sqrt(D),
        'b1': jax.random.normal(next(keys), (hidden,), jnp.float32) * 0.01,
        'wr': jax.random.normal(next(keys), (1, hidden), jnp.float32) / math.sqrt(hidden),
        'br': jax.random.normal(next(keys), (1,), jnp.float32) * 0.01,
        'wo': jax.random.normal(next(keys), (hidden, num_objects), jnp.float32) / math.sqrt(hidden),
        'bo': jax.random.normal(next(keys), (num_objects,), jnp.float32) * 0.01,
    }


def ac_discriminator_forward(params, x, y):
    """x: (N, C, H, W) or (N, H, W) images (NCHW like the PyTorch module),
       y: (N,) int labels.  Returns (real_scores (N, 1), ac_loss scalar)."""
    if x.ndim == 3:
        x = x[:, None]                        # mirrors `x = x[:, None]`
    x = jnp.transpose(x, (0, 2, 3, 1))        # NCHW -> NHWC for the TPU kernels
    N, H, W, C = x.shape
    convs = params['convs']
    cin_pad = max(4, -(-C // 4) * 4)          # lane-friendly first-layer Cin
    feats = image_to_phase_input(x, cin_pad)
    cur_h, cur_w = H, W
    for li, (w, b) in enumerate(convs):
        if li == 0 and w.shape[2] != cin_pad:
            w = jnp.pad(w, ((0, 0), (0, 0), (0, cin_pad - w.shape[2]), (0, 0)))
        # build_cnn places the activation *before* every conv except the first,
        # i.e. ReLU after every conv except the last one.
        feats = conv4x4_s2_phase(feats, w, b, H=cur_h, W=cur_w,
                                 apply_relu=(li < len(convs) - 1))
        cur_h //= 2
        cur_w //= 2
    return head_pallas(feats, cur_h, cur_w, params['w1'], params['b1'],
                       params['wr'], params['br'], params['wo'], params['bo'], y)


if __name__ == '__main__':
    vocab = {'object_idx_to_name': ['obj%d' % i for i in range(16)]}
    arch = 'C4-64-2,C4-128-2,C4-256-2'        # default sg2im discriminator trunk

    key = jax.random.PRNGKey(0)
    kp, kx, ky = jax.random.split(key, 3)
    params = init_ac_discriminator_params(kp, vocab, arch)
    x = jax.random.normal(kx, (2, 3, 16, 16), jnp.float32)                 # NCHW
    y = jax.random.randint(ky, (2,), 0, len(vocab['object_idx_to_name']), jnp.int32)

    _ = _buffered_one_supported()             # eager capability probe before jit

    real_scores, ac_loss = jax.jit(ac_discriminator_forward)(params, x, y)
    jax.block_until_ready(real_scores)
    jax.block_until_ready(ac_loss)

    # ---- layer-by-layer check against XLA convolutions (same bf16 policy) ----
    x_nhwc = jnp.transpose(x, (0, 2, 3, 1))
    h_ref = x_nhwc.astype(jnp.bfloat16)
    cin_pad = 4
    feats = image_to_phase_input(x_nhwc, cin_pad)
    cur_h, cur_w = 16, 16
    for li, (w, b) in enumerate(params['convs']):
        relu = li < len(params['convs']) - 1
        wp = w
        if li == 0 and w.shape[2] != cin_pad:
            wp = jnp.pad(w, ((0, 0), (0, 0), (0, cin_pad - w.shape[2]), (0, 0)))
        feats = conv4x4_s2_phase(feats, wp, b, H=cur_h, W=cur_w, apply_relu=relu)
        cur_h //= 2
        cur_w //= 2
        o = lax.conv_general_dilated(
            h_ref, w.astype(jnp.bfloat16), (_S, _S), [(_PAD, _PAD), (_PAD, _PAD)],
            dimension_numbers=('NHWC', 'HWIO', 'NHWC'),
            preferred_element_type=jnp.float32) + b
        if relu:
            o = jnp.maximum(o, 0.0)
        h_ref = o.astype(jnp.bfloat16)
        got = phase_to_dense(feats, cur_h, cur_w, w.shape[3]).astype(jnp.float32)
        assert got.shape == h_ref.shape
        assert jnp.allclose(got, h_ref.astype(jnp.float32),
                            atol=2e-2, rtol=2e-2), f'conv layer {li} mismatch'

    # ---- full-forward reference --------------------------------------------
    vec = jnp.mean(h_ref.astype(jnp.float32), axis=(1, 2))
    hh = jnp.dot(vec.astype(jnp.bfloat16), params['w1'].astype(jnp.bfloat16),
                 preferred_element_type=jnp.float32) + params['b1']
    real_ref = hh @ params['wr'].T + params['br']
    logits = jnp.dot(hh.astype(jnp.bfloat16), params['wo'].astype(jnp.bfloat16),
                     preferred_element_type=jnp.float32) + params['bo']
    m = jnp.max(logits, axis=1, keepdims=True)
    lse = (m + jnp.log(jnp.sum(jnp.exp(logits - m), axis=1, keepdims=True)))[:, 0]
    picked = jnp.take_along_axis(logits, y[:, None], axis=1)[:, 0]
    loss_ref = jnp.mean(lse - picked)

    assert real_scores.shape == (2, 1)
    assert jnp.allclose(real_scores, real_ref, atol=3e-2, rtol=3e-2)
    assert jnp.allclose(ac_loss, loss_ref, atol=3e-2, rtol=3e-2)
    assert bool(jnp.isfinite(ac_loss))

    print("KERNEL_OK")
</pallas_src>

<mosaic_0001>
module attributes {stable_mosaic.version = 11 : i64} {
  func.func @k(%arg0: i32, %arg1: memref<8x128xf32, #tpu.memory_space<vmem>>, %arg2: memref<8x128xf32, #tpu.memory_space<vmem>>) attributes {dimension_semantics = [#tpu.dimension_semantics<arbitrary>], iteration_bounds = array<i64: 2>, scalar_prefetch = 0 : i64, scratch_operands = 0 : i64, tpu.core_type = #tpu.core_type<tc>, window_params = [{pipeline_mode = #tpu.pipeline_mode<synchronous>, transform_indices = @transform_0, window_bounds = array<i64: 8, 128>}, {transform_indices = @transform_1, window_bounds = array<i64: 8, 128>}]} {
    %c0 = arith.constant 0 : index
    %c0_0 = arith.constant 0 : index
    %0 = vector.load %arg1[%c0, %c0_0] : memref<8x128xf32, #tpu.memory_space<vmem>>, vector<8x128xf32>
    %cst = arith.constant 2.000000e+00 : f32
    %1 = vector.broadcast %cst : f32 to vector<8x128xf32>
    %2 = arith.mulf %0, %1 : vector<8x128xf32>
    %c0_1 = arith.constant 0 : index
    %c0_2 = arith.constant 0 : index
    %3 = vector.load %arg2[%c0_1, %c0_2] : memref<8x128xf32, #tpu.memory_space<vmem>>, vector<8x128xf32>
    tpu.vector_store %arg2[%c0_1, %c0_2], %2 {strides = array<i32>} : memref<8x128xf32, #tpu.memory_space<vmem>>, vector<8x128xf32>,
    return
  }
  func.func @transform_0(%arg0: i32) -> (i32, i32) {
    %c0_i32 = arith.constant 0 : i32
    %c0_i32_0 = arith.constant 0 : i32
    %c0_i32_1 = arith.constant 0 : i32
    return %c0_i32, %c0_i32_0 : i32, i32
  }
  func.func @transform_1(%arg0: i32) -> (i32, i32) {
    %c0_i32 = arith.constant 0 : i32
    %c0_i32_0 = arith.constant 0 : i32
    return %arg0, %c0_i32 : i32, i32
  }
}

module attributes {stable_mosaic.version = 11 : i64} {
  func.func @_conv4x4s2_kernel(%arg0: i32, %arg1: memref<1x4x5x384xbf16, #tpu.memory_space<vmem>>, %arg2: memref<16x64x128xbf16, #tpu.memory_space<vmem>>, %arg3: memref<1x128xf32, #tpu.memory_space<vmem>>, %arg4: memref<1x4x3x384xbf16, #tpu.memory_space<vmem>>) attributes {dimension_semantics = [#tpu.dimension_semantics<parallel>], iteration_bounds = array<i64: 2>, scalar_prefetch = 0 : i64, scratch_operands = 0 : i64, tpu.core_type = #tpu.core_type<tc>, window_params = [{transform_indices = @transform_0, window_bounds = array<i64: 1, 4, 5, 384>}, {pipeline_mode = #tpu.pipeline_mode<synchronous>, transform_indices = @transform_1, window_bounds = array<i64: 16, 64, 128>}, {pipeline_mode = #tpu.pipeline_mode<synchronous>, transform_indices = @transform_2, window_bounds = array<i64: 1, 128>}, {transform_indices = @transform_3, window_bounds = array<i64: 1, 4, 3, 384>}]} {
    %c0 = arith.constant 0 : index
    %c0_0 = arith.constant 0 : index
    %c0_1 = arith.constant 0 : index
    %c0_2 = arith.constant 0 : index
    %0 = vector.load %arg1[%c0, %c0_0, %c0_1, %c0_2] : memref<1x4x5x384xbf16, #tpu.memory_space<vmem>>, vector<1x1x5x384xbf16>
    %1 = vector.shape_cast %0 : vector<1x1x5x384xbf16> to vector<1x5x384xbf16>
    %2 = vector.shape_cast %1 : vector<1x5x384xbf16> to vector<1x5x6x64xbf16>
    %c0_3 = arith.constant 0 : index
    %c1 = arith.constant 1 : index
    %c0_4 = arith.constant 0 : index
    %c0_5 = arith.constant 0 : index
    %3 = vector.load %arg1[%c0_3, %c1, %c0_4, %c0_5] : memref<1x4x5x384xbf16, #tpu.memory_space<vmem>>, vector<1x1x5x384xbf16>
    %4 = vector.shape_cast %3 : vector<1x1x5x384xbf16> to vector<1x5x384xbf16>
    %5 = vector.shape_cast %4 : vector<1x5x384xbf16> to vector<1x5x6x64xbf16>
    %c0_6 = arith.constant 0 : index
    %c2 = arith.constant 2 : index
    %c0_7 = arith.constant 0 : index
    %c0_8 = arith.constant 0 : index
    %6 = vector.load %arg1[%c0_6, %c2, %c0_7, %c0_8] : memref<1x4x5x384xbf16, #tpu.memory_space<vmem>>, vector<1x1x5x384xbf16>
    %7 = vector.shape_cast %6 : vector<1x1x5x384xbf16> to vector<1x5x384xbf16>
    %8 = vector.shape_cast %7 : vector<1x5x384xbf16> to vector<1x5x6x64xbf16>
    %c0_9 = arith.constant 0 : index
    %c3 = arith.constant 3 : index
    %c0_10 = arith.constant 0 : index
    %c0_11 = arith.constant 0 : index
    %9 = vector.load %arg1[%c0_9, %c3, %c0_10, %c0_11] : memref<1x4x5x384xbf16, #tpu.memory_space<vmem>>, vector<1x1x5x384xbf16>
    %10 = vector.shape_cast %9 : vector<1x1x5x384xbf16> to vector<1x5x384xbf16>
    %11 = vector.shape_cast %10 : vector<1x5x384xbf16> to vector<1x5x6x64xbf16>
    %cst = arith.constant 0.000000e+00 : f32
    %12 = vector.broadcast %cst : f32 to vector<16x128xf32>
    %13 = vector.extract_strided_slice %2 {offsets = [0, 0, 0, 0], sizes = [1, 4, 4, 64], strides = [1, 1, 1, 1]} : vector<1x5x6x64xbf16> to vector<1x4x4x64xbf16>
    %14 = vector.shape_cast %13 : vector<1x4x4x64xbf16> to vector<16x64xbf16>
    %c0_12 = arith.constant 0 : index
    %c0_13 = arith.constant 0 : index
    %c0_14 = arith.constant 0 : index
    %15 = vector.load %arg2[%c0_12, %c0_13, %c0_14] : memref<16x64x128xbf16, #tpu.memory_space<vmem>>, vector<1x64x128xbf16>
    %16 = vector.shape_cast %15 : vector<1x64x128xbf16> to vector<64x128xbf16>
    %cst_15 = arith.constant dense<0.000000e+00> : vector<16x128xf32>
    %17 = tpu.matmul %14, %16, %cst_15 {dimension_numbers = #tpu.dot_dimension_numbers<[1], [0], [0], [1], [0, 0, 1, 1], [], []>} : vector<16x64xbf16>, vector<64x128xbf16>, vector<16x128xf32> -> vector<16x128xf32>
    %18 = arith.addf %12, %17 : vector<16x128xf32>
    %19 = vector.extract_strided_slice %5 {offsets = [0, 0, 0, 0], sizes = [1, 4, 4, 64], strides = [1, 1, 1, 1]} : vector<1x5x6x64xbf16> to vector<1x4x4x64xbf16>
    %20 = vector.shape_cast %19 : vector<1x4x4x64xbf16> to vector<16x64xbf16>
    %c1_16 = arith.constant 1 : index
    %c0_17 = arith.constant 0 : index
    %c0_18 = arith.constant 0 : index
    %21 = vector.load %arg2[%c1_16, %c0_17, %c0_18] : memref<16x64x128xbf16, #tpu.memory_space<vmem>>, vector<1x64x128xbf16>
    %22 = vector.shape_cast %21 : vector<1x64x128xbf16> to vector<64x128xbf16>
    %cst_19 = arith.constant dense<0.000000e+00> : vector<16x128xf32>
    %23 = tpu.matmul %20, %22, %cst_19 {dimension_numbers = #tpu.dot_dimension_numbers<[1], [0], [0], [1], [0, 0, 1, 1], [], []>} : vector<16x64xbf16>, vector<64x128xbf16>, vector<16x128xf32> -> vector<16x128xf32>
    %24 = arith.addf %18, %23 : vector<16x128xf32>
    %25 = vector.extract_strided_slice %2 {offsets = [0, 0, 1, 0], sizes = [1, 4, 4, 64], strides = [1, 1, 1, 1]} : vector<1x5x6x64xbf16> to vector<1x4x4x64xbf16>
    %26 = vector.shape_cast %25 : vector<1x4x4x64xbf16> to vector<16x64xbf16>
    %c2_20 = arith.constant 2 : index
    %c0_21 = arith.constant 0 : index
    %c0_22 = arith.constant 0 : index
    %27 = vector.load %arg2[%c2_20, %c0_21, %c0_22] : memref<16x64x128xbf16, #tpu.memory_space<vmem>>, vector<1x64x128xbf16>
    %28 = vector.shape_cast %27 : vector<1x64x128xbf16> to vector<64x128xbf16>
    %cst_23 = arith.constant dense<0.000000e+00> : vector<16x128xf32>
    %29 = tpu.matmul %26, %28, %cst_23 {dimension_numbers = #tpu.dot_dimension_numbers<[1], [0], [0], [1], [0, 0, 1, 1], [], []>} : vector<16x64xbf16>, vector<64x128xbf16>, vector<16x128xf32> -> vector<16x128xf32>
    %30 = arith.addf %24, %29 : vector<16x128xf32>
    %31 = vector.extract_strided_slice %5 {offsets = [0, 0, 1, 0], sizes = [1, 4, 4, 64], strides = [1, 1, 1, 1]} : vector<1x5x6x64xbf16> to vector<1x4x4x64xbf16>
    %32 = vector.shape_cast %31 : vector<1x4x4x64xbf16> to vector<16x64xbf16>
    %c3_24 = arith.constant 3 : index
    %c0_25 = arith.constant 0 : index
    %c0_26 = arith.constant 0 : index
    %33 = vector.load %arg2[%c3_24, %c0_25, %c0_26] : memref<16x64x128xbf16, #tpu.memory_space<vmem>>, vector<1x64x128xbf16>
    %34 = vector.shape_cast %33 : vector<1x64x128xbf16> to vector<64x128xbf16>
    %cst_27 = arith.constant dense<0.000000e+00> : vector<16x128xf32>
    %35 = tpu.matmul %32, %34, %cst_27 {dimension_numbers = #tpu.dot_dimension_numbers<[1], [0], [0], [1], [0, 0, 1, 1], [], []>} : vector<16x64xbf16>, vector<64x128xbf16>, vector<16x128xf32> -> vector<16x128xf32>
    %36 = arith.addf %30, %35 : vector<16x128xf32>
    %37 = vector.extract_strided_slice %8 {offsets = [0, 0, 0, 0], sizes = [1, 4, 4, 64], strides = [1, 1, 1, 1]} : vector<1x5x6x64xbf16> to vector<1x4x4x64xbf16>
    %38 = vector.shape_cast %37 : vector<1x4x4x64xbf16> to vector<16x64xbf16>
    %c4 = arith.constant 4 : index
    %c0_28 = arith.constant 0 : index
    %c0_29 = arith.constant 0 : index
    %39 = vector.load %arg2[%c4, %c0_28, %c0_29] : memref<16x64x128xbf16, #tpu.memory_space<vmem>>, vector<1x64x128xbf16>
    %40 = vector.shape_cast %39 : vector<1x64x128xbf16> to vector<64x128xbf16>
    %cst_30 = arith.constant dense<0.000000e+00> : vector<16x128xf32>
    %41 = tpu.matmul %38, %40, %cst_30 {dimension_numbers = #tpu.dot_dimension_numbers<[1], [0], [0], [1], [0, 0, 1, 1], [], []>} : vector<16x64xbf16>, vector<64x128xbf16>, vector<16x128xf32> -> vector<16x128xf32>
    %42 = arith.addf %36, %41 : vector<16x128xf32>
    %43 = vector.extract_strided_slice %11 {offsets = [0, 0, 0, 0], sizes = [1, 4, 4, 64], strides = [1, 1, 1, 1]} : vector<1x5x6x64xbf16> to vector<1x4x4x64xbf16>
    %44 = vector.shape_cast %43 : vector<1x4x4x64xbf16> to vector<16x64xbf16>
    %c5 = arith.constant 5 : index
    %c0_31 = arith.constant 0 : index
    %c0_32 = arith.constant 0 : index
    %45 = vector.load %arg2[%c5, %c0_31, %c0_32] : memref<16x64x128xbf16, #tpu.memory_space<vmem>>, vector<1x64x128xbf16>
    %46 = vector.shape_cast %45 : vector<1x64x128xbf16> to vector<64x128xbf16>
    %cst_33 = arith.constant dense<0.000000e+00> : vector<16x128xf32>
    %47 = tpu.matmul %44, %46, %cst_33 {dimension_numbers = #tpu.dot_dimension_numbers<[1], [0], [0], [1], [0, 0, 1, 1], [], []>} : vector<16x64xbf16>, vector<64x128xbf16>, vector<16x128xf32> -> vector<16x128xf32>
    %48 = arith.addf %42, %47 : vector<16x128xf32>
    %49 = vector.extract_strided_slice %8 {offsets = [0, 0, 1, 0], sizes = [1, 4, 4, 64], strides = [1, 1, 1, 1]} : vector<1x5x6x64xbf16> to vector<1x4x4x64xbf16>
    %50 = vector.shape_cast %49 : vector<1x4x4x64xbf16> to vector<16x64xbf16>
    %c6 = arith.constant 6 : index
    %c0_34 = arith.constant 0 : index
    %c0_35 = arith.constant 0 : index
    %51 = vector.load %arg2[%c6, %c0_34, %c0_35] : memref<16x64x128xbf16, #tpu.memory_space<vmem>>, vector<1x64x128xbf16>
    %52 = vector.shape_cast %51 : vector<1x64x128xbf16> to vector<64x128xbf16>
    %cst_36 = arith.constant dense<0.000000e+00> : vector<16x128xf32>
    %53 = tpu.matmul %50, %52, %cst_36 {dimension_numbers = #tpu.dot_dimension_numbers<[1], [0], [0], [1], [0, 0, 1, 1], [], []>} : vector<16x64xbf16>, vector<64x128xbf16>, vector<16x128xf32> -> vector<16x128xf32>
    %54 = arith.addf %48, %53 : vector<16x128xf32>
    %55 = vector.extract_strided_slice %11 {offsets = [0, 0, 1, 0], sizes = [1, 4, 4, 64], strides = [1, 1, 1, 1]} : vector<1x5x6x64xbf16> to vector<1x4x4x64xbf16>
    %56 = vector.shape_cast %55 : vector<1x4x4x64xbf16> to vector<16x64xbf16>
    %c7 = arith.constant 7 : index
    %c0_37 = arith.constant 0 : index
    %c0_38 = arith.constant 0 : index
    %57 = vector.load %arg2[%c7, %c0_37, %c0_38] : memref<16x64x128xbf16, #tpu.memory_space<vmem>>, vector<1x64x128xbf16>
    %58 = vector.shape_cast %57 : vector<1x64x128xbf16> to vector<64x128xbf16>
    %cst_39 = arith.constant dense<0.000000e+00> : vector<16x128xf32>
    %59 = tpu.matmul %56, %58, %cst_39 {dimension_numbers = #tpu.dot_dimension_numbers<[1], [0], [0], [1], [0, 0, 1, 1], [], []>} : vector<16x64xbf16>, vector<64x128xbf16>, vector<16x128xf32> -> vector<16x128xf32>
    %60 = arith.addf %54, %59 : vector<16x128xf32>
    %61 = vector.extract_strided_slice %2 {offsets = [0, 1, 0, 0], sizes = [1, 4, 4, 64], strides = [1, 1, 1, 1]} : vector<1x5x6x64xbf16> to vector<1x4x4x64xbf16>
    %62 = vector.shape_cast %61 : vector<1x4x4x64xbf16> to vector<16x64xbf16>
    %c8 = arith.constant 8 : index
    %c0_40 = arith.constant 0 : index
    %c0_41 = arith.constant 0 : index
    %63 = vector.load %arg2[%c8, %c0_40, %c0_41] : memref<16x64x128xbf16, #tpu.memory_space<vmem>>, vector<1x64x128xbf16>
    %64 = vector.shape_cast %63 : vector<1x64x128xbf16> to vector<64x128xbf16>
    %cst_42 = arith.constant dense<0.000000e+00> : vector<16x128xf32>
    %65 = tpu.matmul %62, %64, %cst_42 {dimension_numbers = #tpu.dot_dimension_numbers<[1], [0], [0], [1], [0, 0, 1, 1], [], []>} : vector<16x64xbf16>, vector<64x128xbf16>, vector<16x128xf32> -> vector<16x128xf32>
    %66 = arith.addf %60, %65 : vector<16x128xf32>
    %67 = vector.extract_strided_slice %5 {offsets = [0, 1, 0, 0], sizes = [1, 4, 4, 64], strides = [1, 1, 1, 1]} : vector<1x5x6x64xbf16> to vector<1x4x4x64xbf16>
    %68 = vector.shape_cast %67 : vector<1x4x4x64xbf16> to vector<16x64xbf16>
    %c9 = arith.constant 9 : index
    %c0_43 = arith.constant 0 : index
    %c0_44 = arith.constant 0 : index
    %69 = vector.load %arg2[%c9, %c0_43, %c0_44] : memref<16x64x128xbf16, #tpu.memory_space<vmem>>, vector<1x64x128xbf16>
    %70 = vector.shape_cast %69 : vector<1x64x128xbf16> to vector<64x128xbf16>
    %cst_45 = arith.constant dense<0.000000e+00> : vector<16x128xf32>
    %71 = tpu.matmul %68, %70, %cst_45 {dimension_numbers = #tpu.dot_dimension_numbers<[1], [0], [0], [1], [0, 0, 1, 1], [], []>} : vector<16x64xbf16>, vector<64x128xbf16>, vector<16x128xf32> -> vector<16x128xf32>
    %72 = arith.addf %66, %71 : vector<16x128xf32>
    %73 = vector.extract_strided_slice %2 {offsets = [0, 1, 1, 0], sizes = [1, 4, 4, 64], strides = [1, 1, 1, 1]} : vector<1x5x6x64xbf16> to vector<1x4x4x64xbf16>
    %74 = vector.shape_cast %73 : vector<1x4x4x64xbf16> to vector<16x64xbf16>
    %c10 = arith.constant 10 : index
    %c0_46 = arith.constant 0 : index
    %c0_47 = arith.constant 0 : index
    %75 = vector.load %arg2[%c10, %c0_46, %c0_47] : memref<16x64x128xbf16, #tpu.memory_space<vmem>>, vector<1x64x128xbf16>
    %76 = vector.shape_cast %75 : vector<1x64x128xbf16> to vector<64x128xbf16>
    %cst_48 = arith.constant dense<0.000000e+00> : vector<16x128xf32>
    %77 = tpu.matmul %74, %76, %cst_48 {dimension_numbers = #tpu.dot_dimension_numbers<[1], [0], [0], [1], [0, 0, 1, 1], [], []>} : vector<16x64xbf16>, vector<64x128xbf16>, vector<16x128xf32> -> vector<16x128xf32>
    %78 = arith.addf %72, %77 : vector<16x128xf32>
    %79 = vector.extract_strided_slice %5 {offsets = [0, 1, 1, 0], sizes = [1, 4, 4, 64], strides = [1, 1, 1, 1]} : vector<1x5x6x64xbf16> to vector<1x4x4x64xbf16>
    %80 = vector.shape_cast %79 : vector<1x4x4x64xbf16> to vector<16x64xbf16>
    %c11 = arith.constant 11 : index
    %c0_49 = arith.constant 0 : index
    %c0_50 = arith.constant 0 : index
    %81 = vector.load %arg2[%c11, %c0_49, %c0_50] : memref<16x64x128xbf16, #tpu.memory_space<vmem>>, vector<1x64x128xbf16>
    %82 = vector.shape_cast %81 : vector<1x64x128xbf16> to vector<64x128xbf16>
    %cst_51 = arith.constant dense<0.000000e+00> : vector<16x128xf32>
    %83 = tpu.matmul %80, %82, %cst_51 {dimension_numbers = #tpu.dot_dimension_numbers<[1], [0], [0], [1], [0, 0, 1, 1], [], []>} : vector<16x64xbf16>, vector<64x128xbf16>, vector<16x128xf32> -> vector<16x128xf32>
    %84 = arith.addf %78, %83 : vector<16x128xf32>
    %85 = vector.extract_strided_slice %8 {offsets = [0, 1, 0, 0], sizes = [1, 4, 4, 64], strides = [1, 1, 1, 1]} : vector<1x5x6x64xbf16> to vector<1x4x4x64xbf16>
    %86 = vector.shape_cast %85 : vector<1x4x4x64xbf16> to vector<16x64xbf16>
    %c12 = arith.constant 12 : index
    %c0_52 = arith.constant 0 : index
    %c0_53 = arith.constant 0 : index
    %87 = vector.load %arg2[%c12, %c0_52, %c0_53] : memref<16x64x128xbf16, #tpu.memory_space<vmem>>, vector<1x64x128xbf16>
    %88 = vector.shape_cast %87 : vector<1x64x128xbf16> to vector<64x128xbf16>
    %cst_54 = arith.constant dense<0.000000e+00> : vector<16x128xf32>
    %89 = tpu.matmul %86, %88, %cst_54 {dimension_numbers = #tpu.dot_dimension_numbers<[1], [0], [0], [1], [0, 0, 1, 1], [], []>} : vector<16x64xbf16>, vector<64x128xbf16>, vector<16x128xf32> -> vector<16x128xf32>
    %90 = arith.addf %84, %89 : vector<16x128xf32>
    %91 = vector.extract_strided_slice %11 {offsets = [0, 1, 0, 0], sizes = [1, 4, 4, 64], strides = [1, 1, 1, 1]} : vector<1x5x6x64xbf16> to vector<1x4x4x64xbf16>
    %92 = vector.shape_cast %91 : vector<1x4x4x64xbf16> to vector<16x64xbf16>
    %c13 = arith.constant 13 : index
    %c0_55 = arith.constant 0 : index
    %c0_56 = arith.constant 0 : index
    %93 = vector.load %arg2[%c13, %c0_55, %c0_56] : memref<16x64x128xbf16, #tpu.memory_space<vmem>>, vector<1x64x128xbf16>
    %94 = vector.shape_cast %93 : vector<1x64x128xbf16> to vector<64x128xbf16>
    %cst_57 = arith.constant dense<0.000000e+00> : vector<16x128xf32>
    %95 = tpu.matmul %92, %94, %cst_57 {dimension_numbers = #tpu.dot_dimension_numbers<[1], [0], [0], [1], [0, 0, 1, 1], [], []>} : vector<16x64xbf16>, vector<64x128xbf16>, vector<16x128xf32> -> vector<16x128xf32>
    %96 = arith.addf %90, %95 : vector<16x128xf32>
    %97 = vector.extract_strided_slice %8 {offsets = [0, 1, 1, 0], sizes = [1, 4, 4, 64], strides = [1, 1, 1, 1]} : vector<1x5x6x64xbf16> to vector<1x4x4x64xbf16>
    %98 = vector.shape_cast %97 : vector<1x4x4x64xbf16> to vector<16x64xbf16>
    %c14 = arith.constant 14 : index
    %c0_58 = arith.constant 0 : index
    %c0_59 = arith.constant 0 : index
    %99 = vector.load %arg2[%c14, %c0_58, %c0_59] : memref<16x64x128xbf16, #tpu.memory_space<vmem>>, vector<1x64x128xbf16>
    %100 = vector.shape_cast %99 : vector<1x64x128xbf16> to vector<64x128xbf16>
    %cst_60 = arith.constant dense<0.000000e+00> : vector<16x128xf32>
    %101 = tpu.matmul %98, %100, %cst_60 {dimension_numbers = #tpu.dot_dimension_numbers<[1], [0], [0], [1], [0, 0, 1, 1], [], []>} : vector<16x64xbf16>, vector<64x128xbf16>, vector<16x128xf32> -> vector<16x128xf32>
    %102 = arith.addf %96, %101 : vector<16x128xf32>
    %103 = vector.extract_strided_slice %11 {offsets = [0, 1, 1, 0], sizes = [1, 4, 4, 64], strides = [1, 1, 1, 1]} : vector<1x5x6x64xbf16> to vector<1x4x4x64xbf16>
    %104 = vector.shape_cast %103 : vector<1x4x4x64xbf16> to vector<16x64xbf16>
    %c15 = arith.constant 15 : index
    %c0_61 = arith.constant 0 : index
    %c0_62 = arith.constant 0 : index
    %105 = vector.load %arg2[%c15, %c0_61, %c0_62] : memref<16x64x128xbf16, #tpu.memory_space<vmem>>, vector<1x64x128xbf16>
    %106 = vector.shape_cast %105 : vector<1x64x128xbf16> to vector<64x128xbf16>
    %cst_63 = arith.constant dense<0.000000e+00> : vector<16x128xf32>
    %107 = tpu.matmul %104, %106, %cst_63 {dimension_numbers = #tpu.dot_dimension_numbers<[1], [0], [0], [1], [0, 0, 1, 1], [], []>} : vector<16x64xbf16>, vector<64x128xbf16>, vector<16x128xf32> -> vector<16x128xf32>
    %108 = arith.addf %102, %107 : vector<16x128xf32>
    %c0_64 = arith.constant 0 : index
    %c0_65 = arith.constant 0 : index
    %109 = vector.load %arg3[%c0_64, %c0_65] : memref<1x128xf32, #tpu.memory_space<vmem>>, vector<1x128xf32>
    %110 = vector.broadcast %109 : vector<1x128xf32> to vector<16x128xf32>
    %111 = arith.addf %108, %110 : vector<16x128xf32>
    %cst_66 = arith.constant 0.000000e+00 : f32
    %112 = vector.broadcast %cst_66 : f32 to vector<16x128xf32>
    %113 = arith.maximumf %111, %112 : vector<16x128xf32>
    %114 = vector.shape_cast %113 : vector<16x128xf32> to vector<1x4x4x128xf32>
    %115 = arith.truncf %114 : vector<1x4x4x128xf32> to vector<1x4x4x128xbf16>
    %116 = vector.shape_cast %115 : vector<1x4x4x128xbf16> to vector<1x2x2x4x128xbf16>
    %cst_67 = arith.constant 0.000000e+00 : bf16
    %117 = vector.broadcast %cst_67 : bf16 to vector<1x1x2x128xbf16>
    %118 = vector.extract_strided_slice %116 {offsets = [0, 0, 1, 0, 0], sizes = [1, 2, 1, 4, 128], strides = [1, 1, 1, 1, 1]} : vector<1x2x2x4x128xbf16> to vector<1x2x1x4x128xbf16>
    %119 = vector.shape_cast %118 : vector<1x2x1x4x128xbf16> to vector<1x2x4x128xbf16>
    %120 = vector.shape_cast %119 : vector<1x2x4x128xbf16> to vector<1x2x2x2x128xbf16>
    %121 = vector.extract_strided_slice %120 {offsets = [0, 0, 0, 1, 0], sizes = [1, 2, 2, 1, 128], strides = [1, 1, 1, 1, 1]} : vector<1x2x2x2x128xbf16> to vector<1x2x2x1x128xbf16>
    %122 = vector.shape_cast %121 : vector<1x2x2x1x128xbf16> to vector<1x2x2x128xbf16>
    %123 = tpu.concatenate %117, %122 in 1 : vector<1x1x2x128xbf16>, vector<1x2x2x128xbf16> -> vector<1x3x2x128xbf16>
    %cst_68 = arith.constant 0.000000e+00 : bf16
    %124 = vector.broadcast %cst_68 : bf16 to vector<1x3x1x128xbf16>
    %125 = tpu.concatenate %124, %123 in 2 : vector<1x3x1x128xbf16>, vector<1x3x2x128xbf16> -> vector<1x3x3x128xbf16>
    %126 = vector.shape_cast %125 : vector<1x3x3x128xbf16> to vector<1x3x384xbf16>
    %c0_69 = arith.constant 0 : index
    %c0_70 = arith.constant 0 : index
    %c0_71 = arith.constant 0 : index
    %c0_72 = arith.constant 0 : index
    %127 = vector.load %arg4[%c0_69, %c0_70, %c0_71, %c0_72] : memref<1x4x3x384xbf16, #tpu.memory_space<vmem>>, vector<1x1x3x384xbf16>
    %128 = vector.shape_cast %127 : vector<1x1x3x384xbf16> to vector<1x3x384xbf16>
    %129 = vector.shape_cast %126 : vector<1x3x384xbf16> to vector<1x1x3x384xbf16>
    tpu.vector_store %arg4[%c0_69, %c0_70, %c0_71, %c0_72], %129 {strides = array<i32>} : memref<1x4x3x384xbf16, #tpu.memory_space<vmem>>, vector<1x1x3x384xbf16>,
    %130 = vector.extract_strided_slice %120 {offsets = [0, 0, 0, 0, 0], sizes = [1, 2, 2, 1, 128], strides = [1, 1, 1, 1, 1]} : vector<1x2x2x2x128xbf16> to vector<1x2x2x1x128xbf16>
    %131 = vector.shape_cast %130 : vector<1x2x2x1x128xbf16> to vector<1x2x2x128xbf16>
    %132 = tpu.concatenate %117, %131 in 1 : vector<1x1x2x128xbf16>, vector<1x2x2x128xbf16> -> vector<1x3x2x128xbf16>
    %cst_73 = arith.constant 0.000000e+00 : bf16
    %133 = vector.broadcast %cst_73 : bf16 to vector<1x3x1x128xbf16>
    %134 = tpu.concatenate %132, %133 in 2 : vector<1x3x2x128xbf16>, vector<1x3x1x128xbf16> -> vector<1x3x3x128xbf16>
    %135 = vector.shape_cast %134 : vector<1x3x3x128xbf16> to vector<1x3x384xbf16>
    %c0_74 = arith.constant 0 : index
    %c1_75 = arith.constant 1 : index
    %c0_76 = arith.constant 0 : index
    %c0_77 = arith.constant 0 : index
    %136 = vector.load %arg4[%c0_74, %c1_75, %c0_76, %c0_77] : memref<1x4x3x384xbf16, #tpu.memory_space<vmem>>, vector<1x1x3x384xbf16>
    %137 = vector.shape_cast %136 : vector<1x1x3x384xbf16> to vector<1x3x384xbf16>
    %138 = vector.shape_cast %135 : vector<1x3x384xbf16> to vector<1x1x3x384xbf16>
    tpu.vector_store %arg4[%c0_74, %c1_75, %c0_76, %c0_77], %138 {strides = array<i32>} : memref<1x4x3x384xbf16, #tpu.memory_space<vmem>>, vector<1x1x3x384xbf16>,
    %139 = vector.extract_strided_slice %116 {offsets = [0, 0, 0, 0, 0], sizes = [1, 2, 1, 4, 128], strides = [1, 1, 1, 1, 1]} : vector<1x2x2x4x128xbf16> to vector<1x2x1x4x128xbf16>
    %140 = vector.shape_cast %139 : vector<1x2x1x4x128xbf16> to vector<1x2x4x128xbf16>
    %141 = vector.shape_cast %140 : vector<1x2x4x128xbf16> to vector<1x2x2x2x128xbf16>
    %142 = vector.extract_strided_slice %141 {offsets = [0, 0, 0, 1, 0], sizes = [1, 2, 2, 1, 128], strides = [1, 1, 1, 1, 1]} : vector<1x2x2x2x128xbf16> to vector<1x2x2x1x128xbf16>
    %143 = vector.shape_cast %142 : vector<1x2x2x1x128xbf16> to vector<1x2x2x128xbf16>
    %144 = tpu.concatenate %143, %117 in 1 : vector<1x2x2x128xbf16>, vector<1x1x2x128xbf16> -> vector<1x3x2x128xbf16>
    %cst_78 = arith.constant 0.000000e+00 : bf16
    %145 = vector.broadcast %cst_78 : bf16 to vector<1x3x1x128xbf16>
    %146 = tpu.concatenate %145, %144 in 2 : vector<1x3x1x128xbf16>, vector<1x3x2x128xbf16> -> vector<1x3x3x128xbf16>
    %147 = vector.shape_cast %146 : vector<1x3x3x128xbf16> to vector<1x3x384xbf16>
    %c0_79 = arith.constant 0 : index
    %c2_80 = arith.constant 2 : index
    %c0_81 = arith.constant 0 : index
    %c0_82 = arith.constant 0 : index
    %148 = vector.load %arg4[%c0_79, %c2_80, %c0_81, %c0_82] : memref<1x4x3x384xbf16, #tpu.memory_space<vmem>>, vector<1x1x3x384xbf16>
    %149 = vector.shape_cast %148 : vector<1x1x3x384xbf16> to vector<1x3x384xbf16>
    %150 = vector.shape_cast %147 : vector<1x3x384xbf16> to vector<1x1x3x384xbf16>
    tpu.vector_store %arg4[%c0_79, %c2_80, %c0_81, %c0_82], %150 {strides = array<i32>} : memref<1x4x3x384xbf16, #tpu.memory_space<vmem>>, vector<1x1x3x384xbf16>,
    %151 = vector.extract_strided_slice %141 {offsets = [0, 0, 0, 0, 0], sizes = [1, 2, 2, 1, 128], strides = [1, 1, 1, 1, 1]} : vector<1x2x2x2x128xbf16> to vector<1x2x2x1x128xbf16>
    %152 = vector.shape_cast %151 : vector<1x2x2x1x128xbf16> to vector<1x2x2x128xbf16>
    %153 = tpu.concatenate %152, %117 in 1 : vector<1x2x2x128xbf16>, vector<1x1x2x128xbf16> -> vector<1x3x2x128xbf16>
    %cst_83 = arith.constant 0.000000e+00 : bf16
    %154 = vector.broadcast %cst_83 : bf16 to vector<1x3x1x128xbf16>
    %155 = tpu.concatenate %153, %154 in 2 : vector<1x3x2x128xbf16>, vector<1x3x1x128xbf16> -> vector<1x3x3x128xbf16>
    %156 = vector.shape_cast %155 : vector<1x3x3x128xbf16> to vector<1x3x384xbf16>
    %c0_84 = arith.constant 0 : index
    %c3_85 = arith.constant 3 : index
    %c0_86 = arith.constant 0 : index
    %c0_87 = arith.constant 0 : index
    %157 = vector.load %arg4[%c0_84, %c3_85, %c0_86, %c0_87] : memref<1x4x3x384xbf16, #tpu.memory_space<vmem>>, vector<1x1x3x384xbf16>
    %158 = vector.shape_cast %157 : vector<1x1x3x384xbf16> to vector<1x3x384xbf16>
    %159 = vector.shape_cast %156 : vector<1x3x384xbf16> to vector<1x1x3x384xbf16>
    tpu.vector_store %arg4[%c0_84, %c3_85, %c0_86, %c0_87], %159 {strides = array<i32>} : memref<1x4x3x384xbf16, #tpu.memory_space<vmem>>, vector<1x1x3x384xbf16>,
    return
  }
  func.func @transform_0(%arg0: i32) -> (i32, i32, i32, i32) {
    %c0_i32 = arith.constant 0 : i32
    %c0_i32_0 = arith.constant 0 : i32
    %c0_i32_1 = arith.constant 0 : i32
    %c0_i32_2 = arith.constant 0 : i32
    return %arg0, %c0_i32, %c0_i32_0, %c0_i32_1 : i32, i32, i32, i32
  }
  func.func @transform_1(%arg0: i32) -> (i32, i32, i32) {
    %c0_i32 = arith.constant 0 : i32
    %c0_i32_0 = arith.constant 0 : i32
    %c0_i32_1 = arith.constant 0 : i32
    %c0_i32_2 = arith.constant 0 : i32
    return %c0_i32, %c0_i32_0, %c0_i32_1 : i32, i32, i32
  }
  func.func @transform_2(%arg0: i32) -> (i32, i32) {
    %c0_i32 = arith.constant 0 : i32
    %c0_i32_0 = arith.constant 0 : i32
    %c0_i32_1 = arith.constant 0 : i32
    return %c0_i32, %c0_i32_0 : i32, i32
  }
  func.func @transform_3(%arg0: i32) -> (i32, i32, i32, i32) {
    %c0_i32 = arith.constant 0 : i32
    %c0_i32_0 = arith.constant 0 : i32
    %c0_i32_1 = arith.constant 0 : i32
    %c0_i32_2 = arith.constant 0 : i32
    return %arg0, %c0_i32, %c0_i32_0, %c0_i32_1 : i32, i32, i32, i32
  }
}

module attributes {stable_mosaic.version = 11 : i64} {
  func.func @_conv4x4s2_kernel(%arg0: i32, %arg1: memref<1x4x9x36xbf16, #tpu.memory_space<vmem>>, %arg2: memref<16x4x64xbf16, #tpu.memory_space<vmem>>, %arg3: memref<1x64xf32, #tpu.memory_space<vmem>>, %arg4: memref<1x4x5x384xbf16, #tpu.memory_space<vmem>>) attributes {dimension_semantics = [#tpu.dimension_semantics<parallel>], iteration_bounds = array<i64: 2>, scalar_prefetch = 0 : i64, scratch_operands = 0 : i64, tpu.core_type = #tpu.core_type<tc>, window_params = [{transform_indices = @transform_0, window_bounds = array<i64: 1, 4, 9, 36>}, {pipeline_mode = #tpu.pipeline_mode<synchronous>, transform_indices = @transform_1, window_bounds = array<i64: 16, 4, 64>}, {pipeline_mode = #tpu.pipeline_mode<synchronous>, transform_indices = @transform_2, window_bounds = array<i64: 1, 64>}, {transform_indices = @transform_3, window_bounds = array<i64: 1, 4, 5, 384>}]} {
    %c0 = arith.constant 0 : index
    %c0_0 = arith.constant 0 : index
    %c0_1 = arith.constant 0 : index
    %c0_2 = arith.constant 0 : index
    %0 = vector.load %arg1[%c0, %c0_0, %c0_1, %c0_2] : memref<1x4x9x36xbf16, #tpu.memory_space<vmem>>, vector<1x1x9x36xbf16>
    %1 = vector.shape_cast %0 : vector<1x1x9x36xbf16> to vector<1x9x36xbf16>
    %2 = vector.shape_cast %1 : vector<1x9x36xbf16> to vector<1x9x9x4xbf16>
    %c0_3 = arith.constant 0 : index
    %c1 = arith.constant 1 : index
    %c0_4 = arith.constant 0 : index
    %c0_5 = arith.constant 0 : index
    %3 = vector.load %arg1[%c0_3, %c1, %c0_4, %c0_5] : memref<1x4x9x36xbf16, #tpu.memory_space<vmem>>, vector<1x1x9x36xbf16>
    %4 = vector.shape_cast %3 : vector<1x1x9x36xbf16> to vector<1x9x36xbf16>
    %5 = vector.shape_cast %4 : vector<1x9x36xbf16> to vector<1x9x9x4xbf16>
    %c0_6 = arith.constant 0 : index
    %c2 = arith.constant 2 : index
    %c0_7 = arith.constant 0 : index
    %c0_8 = arith.constant 0 : index
    %6 = vector.load %arg1[%c0_6, %c2, %c0_7, %c0_8] : memref<1x4x9x36xbf16, #tpu.memory_space<vmem>>, vector<1x1x9x36xbf16>
    %7 = vector.shape_cast %6 : vector<1x1x9x36xbf16> to vector<1x9x36xbf16>
    %8 = vector.shape_cast %7 : vector<1x9x36xbf16> to vector<1x9x9x4xbf16>
    %c0_9 = arith.constant 0 : index
    %c3 = arith.constant 3 : index
    %c0_10 = arith.constant 0 : index
    %c0_11 = arith.constant 0 : index
    %9 = vector.load %arg1[%c0_9, %c3, %c0_10, %c0_11] : memref<1x4x9x36xbf16, #tpu.memory_space<vmem>>, vector<1x1x9x36xbf16>
    %10 = vector.shape_cast %9 : vector<1x1x9x36xbf16> to vector<1x9x36xbf16>
    %11 = vector.shape_cast %10 : vector<1x9x36xbf16> to vector<1x9x9x4xbf16>
    %cst = arith.constant 0.000000e+00 : f32
    %12 = vector.broadcast %cst : f32 to vector<64x64xf32>
    %13 = vector.extract_strided_slice %2 {offsets = [0, 0, 0, 0], sizes = [1, 8, 8, 4], strides = [1, 1, 1, 1]} : vector<1x9x9x4xbf16> to vector<1x8x8x4xbf16>
    %14 = vector.shape_cast %13 : vector<1x8x8x4xbf16> to vector<64x4xbf16>
    %c0_12 = arith.constant 0 : index
    %c0_13 = arith.constant 0 : index
    %c0_14 = arith.constant 0 : index
    %15 = vector.load %arg2[%c0_12, %c0_13, %c0_14] : memref<16x4x64xbf16, #tpu.memory_space<vmem>>, vector<1x4x64xbf16>
    %16 = vector.shape_cast %15 : vector<1x4x64xbf16> to vector<4x64xbf16>
    %cst_15 = arith.constant dense<0.000000e+00> : vector<64x64xf32>
    %17 = tpu.matmul %14, %16, %cst_15 {dimension_numbers = #tpu.dot_dimension_numbers<[1], [0], [0], [1], [0, 0, 1, 1], [], []>} : vector<64x4xbf16>, vector<4x64xbf16>, vector<64x64xf32> -> vector<64x64xf32>
    %18 = arith.addf %12, %17 : vector<64x64xf32>
    %19 = vector.extract_strided_slice %5 {offsets = [0, 0, 0, 0], sizes = [1, 8, 8, 4], strides = [1, 1, 1, 1]} : vector<1x9x9x4xbf16> to vector<1x8x8x4xbf16>
    %20 = vector.shape_cast %19 : vector<1x8x8x4xbf16> to vector<64x4xbf16>
    %c1_16 = arith.constant 1 : index
    %c0_17 = arith.constant 0 : index
    %c0_18 = arith.constant 0 : index
    %21 = vector.load %arg2[%c1_16, %c0_17, %c0_18] : memref<16x4x64xbf16, #tpu.memory_space<vmem>>, vector<1x4x64xbf16>
    %22 = vector.shape_cast %21 : vector<1x4x64xbf16> to vector<4x64xbf16>
    %cst_19 = arith.constant dense<0.000000e+00> : vector<64x64xf32>
    %23 = tpu.matmul %20, %22, %cst_19 {dimension_numbers = #tpu.dot_dimension_numbers<[1], [0], [0], [1], [0, 0, 1, 1], [], []>} : vector<64x4xbf16>, vector<4x64xbf16>, vector<64x64xf32> -> vector<64x64xf32>
    %24 = arith.addf %18, %23 : vector<64x64xf32>
    %25 = vector.extract_strided_slice %2 {offsets = [0, 0, 1, 0], sizes = [1, 8, 8, 4], strides = [1, 1, 1, 1]} : vector<1x9x9x4xbf16> to vector<1x8x8x4xbf16>
    %26 = vector.shape_cast %25 : vector<1x8x8x4xbf16> to vector<64x4xbf16>
    %c2_20 = arith.constant 2 : index
    %c0_21 = arith.constant 0 : index
    %c0_22 = arith.constant 0 : index
    %27 = vector.load %arg2[%c2_20, %c0_21, %c0_22] : memref<16x4x64xbf16, #tpu.memory_space<vmem>>, vector<1x4x64xbf16>
    %28 = vector.shape_cast %27 : vector<1x4x64xbf16> to vector<4x64xbf16>
    %cst_23 = arith.constant dense<0.000000e+00> : vector<64x64xf32>
    %29 = tpu.matmul %26, %28, %cst_23 {dimension_numbers = #tpu.dot_dimension_numbers<[1], [0], [0], [1], [0, 0, 1, 1], [], []>} : vector<64x4xbf16>, vector<4x64xbf16>, vector<64x64xf32> -> vector<64x64xf32>
    %30 = arith.addf %24, %29 : vector<64x64xf32>
    %31 = vector.extract_strided_slice %5 {offsets = [0, 0, 1, 0], sizes = [1, 8, 8, 4], strides = [1, 1, 1, 1]} : vector<1x9x9x4xbf16> to vector<1x8x8x4xbf16>
    %32 = vector.shape_cast %31 : vector<1x8x8x4xbf16> to vector<64x4xbf16>
    %c3_24 = arith.constant 3 : index
    %c0_25 = arith.constant 0 : index
    %c0_26 = arith.constant 0 : index
    %33 = vector.load %arg2[%c3_24, %c0_25, %c0_26] : memref<16x4x64xbf16, #tpu.memory_space<vmem>>, vector<1x4x64xbf16>
    %34 = vector.shape_cast %33 : vector<1x4x64xbf16> to vector<4x64xbf16>
    %cst_27 = arith.constant dense<0.000000e+00> : vector<64x64xf32>
    %35 = tpu.matmul %32, %34, %cst_27 {dimension_numbers = #tpu.dot_dimension_numbers<[1], [0], [0], [1], [0, 0, 1, 1], [], []>} : vector<64x4xbf16>, vector<4x64xbf16>, vector<64x64xf32> -> vector<64x64xf32>
    %36 = arith.addf %30, %35 : vector<64x64xf32>
    %37 = vector.extract_strided_slice %8 {offsets = [0, 0, 0, 0], sizes = [1, 8, 8, 4], strides = [1, 1, 1, 1]} : vector<1x9x9x4xbf16> to vector<1x8x8x4xbf16>
    %38 = vector.shape_cast %37 : vector<1x8x8x4xbf16> to vector<64x4xbf16>
    %c4 = arith.constant 4 : index
    %c0_28 = arith.constant 0 : index
    %c0_29 = arith.constant 0 : index
    %39 = vector.load %arg2[%c4, %c0_28, %c0_29] : memref<16x4x64xbf16, #tpu.memory_space<vmem>>, vector<1x4x64xbf16>
    %40 = vector.shape_cast %39 : vector<1x4x64xbf16> to vector<4x64xbf16>
    %cst_30 = arith.constant dense<0.000000e+00> : vector<64x64xf32>
    %41 = tpu.matmul %38, %40, %cst_30 {dimension_numbers = #tpu.dot_dimension_numbers<[1], [0], [0], [1], [0, 0, 1, 1], [], []>} : vector<64x4xbf16>, vector<4x64xbf16>, vector<64x64xf32> -> vector<64x64xf32>
    %42 = arith.addf %36, %41 : vector<64x64xf32>
    %43 = vector.extract_strided_slice %11 {offsets = [0, 0, 0, 0], sizes = [1, 8, 8, 4], strides = [1, 1, 1, 1]} : vector<1x9x9x4xbf16> to vector<1x8x8x4xbf16>
    %44 = vector.shape_cast %43 : vector<1x8x8x4xbf16> to vector<64x4xbf16>
    %c5 = arith.constant 5 : index
    %c0_31 = arith.constant 0 : index
    %c0_32 = arith.constant 0 : index
    %45 = vector.load %arg2[%c5, %c0_31, %c0_32] : memref<16x4x64xbf16, #tpu.memory_space<vmem>>, vector<1x4x64xbf16>
    %46 = vector.shape_cast %45 : vector<1x4x64xbf16> to vector<4x64xbf16>
    %cst_33 = arith.constant dense<0.000000e+00> : vector<64x64xf32>
    %47 = tpu.matmul %44, %46, %cst_33 {dimension_numbers = #tpu.dot_dimension_numbers<[1], [0], [0], [1], [0, 0, 1, 1], [], []>} : vector<64x4xbf16>, vector<4x64xbf16>, vector<64x64xf32> -> vector<64x64xf32>
    %48 = arith.addf %42, %47 : vector<64x64xf32>
    %49 = vector.extract_strided_slice %8 {offsets = [0, 0, 1, 0], sizes = [1, 8, 8, 4], strides = [1, 1, 1, 1]} : vector<1x9x9x4xbf16> to vector<1x8x8x4xbf16>
    %50 = vector.shape_cast %49 : vector<1x8x8x4xbf16> to vector<64x4xbf16>
    %c6 = arith.constant 6 : index
    %c0_34 = arith.constant 0 : index
    %c0_35 = arith.constant 0 : index
    %51 = vector.load %arg2[%c6, %c0_34, %c0_35] : memref<16x4x64xbf16, #tpu.memory_space<vmem>>, vector<1x4x64xbf16>
    %52 = vector.shape_cast %51 : vector<1x4x64xbf16> to vector<4x64xbf16>
    %cst_36 = arith.constant dense<0.000000e+00> : vector<64x64xf32>
    %53 = tpu.matmul %50, %52, %cst_36 {dimension_numbers = #tpu.dot_dimension_numbers<[1], [0], [0], [1], [0, 0, 1, 1], [], []>} : vector<64x4xbf16>, vector<4x64xbf16>, vector<64x64xf32> -> vector<64x64xf32>
    %54 = arith.addf %48, %53 : vector<64x64xf32>
    %55 = vector.extract_strided_slice %11 {offsets = [0, 0, 1, 0], sizes = [1, 8, 8, 4], strides = [1, 1, 1, 1]} : vector<1x9x9x4xbf16> to vector<1x8x8x4xbf16>
    %56 = vector.shape_cast %55 : vector<1x8x8x4xbf16> to vector<64x4xbf16>
    %c7 = arith.constant 7 : index
    %c0_37 = arith.constant 0 : index
    %c0_38 = arith.constant 0 : index
    %57 = vector.load %arg2[%c7, %c0_37, %c0_38] : memref<16x4x64xbf16, #tpu.memory_space<vmem>>, vector<1x4x64xbf16>
    %58 = vector.shape_cast %57 : vector<1x4x64xbf16> to vector<4x64xbf16>
    %cst_39 = arith.constant dense<0.000000e+00> : vector<64x64xf32>
    %59 = tpu.matmul %56, %58, %cst_39 {dimension_numbers = #tpu.dot_dimension_numbers<[1], [0], [0], [1], [0, 0, 1, 1], [], []>} : vector<64x4xbf16>, vector<4x64xbf16>, vector<64x64xf32> -> vector<64x64xf32>
    %60 = arith.addf %54, %59 : vector<64x64xf32>
    %61 = vector.extract_strided_slice %2 {offsets = [0, 1, 0, 0], sizes = [1, 8, 8, 4], strides = [1, 1, 1, 1]} : vector<1x9x9x4xbf16> to vector<1x8x8x4xbf16>
    %62 = vector.shape_cast %61 : vector<1x8x8x4xbf16> to vector<64x4xbf16>
    %c8 = arith.constant 8 : index
    %c0_40 = arith.constant 0 : index
    %c0_41 = arith.constant 0 : index
    %63 = vector.load %arg2[%c8, %c0_40, %c0_41] : memref<16x4x64xbf16, #tpu.memory_space<vmem>>, vector<1x4x64xbf16>
    %64 = vector.shape_cast %63 : vector<1x4x64xbf16> to vector<4x64xbf16>
    %cst_42 = arith.constant dense<0.000000e+00> : vector<64x64xf32>
    %65 = tpu.matmul %62, %64, %cst_42 {dimension_numbers = #tpu.dot_dimension_numbers<[1], [0], [0], [1], [0, 0, 1, 1], [], []>} : vector<64x4xbf16>, vector<4x64xbf16>, vector<64x64xf32> -> vector<64x64xf32>
    %66 = arith.addf %60, %65 : vector<64x64xf32>
    %67 = vector.extract_strided_slice %5 {offsets = [0, 1, 0, 0], sizes = [1, 8, 8, 4], strides = [1, 1, 1, 1]} : vector<1x9x9x4xbf16> to vector<1x8x8x4xbf16>
    %68 = vector.shape_cast %67 : vector<1x8x8x4xbf16> to vector<64x4xbf16>
    %c9 = arith.constant 9 : index
    %c0_43 = arith.constant 0 : index
    %c0_44 = arith.constant 0 : index
    %69 = vector.load %arg2[%c9, %c0_43, %c0_44] : memref<16x4x64xbf16, #tpu.memory_space<vmem>>, vector<1x4x64xbf16>
    %70 = vector.shape_cast %69 : vector<1x4x64xbf16> to vector<4x64xbf16>
    %cst_45 = arith.constant dense<0.000000e+00> : vector<64x64xf32>
    %71 = tpu.matmul %68, %70, %cst_45 {dimension_numbers = #tpu.dot_dimension_numbers<[1], [0], [0], [1], [0, 0, 1, 1], [], []>} : vector<64x4xbf16>, vector<4x64xbf16>, vector<64x64xf32> -> vector<64x64xf32>
    %72 = arith.addf %66, %71 : vector<64x64xf32>
    %73 = vector.extract_strided_slice %2 {offsets = [0, 1, 1, 0], sizes = [1, 8, 8, 4], strides = [1, 1, 1, 1]} : vector<1x9x9x4xbf16> to vector<1x8x8x4xbf16>
    %74 = vector.shape_cast %73 : vector<1x8x8x4xbf16> to vector<64x4xbf16>
    %c10 = arith.constant 10 : index
    %c0_46 = arith.constant 0 : index
    %c0_47 = arith.constant 0 : index
    %75 = vector.load %arg2[%c10, %c0_46, %c0_47] : memref<16x4x64xbf16, #tpu.memory_space<vmem>>, vector<1x4x64xbf16>
    %76 = vector.shape_cast %75 : vector<1x4x64xbf16> to vector<4x64xbf16>
    %cst_48 = arith.constant dense<0.000000e+00> : vector<64x64xf32>
    %77 = tpu.matmul %74, %76, %cst_48 {dimension_numbers = #tpu.dot_dimension_numbers<[1], [0], [0], [1], [0, 0, 1, 1], [], []>} : vector<64x4xbf16>, vector<4x64xbf16>, vector<64x64xf32> -> vector<64x64xf32>
    %78 = arith.addf %72, %77 : vector<64x64xf32>
    %79 = vector.extract_strided_slice %5 {offsets = [0, 1, 1, 0], sizes = [1, 8, 8, 4], strides = [1, 1, 1, 1]} : vector<1x9x9x4xbf16> to vector<1x8x8x4xbf16>
    %80 = vector.shape_cast %79 : vector<1x8x8x4xbf16> to vector<64x4xbf16>
    %c11 = arith.constant 11 : index
    %c0_49 = arith.constant 0 : index
    %c0_50 = arith.constant 0 : index
    %81 = vector.load %arg2[%c11, %c0_49, %c0_50] : memref<16x4x64xbf16, #tpu.memory_space<vmem>>, vector<1x4x64xbf16>
    %82 = vector.shape_cast %81 : vector<1x4x64xbf16> to vector<4x64xbf16>
    %cst_51 = arith.constant dense<0.000000e+00> : vector<64x64xf32>
    %83 = tpu.matmul %80, %82, %cst_51 {dimension_numbers = #tpu.dot_dimension_numbers<[1], [0], [0], [1], [0, 0, 1, 1], [], []>} : vector<64x4xbf16>, vector<4x64xbf16>, vector<64x64xf32> -> vector<64x64xf32>
    %84 = arith.addf %78, %83 : vector<64x64xf32>
    %85 = vector.extract_strided_slice %8 {offsets = [0, 1, 0, 0], sizes = [1, 8, 8, 4], strides = [1, 1, 1, 1]} : vector<1x9x9x4xbf16> to vector<1x8x8x4xbf16>
    %86 = vector.shape_cast %85 : vector<1x8x8x4xbf16> to vector<64x4xbf16>
    %c12 = arith.constant 12 : index
    %c0_52 = arith.constant 0 : index
    %c0_53 = arith.constant 0 : index
    %87 = vector.load %arg2[%c12, %c0_52, %c0_53] : memref<16x4x64xbf16, #tpu.memory_space<vmem>>, vector<1x4x64xbf16>
    %88 = vector.shape_cast %87 : vector<1x4x64xbf16> to vector<4x64xbf16>
    %cst_54 = arith.constant dense<0.000000e+00> : vector<64x64xf32>
    %89 = tpu.matmul %86, %88, %cst_54 {dimension_numbers = #tpu.dot_dimension_numbers<[1], [0], [0], [1], [0, 0, 1, 1], [], []>} : vector<64x4xbf16>, vector<4x64xbf16>, vector<64x64xf32> -> vector<64x64xf32>
    %90 = arith.addf %84, %89 : vector<64x64xf32>
    %91 = vector.extract_strided_slice %11 {offsets = [0, 1, 0, 0], sizes = [1, 8, 8, 4], strides = [1, 1, 1, 1]} : vector<1x9x9x4xbf16> to vector<1x8x8x4xbf16>
    %92 = vector.shape_cast %91 : vector<1x8x8x4xbf16> to vector<64x4xbf16>
    %c13 = arith.constant 13 : index
    %c0_55 = arith.constant 0 : index
    %c0_56 = arith.constant 0 : index
    %93 = vector.load %arg2[%c13, %c0_55, %c0_56] : memref<16x4x64xbf16, #tpu.memory_space<vmem>>, vector<1x4x64xbf16>
    %94 = vector.shape_cast %93 : vector<1x4x64xbf16> to vector<4x64xbf16>
    %cst_57 = arith.constant dense<0.000000e+00> : vector<64x64xf32>
    %95 = tpu.matmul %92, %94, %cst_57 {dimension_numbers = #tpu.dot_dimension_numbers<[1], [0], [0], [1], [0, 0, 1, 1], [], []>} : vector<64x4xbf16>, vector<4x64xbf16>, vector<64x64xf32> -> vector<64x64xf32>
    %96 = arith.addf %90, %95 : vector<64x64xf32>
    %97 = vector.extract_strided_slice %8 {offsets = [0, 1, 1, 0], sizes = [1, 8, 8, 4], strides = [1, 1, 1, 1]} : vector<1x9x9x4xbf16> to vector<1x8x8x4xbf16>
    %98 = vector.shape_cast %97 : vector<1x8x8x4xbf16> to vector<64x4xbf16>
    %c14 = arith.constant 14 : index
    %c0_58 = arith.constant 0 : index
    %c0_59 = arith.constant 0 : index
    %99 = vector.load %arg2[%c14, %c0_58, %c0_59] : memref<16x4x64xbf16, #tpu.memory_space<vmem>>, vector<1x4x64xbf16>
    %100 = vector.shape_cast %99 : vector<1x4x64xbf16> to vector<4x64xbf16>
    %cst_60 = arith.constant dense<0.000000e+00> : vector<64x64xf32>
    %101 = tpu.matmul %98, %100, %cst_60 {dimension_numbers = #tpu.dot_dimension_numbers<[1], [0], [0], [1], [0, 0, 1, 1], [], []>} : vector<64x4xbf16>, vector<4x64xbf16>, vector<64x64xf32> -> vector<64x64xf32>
    %102 = arith.addf %96, %101 : vector<64x64xf32>
    %103 = vector.extract_strided_slice %11 {offsets = [0, 1, 1, 0], sizes = [1, 8, 8, 4], strides = [1, 1, 1, 1]} : vector<1x9x9x4xbf16> to vector<1x8x8x4xbf16>
    %104 = vector.shape_cast %103 : vector<1x8x8x4xbf16> to vector<64x4xbf16>
    %c15 = arith.constant 15 : index
    %c0_61 = arith.constant 0 : index
    %c0_62 = arith.constant 0 : index
    %105 = vector.load %arg2[%c15, %c0_61, %c0_62] : memref<16x4x64xbf16, #tpu.memory_space<vmem>>, vector<1x4x64xbf16>
    %106 = vector.shape_cast %105 : vector<1x4x64xbf16> to vector<4x64xbf16>
    %cst_63 = arith.constant dense<0.000000e+00> : vector<64x64xf32>
    %107 = tpu.matmul %104, %106, %cst_63 {dimension_numbers = #tpu.dot_dimension_numbers<[1], [0], [0], [1], [0, 0, 1, 1], [], []>} : vector<64x4xbf16>, vector<4x64xbf16>, vector<64x64xf32> -> vector<64x64xf32>
    %108 = arith.addf %102, %107 : vector<64x64xf32>
    %c0_64 = arith.constant 0 : index
    %c0_65 = arith.constant 0 : index
    %109 = vector.load %arg3[%c0_64, %c0_65] : memref<1x64xf32, #tpu.memory_space<vmem>>, vector<1x64xf32>
    %110 = vector.broadcast %109 : vector<1x64xf32> to vector<64x64xf32>
    %111 = arith.addf %108, %110 : vector<64x64xf32>
    %cst_66 = arith.constant 0.000000e+00 : f32
    %112 = vector.broadcast %cst_66 : f32 to vector<64x64xf32>
    %113 = arith.maximumf %111, %112 : vector<64x64xf32>
    %114 = vector.shape_cast %113 : vector<64x64xf32> to vector<1x8x8x64xf32>
    %115 = arith.truncf %114 : vector<1x8x8x64xf32> to vector<1x8x8x64xbf16>
    %116 = vector.shape_cast %115 : vector<1x8x8x64xbf16> to vector<1x4x2x8x64xbf16>
    %cst_67 = arith.constant 0.000000e+00 : bf16
    %117 = vector.broadcast %cst_67 : bf16 to vector<1x1x4x64xbf16>
    %118 = vector.extract_strided_slice %116 {offsets = [0, 0, 1, 0, 0], sizes = [1, 4, 1, 8, 64], strides = [1, 1, 1, 1, 1]} : vector<1x4x2x8x64xbf16> to vector<1x4x1x8x64xbf16>
    %119 = vector.shape_cast %118 : vector<1x4x1x8x64xbf16> to vector<1x4x8x64xbf16>
    %120 = vector.shape_cast %119 : vector<1x4x8x64xbf16> to vector<1x4x4x2x64xbf16>
    %121 = vector.extract_strided_slice %120 {offsets = [0, 0, 0, 1, 0], sizes = [1, 4, 4, 1, 64], strides = [1, 1, 1, 1, 1]} : vector<1x4x4x2x64xbf16> to vector<1x4x4x1x64xbf16>
    %122 = vector.shape_cast %121 : vector<1x4x4x1x64xbf16> to vector<1x4x4x64xbf16>
    %123 = tpu.concatenate %117, %122 in 1 : vector<1x1x4x64xbf16>, vector<1x4x4x64xbf16> -> vector<1x5x4x64xbf16>
    %cst_68 = arith.constant 0.000000e+00 : bf16
    %124 = vector.broadcast %cst_68 : bf16 to vector<1x5x1x64xbf16>
    %cst_69 = arith.constant 0.000000e+00 : bf16
    %125 = vector.broadcast %cst_69 : bf16 to vector<1x5x1x64xbf16>
    %126 = tpu.concatenate %124, %123, %125 in 2 : vector<1x5x1x64xbf16>, vector<1x5x4x64xbf16>, vector<1x5x1x64xbf16> -> vector<1x5x6x64xbf16>
    %127 = vector.shape_cast %126 : vector<1x5x6x64xbf16> to vector<1x5x384xbf16>
    %c0_70 = arith.constant 0 : index
    %c0_71 = arith.constant 0 : index
    %c0_72 = arith.constant 0 : index
    %c0_73 = arith.constant 0 : index
    %128 = vector.load %arg4[%c0_70, %c0_71, %c0_72, %c0_73] : memref<1x4x5x384xbf16, #tpu.memory_space<vmem>>, vector<1x1x5x384xbf16>
    %129 = vector.shape_cast %128 : vector<1x1x5x384xbf16> to vector<1x5x384xbf16>
    %130 = vector.shape_cast %127 : vector<1x5x384xbf16> to vector<1x1x5x384xbf16>
    tpu.vector_store %arg4[%c0_70, %c0_71, %c0_72, %c0_73], %130 {strides = array<i32>} : memref<1x4x5x384xbf16, #tpu.memory_space<vmem>>, vector<1x1x5x384xbf16>,
    %131 = vector.extract_strided_slice %120 {offsets = [0, 0, 0, 0, 0], sizes = [1, 4, 4, 1, 64], strides = [1, 1, 1, 1, 1]} : vector<1x4x4x2x64xbf16> to vector<1x4x4x1x64xbf16>
    %132 = vector.shape_cast %131 : vector<1x4x4x1x64xbf16> to vector<1x4x4x64xbf16>
    %133 = tpu.concatenate %117, %132 in 1 : vector<1x1x4x64xbf16>, vector<1x4x4x64xbf16> -> vector<1x5x4x64xbf16>
    %cst_74 = arith.constant 0.000000e+00 : bf16
    %134 = vector.broadcast %cst_74 : bf16 to vector<1x5x2x64xbf16>
    %135 = tpu.concatenate %133, %134 in 2 : vector<1x5x4x64xbf16>, vector<1x5x2x64xbf16> -> vector<1x5x6x64xbf16>
    %136 = vector.shape_cast %135 : vector<1x5x6x64xbf16> to vector<1x5x384xbf16>
    %c0_75 = arith.constant 0 : index
    %c1_76 = arith.constant 1 : index
    %c0_77 = arith.constant 0 : index
    %c0_78 = arith.constant 0 : index
    %137 = vector.load %arg4[%c0_75, %c1_76, %c0_77, %c0_78] : memref<1x4x5x384xbf16, #tpu.memory_space<vmem>>, vector<1x1x5x384xbf16>
    %138 = vector.shape_cast %137 : vector<1x1x5x384xbf16> to vector<1x5x384xbf16>
    %139 = vector.shape_cast %136 : vector<1x5x384xbf16> to vector<1x1x5x384xbf16>
    tpu.vector_store %arg4[%c0_75, %c1_76, %c0_77, %c0_78], %139 {strides = array<i32>} : memref<1x4x5x384xbf16, #tpu.memory_space<vmem>>, vector<1x1x5x384xbf16>,
    %140 = vector.extract_strided_slice %116 {offsets = [0, 0, 0, 0, 0], sizes = [1, 4, 1, 8, 64], strides = [1, 1, 1, 1, 1]} : vector<1x4x2x8x64xbf16> to vector<1x4x1x8x64xbf16>
    %141 = vector.shape_cast %140 : vector<1x4x1x8x64xbf16> to vector<1x4x8x64xbf16>
    %142 = vector.shape_cast %141 : vector<1x4x8x64xbf16> to vector<1x4x4x2x64xbf16>
    %143 = vector.extract_strided_slice %142 {offsets = [0, 0, 0, 1, 0], sizes = [1, 4, 4, 1, 64], strides = [1, 1, 1, 1, 1]} : vector<1x4x4x2x64xbf16> to vector<1x4x4x1x64xbf16>
    %144 = vector.shape_cast %143 : vector<1x4x4x1x64xbf16> to vector<1x4x4x64xbf16>
    %145 = tpu.concatenate %144, %117 in 1 : vector<1x4x4x64xbf16>, vector<1x1x4x64xbf16> -> vector<1x5x4x64xbf16>
    %cst_79 = arith.constant 0.000000e+00 : bf16
    %146 = vector.broadcast %cst_79 : bf16 to vector<1x5x1x64xbf16>
    %cst_80 = arith.constant 0.000000e+00 : bf16
    %147 = vector.broadcast %cst_80 : bf16 to vector<1x5x1x64xbf16>
    %148 = tpu.concatenate %146, %145, %147 in 2 : vector<1x5x1x64xbf16>, vector<1x5x4x64xbf16>, vector<1x5x1x64xbf16> -> vector<1x5x6x64xbf16>
    %149 = vector.shape_cast %148 : vector<1x5x6x64xbf16> to vector<1x5x384xbf16>
    %c0_81 = arith.constant 0 : index
    %c2_82 = arith.constant 2 : index
    %c0_83 = arith.constant 0 : index
    %c0_84 = arith.constant 0 : index
    %150 = vector.load %arg4[%c0_81, %c2_82, %c0_83, %c0_84] : memref<1x4x5x384xbf16, #tpu.memory_space<vmem>>, vector<1x1x5x384xbf16>
    %151 = vector.shape_cast %150 : vector<1x1x5x384xbf16> to vector<1x5x384xbf16>
    %152 = vector.shape_cast %149 : vector<1x5x384xbf16> to vector<1x1x5x384xbf16>
    tpu.vector_store %arg4[%c0_81, %c2_82, %c0_83, %c0_84], %152 {strides = array<i32>} : memref<1x4x5x384xbf16, #tpu.memory_space<vmem>>, vector<1x1x5x384xbf16>,
    %153 = vector.extract_strided_slice %142 {offsets = [0, 0, 0, 0, 0], sizes = [1, 4, 4, 1, 64], strides = [1, 1, 1, 1, 1]} : vector<1x4x4x2x64xbf16> to vector<1x4x4x1x64xbf16>
    %154 = vector.shape_cast %153 : vector<1x4x4x1x64xbf16> to vector<1x4x4x64xbf16>
    %155 = tpu.concatenate %154, %117 in 1 : vector<1x4x4x64xbf16>, vector<1x1x4x64xbf16> -> vector<1x5x4x64xbf16>
    %cst_85 = arith.constant 0.000000e+00 : bf16
    %156 = vector.broadcast %cst_85 : bf16 to vector<1x5x2x64xbf16>
    %157 = tpu.concatenate %155, %156 in 2 : vector<1x5x4x64xbf16>, vector<1x5x2x64xbf16> -> vector<1x5x6x64xbf16>
    %158 = vector.shape_cast %157 : vector<1x5x6x64xbf16> to vector<1x5x384xbf16>
    %c0_86 = arith.constant 0 : index
    %c3_87 = arith.constant 3 : index
    %c0_88 = arith.constant 0 : index
    %c0_89 = arith.constant 0 : index
    %159 = vector.load %arg4[%c0_86, %c3_87, %c0_88, %c0_89] : memref<1x4x5x384xbf16, #tpu.memory_space<vmem>>, vector<1x1x5x384xbf16>
    %160 = vector.shape_cast %159 : vector<1x1x5x384xbf16> to vector<1x5x384xbf16>
    %161 = vector.shape_cast %158 : vector<1x5x384xbf16> to vector<1x1x5x384xbf16>
    tpu.vector_store %arg4[%c0_86, %c3_87, %c0_88, %c0_89], %161 {strides = array<i32>} : memref<1x4x5x384xbf16, #tpu.memory_space<vmem>>, vector<1x1x5x384xbf16>,
    return
  }
  func.func @transform_0(%arg0: i32) -> (i32, i32, i32, i32) {
    %c0_i32 = arith.constant 0 : i32
    %c0_i32_0 = arith.constant 0 : i32
    %c0_i32_1 = arith.constant 0 : i32
    %c0_i32_2 = arith.constant 0 : i32
    return %arg0, %c0_i32, %c0_i32_0, %c0_i32_1 : i32, i32, i32, i32
  }
  func.func @transform_1(%arg0: i32) -> (i32, i32, i32) {
    %c0_i32 = arith.constant 0 : i32
    %c0_i32_0 = arith.constant 0 : i32
    %c0_i32_1 = arith.constant 0 : i32
    %c0_i32_2 = arith.constant 0 : i32
    return %c0_i32, %c0_i32_0, %c0_i32_1 : i32, i32, i32
  }
  func.func @transform_2(%arg0: i32) -> (i32, i32) {
    %c0_i32 = arith.constant 0 : i32
    %c0_i32_0 = arith.constant 0 : i32
    %c0_i32_1 = arith.constant 0 : i32
    return %c0_i32, %c0_i32_0 : i32, i32
  }
  func.func @transform_3(%arg0: i32) -> (i32, i32, i32, i32) {
    %c0_i32 = arith.constant 0 : i32
    %c0_i32_0 = arith.constant 0 : i32
    %c0_i32_1 = arith.constant 0 : i32
    %c0_i32_2 = arith.constant 0 : i32
    return %arg0, %c0_i32, %c0_i32_0, %c0_i32_1 : i32, i32, i32, i32
  }
}

module attributes {stable_mosaic.version = 11 : i64} {
  func.func @_conv4x4s2_kernel(%arg0: i32, %arg1: memref<1x4x3x384xbf16, #tpu.memory_space<vmem>>, %arg2: memref<16x128x256xbf16, #tpu.memory_space<vmem>>, %arg3: memref<1x256xf32, #tpu.memory_space<vmem>>, %arg4: memref<1x4x2x512xbf16, #tpu.memory_space<vmem>>) attributes {dimension_semantics = [#tpu.dimension_semantics<parallel>], iteration_bounds = array<i64: 2>, scalar_prefetch = 0 : i64, scratch_operands = 0 : i64, tpu.core_type = #tpu.core_type<tc>, window_params = [{transform_indices = @transform_0, window_bounds = array<i64: 1, 4, 3, 384>}, {pipeline_mode = #tpu.pipeline_mode<synchronous>, transform_indices = @transform_1, window_bounds = array<i64: 16, 128, 256>}, {pipeline_mode = #tpu.pipeline_mode<synchronous>, transform_indices = @transform_2, window_bounds = array<i64: 1, 256>}, {transform_indices = @transform_3, window_bounds = array<i64: 1, 4, 2, 512>}]} {
    %c0 = arith.constant 0 : index
    %c0_0 = arith.constant 0 : index
    %c0_1 = arith.constant 0 : index
    %c0_2 = arith.constant 0 : index
    %0 = vector.load %arg1[%c0, %c0_0, %c0_1, %c0_2] : memref<1x4x3x384xbf16, #tpu.memory_space<vmem>>, vector<1x1x3x384xbf16>
    %1 = vector.shape_cast %0 : vector<1x1x3x384xbf16> to vector<1x3x384xbf16>
    %2 = vector.shape_cast %1 : vector<1x3x384xbf16> to vector<1x3x3x128xbf16>
    %c0_3 = arith.constant 0 : index
    %c1 = arith.constant 1 : index
    %c0_4 = arith.constant 0 : index
    %c0_5 = arith.constant 0 : index
    %3 = vector.load %arg1[%c0_3, %c1, %c0_4, %c0_5] : memref<1x4x3x384xbf16, #tpu.memory_space<vmem>>, vector<1x1x3x384xbf16>
    %4 = vector.shape_cast %3 : vector<1x1x3x384xbf16> to vector<1x3x384xbf16>
    %5 = vector.shape_cast %4 : vector<1x3x384xbf16> to vector<1x3x3x128xbf16>
    %c0_6 = arith.constant 0 : index
    %c2 = arith.constant 2 : index
    %c0_7 = arith.constant 0 : index
    %c0_8 = arith.constant 0 : index
    %6 = vector.load %arg1[%c0_6, %c2, %c0_7, %c0_8] : memref<1x4x3x384xbf16, #tpu.memory_space<vmem>>, vector<1x1x3x384xbf16>
    %7 = vector.shape_cast %6 : vector<1x1x3x384xbf16> to vector<1x3x384xbf16>
    %8 = vector.shape_cast %7 : vector<1x3x384xbf16> to vector<1x3x3x128xbf16>
    %c0_9 = arith.constant 0 : index
    %c3 = arith.constant 3 : index
    %c0_10 = arith.constant 0 : index
    %c0_11 = arith.constant 0 : index
    %9 = vector.load %arg1[%c0_9, %c3, %c0_10, %c0_11] : memref<1x4x3x384xbf16, #tpu.memory_space<vmem>>, vector<1x1x3x384xbf16>
    %10 = vector.shape_cast %9 : vector<1x1x3x384xbf16> to vector<1x3x384xbf16>
    %11 = vector.shape_cast %10 : vector<1x3x384xbf16> to vector<1x3x3x128xbf16>
    %cst = arith.constant 0.000000e+00 : f32
    %12 = vector.broadcast %cst : f32 to vector<4x256xf32>
    %13 = vector.extract_strided_slice %2 {offsets = [0, 0, 0, 0], sizes = [1, 2, 2, 128], strides = [1, 1, 1, 1]} : vector<1x3x3x128xbf16> to vector<1x2x2x128xbf16>
    %14 = vector.shape_cast %13 : vector<1x2x2x128xbf16> to vector<4x128xbf16>
    %c0_12 = arith.constant 0 : index
    %c0_13 = arith.constant 0 : index
    %c0_14 = arith.constant 0 : index
    %15 = vector.load %arg2[%c0_12, %c0_13, %c0_14] : memref<16x128x256xbf16, #tpu.memory_space<vmem>>, vector<1x128x256xbf16>
    %16 = vector.shape_cast %15 : vector<1x128x256xbf16> to vector<128x256xbf16>
    %cst_15 = arith.constant dense<0.000000e+00> : vector<4x256xf32>
    %17 = tpu.matmul %14, %16, %cst_15 {dimension_numbers = #tpu.dot_dimension_numbers<[1], [0], [0], [1], [0, 0, 1, 1], [], []>} : vector<4x128xbf16>, vector<128x256xbf16>, vector<4x256xf32> -> vector<4x256xf32>
    %18 = arith.addf %12, %17 : vector<4x256xf32>
    %19 = vector.extract_strided_slice %5 {offsets = [0, 0, 0, 0], sizes = [1, 2, 2, 128], strides = [1, 1, 1, 1]} : vector<1x3x3x128xbf16> to vector<1x2x2x128xbf16>
    %20 = vector.shape_cast %19 : vector<1x2x2x128xbf16> to vector<4x128xbf16>
    %c1_16 = arith.constant 1 : index
    %c0_17 = arith.constant 0 : index
    %c0_18 = arith.constant 0 : index
    %21 = vector.load %arg2[%c1_16, %c0_17, %c0_18] : memref<16x128x256xbf16, #tpu.memory_space<vmem>>, vector<1x128x256xbf16>
    %22 = vector.shape_cast %21 : vector<1x128x256xbf16> to vector<128x256xbf16>
    %cst_19 = arith.constant dense<0.000000e+00> : vector<4x256xf32>
    %23 = tpu.matmul %20, %22, %cst_19 {dimension_numbers = #tpu.dot_dimension_numbers<[1], [0], [0], [1], [0, 0, 1, 1], [], []>} : vector<4x128xbf16>, vector<128x256xbf16>, vector<4x256xf32> -> vector<4x256xf32>
    %24 = arith.addf %18, %23 : vector<4x256xf32>
    %25 = vector.extract_strided_slice %2 {offsets = [0, 0, 1, 0], sizes = [1, 2, 2, 128], strides = [1, 1, 1, 1]} : vector<1x3x3x128xbf16> to vector<1x2x2x128xbf16>
    %26 = vector.shape_cast %25 : vector<1x2x2x128xbf16> to vector<4x128xbf16>
    %c2_20 = arith.constant 2 : index
    %c0_21 = arith.constant 0 : index
    %c0_22 = arith.constant 0 : index
    %27 = vector.load %arg2[%c2_20, %c0_21, %c0_22] : memref<16x128x256xbf16, #tpu.memory_space<vmem>>, vector<1x128x256xbf16>
    %28 = vector.shape_cast %27 : vector<1x128x256xbf16> to vector<128x256xbf16>
    %cst_23 = arith.constant dense<0.000000e+00> : vector<4x256xf32>
    %29 = tpu.matmul %26, %28, %cst_23 {dimension_numbers = #tpu.dot_dimension_numbers<[1], [0], [0], [1], [0, 0, 1, 1], [], []>} : vector<4x128xbf16>, vector<128x256xbf16>, vector<4x256xf32> -> vector<4x256xf32>
    %30 = arith.addf %24, %29 : vector<4x256xf32>
    %31 = vector.extract_strided_slice %5 {offsets = [0, 0, 1, 0], sizes = [1, 2, 2, 128], strides = [1, 1, 1, 1]} : vector<1x3x3x128xbf16> to vector<1x2x2x128xbf16>
    %32 = vector.shape_cast %31 : vector<1x2x2x128xbf16> to vector<4x128xbf16>
    %c3_24 = arith.constant 3 : index
    %c0_25 = arith.constant 0 : index
    %c0_26 = arith.constant 0 : index
    %33 = vector.load %arg2[%c3_24, %c0_25, %c0_26] : memref<16x128x256xbf16, #tpu.memory_space<vmem>>, vector<1x128x256xbf16>
    %34 = vector.shape_cast %33 : vector<1x128x256xbf16> to vector<128x256xbf16>
    %cst_27 = arith.constant dense<0.000000e+00> : vector<4x256xf32>
    %35 = tpu.matmul %32, %34, %cst_27 {dimension_numbers = #tpu.dot_dimension_numbers<[1], [0], [0], [1], [0, 0, 1, 1], [], []>} : vector<4x128xbf16>, vector<128x256xbf16>, vector<4x256xf32> -> vector<4x256xf32>
    %36 = arith.addf %30, %35 : vector<4x256xf32>
    %37 = vector.extract_strided_slice %8 {offsets = [0, 0, 0, 0], sizes = [1, 2, 2, 128], strides = [1, 1, 1, 1]} : vector<1x3x3x128xbf16> to vector<1x2x2x128xbf16>
    %38 = vector.shape_cast %37 : vector<1x2x2x128xbf16> to vector<4x128xbf16>
    %c4 = arith.constant 4 : index
    %c0_28 = arith.constant 0 : index
    %c0_29 = arith.constant 0 : index
    %39 = vector.load %arg2[%c4, %c0_28, %c0_29] : memref<16x128x256xbf16, #tpu.memory_space<vmem>>, vector<1x128x256xbf16>
    %40 = vector.shape_cast %39 : vector<1x128x256xbf16> to vector<128x256xbf16>
    %cst_30 = arith.constant dense<0.000000e+00> : vector<4x256xf32>
    %41 = tpu.matmul %38, %40, %cst_30 {dimension_numbers = #tpu.dot_dimension_numbers<[1], [0], [0], [1], [0, 0, 1, 1], [], []>} : vector<4x128xbf16>, vector<128x256xbf16>, vector<4x256xf32> -> vector<4x256xf32>
    %42 = arith.addf %36, %41 : vector<4x256xf32>
    %43 = vector.extract_strided_slice %11 {offsets = [0, 0, 0, 0], sizes = [1, 2, 2, 128], strides = [1, 1, 1, 1]} : vector<1x3x3x128xbf16> to vector<1x2x2x128xbf16>
    %44 = vector.shape_cast %43 : vector<1x2x2x128xbf16> to vector<4x128xbf16>
    %c5 = arith.constant 5 : index
    %c0_31 = arith.constant 0 : index
    %c0_32 = arith.constant 0 : index
    %45 = vector.load %arg2[%c5, %c0_31, %c0_32] : memref<16x128x256xbf16, #tpu.memory_space<vmem>>, vector<1x128x256xbf16>
    %46 = vector.shape_cast %45 : vector<1x128x256xbf16> to vector<128x256xbf16>
    %cst_33 = arith.constant dense<0.000000e+00> : vector<4x256xf32>
    %47 = tpu.matmul %44, %46, %cst_33 {dimension_numbers = #tpu.dot_dimension_numbers<[1], [0], [0], [1], [0, 0, 1, 1], [], []>} : vector<4x128xbf16>, vector<128x256xbf16>, vector<4x256xf32> -> vector<4x256xf32>
    %48 = arith.addf %42, %47 : vector<4x256xf32>
    %49 = vector.extract_strided_slice %8 {offsets = [0, 0, 1, 0], sizes = [1, 2, 2, 128], strides = [1, 1, 1, 1]} : vector<1x3x3x128xbf16> to vector<1x2x2x128xbf16>
    %50 = vector.shape_cast %49 : vector<1x2x2x128xbf16> to vector<4x128xbf16>
    %c6 = arith.constant 6 : index
    %c0_34 = arith.constant 0 : index
    %c0_35 = arith.constant 0 : index
    %51 = vector.load %arg2[%c6, %c0_34, %c0_35] : memref<16x128x256xbf16, #tpu.memory_space<vmem>>, vector<1x128x256xbf16>
    %52 = vector.shape_cast %51 : vector<1x128x256xbf16> to vector<128x256xbf16>
    %cst_36 = arith.constant dense<0.000000e+00> : vector<4x256xf32>
    %53 = tpu.matmul %50, %52, %cst_36 {dimension_numbers = #tpu.dot_dimension_numbers<[1], [0], [0], [1], [0, 0, 1, 1], [], []>} : vector<4x128xbf16>, vector<128x256xbf16>, vector<4x256xf32> -> vector<4x256xf32>
    %54 = arith.addf %48, %53 : vector<4x256xf32>
    %55 = vector.extract_strided_slice %11 {offsets = [0, 0, 1, 0], sizes = [1, 2, 2, 128], strides = [1, 1, 1, 1]} : vector<1x3x3x128xbf16> to vector<1x2x2x128xbf16>
    %56 = vector.shape_cast %55 : vector<1x2x2x128xbf16> to vector<4x128xbf16>
    %c7 = arith.constant 7 : index
    %c0_37 = arith.constant 0 : index
    %c0_38 = arith.constant 0 : index
    %57 = vector.load %arg2[%c7, %c0_37, %c0_38] : memref<16x128x256xbf16, #tpu.memory_space<vmem>>, vector<1x128x256xbf16>
    %58 = vector.shape_cast %57 : vector<1x128x256xbf16> to vector<128x256xbf16>
    %cst_39 = arith.constant dense<0.000000e+00> : vector<4x256xf32>
    %59 = tpu.matmul %56, %58, %cst_39 {dimension_numbers = #tpu.dot_dimension_numbers<[1], [0], [0], [1], [0, 0, 1, 1], [], []>} : vector<4x128xbf16>, vector<128x256xbf16>, vector<4x256xf32> -> vector<4x256xf32>
    %60 = arith.addf %54, %59 : vector<4x256xf32>
    %61 = vector.extract_strided_slice %2 {offsets = [0, 1, 0, 0], sizes = [1, 2, 2, 128], strides = [1, 1, 1, 1]} : vector<1x3x3x128xbf16> to vector<1x2x2x128xbf16>
    %62 = vector.shape_cast %61 : vector<1x2x2x128xbf16> to vector<4x128xbf16>
    %c8 = arith.constant 8 : index
    %c0_40 = arith.constant 0 : index
    %c0_41 = arith.constant 0 : index
    %63 = vector.load %arg2[%c8, %c0_40, %c0_41] : memref<16x128x256xbf16, #tpu.memory_space<vmem>>, vector<1x128x256xbf16>
    %64 = vector.shape_cast %63 : vector<1x128x256xbf16> to vector<128x256xbf16>
    %cst_42 = arith.constant dense<0.000000e+00> : vector<4x256xf32>
    %65 = tpu.matmul %62, %64, %cst_42 {dimension_numbers = #tpu.dot_dimension_numbers<[1], [0], [0], [1], [0, 0, 1, 1], [], []>} : vector<4x128xbf16>, vector<128x256xbf16>, vector<4x256xf32> -> vector<4x256xf32>
    %66 = arith.addf %60, %65 : vector<4x256xf32>
    %67 = vector.extract_strided_slice %5 {offsets = [0, 1, 0, 0], sizes = [1, 2, 2, 128], strides = [1, 1, 1, 1]} : vector<1x3x3x128xbf16> to vector<1x2x2x128xbf16>
    %68 = vector.shape_cast %67 : vector<1x2x2x128xbf16> to vector<4x128xbf16>
    %c9 = arith.constant 9 : index
    %c0_43 = arith.constant 0 : index
    %c0_44 = arith.constant 0 : index
    %69 = vector.load %arg2[%c9, %c0_43, %c0_44] : memref<16x128x256xbf16, #tpu.memory_space<vmem>>, vector<1x128x256xbf16>
    %70 = vector.shape_cast %69 : vector<1x128x256xbf16> to vector<128x256xbf16>
    %cst_45 = arith.constant dense<0.000000e+00> : vector<4x256xf32>
    %71 = tpu.matmul %68, %70, %cst_45 {dimension_numbers = #tpu.dot_dimension_numbers<[1], [0], [0], [1], [0, 0, 1, 1], [], []>} : vector<4x128xbf16>, vector<128x256xbf16>, vector<4x256xf32> -> vector<4x256xf32>
    %72 = arith.addf %66, %71 : vector<4x256xf32>
    %73 = vector.extract_strided_slice %2 {offsets = [0, 1, 1, 0], sizes = [1, 2, 2, 128], strides = [1, 1, 1, 1]} : vector<1x3x3x128xbf16> to vector<1x2x2x128xbf16>
    %74 = vector.shape_cast %73 : vector<1x2x2x128xbf16> to vector<4x128xbf16>
    %c10 = arith.constant 10 : index
    %c0_46 = arith.constant 0 : index
    %c0_47 = arith.constant 0 : index
    %75 = vector.load %arg2[%c10, %c0_46, %c0_47] : memref<16x128x256xbf16, #tpu.memory_space<vmem>>, vector<1x128x256xbf16>
    %76 = vector.shape_cast %75 : vector<1x128x256xbf16> to vector<128x256xbf16>
    %cst_48 = arith.constant dense<0.000000e+00> : vector<4x256xf32>
    %77 = tpu.matmul %74, %76, %cst_48 {dimension_numbers = #tpu.dot_dimension_numbers<[1], [0], [0], [1], [0, 0, 1, 1], [], []>} : vector<4x128xbf16>, vector<128x256xbf16>, vector<4x256xf32> -> vector<4x256xf32>
    %78 = arith.addf %72, %77 : vector<4x256xf32>
    %79 = vector.extract_strided_slice %5 {offsets = [0, 1, 1, 0], sizes = [1, 2, 2, 128], strides = [1, 1, 1, 1]} : vector<1x3x3x128xbf16> to vector<1x2x2x128xbf16>
    %80 = vector.shape_cast %79 : vector<1x2x2x128xbf16> to vector<4x128xbf16>
    %c11 = arith.constant 11 : index
    %c0_49 = arith.constant 0 : index
    %c0_50 = arith.constant 0 : index
    %81 = vector.load %arg2[%c11, %c0_49, %c0_50] : memref<16x128x256xbf16, #tpu.memory_space<vmem>>, vector<1x128x256xbf16>
    %82 = vector.shape_cast %81 : vector<1x128x256xbf16> to vector<128x256xbf16>
    %cst_51 = arith.constant dense<0.000000e+00> : vector<4x256xf32>
    %83 = tpu.matmul %80, %82, %cst_51 {dimension_numbers = #tpu.dot_dimension_numbers<[1], [0], [0], [1], [0, 0, 1, 1], [], []>} : vector<4x128xbf16>, vector<128x256xbf16>, vector<4x256xf32> -> vector<4x256xf32>
    %84 = arith.addf %78, %83 : vector<4x256xf32>
    %85 = vector.extract_strided_slice %8 {offsets = [0, 1, 0, 0], sizes = [1, 2, 2, 128], strides = [1, 1, 1, 1]} : vector<1x3x3x128xbf16> to vector<1x2x2x128xbf16>
    %86 = vector.shape_cast %85 : vector<1x2x2x128xbf16> to vector<4x128xbf16>
    %c12 = arith.constant 12 : index
    %c0_52 = arith.constant 0 : index
    %c0_53 = arith.constant 0 : index
    %87 = vector.load %arg2[%c12, %c0_52, %c0_53] : memref<16x128x256xbf16, #tpu.memory_space<vmem>>, vector<1x128x256xbf16>
    %88 = vector.shape_cast %87 : vector<1x128x256xbf16> to vector<128x256xbf16>
    %cst_54 = arith.constant dense<0.000000e+00> : vector<4x256xf32>
    %89 = tpu.matmul %86, %88, %cst_54 {dimension_numbers = #tpu.dot_dimension_numbers<[1], [0], [0], [1], [0, 0, 1, 1], [], []>} : vector<4x128xbf16>, vector<128x256xbf16>, vector<4x256xf32> -> vector<4x256xf32>
    %90 = arith.addf %84, %89 : vector<4x256xf32>
    %91 = vector.extract_strided_slice %11 {offsets = [0, 1, 0, 0], sizes = [1, 2, 2, 128], strides = [1, 1, 1, 1]} : vector<1x3x3x128xbf16> to vector<1x2x2x128xbf16>
    %92 = vector.shape_cast %91 : vector<1x2x2x128xbf16> to vector<4x128xbf16>
    %c13 = arith.constant 13 : index
    %c0_55 = arith.constant 0 : index
    %c0_56 = arith.constant 0 : index
    %93 = vector.load %arg2[%c13, %c0_55, %c0_56] : memref<16x128x256xbf16, #tpu.memory_space<vmem>>, vector<1x128x256xbf16>
    %94 = vector.shape_cast %93 : vector<1x128x256xbf16> to vector<128x256xbf16>
    %cst_57 = arith.constant dense<0.000000e+00> : vector<4x256xf32>
    %95 = tpu.matmul %92, %94, %cst_57 {dimension_numbers = #tpu.dot_dimension_numbers<[1], [0], [0], [1], [0, 0, 1, 1], [], []>} : vector<4x128xbf16>, vector<128x256xbf16>, vector<4x256xf32> -> vector<4x256xf32>
    %96 = arith.addf %90, %95 : vector<4x256xf32>
    %97 = vector.extract_strided_slice %8 {offsets = [0, 1, 1, 0], sizes = [1, 2, 2, 128], strides = [1, 1, 1, 1]} : vector<1x3x3x128xbf16> to vector<1x2x2x128xbf16>
    %98 = vector.shape_cast %97 : vector<1x2x2x128xbf16> to vector<4x128xbf16>
    %c14 = arith.constant 14 : index
    %c0_58 = arith.constant 0 : index
    %c0_59 = arith.constant 0 : index
    %99 = vector.load %arg2[%c14, %c0_58, %c0_59] : memref<16x128x256xbf16, #tpu.memory_space<vmem>>, vector<1x128x256xbf16>
    %100 = vector.shape_cast %99 : vector<1x128x256xbf16> to vector<128x256xbf16>
    %cst_60 = arith.constant dense<0.000000e+00> : vector<4x256xf32>
    %101 = tpu.matmul %98, %100, %cst_60 {dimension_numbers = #tpu.dot_dimension_numbers<[1], [0], [0], [1], [0, 0, 1, 1], [], []>} : vector<4x128xbf16>, vector<128x256xbf16>, vector<4x256xf32> -> vector<4x256xf32>
    %102 = arith.addf %96, %101 : vector<4x256xf32>
    %103 = vector.extract_strided_slice %11 {offsets = [0, 1, 1, 0], sizes = [1, 2, 2, 128], strides = [1, 1, 1, 1]} : vector<1x3x3x128xbf16> to vector<1x2x2x128xbf16>
    %104 = vector.shape_cast %103 : vector<1x2x2x128xbf16> to vector<4x128xbf16>
    %c15 = arith.constant 15 : index
    %c0_61 = arith.constant 0 : index
    %c0_62 = arith.constant 0 : index
    %105 = vector.load %arg2[%c15, %c0_61, %c0_62] : memref<16x128x256xbf16, #tpu.memory_space<vmem>>, vector<1x128x256xbf16>
    %106 = vector.shape_cast %105 : vector<1x128x256xbf16> to vector<128x256xbf16>
    %cst_63 = arith.constant dense<0.000000e+00> : vector<4x256xf32>
    %107 = tpu.matmul %104, %106, %cst_63 {dimension_numbers = #tpu.dot_dimension_numbers<[1], [0], [0], [1], [0, 0, 1, 1], [], []>} : vector<4x128xbf16>, vector<128x256xbf16>, vector<4x256xf32> -> vector<4x256xf32>
    %108 = arith.addf %102, %107 : vector<4x256xf32>
    %c0_64 = arith.constant 0 : index
    %c0_65 = arith.constant 0 : index
    %109 = vector.load %arg3[%c0_64, %c0_65] : memref<1x256xf32, #tpu.memory_space<vmem>>, vector<1x256xf32>
    %110 = vector.broadcast %109 : vector<1x256xf32> to vector<4x256xf32>
    %111 = arith.addf %108, %110 : vector<4x256xf32>
    %112 = vector.shape_cast %111 : vector<4x256xf32> to vector<1x2x2x256xf32>
    %113 = arith.truncf %112 : vector<1x2x2x256xf32> to vector<1x2x2x256xbf16>
    %114 = vector.shape_cast %113 : vector<1x2x2x256xbf16> to vector<1x1x2x2x256xbf16>
    %cst_66 = arith.constant 0.000000e+00 : bf16
    %115 = vector.broadcast %cst_66 : bf16 to vector<1x1x1x256xbf16>
    %116 = vector.extract_strided_slice %114 {offsets = [0, 0, 1, 0, 0], sizes = [1, 1, 1, 2, 256], strides = [1, 1, 1, 1, 1]} : vector<1x1x2x2x256xbf16> to vector<1x1x1x2x256xbf16>
    %117 = vector.shape_cast %116 : vector<1x1x1x2x256xbf16> to vector<1x1x2x256xbf16>
    %118 = vector.shape_cast %117 : vector<1x1x2x256xbf16> to vector<1x1x1x2x256xbf16>
    %119 = vector.extract_strided_slice %118 {offsets = [0, 0, 0, 1, 0], sizes = [1, 1, 1, 1, 256], strides = [1, 1, 1, 1, 1]} : vector<1x1x1x2x256xbf16> to vector<1x1x1x1x256xbf16>
    %120 = vector.shape_cast %119 : vector<1x1x1x1x256xbf16> to vector<1x1x1x256xbf16>
    %121 = tpu.concatenate %115, %120 in 1 : vector<1x1x1x256xbf16>, vector<1x1x1x256xbf16> -> vector<1x2x1x256xbf16>
    %cst_67 = arith.constant 0.000000e+00 : bf16
    %122 = vector.broadcast %cst_67 : bf16 to vector<1x2x1x256xbf16>
    %123 = tpu.concatenate %122, %121 in 2 : vector<1x2x1x256xbf16>, vector<1x2x1x256xbf16> -> vector<1x2x2x256xbf16>
    %124 = vector.shape_cast %123 : vector<1x2x2x256xbf16> to vector<1x2x512xbf16>
    %c0_68 = arith.constant 0 : index
    %c0_69 = arith.constant 0 : index
    %c0_70 = arith.constant 0 : index
    %c0_71 = arith.constant 0 : index
    %125 = vector.load %arg4[%c0_68, %c0_69, %c0_70, %c0_71] : memref<1x4x2x512xbf16, #tpu.memory_space<vmem>>, vector<1x1x2x512xbf16>
    %126 = vector.shape_cast %125 : vector<1x1x2x512xbf16> to vector<1x2x512xbf16>
    %127 = vector.shape_cast %124 : vector<1x2x512xbf16> to vector<1x1x2x512xbf16>
    tpu.vector_store %arg4[%c0_68, %c0_69, %c0_70, %c0_71], %127 {strides = array<i32>} : memref<1x4x2x512xbf16, #tpu.memory_space<vmem>>, vector<1x1x2x512xbf16>,
    %128 = vector.extract_strided_slice %118 {offsets = [0, 0, 0, 0, 0], sizes = [1, 1, 1, 1, 256], strides = [1, 1, 1, 1, 1]} : vector<1x1x1x2x256xbf16> to vector<1x1x1x1x256xbf16>
    %129 = vector.shape_cast %128 : vector<1x1x1x1x256xbf16> to vector<1x1x1x256xbf16>
    %130 = tpu.concatenate %115, %129 in 1 : vector<1x1x1x256xbf16>, vector<1x1x1x256xbf16> -> vector<1x2x1x256xbf16>
    %cst_72 = arith.constant 0.000000e+00 : bf16
    %131 = vector.broadcast %cst_72 : bf16 to vector<1x2x1x256xbf16>
    %132 = tpu.concatenate %130, %131 in 2 : vector<1x2x1x256xbf16>, vector<1x2x1x256xbf16> -> vector<1x2x2x256xbf16>
    %133 = vector.shape_cast %132 : vector<1x2x2x256xbf16> to vector<1x2x512xbf16>
    %c0_73 = arith.constant 0 : index
    %c1_74 = arith.constant 1 : index
    %c0_75 = arith.constant 0 : index
    %c0_76 = arith.constant 0 : index
    %134 = vector.load %arg4[%c0_73, %c1_74, %c0_75, %c0_76] : memref<1x4x2x512xbf16, #tpu.memory_space<vmem>>, vector<1x1x2x512xbf16>
    %135 = vector.shape_cast %134 : vector<1x1x2x512xbf16> to vector<1x2x512xbf16>
    %136 = vector.shape_cast %133 : vector<1x2x512xbf16> to vector<1x1x2x512xbf16>
    tpu.vector_store %arg4[%c0_73, %c1_74, %c0_75, %c0_76], %136 {strides = array<i32>} : memref<1x4x2x512xbf16, #tpu.memory_space<vmem>>, vector<1x1x2x512xbf16>,
    %137 = vector.extract_strided_slice %114 {offsets = [0, 0, 0, 0, 0], sizes = [1, 1, 1, 2, 256], strides = [1, 1, 1, 1, 1]} : vector<1x1x2x2x256xbf16> to vector<1x1x1x2x256xbf16>
    %138 = vector.shape_cast %137 : vector<1x1x1x2x256xbf16> to vector<1x1x2x256xbf16>
    %139 = vector.shape_cast %138 : vector<1x1x2x256xbf16> to vector<1x1x1x2x256xbf16>
    %140 = vector.extract_strided_slice %139 {offsets = [0, 0, 0, 1, 0], sizes = [1, 1, 1, 1, 256], strides = [1, 1, 1, 1, 1]} : vector<1x1x1x2x256xbf16> to vector<1x1x1x1x256xbf16>
    %141 = vector.shape_cast %140 : vector<1x1x1x1x256xbf16> to vector<1x1x1x256xbf16>
    %142 = tpu.concatenate %141, %115 in 1 : vector<1x1x1x256xbf16>, vector<1x1x1x256xbf16> -> vector<1x2x1x256xbf16>
    %cst_77 = arith.constant 0.000000e+00 : bf16
    %143 = vector.broadcast %cst_77 : bf16 to vector<1x2x1x256xbf16>
    %144 = tpu.concatenate %143, %142 in 2 : vector<1x2x1x256xbf16>, vector<1x2x1x256xbf16> -> vector<1x2x2x256xbf16>
    %145 = vector.shape_cast %144 : vector<1x2x2x256xbf16> to vector<1x2x512xbf16>
    %c0_78 = arith.constant 0 : index
    %c2_79 = arith.constant 2 : index
    %c0_80 = arith.constant 0 : index
    %c0_81 = arith.constant 0 : index
    %146 = vector.load %arg4[%c0_78, %c2_79, %c0_80, %c0_81] : memref<1x4x2x512xbf16, #tpu.memory_space<vmem>>, vector<1x1x2x512xbf16>
    %147 = vector.shape_cast %146 : vector<1x1x2x512xbf16> to vector<1x2x512xbf16>
    %148 = vector.shape_cast %145 : vector<1x2x512xbf16> to vector<1x1x2x512xbf16>
    tpu.vector_store %arg4[%c0_78, %c2_79, %c0_80, %c0_81], %148 {strides = array<i32>} : memref<1x4x2x512xbf16, #tpu.memory_space<vmem>>, vector<1x1x2x512xbf16>,
    %149 = vector.extract_strided_slice %139 {offsets = [0, 0, 0, 0, 0], sizes = [1, 1, 1, 1, 256], strides = [1, 1, 1, 1, 1]} : vector<1x1x1x2x256xbf16> to vector<1x1x1x1x256xbf16>
    %150 = vector.shape_cast %149 : vector<1x1x1x1x256xbf16> to vector<1x1x1x256xbf16>
    %151 = tpu.concatenate %150, %115 in 1 : vector<1x1x1x256xbf16>, vector<1x1x1x256xbf16> -> vector<1x2x1x256xbf16>
    %cst_82 = arith.constant 0.000000e+00 : bf16
    %152 = vector.broadcast %cst_82 : bf16 to vector<1x2x1x256xbf16>
    %153 = tpu.concatenate %151, %152 in 2 : vector<1x2x1x256xbf16>, vector<1x2x1x256xbf16> -> vector<1x2x2x256xbf16>
    %154 = vector.shape_cast %153 : vector<1x2x2x256xbf16> to vector<1x2x512xbf16>
    %c0_83 = arith.constant 0 : index
    %c3_84 = arith.constant 3 : index
    %c0_85 = arith.constant 0 : index
    %c0_86 = arith.constant 0 : index
    %155 = vector.load %arg4[%c0_83, %c3_84, %c0_85, %c0_86] : memref<1x4x2x512xbf16, #tpu.memory_space<vmem>>, vector<1x1x2x512xbf16>
    %156 = vector.shape_cast %155 : vector<1x1x2x512xbf16> to vector<1x2x512xbf16>
    %157 = vector.shape_cast %154 : vector<1x2x512xbf16> to vector<1x1x2x512xbf16>
    tpu.vector_store %arg4[%c0_83, %c3_84, %c0_85, %c0_86], %157 {strides = array<i32>} : memref<1x4x2x512xbf16, #tpu.memory_space<vmem>>, vector<1x1x2x512xbf16>,
    return
  }
  func.func @transform_0(%arg0: i32) -> (i32, i32, i32, i32) {
    %c0_i32 = arith.constant 0 : i32
    %c0_i32_0 = arith.constant 0 : i32
    %c0_i32_1 = arith.constant 0 : i32
    %c0_i32_2 = arith.constant 0 : i32
    return %arg0, %c0_i32, %c0_i32_0, %c0_i32_1 : i32, i32, i32, i32
  }
  func.func @transform_1(%arg0: i32) -> (i32, i32, i32) {
    %c0_i32 = arith.constant 0 : i32
    %c0_i32_0 = arith.constant 0 : i32
    %c0_i32_1 = arith.constant 0 : i32
    %c0_i32_2 = arith.constant 0 : i32
    return %c0_i32, %c0_i32_0, %c0_i32_1 : i32, i32, i32
  }
  func.func @transform_2(%arg0: i32) -> (i32, i32) {
    %c0_i32 = arith.constant 0 : i32
    %c0_i32_0 = arith.constant 0 : i32
    %c0_i32_1 = arith.constant 0 : i32
    return %c0_i32, %c0_i32_0 : i32, i32
  }
  func.func @transform_3(%arg0: i32) -> (i32, i32, i32, i32) {
    %c0_i32 = arith.constant 0 : i32
    %c0_i32_0 = arith.constant 0 : i32
    %c0_i32_1 = arith.constant 0 : i32
    %c0_i32_2 = arith.constant 0 : i32
    return %arg0, %c0_i32, %c0_i32_0, %c0_i32_1 : i32, i32, i32, i32
  }
}

module attributes {stable_mosaic.version = 11 : i64} {
  func.func @_head_kernel(%arg0: i32, %arg1: memref<2x4x2x512xbf16, #tpu.memory_space<vmem>>, %arg2: memref<256x1024xbf16, #tpu.memory_space<vmem>>, %arg3: memref<1x1024xf32, #tpu.memory_space<vmem>>, %arg4: memref<1x1024xf32, #tpu.memory_space<vmem>>, %arg5: memref<1x1xf32, #tpu.memory_space<vmem>>, %arg6: memref<1024x128xbf16, #tpu.memory_space<vmem>>, %arg7: memref<1x128xf32, #tpu.memory_space<vmem>>, %arg8: memref<2x1xi32, #tpu.memory_space<vmem>>, %arg9: memref<2x1xf32, #tpu.memory_space<vmem>>, %arg10: memref<1x1xf32, #tpu.memory_space<vmem>>) attributes {dimension_semantics = [#tpu.dimension_semantics<arbitrary>], iteration_bounds = array<i64: 1>, scalar_prefetch = 0 : i64, scratch_operands = 0 : i64, tpu.core_type = #tpu.core_type<tc>, window_params = [{pipeline_mode = #tpu.pipeline_mode<synchronous>, transform_indices = @transform_0, window_bounds = array<i64: 2, 4, 2, 512>}, {pipeline_mode = #tpu.pipeline_mode<synchronous>, transform_indices = @transform_1, window_bounds = array<i64: 256, 1024>}, {pipeline_mode = #tpu.pipeline_mode<synchronous>, transform_indices = @transform_2, window_bounds = array<i64: 1, 1024>}, {pipeline_mode = #tpu.pipeline_mode<synchronous>, transform_indices = @transform_3, window_bounds = array<i64: 1, 1024>}, {pipeline_mode = #tpu.pipeline_mode<synchronous>, transform_indices = @transform_4, window_bounds = array<i64: 1, 1>}, {pipeline_mode = #tpu.pipeline_mode<synchronous>, transform_indices = @transform_5, window_bounds = array<i64: 1024, 128>}, {pipeline_mode = #tpu.pipeline_mode<synchronous>, transform_indices = @transform_6, window_bounds = array<i64: 1, 128>}, {pipeline_mode = #tpu.pipeline_mode<synchronous>, transform_indices = @transform_7, window_bounds = array<i64: 2, 1>}, {pipeline_mode = #tpu.pipeline_mode<synchronous>, transform_indices = @transform_8, window_bounds = array<i64: 2, 1>}, {pipeline_mode = #tpu.pipeline_mode<synchronous>, transform_indices = @transform_9, window_bounds = array<i64: 1, 1>}]} {
    %c0 = arith.constant 0 : index
    %c0_0 = arith.constant 0 : index
    %c0_1 = arith.constant 0 : index
    %c0_2 = arith.constant 0 : index
    %0 = vector.load %arg1[%c0, %c0_0, %c0_1, %c0_2] : memref<2x4x2x512xbf16, #tpu.memory_space<vmem>>, vector<2x4x2x512xbf16>
    %1 = vector.shape_cast %0 : vector<2x4x2x512xbf16> to vector<2x8x512xbf16>
    %2 = arith.extf %1 : vector<2x8x512xbf16> to vector<2x8x512xf32>
    %cst = arith.constant dense<0.000000e+00> : vector<2x512xf32>
    %3 = vector.multi_reduction <add>, %2, %cst [1] : vector<2x8x512xf32> to vector<2x512xf32>
    %4 = vector.extract_strided_slice %3 {offsets = [0, 0], sizes = [2, 256], strides = [1, 1]} : vector<2x512xf32> to vector<2x256xf32>
    %5 = vector.extract_strided_slice %3 {offsets = [0, 256], sizes = [2, 256], strides = [1, 1]} : vector<2x512xf32> to vector<2x256xf32>
    %6 = arith.addf %4, %5 : vector<2x256xf32>
    %cst_3 = arith.constant 2.500000e-01 : f32
    %7 = vector.broadcast %cst_3 : f32 to vector<2x256xf32>
    %8 = arith.mulf %6, %7 : vector<2x256xf32>
    %9 = arith.truncf %8 : vector<2x256xf32> to vector<2x256xbf16>
    %c0_4 = arith.constant 0 : index
    %c0_5 = arith.constant 0 : index
    %10 = vector.load %arg2[%c0_4, %c0_5] : memref<256x1024xbf16, #tpu.memory_space<vmem>>, vector<256x1024xbf16>
    %cst_6 = arith.constant dense<0.000000e+00> : vector<2x1024xf32>
    %11 = tpu.matmul %9, %10, %cst_6 {dimension_numbers = #tpu.dot_dimension_numbers<[1], [0], [0], [1], [0, 0, 1, 1], [], []>} : vector<2x256xbf16>, vector<256x1024xbf16>, vector<2x1024xf32> -> vector<2x1024xf32>
    %c0_7 = arith.constant 0 : index
    %c0_8 = arith.constant 0 : index
    %12 = vector.load %arg3[%c0_7, %c0_8] : memref<1x1024xf32, #tpu.memory_space<vmem>>, vector<1x1024xf32>
    %13 = vector.broadcast %12 : vector<1x1024xf32> to vector<2x1024xf32>
    %14 = arith.addf %11, %13 : vector<2x1024xf32>
    %c0_9 = arith.constant 0 : index
    %c0_10 = arith.constant 0 : index
    %15 = vector.load %arg4[%c0_9, %c0_10] : memref<1x1024xf32, #tpu.memory_space<vmem>>, vector<1x1024xf32>
    %16 = vector.broadcast %15 : vector<1x1024xf32> to vector<2x1024xf32>
    %17 = arith.mulf %14, %16 : vector<2x1024xf32>
    %cst_11 = arith.constant dense<0.000000e+00> : vector<2xf32>
    %18 = vector.multi_reduction <add>, %17, %cst_11 [1] : vector<2x1024xf32> to vector<2xf32>
    %19 = vector.shape_cast %18 : vector<2xf32> to vector<2x1xf32>
    %c0_12 = arith.constant 0 : index
    %c0_13 = arith.constant 0 : index
    %20 = vector.load %arg5[%c0_12, %c0_13] : memref<1x1xf32, #tpu.memory_space<vmem>>, vector<1x1xf32>
    %21 = vector.broadcast %20 : vector<1x1xf32> to vector<2x1xf32>
    %22 = arith.addf %19, %21 : vector<2x1xf32>
    %c0_14 = arith.constant 0 : index
    %c0_15 = arith.constant 0 : index
    %23 = vector.load %arg9[%c0_14, %c0_15] : memref<2x1xf32, #tpu.memory_space<vmem>>, vector<2x1xf32>
    tpu.vector_store %arg9[%c0_14, %c0_15], %22 {strides = array<i32>} : memref<2x1xf32, #tpu.memory_space<vmem>>, vector<2x1xf32>,
    %24 = arith.truncf %14 : vector<2x1024xf32> to vector<2x1024xbf16>
    %c0_16 = arith.constant 0 : index
    %c0_17 = arith.constant 0 : index
    %25 = vector.load %arg6[%c0_16, %c0_17] : memref<1024x128xbf16, #tpu.memory_space<vmem>>, vector<1024x128xbf16>
    %cst_18 = arith.constant dense<0.000000e+00> : vector<2x128xf32>
    %26 = tpu.matmul %24, %25, %cst_18 {dimension_numbers = #tpu.dot_dimension_numbers<[1], [0], [0], [1], [0, 0, 1, 1], [], []>} : vector<2x1024xbf16>, vector<1024x128xbf16>, vector<2x128xf32> -> vector<2x128xf32>
    %c0_19 = arith.constant 0 : index
    %c0_20 = arith.constant 0 : index
    %27 = vector.load %arg7[%c0_19, %c0_20] : memref<1x128xf32, #tpu.memory_space<vmem>>, vector<1x128xf32>
    %28 = vector.broadcast %27 : vector<1x128xf32> to vector<2x128xf32>
    %29 = arith.addf %26, %28 : vector<2x128xf32>
    %cst_21 = arith.constant dense<0xFF800000> : vector<2xf32>
    %30 = vector.multi_reduction <maximumf>, %29, %cst_21 [1] : vector<2x128xf32> to vector<2xf32>
    %31 = vector.shape_cast %30 : vector<2xf32> to vector<2x1xf32>
    %32 = vector.broadcast %31 : vector<2x1xf32> to vector<2x128xf32>
    %33 = arith.subf %29, %32 : vector<2x128xf32>
    %34 = math.exp %33 : vector<2x128xf32>
    %cst_22 = arith.constant dense<0.000000e+00> : vector<2xf32>
    %35 = vector.multi_reduction <add>, %34, %cst_22 [1] : vector<2x128xf32> to vector<2xf32>
    %36 = vector.shape_cast %35 : vector<2xf32> to vector<2x1xf32>
    %37 = math.log %36 : vector<2x1xf32>
    %38 = arith.addf %31, %37 : vector<2x1xf32>
    %39 = tpu.iota {dimensions = array<i32: 1>} : vector<2x128xi32>
    %c0_23 = arith.constant 0 : index
    %c0_24 = arith.constant 0 : index
    %40 = vector.load %arg8[%c0_23, %c0_24] : memref<2x1xi32, #tpu.memory_space<vmem>>, vector<2x1xi32>
    %41 = vector.broadcast %40 : vector<2x1xi32> to vector<2x128xi32>
    %42 = arith.cmpi eq, %39, %41 : vector<2x128xi32>
    %cst_25 = arith.constant 0.000000e+00 : f32
    %43 = vector.broadcast %cst_25 : f32 to vector<2x128xf32>
    %44 = arith.select %42, %29, %43 : vector<2x128xi1>, vector<2x128xf32>
    %cst_26 = arith.constant dense<0.000000e+00> : vector<2xf32>
    %45 = vector.multi_reduction <add>, %44, %cst_26 [1] : vector<2x128xf32> to vector<2xf32>
    %46 = vector.shape_cast %45 : vector<2xf32> to vector<2x1xf32>
    %47 = arith.subf %38, %46 : vector<2x1xf32>
    %cst_27 = arith.constant dense<0.000000e+00> : vector<1xf32>
    %48 = vector.multi_reduction <add>, %47, %cst_27 [0] : vector<2x1xf32> to vector<1xf32>
    %49 = vector.shape_cast %48 : vector<1xf32> to vector<1x1xf32>
    %cst_28 = arith.constant 2.000000e+00 : f32
    %50 = vector.broadcast %cst_28 : f32 to vector<1x1xf32>
    %51 = arith.divf %49, %50 : vector<1x1xf32>
    %c0_29 = arith.constant 0 : index
    %c0_30 = arith.constant 0 : index
    %52 = vector.load %arg10[%c0_29, %c0_30] : memref<1x1xf32, #tpu.memory_space<vmem>>, vector<1x1xf32>
    tpu.vector_store %arg10[%c0_29, %c0_30], %51 {strides = array<i32>} : memref<1x1xf32, #tpu.memory_space<vmem>>, vector<1x1xf32>,
    return
  }
  func.func @transform_0(%arg0: i32) -> (i32, i32, i32, i32) {
    %c0_i32 = arith.constant 0 : i32
    %c0_i32_0 = arith.constant 0 : i32
    %c0_i32_1 = arith.constant 0 : i32
    %c0_i32_2 = arith.constant 0 : i32
    %c0_i32_3 = arith.constant 0 : i32
    return %c0_i32, %c0_i32_0, %c0_i32_1, %c0_i32_2 : i32, i32, i32, i32
  }
  func.func @transform_1(%arg0: i32) -> (i32, i32) {
    %c0_i32 = arith.constant 0 : i32
    %c0_i32_0 = arith.constant 0 : i32
    %c0_i32_1 = arith.constant 0 : i32
    return %c0_i32, %c0_i32_0 : i32, i32
  }
  func.func @transform_2(%arg0: i32) -> (i32, i32) {
    %c0_i32 = arith.constant 0 : i32
    %c0_i32_0 = arith.constant 0 : i32
    %c0_i32_1 = arith.constant 0 : i32
    return %c0_i32, %c0_i32_0 : i32, i32
  }
  func.func @transform_3(%arg0: i32) -> (i32, i32) {
    %c0_i32 = arith.constant 0 : i32
    %c0_i32_0 = arith.constant 0 : i32
    %c0_i32_1 = arith.constant 0 : i32
    return %c0_i32, %c0_i32_0 : i32, i32
  }
  func.func @transform_4(%arg0: i32) -> (i32, i32) {
    %c0_i32 = arith.constant 0 : i32
    %c0_i32_0 = arith.constant 0 : i32
    %c0_i32_1 = arith.constant 0 : i32
    return %c0_i32, %c0_i32_0 : i32, i32
  }
  func.func @transform_5(%arg0: i32) -> (i32, i32) {
    %c0_i32 = arith.constant 0 : i32
    %c0_i32_0 = arith.constant 0 : i32
    %c0_i32_1 = arith.constant 0 : i32
    return %c0_i32, %c0_i32_0 : i32, i32
  }
  func.func @transform_6(%arg0: i32) -> (i32, i32) {
    %c0_i32 = arith.constant 0 : i32
    %c0_i32_0 = arith.constant 0 : i32
    %c0_i32_1 = arith.constant 0 : i32
    return %c0_i32, %c0_i32_0 : i32, i32
  }
  func.func @transform_7(%arg0: i32) -> (i32, i32) {
    %c0_i32 = arith.constant 0 : i32
    %c0_i32_0 = arith.constant 0 : i32
    %c0_i32_1 = arith.constant 0 : i32
    return %c0_i32, %c0_i32_0 : i32, i32
  }
  func.func @transform_8(%arg0: i32) -> (i32, i32) {
    %c0_i32 = arith.constant 0 : i32
    %c0_i32_0 = arith.constant 0 : i32
    %c0_i32_1 = arith.constant 0 : i32
    return %c0_i32, %c0_i32_0 : i32, i32
  }
  func.func @transform_9(%arg0: i32) -> (i32, i32) {
    %c0_i32 = arith.constant 0 : i32
    %c0_i32_0 = arith.constant 0 : i32
    %c0_i32_1 = arith.constant 0 : i32
    return %c0_i32, %c0_i32_0 : i32, i32
  }
}

</mosaic_0001>

<bundles_post_ra>
// kernel: tpu_custom_call.1
= control target key start
LH: loop header
LB: loop body
LE: loop exit
PB: predicated region body
PF: predicated region fallthrough
CT: control target
= control target key end

     0   :  { %6 = vsyncpa [#allocation3], 0  ;;  %s482_s0 = inlined_call_operand.hbm [shape: f32[8,128], index: 0, kind: input, shape index: {}]   ;;  %s483_s1 = inlined_call_operand.hbm [shape: f32[16,128], index: 1, kind: output, shape index: {}]  }
   0x1   :  { %7 = vsyncpa [#allocation4], 0 }
   0x2   :  { %9 = vsyncpa [#allocation4 + $0x1], 0  ;;  %s352_s6 = smov 0   ;;  %s354_s7 = smov 0  }
   0x3   :  { %s356_s8 = smov 0   ;;  %s358_s9 = smov 0  }
   0x4 LB: > { %s373_s10 = sadd.s32 4294967295, %s338_s9   ;;  %s184_s11 = sadd.s32 4294967294, %s338_s9   ;;  %s338_s9 = sphi %s358_s9, %s499_s9   ;;  %s334_s8 = sphi %s356_s8, %s498_s8   ;;  %s330_s7 = sphi %s354_s7, %s497_s7   ;;  %s326_s6 = sphi %s352_s6, %s496_s6  }
   0x5   : > { %s377_s12 = sadd.s32 1, %s338_s9   ;;  %s43_s13 = sadd.s32 1, %s334_s8 }
   0x6   : > { %s40_s14 = ssub.s32 %s338_s9, %s377_s12  ;;  %p53_p0 = scmp.ne.s32.totalorder %s334_s8, %s330_s7 }
   0x7   : > { %p41_p1 = scmp.eq.s32.totalorder %s40_s14, 0  ;;  %p54_p2 = scmp.eq.s32.totalorder %s373_s10, 1 }
   0x8   : > { %p59_p3 = scmp.ne.s32.totalorder %s330_s7, %s326_s6  ;;  %p60_p4 = scmp.eq.s32.totalorder %s184_s11, 1 }
   0x9   : > { %s388_s15 = scalar_select %p41_p1, %s334_s8, %s43_s13  }
   0xa   : > { %p390_p5 = por %p54_p2, %p53_p0  ;;  %p394_p6 = por %p60_p4, %p59_p3 }
   0xb   : > { %p185_p7 = scmp.ge.s32.totalorder %s338_s9, 1  ;;  %p67_p8 = scmp.lt.s32.totalorder %s338_s9, 3 }
   0xc   : > { %s487_s16 = scalar_select %p390_p5, 1, 0 }
   0xd   : > { %s488_s17 = scalar_select %p394_p6, 1, 0 }
   0xe   : > { %p484_p9 = scmp.eq.s32.totalorder %s373_s10, 0  ;;  %p401_p10 = pnand %p185_p7, %p67_p8 }
   0xf   : > { %s340_s19 = smov [#allocation2]   ;;  %s244_s24 = scalar_lea.hbm %s482_s0, 128 }
  0x10   : > { %s489_s18 = scalar_select %p401_p10, 1, 0 }
  0x11   : > { %s80_s20 = sshll.u32 %s340_s19, 4  ;;  %p200_p11 = pneg %p401_p10  ;;  %s81_s20 = int_to_ptr.vmem [resolvable:$true] %s80_s20 }
  0x12   : > { %p245_p13 = scmp.ne.s32.totalorder %s482_s0, %s244_s24  ;;  %p251_p3 = scmp.lt.u32.totalorder %s244_s24, %s482_s0 }
  0x13   : > { %p409_p12 = pnand %p484_p9, %p200_p11 }
  0x15   : > { %p246_p0 = pneg %p409_p12 }
  0x17   : > { %p247_p1 = pnand %p246_p0, %p245_p13 }
  0x19   : > { %p248_p2 = pneg %p247_p1 }
  0x1b   : > { %p253_p4 = pnand %p251_p3, %p248_p2 }
  0x1d   : > { %256 = shalt.err (!%p253_p4)
}
  0x1e   : > { %s257_s29 = scalar_lea.vmem %s81_s20, 128  ;;  %p265_p9 = scmp.lt.s32.totalorder %s81_s20, %s81_s20 }
  0x1f   : > { %p258_p7 = scmp.ne.s32.totalorder %s81_s20, %s257_s29  ;;  %p266_p6 = scmp.lt.s32.totalorder %s257_s29, %s257_s29 }
  0x21   : > { %p260_p8 = pnand %p258_p7, %p246_p0  ;;  %p267_p5 = por %p266_p6, %p265_p9 }
  0x23   : > { %p261_p11 = pneg %p260_p8 }
  0x25   : > { %p268_p10 = pnand %p267_p5, %p261_p11 }
  0x27   : > { %271 = shalt.err (!%p268_p10)
}
  0x28   : > { %203 = dma.hbm_to_vmem [thread:$0]  (!%p409_p12), %s482_s0, 128, %s81_s20, [#allocation3]  }
  0x29   : > { %p491_p13 = scmp.ne.s32.totalorder %s489_s18, 0 }
  0x2a   : > { %p492_p1 = scmp.eq.s32.totalorder (!%p491_p13), %s373_s10, 0 }
  0x2b   : > { %93 = sbr.rel (%p491_p13) target bundleno = 77 (0x4d), region = 24 }
  0x32   : > { %317 = dma.done.wait (%p492_p1), [#allocation3], 128   ;;  %p493_p0 = pmov %p492_p1 }
  0x33   : > { %s105_s3 = sand.u32 1, %s330_s7   ;;  %s191_s13 = sshll.u32 %s373_s10, 7  ;;  %v108_v0 = vld [vmem:[#allocation2] sm:$0xff] }
  0x34   : > { %319 = vsyncadd (%p493_p0), [#allocation3], 4294967168  ;;  %s189_s4 = sshll.u32 %s105_s3, 3  ;;  %v109_v1 = vmul.f32 2.0, %v108_v0  ;;  %s442_s19 = scalar_lea.hbm %s483_s1, %s191_s13 }
  0x35   : > { %s107_s5 = scalar_lea.vmem [#allocation5], %s189_s4  ;;  %s112_s20 = scalar_lea.sflag [#allocation4], %s105_s3 }
  0x36   : > { %s125_s11 = sshll.u32 %s107_s5, 4  ;;  %110 = vst [vmem:[%s107_s5] sm:$0xff] %v109_v1  ;;  %p494_p6 = scmp.ne.s32.totalorder %s487_s16, 0  ;;  %s437_s11 = int_to_ptr.vmem [resolvable:$true] %s125_s11 }
  0x37   : > { %s272_s21 = scalar_lea.vmem %s437_s11, 128  ;;  %s341_s10 = smov [#allocation5]  }
  0x38   : > { %p273_p5 = scmp.ne.s32.totalorder %s437_s11, %s272_s21  ;;  %s276_s22 = sshll.u32 %s341_s10, 4  ;;  %s277_s22 = int_to_ptr.vmem [resolvable:$false] %s276_s22 }
  0x39   : > { %s278_s23 = scalar_lea.vmem %s277_s22, 256  ;;  %p279_p12 = scmp.lt.s32.totalorder %s437_s11, %s277_s22 }
  0x3a   : > { %p274_p9 = pnand %p273_p5, %p494_p6  ;;  %p280_p2 = scmp.lt.s32.totalorder %s278_s23, %s272_s21 }
  0x3c   : > { %p275_p10 = pneg %p274_p9  ;;  %p281_p3 = por %p280_p2, %p279_p12 }
  0x3e   : > { %p282_p4 = pnand %p281_p3, %p275_p10 }
  0x40   : > { %285 = shalt.err (!%p282_p4)
}
  0x41   : > { %s286_s24 = scalar_lea.hbm %s442_s19, 128  ;;  %s290_s27 = scalar_lea.hbm %s483_s1, 256 }
  0x42   : > { %p287_p7 = scmp.ne.s32.totalorder %s442_s19, %s286_s24  ;;  %p291_p13 = scmp.lt.u32.totalorder %s442_s19, %s483_s1 }
  0x43   : > { %p292_p1 = scmp.lt.u32.totalorder %s290_s27, %s286_s24  ;;  %p294_p5 = scmp.lt.u32.totalorder %s286_s24, %s442_s19 }
  0x44   : > { %p288_p8 = pnand %p287_p7, %p494_p6 }
  0x45   : > { %p293_p0 = por %p292_p1, %p291_p13 }
  0x46   : > { %p289_p11 = pneg %p288_p8 }
  0x47   : > { %p295_p9 = por %p294_p5, %p293_p0 }
  0x49   : > { %p296_p10 = pnand %p295_p9, %p289_p11 }
  0x4b   : > { %299 = shalt.err (!%p296_p10)
}
  0x4c   : > { %198 = dma.vmem_to_hbm [thread:$0]  (%p494_p6), %s437_s11, 128, %s442_s19, %s112_s20  }
  0x4d PF: > { %p210_p12 = scmp.ge.s32.totalorder %s338_s9, 2  ;;  %s137_s30 = sand.u32 1, %s326_s6  }
  0x4e   : > { %p495_p2 = scmp.ne.s32.totalorder %s488_s17, 0  ;;  %s138_s2 = scalar_lea.sflag [#allocation4], %s137_s30 }
  0x50   : > { %p205_p3 = pnand %p210_p12, %p495_p2 }
  0x52   : > { %321 = dma.done.wait (!%p205_p3), %s138_s2, 128  }
  0x53   : > { %323 = vsyncadd (!%p205_p3), %s138_s2, 4294967168  ;;  %p12_p4 = scmp.ge.s32.totalorder %s377_s12, 4   ;;  %s496_s6 = smov %s330_s7 }
  0x54   : > { %s497_s7 = smov %s334_s8  ;;  %s498_s8 = smov %s388_s15 }
  0x55   : > { %s499_s9 = smov %s377_s12  ;;  %14 = sbr.rel (!%p12_p4) target bundleno = 4 (0x4), region = 61 }
  0x5c   :  { %143 = vsyncpa [#allocation3], 1 }
  0x5d   :  { %145 = vsyncpa [#allocation3 + $0x1], 1 }
  0x5e   :  { %146 = vsyncpa [#allocation4], 1 }
  0x5f   :  { %148 = vsyncpa [#allocation4 + $0x1], 1 }

// kernel: ac_discriminator_forward.5
= control target key start
LH: loop header
LB: loop body
LE: loop exit
PB: predicated region body
PF: predicated region fallthrough
CT: control target
= control target key end

     0   :  { %8 = vsyncpa [#allocation3], 0  ;;  %s3794_s12 = smov 0   ;;  %s5029_s0 = inlined_call_operand.vmem [shape: bf16[2,4,5,384], index: 0, kind: input, shape index: {}]   ;;  %s5030_s1 = inlined_call_operand.vmem [shape: bf16[16,64,128], index: 1, kind: input, shape index: {}]   ;;  %s5031_s2 = inlined_call_operand.hbm [shape: f32[1,128], index: 2, kind: input, shape index: {}]   ;;  %s5032_s3 = inlined_call_operand.vmem [shape: bf16[2,4,3,384], index: 3, kind: output, shape index: {}]  }
   0x1 LB: > { %s3800_s13 = sadd.s32 4294967295, %s3764_s12   ;;  %p3136_p0 = scmp.ge.s32.totalorder %s3764_s12, 1  ;;  %s3764_s12 = sphi %s3794_s12, %s14_s12  }
   0x2   : > { %p113_p1 = scmp.lt.s32.totalorder %s3764_s12, 3  ;;  %p5033_p3 = scmp.eq.s32.totalorder %s3800_s13, 0 }
   0x3   : > { %s3766_s15 = smov [#allocation2]   ;;  %s3726_s20 = scalar_lea.hbm %s5031_s2, 16 }
   0x4   : > { %p3804_p2 = pnand %p3136_p0, %p113_p1  ;;  %s129_s16 = sshll.u32 %s3766_s15, 4  ;;  %s130_s16 = int_to_ptr.vmem [resolvable:$true] %s129_s16 }
   0x5   : > { %p3727_p6 = scmp.ne.s32.totalorder %s5031_s2, %s3726_s20  ;;  %p3733_p10 = scmp.lt.u32.totalorder %s3726_s20, %s5031_s2 }
   0x6   : > { %s5052_s14 = scalar_select %p3804_p2, 1, 0 }
   0x7   : > { %p3636_p4 = pneg %p3804_p2 }
   0x9   : > { %p3813_p5 = pnand %p5033_p3, %p3636_p4 }
   0xb   : > { %p3728_p7 = pneg %p3813_p5 }
   0xd   : > { %p3729_p8 = pnand %p3728_p7, %p3727_p6 }
   0xf   : > { %p3730_p9 = pneg %p3729_p8 }
  0x11   : > { %p3735_p11 = pnand %p3733_p10, %p3730_p9 }
  0x13   : > { %3738 = shalt.err (!%p3735_p11)
}
  0x14   : > { %s3739_s25 = scalar_lea.vmem %s130_s16, 16  ;;  %s3746_s26 = scalar_lea.vmem %s130_s16, 32 }
  0x15   : > { %p3740_p12 = scmp.ne.s32.totalorder %s130_s16, %s3739_s25  ;;  %p3747_p1 = scmp.lt.s32.totalorder %s130_s16, %s130_s16 }
  0x16   : > { %p3748_p4 = scmp.lt.s32.totalorder %s3746_s26, %s3739_s25 }
  0x17   : > { %p3742_p13 = pnand %p3740_p12, %p3728_p7 }
  0x18   : > { %p3749_p3 = por %p3748_p4, %p3747_p1 }
  0x19   : > { %p3743_p0 = pneg %p3742_p13 }
  0x1b   : > { %p3750_p2 = pnand %p3749_p3, %p3743_p0 }
  0x1d   : > { %3753 = shalt.err (!%p3750_p2)
}
  0x1e   : > { %3639 = dma.hbm_to_vmem [thread:$0]  (!%p3813_p5), %s5031_s2, 16, %s130_s16, [#allocation3]  }
  0x1f   : > { %p5054_p6 = scmp.ne.s32.totalorder %s5052_s14, 0 }
  0x21   : > { %150 = sbr.rel (%p5054_p6) target bundleno = 603 (0x25b), region = 32 }
  0x28   : > { %p5055_p8 = scmp.eq.s32.totalorder %s3800_s13, 0 }
  0x2a   : > { %3759 = dma.done.wait (%p5055_p8), [#allocation3], 16   ;;  %p5056_p7 = pmov %p5055_p8 }
  0x2b   : > { %p174_p9 = scmp.lt.s32.totalorder %s3800_s13, 1  ;;  %v201_v0 = vlaneseq  ;;  %v3767_v1 = vmov 1983009808   ;;  %s3768_s6 = smov 64   ;;  %v3662_v38 = vld [vmem:[%s5030_s1 + $0x20] sm:$0xff]   ;;  %v5039_v40 = vmov 0.0  }
  0x2c   : > { %3761 = vsyncadd (%p5056_p7), [#allocation3], 4294967280  ;;  %v199_v2 = vunpack.c.l.s4 %v3767_v1  ;;  %v3663_v39 = vld [vmem:[%s5030_s1] sm:$0xff]   ;;  %3438 = vmatprep.subr.bf16.mxu0 %v5039_v40  ;;  %3450 = vmatprep.subr.bf16.mxu1 %v5039_v40  ;;  %v3664_v41 = vld [vmem:[%s5030_s1 + $0x28] sm:$0xff]   ;;  %vm3770_vm0 = vmmov 0   ;;  %vm618_vm1 = vcmask 523264  }
  0x2d   : > { %s5128_s13 = smov (!%p174_p9, %s3800_s13), 1  ;;  %v3844_v4 = vshrl.u32 %v201_v0, 7  ;;  %3439 = vmatpush3.bf16.msra.mxu0 %v3662_v38  ;;  %3451 = vmatpush3.bf16.msra.mxu1 %v3663_v39  ;;  %v3665_v42 = vld [vmem:[%s5030_s1 + $0x8] sm:$0xff]   ;;  %v3666_v43 = vld [vmem:[%s5030_s1 + $0x30] sm:$0xff]   ;;  %v3668_v45 = vld [vmem:[%s5030_s1 + $0x38] sm:$0xff]   ;;  %vm2943_vm9 = vcmask 1042434  }
  0x2e   : > { %s3630_s29 = smul.u32 48, %s5128_s13  ;;  %v200_v3 = vunpack.c.0.s8 %v199_v2  ;;  %3440 = vmatprep.subr.bf16.mxu0 %v5039_v40  ;;  %3452 = vmatprep.subr.bf16.mxu1 %v5039_v40  ;;  %v3667_v44 = vld [vmem:[%s5030_s1 + $0x10] sm:$0xff]   ;;  %v3669_v46 = vld [vmem:[%s5030_s1 + $0x18] sm:$0xff]   ;;  %v3771_v47 = vmov 1934713408   ;;  %vm2667_vm10 = vcmask 1041409  }
  0x2f   : > { %5057 = vst [vmem:[#allocation5_spill] sm:$0xff] %v3844_v4  ;;  %3446 = vmatprep.mubr.msk.bf16.mxu0 %vm3770_vm0, %v5039_v40  ;;  %3458 = vmatprep.mubr.msk.bf16.mxu1 %vm3770_vm0, %v5039_v40  ;;  %v216_v48 = vunpack.c.l.s4 %v3771_v47  ;;  %vm780_vm2 = vsmask.f32 1280  ;;  %vm781_vm3 = vsmask.f32 3336  ;;  %vm2697_vm11 = vcmask 1040384  }
  0x30   : > { %s178_s5 = scalar_lea.vmem %s5029_s0, %s3630_s29  ;;  %v3850_v8 = vsub.s32 %v200_v3, %v3844_v4  ;;  %vm783_vm4 = vsmask.f32 5392  ;;  %vm785_vm5 = vsmask.f32 7448  ;;  %vm4130_vm6 = vmor %vm780_vm2, %vm781_vm3  ;;  %vm2698_vm12 = vsmask.f32 256 }
  0x31   : > { %v3143_v5 = vld [vmem:[%s178_s5 + $0xc] sm:$0x77]  ;;  %v185_v6 = vld [vmem:[%s178_s5] sm:$0x77]  ;;  %v3144_v7 = vld [vmem:[%s178_s5 + $0x14] sm:$0x7]  ;;  %3441 = vmatpush3.bf16.msra.mxu0 %v3664_v41  ;;  %3453 = vmatpush3.bf16.msra.mxu1 %v3665_v42  ;;  %v217_v49 = vunpack.c.0.s8 %v216_v48 }
  0x32   : > { %283 = vrot.lane.b32.xlu0 %v3143_v5, %s3768_s6  ;;  %v282_v9 = vrot.slane %v3143_v5, 4  ;;  %189 = vrot.lane.b32.xlu1 %v185_v6, %s3768_s6  ;;  %v188_v10 = vrot.slane %v185_v6, 4  ;;  %v291_v11 = vcombine.low %v3143_v5, %v3144_v7  ;;  %v186_v12 = vld [vmem:[%s178_s5 + $0x8] sm:$0x7]  ;;  %v3145_v13 = vld [vmem:[%s178_s5 + $0x18] sm:$0x77]  ;;  %vm4167_vm7 = vmor %vm4130_vm6, %vm783_vm4 }
  0x33   : > { %v3146_v14 = vld [vmem:[%s178_s5 + $0x20] sm:$0x7]  ;;  %v197_v18 = vcombine.low %v185_v6, %v186_v12  ;;  %v3147_v19 = vld [vmem:[%s178_s5 + $0x24] sm:$0x77]  ;;  %v3148_v20 = vld [vmem:[%s178_s5 + $0x2c] sm:$0x7]  ;;  %3442 = vmatprep.subr.bf16.mxu0 %v5039_v40  ;;  %3454 = vmatprep.subr.bf16.mxu1 %v5039_v40  ;;  %v3939_v52 = vsub.s32 %v217_v49, %v3844_v4 }
  0x34   : > { %v3855_v15 = vrot.slane %v282_v9, %v3850_v8  ;;  %v3858_v16 = vrot.slane %v188_v10, %v3850_v8  ;;  %v3861_v17 = vrot.slane %v291_v11, %v3850_v8  ;;  %v376_v21 = vrot.slane %v3145_v13, 4  ;;  %vm4196_vm8 = vmor %vm4167_vm7, %vm785_vm5  ;;  %s3631_s10 = smul.u32 24, %s5128_s13 }
  0x35   : > { %v385_v22 = vcombine.low %v3145_v13, %v3146_v14  ;;  %v470_v23 = vrot.slane %v3147_v19, 4  ;;  %v479_v24 = vcombine.low %v3147_v19, %v3148_v20  ;;  %v3870_v27 = vrot.slane %v197_v18, %v3850_v8  ;;  %3443 = vmatpush3.bf16.msra.mxu0 %v3666_v43  ;;  %3455 = vmatpush3.bf16.msra.mxu1 %v3667_v44  ;;  %vm4903_vm13 = vmand %vm2697_vm11, %vm2698_vm12 }
  0x36   : > { %288 = vrot.lane.b32.xlu0 %v3144_v7, %s3768_s6  ;;  %v307_v25 = vcombine.low %v3861_v17, %v3855_v15  ;;  %v308_v26 = vcombine.high %v3861_v17, %v3855_v15  ;;  %194 = vrot.lane.b32.xlu1 %v186_v12, %s3768_s6  ;;  %v3873_v28 = vrot.slane %v376_v21, %v3850_v8  ;;  %v5035_v6 = vmov 0   ;;  %s4989_s14 = scalar_lea.vmem %s5032_s3, %s3631_s10 }
  0x37   : > { %v3876_v29 = vrot.slane %v385_v22, %v3850_v8  ;;  %v3879_v30 = vrot.slane %v470_v23, %v3850_v8  ;;  %v3882_v31 = vrot.slane %v479_v24, %v3850_v8  ;;  %v213_v32 = vcombine.low %v3870_v27, %v3858_v16  ;;  %3444 = vmatprep.subr.bf16.mxu0 %v5039_v40 }
  0x38   : > { %v214_v33 = vcombine.high %v3870_v27, %v3858_v16  ;;  %3456 = vmatprep.subr.bf16.mxu1 %v5039_v40  ;;  %5058 = vst [vmem:[#allocation6_spill] sm:$0xff] %v3939_v52  ;;  %v315_v59 = vrot.slane %v307_v25, %v3939_v52  ;;  %v323_v0 = vrot.slane %v308_v26, %v3939_v52  ;;  %vm2746_vm14 = vcmask 1041408  }
  0x39   : > { %v401_v34 = vcombine.low %v3876_v29, %v3873_v28  ;;  %v402_v35 = vcombine.high %v3876_v29, %v3873_v28  ;;  %v495_v36 = vcombine.low %v3882_v31, %v3879_v30  ;;  %v496_v37 = vcombine.high %v3882_v31, %v3879_v30  ;;  %3445 = vmatpush3.bf16.msra.mxu0 %v3668_v45  ;;  %vm4963_vm4 = vmand %vm2746_vm14, %vm780_vm2 }
  0x3a   : > { %377 = vrot.lane.b32.xlu0 %v3145_v13, %s3768_s6  ;;  %382 = vrot.lane.b32.xlu1 %v3146_v14, %s3768_s6  ;;  %v316_v7 = vcombine.high %v315_v59, %v5035_v6  ;;  %v229_v9 = vrot.slane %v214_v33, %v3939_v52  ;;  %v360_v10 = vshrl.u32 %v315_v59, 16  ;;  %v221_v14 = vrot.slane %v213_v32, %v3939_v52 }
  0x3b   : > { %3457 = vmatpush3.bf16.msra.mxu1 %v3669_v46  ;;  %3462 = vmatprep.subr.bf16.mxu0 %v5039_v40  ;;  %v3966_v15 = vrot.slane %v401_v34, %v3939_v52  ;;  %v3972_v17 = vrot.slane %v495_v36, %v3939_v52  ;;  %v3984_v22 = vrot.slane %v402_v35, %v3939_v52  ;;  %vm2748_vm15 = vcmask 1043458  }
  0x3c   : > { %3474 = vmatprep.subr.bf16.mxu1 %v5039_v40  ;;  %v366_v25 = vshrl.u32 %v316_v7, 16  ;;  %v3992_v26 = vrot.slane %v496_v37, %v3939_v52  ;;  %v222_v34 = vcombine.high %v221_v14, %v5035_v6  ;;  %v266_v28 = vshrl.u32 %v221_v14, 16 }
  0x3d   : > { %v3999_v29 = vcombine.high %v3966_v15, %v5035_v6  ;;  %v4004_v36 = vcombine.high %v3972_v17, %v5035_v6  ;;  %v454_v43 = vshrl.u32 %v3966_v15, 16  ;;  %vm2753_vm3 = vsmask.f32 5376 }
  0x3e   : > { %471 = vrot.lane.b32.xlu0 %v3147_v19, %s3768_s6  ;;  %476 = vrot.lane.b32.xlu1 %v3148_v20, %s3768_s6  ;;  %v272_v47 = vshrl.u32 %v222_v34, 16 }
  0xa4   : > { %v284_v50 = vpop.permute.xlu0 %283  ;;  %v190_v51 = vpop.permute.xlu1 %189 }
  0xa5   : > { %v285_v53 = vrot.slane %v284_v50, 4  ;;  %v191_v54 = vrot.slane %v190_v51, 4 }
  0xa7   : > { %v339_v60 = vrot.slane %v285_v53, %v3850_v8  ;;  %v245_v61 = vrot.slane %v191_v54, %v3850_v8 }
  0xa8   : > { %v289_v55 = vpop.permute.xlu0 %288  ;;  %v195_v56 = vpop.permute.xlu1 %194 }
  0xa9   : > { %v324_v57 = vcombine.low %v284_v50, %v289_v55  ;;  %v230_v58 = vcombine.low %v190_v51, %v195_v56 }
  0xab   : > { %v331_v62 = vrot.slane %v324_v57, %v3850_v8  ;;  %v237_v63 = vrot.slane %v230_v58, %v3850_v8 }
  0xac   : > { %v378_v24 = vpop.permute.xlu0 %377  ;;  %v383_v33 = vpop.permute.xlu1 %382 }
  0xad   : > { %v340_v1 = vcombine.low %v331_v62, %v339_v60  ;;  %v341_v2 = vcombine.high %v331_v62, %v339_v60  ;;  %v246_v3 = vcombine.low %v237_v63, %v245_v61  ;;  %v247_v5 = vcombine.high %v237_v63, %v245_v61 }
  0xae   : > { %v379_v37 = vrot.slane %v378_v24, 4  ;;  %v418_v42 = vcombine.low %v378_v24, %v383_v33 }
  0xaf   : > { %v348_v11 = vrot.slane %v340_v1, %v3939_v52  ;;  %v356_v12 = vrot.slane %v341_v2, %v3939_v52  ;;  %v262_v13 = vrot.slane %v247_v5, %v3939_v52  ;;  %v254_v18 = vrot.slane %v246_v3, %v3939_v52 }
  0xb0   : > { %v4027_v55 = vrot.slane %v379_v37, %v3850_v8 }
  0xb1   : > { %v349_v19 = vcombine.high %v348_v11, %v5035_v6  ;;  %v3976_v20 = vpack.i.b16 %v348_v11, %v315_v59  ;;  %v361_v16 = vshrl.u32 %v348_v11, 16  ;;  %v3978_v21 = vpack.i.b16 %v356_v12, %v323_v0 }
  0xb2   : > { %v3986_v23 = vpack.i.b16 %v262_v13, %v229_v9  ;;  %v255_v35 = vcombine.high %v254_v18, %v5035_v6  ;;  %v267_v46 = vshrl.u32 %v254_v18, 16  ;;  %v4030_v59 = vrot.slane %v418_v42, %v3850_v8 }
  0xb3   : > { %5059 = vst [vmem:[#allocation7_spill] sm:$0xff] %v3978_v21  ;;  %v367_v27 = vshrl.u32 %v349_v19, 16  ;;  %v945_v32 = vrot.slane %v3976_v20, %v3850_v8  ;;  %v4006_v30 = vpack.i.b16 %v361_v16, %v360_v10  ;;  %v4008_v31 = vpack.i.b16 %v349_v19, %v316_v7 }
  0xb4   : > { %v1999_v41 = vrot.slane %v3978_v21, %v3850_v8  ;;  %v273_v50 = vshrl.u32 %v255_v35, 16  ;;  %v265_v61 = vpack.i.b16 %v254_v18, %v221_v14  ;;  %v4034_v62 = vpack.i.b16 %v267_v46, %v266_v28  ;;  %v3670_v18 = vld [vmem:[%s5030_s1 + $0x40] sm:$0xff]  }
  0xb5   : > { %5060 = vst [vmem:[#allocation8_spill] sm:$0xff] %v4006_v30  ;;  %5061 = vst [vmem:[#allocation9_spill] sm:$0xff] %v4008_v31  ;;  %v972_v38 = vshrl.u32 %v945_v32, 16  ;;  %v975_v39 = vshll.u32 %v945_v32, 16  ;;  %v4014_v45 = vpack.i.b16 %v367_v27, %v366_v25  ;;  %v946_v49 = vcombine.high %v945_v32, %v945_v32 }
  0xb6   : > { %v4020_v53 = vrot.slane %v4006_v30, %v3850_v8  ;;  %v4024_v54 = vrot.slane %v4008_v31, %v3850_v8  ;;  %v2000_v58 = vcombine.high %v1999_v41, %v1999_v41  ;;  %v4036_v63 = vpack.i.b16 %v255_v35, %v222_v34 }
  0xb7   : > { %5062 = vst [vmem:[#allocation10_spill] sm:$0xff] %v4014_v45  ;;  %v974_v56 = vrot.slane %v972_v38, 6  ;;  %v977_v57 = vrot.slane %v975_v39, 7  ;;  %v4038_v0 = vshll.u32 %v946_v49, 16  ;;  %v2002_v1 = vshrl.u32 %v1999_v41, 16  ;;  %v3671_v49 = vld [vmem:[%s5030_s1 + $0x60] sm:$0xff]  }
  0xb8   : > { %v2005_v2 = vshll.u32 %v1999_v41, 16  ;;  %v4040_v3 = vpack.i.b16 %v273_v50, %v272_v47  ;;  %v4044_v5 = vrot.slane %v4014_v45, %v3850_v8  ;;  %v986_v7 = vshrl.u32 %v4020_v53, 16 }
  0xb9   : > { %v989_v9 = vshll.u32 %v4020_v53, 16  ;;  %v1000_v10 = vshrl.u32 %v4024_v54, 16  ;;  %v978_v11 = vor.u32 %v977_v57, %v974_v56  ;;  %v1003_v12 = vshll.u32 %v4024_v54, 16 }
  0xba   : > { %v4050_v13 = vshll.u32 %v2000_v58, 16  ;;  %v754_v19 = vrot.slane %v265_v61, %v3850_v8  ;;  %v4059_v16 = vrot.slane %v4034_v62, %v3850_v8  ;;  %v4063_v24 = vrot.slane %v4036_v63, %v3850_v8 }
  0xbb   : > { %v4068_v32 = vrot.slane %v2002_v1, 6  ;;  %v4070_v33 = vrot.slane %v2005_v2, 7  ;;  %v4072_v34 = vrot.slane %v986_v7, 6  ;;  %v4074_v28 = vrot.slane %v989_v9, 7 }
  0xbc   : > { %5063 = vst [vmem:[#allocation11_spill] sm:$0xff] %v4050_v13  ;;  %v4078_v38 = vrot.slane %v978_v11, 2  ;;  %v4080_v39 = vrot.slane %v1000_v10, 6  ;;  %v4082_v41 = vrot.slane %v1003_v12, 7  ;;  %v755_v46 = vcombine.high %v754_v19, %v754_v19 }
  0xbd   : > { %v4091_v50 = vrot.slane %v4040_v3, %v3850_v8  ;;  %v2008_v56 = vor.u32 %v4070_v33, %v4068_v32  ;;  %v788_v57 = vshrl.u32 %v754_v19, 16  ;;  %v791_v58 = vshll.u32 %v754_v19, 16  ;;  %v472_v33 = vpop.permute.xlu0 %471 }
  0xbe   : > { %v1881_v1 = vrot.slane %v3986_v23, %v3850_v8  ;;  %v577_v2 = vcombine.low %v3976_v20, %v4006_v30  ;;  %v578_v7 = vcombine.low %v4008_v31, %v4014_v45  ;;  %v663_v9 = vcombine.low %v265_v61, %v4034_v62  ;;  %v477_v61 = vpop.permute.xlu1 %476 }
  0xbf   : > { %v664_v10 = vcombine.low %v4036_v63, %v4040_v3  ;;  %v802_v11 = vshrl.u32 %v4059_v16, 16  ;;  %v805_v12 = vshll.u32 %v4059_v16, 16  ;;  %v790_v37 = vrot.slane %v788_v57, 6 }
  0xc0   : > { %v1884_v32 = vshrl.u32 %v1881_v1, 16  ;;  %v1887_v19 = vshll.u32 %v1881_v1, 16  ;;  %v585_v60 = vrot.slane %v577_v2, %v3850_v8  ;;  %v592_v20 = vrot.slane %v578_v7, %v3850_v8 }
  0xc1   : > { %v671_v42 = vrot.slane %v663_v9, %v3850_v8  ;;  %v678_v27 = vrot.slane %v664_v10, %v3850_v8  ;;  %v793_v25 = vrot.slane %v791_v58, 7  ;;  %v4110_v35 = vshll.u32 %v755_v46, 16 }
  0xc2   : > { %v434_v2 = vcombine.low %v4030_v59, %v4027_v55  ;;  %v593_v7 = vcombine.low %v585_v60, %v592_v20  ;;  %v435_v10 = vcombine.high %v4030_v59, %v4027_v55  ;;  %v473_v57 = vrot.slane %v472_v33, 4 }
  0xc3   : > { %v679_v9 = vcombine.low %v671_v42, %v678_v27  ;;  %v816_v46 = vshrl.u32 %v4063_v24, 16  ;;  %v1882_v58 = vcombine.high %v1881_v1, %v1881_v1  ;;  %v512_v44 = vcombine.low %v472_v33, %v477_v61 }
  0xc4   : > { %v442_v51 = vrot.slane %v434_v2, %v3939_v52  ;;  %v819_v48 = vshll.u32 %v4063_v24, 16  ;;  %v1886_v14 = vrot.slane %v1884_v32, 6  ;;  %v1889_v47 = vrot.slane %v1887_v19, 7  ;;  %3447 = vmatmul.mubr.msk.bf16.vlgmr.msra.gmra.mrb[0].mxu0 %vm618_vm1, %v593_v7  ;;  %v3672_v32 = vld [vmem:[%s5030_s1 + $0x48] sm:$0xff]  }
  0xc5   : > { %3459 = vmatmul.mubr.msk.bf16.vlgmr.msra.gmra.mrb[0].mxu1 %vm618_vm1, %v679_v9  ;;  %v450_v60 = vrot.slane %v435_v10, %v3939_v52  ;;  %v794_v59 = vor.u32 %v793_v25, %v790_v37  ;;  %3463 = vmatpush3.bf16.msra.mxu0 %v3670_v18  ;;  %v4141_v19 = vrot.slane %v2008_v56, 2  ;;  %v3673_v18 = vld [vmem:[%s5030_s1 + $0x68] sm:$0xff]   ;;  %v527_v25 = vrot.slane %v473_v57, %v3850_v8  ;;  %v3674_v10 = vld [vmem:[%s5030_s1 + $0x50] sm:$0xff]  }
  0xc6   : > { %3475 = vmatpush3.bf16.msra.mxu1 %v3671_v49  ;;  %v443_v27 = vcombine.high %v442_v51, %v5035_v6  ;;  %v4136_v42 = vpack.i.b16 %v442_v51, %v3966_v15  ;;  %v455_v1 = vshrl.u32 %v442_v51, 16  ;;  %3464 = vmatprep.subr.bf16.mxu0 %v5039_v40  ;;  %v519_v51 = vrot.slane %v512_v44, %v3850_v8  ;;  %v3675_v15 = vld [vmem:[%s5030_s1 + $0x70] sm:$0xff]  }
  0xc7   : > { %5066 = vst [vmem:[#allocation12_spill] sm:$0xff] %v4141_v19  ;;  %v4145_v33 = vpack.i.b16 %v450_v60, %v3984_v22  ;;  %3476 = vmatprep.subr.bf16.mxu1 %v5039_v40  ;;  %v799_v37 = vrot.slane %v4110_v35, 7  ;;  %v4154_v49 = vrot.slane %v802_v11, 6  ;;  %v4156_v56 = vrot.slane %v805_v12, 7  ;;  %3470 = vmatprep.mubr.msk.bf16.mxu0 %vm3770_vm0, %v5039_v40 }
  0xc8   : > { %v4158_v20 = vshll.u32 %v1882_v58, 16  ;;  %3482 = vmatprep.mubr.msk.bf16.mxu1 %vm3770_vm0, %v5039_v40  ;;  %v4171_v44 = vrot.slane %v816_v46, 6  ;;  %v1890_v35 = vor.u32 %v1889_v47, %v1886_v14  ;;  %v1321_v11 = vrot.slane %v4136_v42, %v3850_v8 }
  0xc9   : > { %v529_v12 = vcombine.high %v519_v51, %v527_v25  ;;  %v795_v61 = vrot.slane %v794_v59, 2  ;;  %v4175_v2 = vrot.slane %v819_v48, 7  ;;  %v4179_v7 = vpack.i.b16 %v455_v1, %v454_v43  ;;  %3465 = vmatpush3.bf16.msra.mxu0 %v3672_v32  ;;  %v3694_v43 = vld [vmem:[%s5030_s1 + $0x100] sm:$0xff]  }
  0xca   : > { %v461_v9 = vshrl.u32 %v443_v27, 16  ;;  %v4187_v47 = vpack.i.b16 %v443_v27, %v3999_v29  ;;  %3477 = vmatpush3.bf16.msra.mxu1 %v3673_v18  ;;  %3466 = vmatprep.subr.bf16.mxu0 %v5039_v40  ;;  %v5071_v48 = vcombine.high %v4059_v16, %v4059_v16  ;;  %v5072_v58 = vcombine.low %v4040_v3, %v3986_v23 }
  0xcb   : > { %v2309_v59 = vrot.slane %v4145_v33, %v3850_v8  ;;  %3478 = vmatprep.subr.bf16.mxu1 %v5039_v40  ;;  %v4217_v1 = vrot.slane %v1890_v35, 2  ;;  %v1348_v16 = vshrl.u32 %v1321_v11, 16  ;;  %v1351_v32 = vshll.u32 %v1321_v11, 16 }
  0xcc   : > { %v4203_v46 = vshll.u32 %v5071_v48, 16  ;;  %v4209_v60 = vrot.slane %v5072_v58, %v3850_v8  ;;  %v528_v18 = vcombine.low %v519_v51, %v527_v25  ;;  %v5074_v22 = vshrl.u32 %v3999_v29, 16  ;;  %v3676_v58 = vld [vmem:[%s5030_s1 + $0x58] sm:$0xff]  }
  0xcd   : > { %v1322_v3 = vcombine.high %v1321_v11, %v1321_v11  ;;  %v4225_v48 = vrot.slane %v4179_v7, %v3850_v8  ;;  %3467 = vmatpush3.bf16.msra.mxu0 %v3674_v10  ;;  %v4232_v35 = vsel %vm4196_vm8, %v795_v61, %v799_v37  ;;  %v4238_v29 = vrot.slane %v4187_v47, %v3850_v8  ;;  %v3677_v51 = vld [vmem:[%s5030_s1 + $0x78] sm:$0xff]  }
  0xce   : > { %5073 = vst [vmem:[#allocation13_spill] sm:$0xff] %v4209_v60  ;;  %v4221_v23 = vpack.i.b16 %v461_v9, %v5074_v22  ;;  %3479 = vmatpush3.bf16.msra.mxu1 %v3675_v15  ;;  %3468 = vmatprep.subr.bf16.mxu0 %v5039_v40  ;;  %v808_v11 = vor.u32 %v4156_v56, %v4154_v49  ;;  %v813_v37 = vrot.slane %v4203_v46, 7  ;;  %v2312_v22 = vshrl.u32 %v2309_v59, 16 }
  0xcf   : > { %v2310_v10 = vcombine.high %v2309_v59, %v2309_v59  ;;  %3480 = vmatprep.subr.bf16.mxu1 %v5039_v40  ;;  %v1350_v15 = vrot.slane %v1348_v16, 6  ;;  %v1353_v55 = vrot.slane %v1351_v32, 7  ;;  %v2315_v25 = vshll.u32 %v2309_v59, 16 }
  0xd0   : > { %v2121_v9 = vcombine.low %v4221_v23, %v4145_v33  ;;  %v536_v27 = vrot.slane %v528_v18, %v3939_v52  ;;  %v4255_v49 = vrot.slane %v4221_v23, %v3850_v8  ;;  %v4257_v56 = vshll.u32 %v1322_v3, 16 }
  0xd1   : > { %v1362_v46 = vshrl.u32 %v4225_v48, 16  ;;  %v544_v61 = vrot.slane %v529_v12, %v3939_v52  ;;  %3469 = vmatpush3.bf16.msra.mxu0 %v3676_v58  ;;  %v1365_v16 = vshll.u32 %v4225_v48, 16  ;;  %v2314_v18 = vrot.slane %v2312_v22, 6 }
  0xd2   : > { %v537_v59 = vcombine.high %v536_v27, %v5035_v6  ;;  %v4266_v32 = vpack.i.b16 %v536_v27, %v3972_v17  ;;  %3481 = vmatpush3.bf16.msra.mxu1 %v3677_v51  ;;  %3486 = vmatprep.subr.bf16.mxu0 %v5039_v40  ;;  %v2317_v3 = vrot.slane %v2315_v25, 7  ;;  %v549_v14 = vshrl.u32 %v536_v27, 16 }
  0xd3   : > { %v4270_v57 = vpack.i.b16 %v544_v61, %v3992_v26  ;;  %3498 = vmatprep.subr.bf16.mxu1 %v5039_v40  ;;  %v1354_v12 = vor.u32 %v1353_v55, %v1350_v15  ;;  %v1376_v58 = vshrl.u32 %v4238_v29, 16  ;;  %v1379_v33 = vshll.u32 %v4238_v29, 16 }
  0xd4   : > { %v4276_v6 = vpack.i.b16 %v537_v59, %v4004_v36  ;;  %v4279_v52 = vrot.slane %v1362_v46, 6  ;;  %v4281_v22 = vshll.u32 %v2310_v10, 16  ;;  %v555_v27 = vshrl.u32 %v537_v59, 16 }
  0xd5   : > { %v4283_v25 = vrot.slane %v1365_v16, 7  ;;  %v4287_v26 = vrot.slane %v4266_v32, %v3850_v8  ;;  %v809_v55 = vrot.slane %v808_v11, 2  ;;  %v822_v61 = vor.u32 %v4175_v2, %v4171_v44 }
  0xd6   : > { %5075 = vst [vmem:[#allocation14_spill] sm:$0xff] %v4281_v22  ;;  %v2318_v40 = vor.u32 %v2317_v3, %v2314_v18  ;;  %v5077_v51 = vshrl.u32 %v3972_v17, 16  ;;  %v4298_v10 = vrot.slane %v4276_v6, %v3850_v8  ;;  %v4300_v16 = vrot.slane %v1354_v12, 2 }
  0xd7   : > { %5076 = vst [vmem:[#allocation15_spill] sm:$0xff] %v4287_v26  ;;  %v4302_v59 = vrot.slane %v1376_v58, 6  ;;  %v4304_v4 = vrot.slane %v1379_v33, 7  ;;  %v4308_v44 = vrot.slane %v2121_v9, %v3850_v8  ;;  %v5079_v17 = vshrl.u32 %v4004_v36, 16 }
  0xd8   : > { %v4294_v46 = vpack.i.b16 %v549_v14, %v5077_v51  ;;  %v2427_v18 = vrot.slane %v4270_v57, %v3850_v8  ;;  %v1532_v3 = vshrl.u32 %v4287_v26, 16  ;;  %v1535_v12 = vshll.u32 %v4287_v26, 16 }
  0xd9   : > { %5078 = vst [vmem:[#allocation16_spill] sm:$0xff] %v4308_v44  ;;  %v4313_v14 = vpack.i.b16 %v555_v27, %v5079_v17  ;;  %v4321_v33 = vsel %vm4196_vm8, %v809_v55, %v813_v37  ;;  %v823_v58 = vrot.slane %v822_v61, 2  ;;  %v4323_v9 = vrot.slane %v2318_v40, 2 }
  0xda   : > { %v4327_v51 = vrot.slane %v4294_v46, %v3850_v8  ;;  %v1560_v36 = vshrl.u32 %v4298_v10, 16  ;;  %v5081_v27 = vcombine.high %v4063_v24, %v4063_v24  ;;  %v2430_v24 = vshrl.u32 %v2427_v18, 16 }
  0xdb   : > { %5080 = vst [vmem:[#allocation17_spill] sm:$0xff] %v4323_v9  ;;  %v2217_v55 = vcombine.low %v4313_v14, %v4270_v57  ;;  %v4345_v11 = vrot.slane %v4313_v14, %v3850_v8  ;;  %v4347_v15 = vrot.slane %v1532_v3, 6  ;;  %v4349_v2 = vrot.slane %v1535_v12, 7 }
  0xdc   : > { %v825_v17 = vshll.u32 %v5081_v27, 16  ;;  %v2433_v27 = vshll.u32 %v2427_v18, 16  ;;  %v5082_v37 = vshrl.u32 %v4091_v50, 16  ;;  %v5083_v40 = vshll.u32 %v4091_v50, 16 }
  0xdd   : > { %v1546_v57 = vshrl.u32 %v4327_v51, 16  ;;  %v1549_v61 = vshll.u32 %v4327_v51, 16  ;;  %v4357_v30 = vrot.slane %v1560_v36, 6  ;;  %v5084_v31 = vcombine.high %v4091_v50, %v4091_v50 }
  0xde   : > { %v832_v21 = vrot.slane %v5082_v37, 6  ;;  %v835_v45 = vrot.slane %v5083_v40, 7  ;;  %v1563_v3 = vshll.u32 %v4298_v10, 16  ;;  %v2428_v12 = vcombine.high %v2427_v18, %v2427_v18 }
  0xdf   : > { %v839_v44 = vshll.u32 %v5084_v31, 16  ;;  %v827_v26 = vrot.slane %v825_v17, 7  ;;  %v2432_v22 = vrot.slane %v2430_v24, 6  ;;  %v2435_v37 = vrot.slane %v2433_v27, 7 }
  0xe0   : > { %v836_v9 = vor.u32 %v835_v45, %v832_v21  ;;  %v970_v40 = vcombine.high %v4044_v5, %v4044_v5  ;;  %v992_v60 = vor.u32 %v4074_v28, %v4072_v34  ;;  %v5085_v13 = vcombine.high %v4020_v53, %v4020_v53 }
  0xe1   : > { %v841_v36 = vrot.slane %v839_v44, 7  ;;  %v1006_v31 = vor.u32 %v4082_v41, %v4080_v39  ;;  %v4374_v21 = vsel %vm4196_vm8, %v823_v58, %v827_v26  ;;  %v852_v45 = vcombine.low %v4232_v35, %v4321_v33 }
  0xe2   : > { %v837_v19 = vrot.slane %v836_v9, 2  ;;  %v995_v50 = vshll.u32 %v5085_v13, 16  ;;  %v993_v18 = vrot.slane %v992_v60, 2  ;;  %v5086_v17 = vshrl.u32 %v4044_v5, 16 }
  0xe3   : > { %v5087_v13 = vcombine.high %v4024_v54, %v4024_v54  ;;  %v5088_v41 = vshll.u32 %v4044_v5, 16  ;;  %v1538_v44 = vor.u32 %v4349_v2, %v4347_v15  ;;  %v4391_v35 = vrot.slane %v1546_v57, 6 }
  0xe4   : > { %v1016_v34 = vrot.slane %v5086_v17, 6  ;;  %v4382_v28 = vsel %vm4196_vm8, %v837_v19, %v841_v36  ;;  %v997_v53 = vrot.slane %v995_v50, 7  ;;  %v1023_v58 = vshll.u32 %v970_v40, 16 }
  0xe5   : > { %v1009_v39 = vshll.u32 %v5087_v13, 16  ;;  %v1019_v26 = vrot.slane %v5088_v41, 7  ;;  %v853_v60 = vcombine.low %v4374_v21, %v4382_v28  ;;  %v1574_v19 = vshrl.u32 %v4345_v11, 16 }
  0xe6   : > { %v4398_v9 = vsel %vm4196_vm8, %v993_v18, %v997_v53  ;;  %v1007_v54 = vrot.slane %v1006_v31, 2  ;;  %v2436_v27 = vor.u32 %v2435_v37, %v2432_v22  ;;  %v4400_v5 = vshll.u32 %v2428_v12, 16  ;;  %v3678_v31 = vld [vmem:[%s5030_s1 + $0x80] sm:$0xff]  }
  0xe7   : > { %v1020_v24 = vor.u32 %v1019_v26, %v1016_v34  ;;  %v860_v36 = vrot.slane %v852_v45, %v3850_v8  ;;  %v867_v57 = vrot.slane %v853_v60, %v3850_v8  ;;  %v5089_v50 = vrot.slane %v4038_v0, 7  ;;  %v3680_v26 = vld [vmem:[%s5030_s1 + $0x88] sm:$0xff]  }
  0xe8   : > { %v1011_v17 = vrot.slane %v1009_v39, 7  ;;  %v1025_v41 = vrot.slane %v1023_v58, 7  ;;  %v1551_v22 = vrot.slane %v1549_v61, 7  ;;  %v1577_v12 = vshll.u32 %v4345_v11, 16 }
  0xe9   : > { %v984_v40 = vsel %vm4196_vm8, %v4078_v38, %v5089_v50  ;;  %v1021_v13 = vrot.slane %v1020_v24, 2  ;;  %v868_v37 = vcombine.low %v860_v36, %v867_v57  ;;  %v1565_v18 = vrot.slane %v1563_v3, 7 }
  0xea   : > { %v1036_v45 = vcombine.low %v984_v40, %v4398_v9  ;;  %v4416_v0 = vsel %vm4196_vm8, %v1007_v54, %v1011_v17  ;;  %v1346_v34 = vcombine.high %v4255_v49, %v4255_v49  ;;  %v4425_v53 = vrot.slane %v2217_v55, %v3850_v8 }
  0xeb   : > { %v4420_v38 = vsel %vm4196_vm8, %v1021_v13, %v1025_v41  ;;  %v4427_v61 = vrot.slane %v2436_v27, 2  ;;  %v2441_v39 = vrot.slane %v4400_v5, 7  ;;  %3471 = vmatmul.mubr.msk.bf16.vlgmr.msra.gmra.mrb[4].mxu0 %vm618_vm1, %v868_v37  ;;  %v5090_v60 = vmov 0.0  }
  0xec   : > { %v1037_v3 = vcombine.low %v4416_v0, %v4420_v38  ;;  %3487 = vmatpush3.bf16.msra.mxu0 %v3678_v31  ;;  %3494 = vmatprep.mubr.msk.bf16.mxu0 %vm3770_vm0, %v5090_v60  ;;  %v1133_v55 = vcombine.low %v4187_v47, %v4221_v23  ;;  %v1368_v58 = vor.u32 %v4283_v25, %v4279_v52  ;;  %v5091_v54 = vshrl.u32 %v4255_v49, 16 }
  0xed   : > { %v5092_v27 = vshll.u32 %v4255_v49, 16  ;;  %v1044_v57 = vrot.slane %v1036_v45, %v3850_v8  ;;  %3488 = vmatprep.subr.bf16.mxu0 %v5090_v60  ;;  %v5093_v40 = vcombine.low %v4136_v42, %v4179_v7  ;;  %v5094_v52 = vcombine.high %v4225_v48, %v4225_v48  ;;  %v3679_v49 = vld [vmem:[%s5030_s1 + $0xa0] sm:$0xff]  }
  0xee   : > { %v1392_v24 = vrot.slane %v5091_v54, 6  ;;  %v1051_v50 = vrot.slane %v1037_v3, %v3850_v8  ;;  %v1382_v17 = vor.u32 %v4304_v4, %v4302_v59  ;;  %v5095_v13 = vcombine.high %v4238_v29, %v4238_v29  ;;  %v3682_v4 = vld [vmem:[%s5030_s1 + $0x90] sm:$0xff]  }
  0xef   : > { %v1395_v36 = vrot.slane %v5092_v27, 7  ;;  %v4453_v23 = vrot.slane %v5093_v40, %v3850_v8  ;;  %v1371_v25 = vshll.u32 %v5094_v52, 16  ;;  %v1399_v37 = vshll.u32 %v1346_v34, 16 }
  0xf0   : > { %v1385_v41 = vshll.u32 %v5095_v13, 16  ;;  %v1052_v42 = vcombine.low %v1044_v57, %v1051_v50  ;;  %v1229_v45 = vcombine.low %v4276_v6, %v4313_v14  ;;  %v1530_v48 = vcombine.high %v4345_v11, %v4345_v11  ;;  %3489 = vmatpush3.bf16.msra.mxu0 %v3680_v26 }
  0xf1   : > { %v1396_v31 = vor.u32 %v1395_v36, %v1392_v24  ;;  %v1552_v3 = vor.u32 %v1551_v22, %v4391_v35  ;;  %v4475_v59 = vrot.slane %v1133_v55, %v3850_v8  ;;  %v1369_v29 = vrot.slane %v1368_v58, 2  ;;  %3490 = vmatprep.subr.bf16.mxu0 %v5090_v60  ;;  %v3681_v55 = vld [vmem:[%s5030_s1 + $0xa8] sm:$0xff]  }
  0xf2   : > { %v5096_v34 = vcombine.high %v4327_v51, %v4327_v51  ;;  %v1566_v14 = vor.u32 %v1565_v18, %v4357_v30  ;;  %3483 = vmatmul.mubr.msk.bf16.vlgmr.msra.gmra.mrb[4].mxu1 %vm618_vm1, %v1052_v42  ;;  %v1373_v11 = vrot.slane %v1371_v25, 7  ;;  %v5097_v35 = vcombine.high %v4298_v10, %v4298_v10  ;;  %v5101_v42 = vld [vmem:[#allocation11_spill] sm:$0xff] }
  0xf3   : > { %v1576_v26 = vrot.slane %v1574_v19, 6  ;;  %v1579_v24 = vrot.slane %v1577_v12, 7  ;;  %3499 = vmatpush3.bf16.msra.mxu1 %v3679_v49  ;;  %3506 = vmatprep.mubr.msk.bf16.mxu1 %vm3770_vm0, %v5090_v60  ;;  %v1383_v30 = vrot.slane %v1382_v17, 2  ;;  %v1387_v51 = vrot.slane %v1385_v41, 7  ;;  %v3684_v19 = vld [vmem:[%s5030_s1 + $0x98] sm:$0xff]  }
  0xf4   : > { %v1555_v54 = vshll.u32 %v5096_v34, 16  ;;  %v1569_v22 = vshll.u32 %v5097_v35, 16  ;;  %v1397_v18 = vrot.slane %v1396_v31, 2  ;;  %v1401_v58 = vrot.slane %v1399_v37, 7  ;;  %3500 = vmatprep.subr.bf16.mxu1 %v5090_v60  ;;  %3491 = vmatpush3.bf16.msra.mxu0 %v3682_v4  ;;  %v3685_v35 = vld [vmem:[%s5030_s1 + $0xb8] sm:$0xff]  }
  0xf5   : > { %v1553_v27 = vrot.slane %v1552_v3, 2  ;;  %v1580_v10 = vor.u32 %v1579_v24, %v1576_v26  ;;  %v1583_v57 = vshll.u32 %v1530_v48, 16  ;;  %v1567_v12 = vrot.slane %v1566_v14, 2  ;;  %3492 = vmatprep.subr.bf16.mxu0 %v5090_v60  ;;  %v5103_v48 = vld [vmem:[#allocation12_spill] sm:$0xff] }
  0xf6   : > { %v1557_v36 = vrot.slane %v1555_v54, 7  ;;  %v1571_v50 = vrot.slane %v1569_v22, 7  ;;  %v1692_v40 = vcombine.low %v4034_v62, %v4036_v63  ;;  %v5098_v52 = vrot.slane %v4158_v20, 7  ;;  %v3683_v20 = vld [vmem:[%s5030_s1 + $0xb0] sm:$0xff]  }
  0xf7   : > { %v1148_v49 = vcombine.low %v4453_v23, %v4475_v59  ;;  %v5099_v17 = vcombine.low %v4266_v32, %v4294_v46  ;;  %v4512_v41 = vrot.slane %v1229_v45, %v3850_v8  ;;  %v5100_v62 = vrot.slane %v4257_v56, 7  ;;  %3501 = vmatpush3.bf16.msra.mxu1 %v3681_v55  ;;  %v5104_v59 = vld [vmem:[#allocation13_spill] sm:$0xff]  ;;  %v5105_v55 = vld [vmem:[#allocation14_spill] sm:$0xff] }
  0xf8   : > { %v1896_v25 = vsel %vm4196_vm8, %v4217_v1, %v5098_v52  ;;  %v1581_v1 = vrot.slane %v1580_v10, 2  ;;  %v1585_v23 = vrot.slane %v1583_v57, 7  ;;  %v4525_v32 = vrot.slane %v1692_v40, %v3850_v8  ;;  %3502 = vmatprep.subr.bf16.mxu1 %v5090_v60  ;;  %3493 = vmatpush3.bf16.msra.mxu0 %v3684_v19  ;;  %v5110_v40 = vld [vmem:[#allocation16_spill] sm:$0xff] }
  0xf9   : > { %v4509_v13 = vrot.slane %v5099_v17, %v3850_v8  ;;  %v4519_v63 = vsel %vm4196_vm8, %v4300_v16, %v5100_v62  ;;  %v1906_v31 = vcombine.low %v4321_v33, %v4374_v21  ;;  %v4532_v56 = vsel %vm4196_vm8, %v1369_v29, %v1373_v11  ;;  %v3686_v33 = vld [vmem:[%s5030_s1 + $0xc0] sm:$0xff]   ;;  %3510 = vmatprep.subr.bf16.mxu0 %v5090_v60 }
  0xfa   : > { %v4536_v16 = vsel %vm4196_vm8, %v1383_v30, %v1387_v51  ;;  %v1907_v37 = vcombine.low %v4382_v28, %v1896_v25  ;;  %v5102_v45 = vrot.slane %v5101_v42, 7  ;;  %v4549_v21 = vsel %vm4196_vm8, %v1397_v18, %v1401_v58  ;;  %v3688_v58 = vld [vmem:[%s5030_s1 + $0xc8] sm:$0xff]  }
  0xfb   : > { %v4553_v4 = vsel %vm4196_vm8, %v1553_v27, %v1557_v36  ;;  %v4557_v28 = vsel %vm4196_vm8, %v1567_v12, %v1571_v50  ;;  %v1708_v29 = vcombine.low %v4525_v32, %v5104_v59  ;;  %v4563_v34 = vrot.slane %v1906_v31, %v3850_v8  ;;  %3503 = vmatpush3.bf16.msra.mxu1 %v3683_v20  ;;  %v3687_v50 = vld [vmem:[%s5030_s1 + $0xe0] sm:$0xff]   ;;  %v3706_v59 = vld [vmem:[%s5030_s1 + $0x150] sm:$0xff]  }
  0xfc   : > { %v2014_v3 = vsel %vm4196_vm8, %v5103_v48, %v5102_v45  ;;  %v4566_v54 = vrot.slane %v1907_v37, %v3850_v8  ;;  %v2024_v14 = vcombine.low %v4398_v9, %v4416_v0  ;;  %v4576_v22 = vsel %vm4196_vm8, %v1581_v1, %v1585_v23  ;;  %v5107_v9 = vld [vmem:[#allocation17_spill] sm:$0xff]  ;;  %3504 = vmatprep.subr.bf16.mxu1 %v5090_v60  ;;  %v3691_v37 = vld [vmem:[%s5030_s1 + $0xf0] sm:$0xff]  }
  0xfd   : > { %v2025_v11 = vcombine.low %v4420_v38, %v2014_v3  ;;  %v2120_v26 = vcombine.low %v4179_v7, %v4187_v47  ;;  %v2216_v24 = vcombine.low %v4294_v46, %v4276_v6  ;;  %v5106_v30 = vrot.slane %v5105_v55, 7  ;;  %3495 = vmatmul.mubr.msk.bf16.vlgmr.msra.gmra.mrb[8].mxu0 %vm618_vm1, %v1148_v49  ;;  %v5108_v6 = vld [vmem:[#allocation15_spill] sm:$0xff]  ;;  %v3689_v1 = vld [vmem:[%s5030_s1 + $0xe8] sm:$0xff]  }
  0xfe   : > { %v1922_v38 = vcombine.low %v4563_v34, %v4566_v54  ;;  %v4592_v51 = vrot.slane %v2024_v14, %v3850_v8  ;;  %v5109_v47 = vcombine.high %v5108_v6, %v5108_v6  ;;  %v1244_v18 = vcombine.low %v4509_v13, %v4512_v41  ;;  %3511 = vmatpush3.bf16.msra.mxu0 %v3686_v33  ;;  %v3690_v41 = vld [vmem:[%s5030_s1 + $0xd0] sm:$0xff]   ;;  %v3693_v3 = vld [vmem:[%s5030_s1 + $0xf8] sm:$0xff]   ;;  %v5111_v55 = vld [vmem:[#allocation9_spill] sm:$0xff] }
  0xff   : > { %v2324_v0 = vsel %vm4196_vm8, %v5107_v9, %v5106_v30  ;;  %v4595_v7 = vrot.slane %v2025_v11, %v3850_v8  ;;  %3518 = vmatprep.mubr.msk.bf16.mxu0 %vm3770_vm0, %v5090_v60  ;;  %v4608_v27 = vrot.slane %v2120_v26, %v3850_v8  ;;  %v4611_v36 = vrot.slane %v2216_v24, %v3850_v8  ;;  %v3698_v11 = vld [vmem:[%s5030_s1 + $0x110] sm:$0xff]   ;;  %v3702_v24 = vld [vmem:[%s5030_s1 + $0x140] sm:$0xff]   ;;  %v3713_v54 = vld [vmem:[%s5030_s1 + $0x1a8] sm:$0xff]  }
 0x100   : > { %v1541_v46 = vshll.u32 %v5109_v47, 16  ;;  %3512 = vmatprep.subr.bf16.mxu0 %v5090_v60  ;;  %v2334_v57 = vcombine.low %v4532_v56, %v4536_v16  ;;  %v2335_v19 = vcombine.low %v4549_v21, %v2324_v0  ;;  %v2442_v12 = vsel %vm4196_vm8, %v4427_v61, %v2441_v39  ;;  %3505 = vmatpush3.bf16.msra.mxu1 %v3685_v35  ;;  %v3697_v35 = vld [vmem:[%s5030_s1 + $0x128] sm:$0xff]   ;;  %v3699_v26 = vld [vmem:[%s5030_s1 + $0x130] sm:$0xff]   ;;  %v5112_v30 = vld [vmem:[#allocation8_spill] sm:$0xff] }
 0x101   : > { %v2040_v10 = vcombine.low %v4592_v51, %v4595_v7  ;;  %v2136_v52 = vcombine.low %v4608_v27, %v5110_v40  ;;  %v2232_v25 = vcombine.low %v4611_v36, %v4425_v53  ;;  %v2452_v49 = vcombine.low %v4553_v4, %v4557_v28  ;;  %3522 = vmatprep.subr.bf16.mxu1 %v5090_v60  ;;  %v3701_v0 = vld [vmem:[%s5030_s1 + $0x138] sm:$0xff]   ;;  %v5113_v6 = vld [vmem:[#allocation10_spill] sm:$0xff]  ;;  %v3718_v7 = vld [vmem:[%s5030_s1 + $0x1c0] sm:$0xff]  }
 0x102   : > { %v2453_v5 = vcombine.low %v4576_v22, %v2442_v12  ;;  %v4636_v61 = vrot.slane %v2334_v57, %v3850_v8  ;;  %v4639_v39 = vrot.slane %v2335_v19, %v3850_v8  ;;  %v1539_v17 = vrot.slane %v1538_v44, 2  ;;  %3513 = vmatpush3.bf16.msra.mxu0 %v3688_v58  ;;  %v5114_v47 = vld [vmem:[#allocation7_spill] sm:$0xff]  ;;  %v3704_v58 = vld [vmem:[%s5030_s1 + $0x148] sm:$0xff]   ;;  %v3703_v19 = vld [vmem:[%s5030_s1 + $0x160] sm:$0xff]  }
 0x103   : > { %v1543_v13 = vrot.slane %v1541_v46, 7  ;;  %v4648_v62 = vrot.slane %v2452_v49, %v3850_v8  ;;  %3507 = vmatmul.mubr.msk.bf16.vlgmr.msra.gmra.mrb[8].mxu1 %vm618_vm1, %v1244_v18  ;;  %3514 = vmatprep.subr.bf16.mxu0 %v5090_v60  ;;  %v1412_v15 = vcombine.low %v4519_v63, %v4532_v56  ;;  %v1413_v2 = vcombine.low %v4536_v16, %v4549_v21  ;;  %v3692_v63 = vld [vmem:[%s5030_s1 + $0xd8] sm:$0xff]   ;;  %v3710_v49 = vld [vmem:[%s5030_s1 + $0x180] sm:$0xff]   ;;  %v3714_v34 = vld [vmem:[%s5030_s1 + $0x190] sm:$0xff]  }
 0x104   : > { %v4651_v20 = vrot.slane %v2453_v5, %v3850_v8  ;;  %v2350_v44 = vcombine.low %v4636_v61, %v4639_v39  ;;  %3523 = vmatpush3.bf16.msra.mxu1 %v3687_v50  ;;  %3530 = vmatprep.mubr.msk.bf16.mxu1 %vm3770_vm0, %v5090_v60  ;;  %v1597_v45 = vcombine.low %v4557_v28, %v4576_v22  ;;  %v3695_v28 = vld [vmem:[%s5030_s1 + $0x120] sm:$0xff]   ;;  %v3700_v22 = vld [vmem:[%s5030_s1 + $0x118] sm:$0xff]   ;;  %v3707_v50 = vld [vmem:[%s5030_s1 + $0x170] sm:$0xff]  }
 0x105   : > { %3524 = vmatprep.subr.bf16.mxu1 %v5090_v60  ;;  %v1544_v31 = vsel %vm4196_vm8, %v1539_v17, %v1543_v13  ;;  %v1420_v56 = vrot.slane %v1412_v15, %v3850_v8  ;;  %v1427_v16 = vrot.slane %v1413_v2, %v3850_v8  ;;  %v1788_v9 = vcombine.low %v5112_v30, %v5111_v55  ;;  %v3708_v12 = vld [vmem:[%s5030_s1 + $0x158] sm:$0xff]   ;;  %v3712_v17 = vld [vmem:[%s5030_s1 + $0x188] sm:$0xff]   ;;  %v3711_v13 = vld [vmem:[%s5030_s1 + $0x1a0] sm:$0xff]  }
 0x106   : > { %v2468_v23 = vcombine.low %v4648_v62, %v4651_v20  ;;  %3515 = vmatpush3.bf16.msra.mxu0 %v3690_v41  ;;  %v1596_v42 = vcombine.low %v1544_v31, %v4553_v4  ;;  %v1611_v21 = vrot.slane %v1597_v45, %v3850_v8  ;;  %v3696_v4 = vld [vmem:[%s5030_s1 + $0x108] sm:$0xff]   ;;  %v5115_v46 = vcombine.low %v5113_v6, %v5114_v47  ;;  %v3709_v5 = vld [vmem:[%s5030_s1 + $0x178] sm:$0xff]   ;;  %v3715_v51 = vld [vmem:[%s5030_s1 + $0x1b0] sm:$0xff]  }
 0x107   : > { %3516 = vmatprep.subr.bf16.mxu0 %v5090_v60  ;;  %v1428_v48 = vcombine.low %v1420_v56, %v1427_v16  ;;  %v1796_v57 = vrot.slane %v1788_v9, %v3850_v8  ;;  %v3720_v41 = vld [vmem:[%s5030_s1 + $0x1c8] sm:$0xff]   ;;  %v3719_v15 = vld [vmem:[%s5030_s1 + $0x1e0] sm:$0xff]   ;;  %v3722_v27 = vld [vmem:[%s5030_s1 + $0x1d0] sm:$0xff]  }
 0x108   : > { %3525 = vmatpush3.bf16.msra.mxu1 %v3689_v1  ;;  %v1604_v33 = vrot.slane %v1596_v42, %v3850_v8  ;;  %v1803_v18 = vrot.slane %v5115_v46, %v3850_v8  ;;  %v3721_v40 = vld [vmem:[%s5030_s1 + $0x1e8] sm:$0xff]   ;;  %v3723_v53 = vld [vmem:[%s5030_s1 + $0x1f0] sm:$0xff]   ;;  %v3725_v36 = vld [vmem:[%s5030_s1 + $0x1f8] sm:$0xff]  }
 0x109   : > { %3526 = vmatprep.subr.bf16.mxu1 %v5090_v60 }
 0x10a   : > { %3517 = vmatpush3.bf16.msra.mxu0 %v3692_v63  ;;  %v1612_v14 = vcombine.low %v1604_v33, %v1611_v21  ;;  %v1804_v32 = vcombine.low %v1796_v57, %v1803_v18 }
 0x10b   : > { %3534 = vmatprep.subr.bf16.mxu0 %v5090_v60 }
 0x10c   : > { %3527 = vmatpush3.bf16.msra.mxu1 %v3691_v37 }
 0x10d   : > { %3528 = vmatprep.subr.bf16.mxu1 %v5090_v60  ;;  %3519 = vmatmul.mubr.msk.bf16.vlgmr.msra.gmra.mrb[12].mxu0 %vm618_vm1, %v1428_v48 }
 0x10e   : > { %3535 = vmatpush3.bf16.msra.mxu0 %v3694_v43  ;;  %3542 = vmatprep.mubr.msk.bf16.mxu0 %vm3770_vm0, %v5090_v60 }
 0x10f   : > { %3536 = vmatprep.subr.bf16.mxu0 %v5090_v60 }
 0x110   : > { %3529 = vmatpush3.bf16.msra.mxu1 %v3693_v3 }
 0x111   : > { %3546 = vmatprep.subr.bf16.mxu1 %v5090_v60 }
 0x112   : > { %3537 = vmatpush3.bf16.msra.mxu0 %v3696_v4 }
 0x113   : > { %3531 = vmatmul.mubr.msk.bf16.vlgmr.msra.gmra.mrb[12].mxu1 %vm618_vm1, %v1612_v14  ;;  %3538 = vmatprep.subr.bf16.mxu0 %v5090_v60 }
 0x114   : > { %3547 = vmatpush3.bf16.msra.mxu1 %v3695_v28  ;;  %3554 = vmatprep.mubr.msk.bf16.mxu1 %vm3770_vm0, %v5090_v60 }
 0x115   : > { %3548 = vmatprep.subr.bf16.mxu1 %v5090_v60 }
 0x116   : > { %3539 = vmatpush3.bf16.msra.mxu0 %v3698_v11 }
 0x117   : > { %3540 = vmatprep.subr.bf16.mxu0 %v5090_v60 }
 0x118   : > { %3549 = vmatpush3.bf16.msra.mxu1 %v3697_v35 }
 0x119   : > { %3550 = vmatprep.subr.bf16.mxu1 %v5090_v60 }
 0x11a   : > { %3541 = vmatpush3.bf16.msra.mxu0 %v3700_v22 }
 0x11b   : > { %3558 = vmatprep.subr.bf16.mxu0 %v5090_v60 }
 0x11c   : > { %3551 = vmatpush3.bf16.msra.mxu1 %v3699_v26 }
 0x11d   : > { %3552 = vmatprep.subr.bf16.mxu1 %v5090_v60  ;;  %3543 = vmatmul.mubr.msk.bf16.vlgmr.msra.gmra.mrb[16].mxu0 %vm618_vm1, %v1708_v29  ;;  %v3705_v29 = vld [vmem:[%s5030_s1 + $0x168] sm:$0xff]  }
 0x11e   : > { %3559 = vmatpush3.bf16.msra.mxu0 %v3702_v24  ;;  %3566 = vmatprep.mubr.msk.bf16.mxu0 %vm3770_vm0, %v5090_v60 }
 0x11f   : > { %3560 = vmatprep.subr.bf16.mxu0 %v5090_v60 }
 0x120   : > { %3553 = vmatpush3.bf16.msra.mxu1 %v3701_v0 }
 0x121   : > { %3570 = vmatprep.subr.bf16.mxu1 %v5090_v60 }
 0x122   : > { %3561 = vmatpush3.bf16.msra.mxu0 %v3704_v58 }
 0x123   : > { %3555 = vmatmul.mubr.msk.bf16.vlgmr.msra.gmra.mrb[16].mxu1 %vm618_vm1, %v1804_v32  ;;  %3562 = vmatprep.subr.bf16.mxu0 %v5090_v60 }
 0x124   : > { %3571 = vmatpush3.bf16.msra.mxu1 %v3703_v19  ;;  %3578 = vmatprep.mubr.msk.bf16.mxu1 %vm3770_vm0, %v5090_v60 }
 0x125   : > { %3572 = vmatprep.subr.bf16.mxu1 %v5090_v60 }
 0x126   : > { %3563 = vmatpush3.bf16.msra.mxu0 %v3706_v59 }
 0x127   : > { %3564 = vmatprep.subr.bf16.mxu0 %v5090_v60 }
 0x128   : > { %3573 = vmatpush3.bf16.msra.mxu1 %v3705_v29 }
 0x129   : > { %3574 = vmatprep.subr.bf16.mxu1 %v5090_v60 }
 0x12a   : > { %3565 = vmatpush3.bf16.msra.mxu0 %v3708_v12 }
 0x12b   : > { %3582 = vmatprep.subr.bf16.mxu0 %v5090_v60 }
 0x12c   : > { %3575 = vmatpush3.bf16.msra.mxu1 %v3707_v50 }
 0x12d   : > { %3576 = vmatprep.subr.bf16.mxu1 %v5090_v60  ;;  %3567 = vmatmul.mubr.msk.bf16.vlgmr.msra.gmra.mrb[20].mxu0 %vm618_vm1, %v1922_v38  ;;  %v3716_v38 = vld [vmem:[%s5030_s1 + $0x198] sm:$0xff]  }
 0x12e   : > { %3583 = vmatpush3.bf16.msra.mxu0 %v3710_v49  ;;  %3590 = vmatprep.mubr.msk.bf16.mxu0 %vm3770_vm0, %v5090_v60 }
 0x12f   : > { %3584 = vmatprep.subr.bf16.mxu0 %v5090_v60 }
 0x130   : > { %3577 = vmatpush3.bf16.msra.mxu1 %v3709_v5 }
 0x131   : > { %3594 = vmatprep.subr.bf16.mxu1 %v5090_v60 }
 0x132   : > { %3585 = vmatpush3.bf16.msra.mxu0 %v3712_v17 }
 0x133   : > { %3579 = vmatmul.mubr.msk.bf16.vlgmr.msra.gmra.mrb[20].mxu1 %vm618_vm1, %v2040_v10  ;;  %3586 = vmatprep.subr.bf16.mxu0 %v5090_v60  ;;  %v3717_v10 = vld [vmem:[%s5030_s1 + $0x1b8] sm:$0xff]  }
 0x134   : > { %3595 = vmatpush3.bf16.msra.mxu1 %v3711_v13  ;;  %3602 = vmatprep.mubr.msk.bf16.mxu1 %vm3770_vm0, %v5090_v60 }
 0x135   : > { %3596 = vmatprep.subr.bf16.mxu1 %v5090_v60 }
 0x136   : > { %3587 = vmatpush3.bf16.msra.mxu0 %v3714_v34 }
 0x137   : > { %3588 = vmatprep.subr.bf16.mxu0 %v5090_v60 }
 0x138   : > { %3597 = vmatpush3.bf16.msra.mxu1 %v3713_v54 }
 0x139   : > { %3598 = vmatprep.subr.bf16.mxu1 %v5090_v60 }
 0x13a   : > { %3589 = vmatpush3.bf16.msra.mxu0 %v3716_v38 }
 0x13b   : > { %3606 = vmatprep.subr.bf16.mxu0 %v5090_v60 }
 0x13c   : > { %3599 = vmatpush3.bf16.msra.mxu1 %v3715_v51 }
 0x13d   : > { %3600 = vmatprep.subr.bf16.mxu1 %v5090_v60  ;;  %3591 = vmatmul.mubr.msk.bf16.vlgmr.msra.gmra.mrb[24].mxu0 %vm618_vm1, %v2136_v52  ;;  %v3724_v52 = vld [vmem:[%s5030_s1 + $0x1d8] sm:$0xff]  }
 0x13e   : > { %3607 = vmatpush3.bf16.msra.mxu0 %v3718_v7  ;;  %3614 = vmatprep.mubr.msk.bf16.mxu0 %vm3770_vm0, %v5090_v60 }
 0x13f   : > { %3608 = vmatprep.subr.bf16.mxu0 %v5090_v60 }
 0x140   : > { %3601 = vmatpush3.bf16.msra.mxu1 %v3717_v10 }
 0x141   : > { %3618 = vmatprep.subr.bf16.mxu1 %v5090_v60 }
 0x142   : > { %3609 = vmatpush3.bf16.msra.mxu0 %v3720_v41 }
 0x143   : > { %3603 = vmatmul.mubr.msk.bf16.vlgmr.msra.gmra.mrb[24].mxu1 %vm618_vm1, %v2232_v25  ;;  %3610 = vmatprep.subr.bf16.mxu0 %v5090_v60 }
 0x144   : > { %3619 = vmatpush3.bf16.msra.mxu1 %v3719_v15  ;;  %3626 = vmatprep.mubr.msk.bf16.mxu1 %vm3770_vm0, %v5090_v60  ;;  %vm2749_vm0 = vsmask.f32 3328 }
 0x145   : > { %3620 = vmatprep.subr.bf16.mxu1 %v5090_v60  ;;  %vm4971_vm5 = vmand %vm2748_vm15, %vm2749_vm0 }
 0x146   : > { %3611 = vmatpush3.bf16.msra.mxu0 %v3722_v27  ;;  %vm2751_vm2 = vmor %vm4971_vm5, %vm4963_vm4 }
 0x147   : > { %3612 = vmatprep.subr.bf16.mxu0 %v5090_v60 }
 0x148   : > { %3621 = vmatpush3.bf16.msra.mxu1 %v3721_v40 }
 0x149   : > { %3622 = vmatprep.subr.bf16.mxu1 %v5090_v60 }
 0x14a   : > { %3613 = vmatpush3.bf16.msra.mxu0 %v3724_v52 }
 0x14c   : > { %3623 = vmatpush3.bf16.msra.mxu1 %v3723_v53 }
 0x14d   : > { %3624 = vmatprep.subr.bf16.mxu1 %v5090_v60  ;;  %3615 = vmatmul.mubr.msk.bf16.vlgmr.msra.gmra.mrb[28].mxu0 %vm618_vm1, %v2350_v44 }
 0x150   : > { %3625 = vmatpush3.bf16.msra.mxu1 %v3725_v36 }
 0x153   : > { %3627 = vmatmul.mubr.msk.bf16.vlgmr.msra.gmra.mrb[28].mxu1 %vm618_vm1, %v2468_v23  ;;  %vm2752_vm1 = vcmask 1045508  }
 0x154   : > { %vm2754_vm6 = vmand %vm2752_vm1, %vm2753_vm3 }
 0x155   : > { %vm5000_vm7 = vmor %vm2754_vm6, %vm2751_vm2 }
 0x197   : > { %v656_v25 = vpop.f32.mrb[0].mxu0 }
 0x198   : > { %v741_v2 = vpop.f32.mrb[0].mxu1  ;;  %v3448_v63 = vpop.f32.mrb[1].mxu0 }
 0x199   : > { %v742_v1 = vadd.f32 %v741_v2, %v656_v25  ;;  %v3460_v31 = vpop.f32.mrb[1].mxu1  ;;  %v659_v56 = vpop.f32.mrb[2].mxu0 }
 0x19a   : > { %v744_v16 = vpop.f32.mrb[2].mxu1  ;;  %v3449_v60 = vpop.f32.mrb[3].mxu0 }
 0x19b   : > { %v745_v37 = vadd.f32 %v744_v16, %v659_v56  ;;  %v3461_v42 = vpop.f32.mrb[3].mxu1 }
 0x1be   : > { %v930_v45 = vpop.f32.mrb[4].mxu0 }
 0x1bf   : > { %v937_v61 = vadd.f32 %v930_v45, %v742_v1  ;;  %v3472_v39 = vpop.f32.mrb[5].mxu0 }
 0x1c0   : > { %v933_v44 = vpop.f32.mrb[6].mxu0 }
 0x1c1   : > { %v938_v43 = vadd.f32 %v933_v44, %v745_v37  ;;  %v3473_v48 = vpop.f32.mrb[7].mxu0  ;;  %v3773_v44 = vmov 1966171168  }
 0x1c5   : > { %v1114_v3 = vpop.f32.mrb[4].mxu1 }
 0x1c6   : > { %v1121_v62 = vadd.f32 %v1114_v3, %v937_v61  ;;  %v3484_v20 = vpop.f32.mrb[5].mxu1 }
 0x1c7   : > { %v1117_v23 = vpop.f32.mrb[6].mxu1 }
 0x1c8   : > { %v1122_v33 = vadd.f32 %v1117_v23, %v938_v43  ;;  %v3485_v21 = vpop.f32.mrb[7].mxu1  ;;  %v2563_v43 = vunpack.c.l.s4 %v3773_v44 }
 0x1ca   : > { %v2564_v21 = vunpack.c.0.s8 %v2563_v43 }
 0x1d0   : > { %v1210_v4 = vpop.f32.mrb[8].mxu0 }
 0x1d1   : > { %v1217_v28 = vadd.f32 %v1210_v4, %v1121_v62  ;;  %v3496_v14 = vpop.f32.mrb[9].mxu0  ;;  %v5116_v4 = vld [vmem:[#allocation5_spill] sm:$0xff] }
 0x1d2   : > { %v1213_v11 = vpop.f32.mrb[10].mxu0 }
 0x1d3   : > { %v1218_v35 = vadd.f32 %v1213_v11, %v1122_v33  ;;  %v3497_v22 = vpop.f32.mrb[11].mxu0  ;;  %v5117_v11 = vmov 0  }
 0x1d6   : > { %v1306_v26 = vpop.f32.mrb[8].mxu1 }
 0x1d7   : > { %v1313_v24 = vadd.f32 %v1306_v26, %v1217_v28  ;;  %v3508_v55 = vpop.f32.mrb[9].mxu1  ;;  %v4873_v28 = vsub.s32 %v2564_v21, %v5116_v4 }
 0x1d8   : > { %v1309_v30 = vpop.f32.mrb[10].mxu1 }
 0x1d9   : > { %v1314_v9 = vadd.f32 %v1309_v30, %v1218_v35  ;;  %v3509_v0 = vpop.f32.mrb[11].mxu1  ;;  %v2929_v35 = vrot.slane %v5117_v11, %v4873_v28 }
 0x1e0   : > { %v1490_v6 = vpop.f32.mrb[12].mxu0 }
 0x1e1   : > { %v1497_v47 = vadd.f32 %v1490_v6, %v1313_v24  ;;  %v3520_v46 = vpop.f32.mrb[13].mxu0  ;;  %v3349_v6 = vld [vmem:[#allocation2] ss:$0 sm:$0xff] }
 0x1e2   : > { %v1493_v18 = vpop.f32.mrb[14].mxu0 }
 0x1e3   : > { %v1498_v58 = vadd.f32 %v1493_v18, %v1314_v9  ;;  %v3521_v57 = vpop.f32.mrb[15].mxu0  ;;  %v2936_v9 = vrot.slane %v2929_v35, %v4873_v28 }
 0x1e5   : > { %v2941_v18 = vunpack.c.l.b16 %v2936_v9 }
 0x1e6   : > { %v1674_v19 = vpop.f32.mrb[12].mxu1 }
 0x1e7   : > { %v1681_v32 = vadd.f32 %v1674_v19, %v1497_v47  ;;  %v3532_v59 = vpop.f32.mrb[13].mxu1 }
 0x1e8   : > { %v1677_v29 = vpop.f32.mrb[14].mxu1 }
 0x1e9   : > { %v1682_v12 = vadd.f32 %v1677_v29, %v1498_v58  ;;  %v3533_v50 = vpop.f32.mrb[15].mxu1 }
 0x1f0   : > { %v1770_v49 = vpop.f32.mrb[16].mxu0 }
 0x1f1   : > { %v1777_v5 = vadd.f32 %v1770_v49, %v1681_v32  ;;  %v3544_v17 = vpop.f32.mrb[17].mxu0 }
 0x1f2   : > { %v1773_v13 = vpop.f32.mrb[18].mxu0 }
 0x1f3   : > { %v1778_v34 = vadd.f32 %v1773_v13, %v1682_v12  ;;  %v3545_v54 = vpop.f32.mrb[19].mxu0  ;;  %v2947_v12 = vrot.slane %v2941_v18, 7 }
 0x1f6   : > { %v1866_v38 = vpop.f32.mrb[16].mxu1 }
 0x1f7   : > { %v1873_v51 = vadd.f32 %v1866_v38, %v1777_v5  ;;  %v3556_v7 = vpop.f32.mrb[17].mxu1  ;;  %v2948_v38 = vsel %vm2943_vm9, %v2947_v12, %v2941_v18 }
 0x1f8   : > { %v1869_v10 = vpop.f32.mrb[18].mxu1 }
 0x1f9   : > { %v1874_v41 = vadd.f32 %v1869_v10, %v1778_v34  ;;  %v3557_v15 = vpop.f32.mrb[19].mxu1 }
 0x1fa   : > { %v3007_v15 = vsel %vm2667_vm10, %v2947_v12, %v2941_v18 }
 0x200   : > { %v1984_v27 = vpop.f32.mrb[20].mxu0 }
 0x201   : > { %v1991_v40 = vadd.f32 %v1984_v27, %v1873_v51  ;;  %v3568_v52 = vpop.f32.mrb[21].mxu0  ;;  %v4884_v27 = vrot.slane %v5117_v11, 7 }
 0x202   : > { %v1987_v53 = vpop.f32.mrb[22].mxu0 }
 0x203   : > { %v1992_v36 = vadd.f32 %v1987_v53, %v1874_v41  ;;  %v3569_v25 = vpop.f32.mrb[23].mxu0 }
 0x206   : > { %v2102_v2 = vpop.f32.mrb[20].mxu1 }
 0x207   : > { %v2109_v1 = vadd.f32 %v2102_v2, %v1991_v40  ;;  %v3580_v63 = vpop.f32.mrb[21].mxu1  ;;  %v2951_v2 = vpack.c.b16 %v2948_v38, %v2948_v38 }
 0x208   : > { %v2105_v31 = vpop.f32.mrb[22].mxu1 }
 0x209   : > { %v2110_v56 = vadd.f32 %v2105_v31, %v1992_v36  ;;  %v3581_v16 = vpop.f32.mrb[23].mxu1 }
 0x210   : > { %v2198_v37 = vpop.f32.mrb[24].mxu0 }
 0x211   : > { %v2205_v60 = vadd.f32 %v2198_v37, %v2109_v1  ;;  %v3592_v42 = vpop.f32.mrb[25].mxu0 }
 0x212   : > { %v2201_v45 = vpop.f32.mrb[26].mxu0 }
 0x213   : > { %v2206_v61 = vadd.f32 %v2201_v45, %v2110_v56  ;;  %v3593_v39 = vpop.f32.mrb[27].mxu0 }
 0x216   : > { %v2294_v48 = vpop.f32.mrb[24].mxu1 }
 0x217   : > { %v2301_v3 = vadd.f32 %v2294_v48, %v2205_v60  ;;  %v3604_v62 = vpop.f32.mrb[25].mxu1 }
 0x218   : > { %v2297_v20 = vpop.f32.mrb[26].mxu1  ;;  %v3010_v62 = vpack.c.b16 %v3007_v15, %v3007_v15 }
 0x219   : > { %v2302_v23 = vadd.f32 %v2297_v20, %v2206_v61  ;;  %v3605_v33 = vpop.f32.mrb[27].mxu1 }
 0x220   : > { %v2412_v14 = vpop.f32.mrb[28].mxu0 }
 0x221   : > { %v2419_v22 = vadd.f32 %v2412_v14, %v2301_v3  ;;  %v3616_v26 = vpop.f32.mrb[29].mxu0 }
 0x222   : > { %v2415_v24 = vpop.f32.mrb[30].mxu0  ;;  %v2956_v26 = vsel %vm4903_vm13, 0, %v2951_v2  ;;  %v5120_v2 = vld [vmem:[#allocation6_spill] sm:$0xff] }
 0x223   : > { %v2420_v55 = vadd.f32 %v2415_v24, %v2302_v23  ;;  %v3617_v30 = vpop.f32.mrb[31].mxu0 }
 0x226   : > { %v2530_v0 = vpop.f32.mrb[28].mxu1 }
 0x227   : > { %v2537_v47 = vadd.f32 %v2530_v0, %v2419_v22  ;;  %v3628_v46 = vpop.f32.mrb[29].mxu1  ;;  %v2700_v22 = vsel %vm4903_vm13, 0, %v4884_v27 }
 0x228   : > { %v2533_v58 = vpop.f32.mrb[30].mxu1  ;;  %v3016_v46 = vsel %vm2697_vm11, %v3010_v62, 0 }
 0x229   : > { %v2546_v57 = vadd.f32 %v3349_v6, %v2537_v47  ;;  %v2538_v19 = vadd.f32 %v2533_v58, %v2420_v55  ;;  %v3629_v32 = vpop.f32.mrb[31].mxu1 }
 0x22b   : > { %v2548_v59 = vmax.f32 %v2546_v57, 0.0  ;;  %v2547_v29 = vadd.f32 %v3349_v6, %v2538_v19 }
 0x22d   : > { %v2552_v50 = vcombine.high %v2548_v59, %v2548_v59  ;;  %v2556_v49 = vpack.c.bf16 %v2548_v59, %v2548_v59  ;;  %v2549_v5 = vmax.f32 %v2547_v29, 0.0 }
 0x22f   : > { %v2557_v17 = vpack.c.bf16 %v2552_v50, %v2552_v50  ;;  %v2828_v13 = vrot.slane %v2556_v49, %v4873_v28  ;;  %v2553_v34 = vcombine.high %v2549_v5, %v2549_v5  ;;  %v2558_v54 = vpack.c.bf16 %v2549_v5, %v2549_v5 }
 0x231   : > { %v2568_v51 = vrot.slane %v2557_v17, %v4873_v28  ;;  %v2829_v7 = vcombine.high %v2828_v13, %v2828_v13  ;;  %v2836_v10 = vrot.slane %v2828_v13, %v4873_v28  ;;  %v2559_v41 = vpack.c.bf16 %v2553_v34, %v2553_v34 }
 0x232   : > { %v2850_v40 = vrot.slane %v2558_v54, %v4873_v28 }
 0x233   : > { %v2569_v52 = vcombine.high %v2568_v51, %v2568_v51  ;;  %v2576_v53 = vrot.slane %v2568_v51, %v4873_v28  ;;  %v2843_v36 = vrot.slane %v2829_v7, %v4873_v28  ;;  %v2873_v25 = vrot.slane %v2836_v10, %v4873_v28 }
 0x234   : > { %v2590_v1 = vrot.slane %v2559_v41, %v4873_v28  ;;  %v2851_v63 = vcombine.high %v2850_v40, %v2850_v40  ;;  %v2858_v31 = vrot.slane %v2850_v40, %v4873_v28 }
 0x235   : > { %v2583_v56 = vrot.slane %v2569_v52, %v4873_v28  ;;  %v2612_v16 = vrot.slane %v2576_v53, %v4873_v28  ;;  %v2880_v37 = vrot.slane %v2873_v25, %v4873_v28  ;;  %v2887_v60 = vrot.slane %v2843_v36, %v4873_v28 }
 0x236   : > { %v2591_v42 = vcombine.high %v2590_v1, %v2590_v1  ;;  %v2598_v45 = vrot.slane %v2590_v1, %v4873_v28  ;;  %v2865_v61 = vrot.slane %v2851_v63, %v4873_v28  ;;  %v2901_v39 = vrot.slane %v2858_v31, %v4873_v28 }
 0x237   : > { %v2619_v44 = vrot.slane %v2612_v16, %v4873_v28  ;;  %v2626_v43 = vrot.slane %v2583_v56, %v4873_v28  ;;  %v2894_v3 = vrot.slane %v2887_v60, %v4873_v28  ;;  %v2937_v6 = vunpack.c.l.b16 %v2880_v37 }
 0x238   : > { %v2605_v20 = vrot.slane %v2591_v42, %v4873_v28  ;;  %v2640_v23 = vrot.slane %v2598_v45, %v4873_v28  ;;  %v2908_v33 = vrot.slane %v2901_v39, %v4873_v28  ;;  %v2915_v21 = vrot.slane %v2865_v61, %v4873_v28 }
 0x239   : > { %v2633_v4 = vrot.slane %v2626_v43, %v4873_v28  ;;  %v2662_v14 = vunpack.c.l.b16 %v2619_v44  ;;  %v2938_v35 = vunpack.c.l.b16 %v2894_v3 }
 0x23a   : > { %v2647_v24 = vrot.slane %v2640_v23, %v4873_v28  ;;  %v2654_v55 = vrot.slane %v2605_v20, %v4873_v28  ;;  %v2922_v30 = vrot.slane %v2915_v21, %v4873_v28  ;;  %v2939_v34 = vunpack.c.l.b16 %v2908_v33 }
 0x23b   : > { %v2663_v9 = vunpack.c.l.b16 %v2633_v4  ;;  %v2666_v0 = vrot.slane %v2662_v14, 1  ;;  %v2942_v47 = vrot.slane %v2938_v35, 7 }
 0x23c   : > { %v2661_v18 = vrot.slane %v2654_v55, %v4873_v28  ;;  %v2664_v58 = vunpack.c.l.b16 %v2647_v24  ;;  %v2940_v57 = vunpack.c.l.b16 %v2922_v30 }
 0x23d   : > { %v2668_v19 = vsel %vm2667_vm10, %v2663_v9, %v2666_v0  ;;  %v2759_v32 = vrot.slane %v2663_v9, 7  ;;  %v2944_v59 = vsel %vm2943_vm9, %v2942_v47, %v2937_v6  ;;  %v3005_v29 = vsel %vm2667_vm10, %v2942_v47, %v2937_v6 }
 0x23e   : > { %v2671_v12 = vpack.c.b16 %v2668_v19, %v2668_v19  ;;  %v2949_v50 = vpack.c.b16 %v2944_v59, %v2944_v59  ;;  %v3008_v49 = vpack.c.b16 %v3005_v29, %v3005_v29  ;;  %v2665_v5 = vunpack.c.l.b16 %v2661_v18 }
 0x23f   : > { %v2760_v17 = vsel %vm2667_vm10, %v2759_v32, %v2662_v14  ;;  %v2669_v13 = vrot.slane %v2664_v58, 1  ;;  %v2945_v54 = vrot.slane %v2940_v57, 7 }
 0x240   : > { %v2681_v38 = vshrl.u32 %v2671_v12, 16  ;;  %v2684_v28 = vshll.u32 %v2671_v12, 16  ;;  %v2763_v51 = vpack.c.b16 %v2760_v17, %v2760_v17  ;;  %v2955_v7 = vsel %vm4903_vm13, 0, %v2949_v50 }
 0x241   : > { %v2957_v10 = vcombine.low %v2955_v7, %v2956_v26  ;;  %v3012_v41 = vsel %vm2697_vm11, %v3008_v49, 0  ;;  %v2670_v15 = vsel %vm2667_vm10, %v2665_v5, %v2669_v13  ;;  %v2761_v40 = vrot.slane %v2665_v5, 7 }
 0x242   : > { %v2683_v52 = vrot.slane %v2681_v38, 7  ;;  %v2767_v53 = vsel %vm2697_vm11, %v2763_v51, 0  ;;  %v3019_v36 = vcombine.low %v3012_v41, %v3016_v46  ;;  %v2672_v25 = vpack.c.b16 %v2670_v15, %v2670_v15 }
 0x243   : > { %v4933_v1 = vrot.slane %v2767_v53, %v5120_v2  ;;  %v2762_v63 = vsel %vm2667_vm10, %v2761_v40, %v2664_v58  ;;  %v2946_v31 = vsel %vm2943_vm9, %v2945_v54, %v2939_v34  ;;  %v2964_v16 = vrot.slane %v2957_v10, %v5120_v2 }
 0x244   : > { %v2686_v56 = vor.u32 %v2684_v28, %v2683_v52  ;;  %v2688_v37 = vshrl.u32 %v2672_v25, 16  ;;  %v3026_v60 = vrot.slane %v3019_v36, %v5120_v2  ;;  %v2691_v42 = vshll.u32 %v2672_v25, 16 }
 0x245   : > { %v2789_v61 = vcombine.high %v4933_v1, %v5117_v11  ;;  %v2794_v39 = vshrl.u32 %v4933_v1, 16  ;;  %v2764_v3 = vpack.c.b16 %v2762_v63, %v2762_v63  ;;  %v2950_v62 = vpack.c.b16 %v2946_v31, %v2946_v31  ;;  %v3352_v63 = vld [vmem:[%s4989_s14 + $0xc] sm:$0x3f] }
 0x246   : > { %v2711_v45 = vsel %vm4903_vm13, 0, %v2686_v56  ;;  %v2690_v44 = vrot.slane %v2688_v37, 7  ;;  %v3006_v20 = vsel %vm2667_vm10, %v2945_v54, %v2939_v34  ;;  %v2965_v23 = vcombine.high %v2964_v16, %v5117_v11 }
 0x247   : > { %v2718_v43 = vrot.slane %v2711_v45, %v5120_v2  ;;  %v2978_v33 = vshrl.u32 %v2964_v16, 16  ;;  %v3009_v4 = vpack.c.b16 %v3006_v20, %v3006_v20  ;;  %v3027_v14 = vcombine.high %v3026_v60, %v5117_v11 }
 0x248   : > { %v2693_v21 = vor.u32 %v2691_v42, %v2690_v44  ;;  %v3040_v35 = vshrl.u32 %v3026_v60, 16  ;;  %v2769_v26 = vsel %vm2697_vm11, %v2764_v3, 0  ;;  %v2966_v24 = vsel %vm4903_vm13, 0, %v2950_v62 }
 0x249   : > { %v2772_v30 = vcombine.low %v5117_v11, %v2769_v26  ;;  %v2973_v9 = vrot.slane %v2966_v24, %v5120_v2  ;;  %v3014_v0 = vsel %vm2697_vm11, %v3009_v4, 0  ;;  %v2719_v6 = vcombine.high %v2718_v43, %v5117_v11 }
 0x24a   : > { %v2701_v55 = vsel %vm4903_vm13, 0, %v2693_v21  ;;  %v2724_v47 = vshrl.u32 %v2718_v43, 16  ;;  %v3035_v58 = vrot.slane %v3014_v0, %v5120_v2 }
 0x24b   : > { %v2702_v46 = vcombine.low %v2700_v22, %v2701_v55  ;;  %v2779_v48 = vrot.slane %v2772_v30, %v5120_v2  ;;  %v2974_v27 = vcombine.high %v2973_v9, %v5117_v11  ;;  %v2977_v22 = vpack.i.b16 %v2973_v9, %v2964_v16 }
 0x24c   : > { %v2979_v19 = vshrl.u32 %v2973_v9, 16  ;;  %v3036_v59 = vcombine.high %v3035_v58, %v5117_v11  ;;  %v3039_v29 = vpack.i.b16 %v3035_v58, %v3026_v60  ;;  %v3041_v12 = vshrl.u32 %v3035_v58, 16  ;;  %v3350_v60 = vld [vmem:[%s4989_s14 + $0x6] sm:$0x3f] }
 0x24d   : > { %v2709_v32 = vrot.slane %v2702_v46, %v5120_v2  ;;  %v2780_v50 = vcombine.high %v2779_v48, %v5117_v11  ;;  %v2792_v49 = vpack.i.b16 %v4933_v1, %v2779_v48  ;;  %v2793_v5 = vshrl.u32 %v2779_v48, 16 }
 0x24e   : > { %v2980_v17 = vpack.i.b16 %v2979_v19, %v2978_v33  ;;  %v2983_v38 = vpack.i.b16 %v2974_v27, %v2965_v23  ;;  %v3042_v7 = vpack.i.b16 %v3041_v12, %v3040_v35  ;;  %v3045_v15 = vpack.i.b16 %v3036_v59, %v3027_v14 }
 0x24f   : > { %v2710_v13 = vcombine.high %v2709_v32, %v5117_v11  ;;  %v2722_v34 = vpack.i.b16 %v2718_v43, %v2709_v32  ;;  %v2723_v54 = vshrl.u32 %v2709_v32, 16  ;;  %v2795_v28 = vpack.i.b16 %v2794_v39, %v2793_v5  ;;  %v2756_v39 = vld [vmem:[%s4989_s14] sm:$0x3f] }
 0x250   : > { %v2798_v51 = vpack.i.b16 %v2789_v61, %v2780_v50  ;;  %v2984_v11 = vcombine.low %v2977_v22, %v2980_v17  ;;  %v2998_v53 = vrot.slane %v2983_v38, %v3850_v8  ;;  %v3046_v36 = vcombine.low %v3039_v29, %v3042_v7  ;;  %v3354_v61 = vld [vmem:[%s4989_s14 + $0x12] sm:$0x3f] }
 0x251   : > { %v2725_v10 = vpack.i.b16 %v2724_v47, %v2723_v54  ;;  %v2728_v41 = vpack.i.b16 %v2719_v6, %v2710_v13  ;;  %v2799_v40 = vcombine.low %v2792_v49, %v2795_v28  ;;  %v3060_v37 = vrot.slane %v3045_v15, %v3850_v8 }
 0x252   : > { %v2991_v52 = vrot.slane %v2984_v11, %v3850_v8  ;;  %v2813_v1 = vrot.slane %v2798_v51, %v3850_v8  ;;  %v3053_v16 = vrot.slane %v3046_v36, %v3850_v8 }
 0x253   : > { %v2729_v25 = vcombine.low %v2722_v34, %v2725_v10  ;;  %v2806_v31 = vrot.slane %v2799_v40, %v3850_v8  ;;  %v2743_v45 = vrot.slane %v2728_v41, %v3850_v8 }
 0x254   : > { %v2999_v56 = vcombine.low %v2991_v52, %v2998_v53  ;;  %v3061_v3 = vcombine.low %v3053_v16, %v3060_v37 }
 0x255   : > { %v2736_v42 = vrot.slane %v2729_v25, %v3850_v8  ;;  %v2814_v44 = vcombine.low %v2806_v31, %v2813_v1 }
 0x256   : > { %v3003_v43 = vsel %vm5000_vm7, %v2999_v56, %v3352_v63  ;;  %v3065_v23 = vsel %vm5000_vm7, %v3061_v3, %v3354_v61 }
 0x257   : > { %v2744_v62 = vcombine.low %v2736_v42, %v2743_v45  ;;  %3353 = vst [vmem:[%s4989_s14 + $0xc] sm:$0x3f] %v3003_v43  ;;  %v2818_v20 = vsel %vm5000_vm7, %v2814_v44, %v3350_v60  ;;  %3355 = vst [vmem:[%s4989_s14 + $0x12] sm:$0x3f] %v3065_v23 }
 0x258   : > { %3351 = vst [vmem:[%s4989_s14 + $0x6] sm:$0x3f] %v2818_v20 }
 0x259   : > { %v2757_v33 = vsel %vm5000_vm7, %v2744_v62, %v2756_v39 }
 0x25a   : > { %2758 = vst [vmem:[%s4989_s14] sm:$0x3f] %v2757_v33 }
 0x25b PF: > { %s14_s12 = sadd.s32 1, %s3764_s12  }
 0x25c   : > { %p11_p2 = scmp.ge.s32.totalorder %s14_s12, 4  }
 0x25e   :  { %13 = sbr.rel (!%p11_p2) target bundleno = 1 (0x1), region = 88 }
 0x265   :  { %3088 = vsyncpa [#allocation3], 1 }
 0x266   :  { %3090 = vsyncpa [#allocation3 + $0x1], 1 }

// kernel: ac_discriminator_forward.4
= control target key start
LH: loop header
LB: loop body
LE: loop exit
PB: predicated region body
PF: predicated region fallthrough
CT: control target
= control target key end

     0   :  { %8 = vsyncpa [#allocation3], 0  ;;  %s5369_s12 = smov 0   ;;  %s7125_s0 = inlined_call_operand.vmem [shape: bf16[2,4,9,36], index: 0, kind: input, shape index: {}]   ;;  %s7126_s1 = inlined_call_operand.vmem [shape: bf16[16,4,64], index: 1, kind: input, shape index: {}]   ;;  %s7127_s2 = inlined_call_operand.hbm [shape: f32[1,64], index: 2, kind: input, shape index: {}]   ;;  %s7128_s3 = inlined_call_operand.vmem [shape: bf16[2,4,5,384], index: 3, kind: output, shape index: {}]  }
   0x1 LB: > { %s5375_s13 = sadd.s32 4294967295, %s5332_s12   ;;  %p4666_p0 = scmp.ge.s32.totalorder %s5332_s12, 1  ;;  %s5332_s12 = sphi %s5369_s12, %s14_s12  }
   0x2   : > { %p113_p1 = scmp.lt.s32.totalorder %s5332_s12, 3  ;;  %p7129_p3 = scmp.eq.s32.totalorder %s5375_s13, 0 }
   0x3   : > { %s5334_s15 = smov [#allocation2]   ;;  %s5294_s20 = scalar_lea.hbm %s7127_s2, 16 }
   0x4   : > { %p5379_p2 = pnand %p4666_p0, %p113_p1  ;;  %s129_s16 = sshll.u32 %s5334_s15, 4  ;;  %s130_s16 = int_to_ptr.vmem [resolvable:$true] %s129_s16 }
   0x5   : > { %p5295_p6 = scmp.ne.s32.totalorder %s7127_s2, %s5294_s20  ;;  %p5301_p10 = scmp.lt.u32.totalorder %s5294_s20, %s7127_s2 }
   0x6   : > { %s7139_s14 = scalar_select %p5379_p2, 1, 0 }
   0x7   : > { %p5264_p4 = pneg %p5379_p2 }
   0x9   : > { %p5388_p5 = pnand %p7129_p3, %p5264_p4 }
   0xb   : > { %p5296_p7 = pneg %p5388_p5 }
   0xd   : > { %p5297_p8 = pnand %p5296_p7, %p5295_p6 }
   0xf   : > { %p5298_p9 = pneg %p5297_p8 }
  0x11   : > { %p5303_p11 = pnand %p5301_p10, %p5298_p9 }
  0x13   : > { %5306 = shalt.err (!%p5303_p11)
}
  0x14   : > { %s5307_s25 = scalar_lea.vmem %s130_s16, 16  ;;  %s5314_s26 = scalar_lea.vmem %s130_s16, 32 }
  0x15   : > { %p5308_p12 = scmp.ne.s32.totalorder %s130_s16, %s5307_s25  ;;  %p5315_p1 = scmp.lt.s32.totalorder %s130_s16, %s130_s16 }
  0x16   : > { %p5316_p4 = scmp.lt.s32.totalorder %s5314_s26, %s5307_s25 }
  0x17   : > { %p5310_p13 = pnand %p5308_p12, %p5296_p7 }
  0x18   : > { %p5317_p3 = por %p5316_p4, %p5315_p1 }
  0x19   : > { %p5311_p0 = pneg %p5310_p13 }
  0x1b   : > { %p5318_p2 = pnand %p5317_p3, %p5311_p0 }
  0x1d   : > { %5321 = shalt.err (!%p5318_p2)
}
  0x1e   : > { %5267 = dma.hbm_to_vmem [thread:$0]  (!%p5388_p5), %s7127_s2, 16, %s130_s16, [#allocation3]  }
  0x1f   : > { %p7141_p6 = scmp.ne.s32.totalorder %s7139_s14, 0 }
  0x21   : > { %150 = sbr.rel (%p7141_p6) target bundleno = 793 (0x319), region = 32 }
  0x28   : > { %p7142_p8 = scmp.eq.s32.totalorder %s5375_s13, 0 }
  0x2a   : > { %5327 = dma.done.wait (%p7142_p8), [#allocation3], 16   ;;  %p7143_p7 = pmov %p7142_p8 }
  0x2b   : > { %p174_p9 = scmp.lt.s32.totalorder %s5375_s13, 1  ;;  %s5335_s6 = smov 116   ;;  %vm1162_vm0 = vcmask 1041408   ;;  %v4783_v2 = vld [vmem:[%s7126_s1 + $0x10] sm:$0x3]  ;;  %v239_v16 = vlaneseq  ;;  %vm1149_vm1 = vcmask 31744  }
  0x2c   : > { %5329 = vsyncadd (%p7143_p7), [#allocation3], 4294967280  ;;  %s5336_s7 = smov 124   ;;  %s5337_s8 = smov 112   ;;  %5251 = vmatprep.subr.msk.bf16.mxu0 %vm1162_vm0, %v4783_v2  ;;  %v2406_v3 = vsel %vm1162_vm0, %v4783_v2, 0  ;;  %v7131_v55 = vmov 0  }
  0x2d   : > { %s7199_s13 = smov (!%p174_p9, %s5375_s13), 1  ;;  %s5338_s9 = smov 120   ;;  %5044 = vmatpush3.bf16.msra.mxu0 %v2406_v3  ;;  %v4680_v5 = vld [vmem:[%s7126_s1 + $0x2] sm:$0x3]  ;;  %v5482_v7 = vld [vmem:[%s7126_s1] sm:$0x3] }
  0x2e   : > { %s4882_s29 = sshll.u32 %s7199_s13, 5  ;;  %s5339_s10 = smov 104   ;;  %5243 = vmatprep.subr.msk.bf16.mxu1 %vm1162_vm0, %v4680_v5  ;;  %v1164_v6 = vsel %vm1162_vm0, %v4680_v5, 0  ;;  %v5487_v8 = vld [vmem:[%s7126_s1 + $0x12] sm:$0x3]  ;;  %v5581_v20 = vshrl.u32 %v239_v16, 7 }
  0x2f   : > { %s5422_s5 = scalar_lea.vmem %s7125_s0, %s4882_s29  ;;  %s5340_s11 = smov 108   ;;  %4964 = vmatpush3.bf16.msra.mxu1 %v1164_v6  ;;  %5252 = vmatprep.subr.msk.bf16.mxu0 %vm1162_vm0, %v5487_v8  ;;  %v5343_v14 = vmov 1983009808   ;;  %v5344_v23 = vmov 1934713408   ;;  %v5627_v52 = vsel %vm1162_vm0, %v5482_v7, 0 }
  0x30   : > { %v5425_v0 = vld [vmem:[%s5422_s5] sm:$0xf]  ;;  %v5440_v1 = vld [vmem:[%s5422_s5 + $0x8] sm:$0xf]  ;;  %s5341_s14 = smov 100   ;;  %5244 = vmatprep.subr.msk.bf16.mxu1 %vm1162_vm0, %v5482_v7  ;;  %s5342_s23 = smov 96   ;;  %v237_v15 = vunpack.c.l.s4 %v5343_v14  ;;  %v254_v24 = vunpack.c.l.s4 %v5344_v23 }
  0x31   : > { %201 = vrot.lane.b32.xlu1 %v5425_v0, %s5335_s6  ;;  %189 = vrot.lane.b32.xlu0 %v5425_v0, %s5336_s7  ;;  %v5464_v4 = vld [vmem:[%s5422_s5 + $0x4] sm:$0x1]  ;;  %v5494_v9 = vld [vmem:[%s5422_s5 + $0xc] sm:$0x1]  ;;  %7144 = vst [vmem:[#allocation5_spill] sm:$0xff] %v5581_v20  ;;  %v5631_v53 = vsel %vm1162_vm0, %v5487_v8, 0 }
  0x32   : > { %v5521_v10 = vld [vmem:[%s5422_s5 + $0x10] sm:$0xf]  ;;  %v5540_v11 = vld [vmem:[%s5422_s5 + $0x14] sm:$0x1]  ;;  %v5559_v12 = vld [vmem:[%s5422_s5 + $0x18] sm:$0xf]  ;;  %v238_v19 = vunpack.c.0.s8 %v237_v15  ;;  %v255_v27 = vunpack.c.0.s8 %v254_v24 }
  0x33   : > { %v4679_v13 = vld [vmem:[%s5422_s5 + $0x1c] sm:$0x1]  ;;  %v5607_v45 = vld [vmem:[%s7126_s1 + $0x4] sm:$0x3]  ;;  %v5612_v48 = vld [vmem:[%s7126_s1 + $0x14] sm:$0x3] }
  0x34   : > { %v5586_v25 = vsub.s32 %v238_v19, %v5581_v20  ;;  %v5599_v33 = vsub.s32 %v255_v27, %v5581_v20  ;;  %v5617_v49 = vld [vmem:[%s7126_s1 + $0x6] sm:$0x3]  ;;  %v5622_v50 = vld [vmem:[%s7126_s1 + $0x16] sm:$0x3]  ;;  %v5636_v54 = vld [vmem:[%s7126_s1 + $0x8] sm:$0x3] }
  0x35   : > { %207 = vrot.lane.b32.xlu1 %v5425_v0, %s5337_s8  ;;  %195 = vrot.lane.b32.xlu0 %v5425_v0, %s5338_s9  ;;  %v5643_v61 = vsel %vm1162_vm0, %v5607_v45, 0  ;;  %v5647_v62 = vsel %vm1162_vm0, %v5612_v48, 0  ;;  %v5651_v63 = vsel %vm1162_vm0, %v5617_v49, 0  ;;  %v5661_v6 = vsel %vm1162_vm0, %v5636_v54, 0  ;;  %s5259_s24 = smul.u32 48, %s7199_s13 }
  0x36   : > { %vm1323_vm2 = vsmask.f32 3328  ;;  %vm1324_vm3 = vsmask.f32 7440  ;;  %vm3577_vm5 = vcmask 1042434   ;;  %vm3574_vm6 = vcmask 1041409  }
  0x37   : > { %vm5894_vm4 = vmor %vm1323_vm2, %vm1324_vm3  ;;  %vm3580_vm7 = vcmask 1043459   ;;  %vm4290_vm8 = vcmask 1044484   ;;  %vm3642_vm9 = vcmask 1040384   ;;  %vm3643_vm10 = vsmask.f32 256  ;;  %s7058_s27 = scalar_lea.vmem %s7128_s3, %s5259_s24 }
  0x38   : > { %vm3650_vm11 = vcmask 1042432   ;;  %vm6563_vm12 = vmand %vm3642_vm9, %vm3643_vm10  ;;  %vm3651_vm13 = vsmask.f32 2304  ;;  %vm3765_vm15 = vcmask 1046532  }
  0x39   : > { %219 = vrot.lane.b32.xlu1 %v5425_v0, %s5339_s10  ;;  %213 = vrot.lane.b32.xlu0 %v5425_v0, %s5340_s11  ;;  %vm6572_vm14 = vmand %vm3650_vm11, %vm3651_vm13 }
  0x3d   : > { %428 = vrot.lane.b32.xlu1 %v5440_v1, %s5336_s7  ;;  %225 = vrot.lane.b32.xlu0 %v5425_v0, %s5341_s14 }
  0x41   : > { %440 = vrot.lane.b32.xlu1 %v5440_v1, %s5335_s6  ;;  %434 = vrot.lane.b32.xlu0 %v5440_v1, %s5338_s9 }
  0x45   : > { %452 = vrot.lane.b32.xlu1 %v5440_v1, %s5340_s11  ;;  %446 = vrot.lane.b32.xlu0 %v5440_v1, %s5337_s8 }
  0x49   : > { %464 = vrot.lane.b32.xlu1 %v5440_v1, %s5341_s14  ;;  %458 = vrot.lane.b32.xlu0 %v5440_v1, %s5339_s10 }
  0x4d   : > { %197 = vrot.lane.b32.xlu1 %v5464_v4, %s5338_s9  ;;  %191 = vrot.lane.b32.xlu0 %v5464_v4, %s5336_s7 }
  0x51   : > { %209 = vrot.lane.b32.xlu1 %v5464_v4, %s5337_s8  ;;  %203 = vrot.lane.b32.xlu0 %v5464_v4, %s5335_s6 }
  0x55   : > { %221 = vrot.lane.b32.xlu1 %v5464_v4, %s5339_s10  ;;  %215 = vrot.lane.b32.xlu0 %v5464_v4, %s5340_s11 }
  0x59   : > { %430 = vrot.lane.b32.xlu1 %v5494_v9, %s5336_s7  ;;  %227 = vrot.lane.b32.xlu0 %v5464_v4, %s5341_s14 }
  0x5d   : > { %442 = vrot.lane.b32.xlu1 %v5494_v9, %s5335_s6  ;;  %436 = vrot.lane.b32.xlu0 %v5494_v9, %s5338_s9 }
  0x61   : > { %454 = vrot.lane.b32.xlu1 %v5494_v9, %s5340_s11  ;;  %448 = vrot.lane.b32.xlu0 %v5494_v9, %s5337_s8 }
  0x65   : > { %466 = vrot.lane.b32.xlu1 %v5494_v9, %s5341_s14  ;;  %460 = vrot.lane.b32.xlu0 %v5494_v9, %s5339_s10 }
  0x69   : > { %233 = vrot.lane.b32.xlu1 %v5464_v4, %s5342_s23  ;;  %231 = vrot.lane.b32.xlu0 %v5425_v0, %s5342_s23 }
  0x6d   : > { %665 = vrot.lane.b32.xlu1 %v5521_v10, %s5336_s7  ;;  %470 = vrot.lane.b32.xlu0 %v5440_v1, %s5342_s23 }
  0x71   : > { %677 = vrot.lane.b32.xlu1 %v5521_v10, %s5335_s6  ;;  %671 = vrot.lane.b32.xlu0 %v5521_v10, %s5338_s9 }
  0x75   : > { %689 = vrot.lane.b32.xlu1 %v5521_v10, %s5340_s11  ;;  %683 = vrot.lane.b32.xlu0 %v5521_v10, %s5337_s8 }
  0x79   : > { %701 = vrot.lane.b32.xlu1 %v5521_v10, %s5341_s14  ;;  %695 = vrot.lane.b32.xlu0 %v5521_v10, %s5339_s10 }
  0x7d   : > { %667 = vrot.lane.b32.xlu1 %v5540_v11, %s5336_s7  ;;  %472 = vrot.lane.b32.xlu0 %v5494_v9, %s5342_s23 }
  0x81   : > { %679 = vrot.lane.b32.xlu1 %v5540_v11, %s5335_s6  ;;  %673 = vrot.lane.b32.xlu0 %v5540_v11, %s5338_s9 }
  0x85   : > { %691 = vrot.lane.b32.xlu1 %v5540_v11, %s5340_s11  ;;  %685 = vrot.lane.b32.xlu0 %v5540_v11, %s5337_s8 }
  0x89   : > { %703 = vrot.lane.b32.xlu1 %v5540_v11, %s5341_s14  ;;  %697 = vrot.lane.b32.xlu0 %v5540_v11, %s5339_s10 }
  0x8d   : > { %908 = vrot.lane.b32.xlu1 %v5559_v12, %s5338_s9  ;;  %902 = vrot.lane.b32.xlu0 %v5559_v12, %s5336_s7 }
  0x91   : > { %920 = vrot.lane.b32.xlu1 %v5559_v12, %s5337_s8  ;;  %914 = vrot.lane.b32.xlu0 %v5559_v12, %s5335_s6 }
  0x95   : > { %932 = vrot.lane.b32.xlu1 %v5559_v12, %s5339_s10  ;;  %926 = vrot.lane.b32.xlu0 %v5559_v12, %s5340_s11 }
  0x99   : > { %904 = vrot.lane.b32.xlu1 %v4679_v13, %s5336_s7  ;;  %938 = vrot.lane.b32.xlu0 %v5559_v12, %s5341_s14 }
  0x9d   : > { %916 = vrot.lane.b32.xlu1 %v4679_v13, %s5335_s6  ;;  %910 = vrot.lane.b32.xlu0 %v4679_v13, %s5338_s9 }
  0xa1   : > { %928 = vrot.lane.b32.xlu1 %v4679_v13, %s5340_s11  ;;  %922 = vrot.lane.b32.xlu0 %v4679_v13, %s5337_s8 }
  0xa3   : > { %v202_v17 = vpop.permute.xlu1 %201  ;;  %v190_v18 = vpop.permute.xlu0 %189 }
  0xa5   : > { %940 = vrot.lane.b32.xlu1 %v4679_v13, %s5341_s14  ;;  %934 = vrot.lane.b32.xlu0 %v4679_v13, %s5339_s10 }
  0xa7   : > { %v208_v21 = vpop.permute.xlu1 %207  ;;  %v196_v22 = vpop.permute.xlu0 %195 }
  0xa8   : > { %v235_v26 = vcombine.low %v5425_v0, %v208_v21  ;;  %v5655_v0 = vsel %vm1162_vm0, %v5622_v50, 0 }
  0xa9   : > { %709 = vrot.lane.b32.xlu1 %v5540_v11, %s5342_s23  ;;  %707 = vrot.lane.b32.xlu0 %v5521_v10, %s5342_s23 }
  0xaa   : > { %v242_v30 = vrot.slane %v235_v26, %v5586_v25 }
  0xab   : > { %v220_v28 = vpop.permute.xlu1 %219  ;;  %v214_v29 = vpop.permute.xlu0 %213 }
  0xac   : > { %v243_v31 = vcombine.low %v196_v22, %v220_v28  ;;  %v269_v34 = vcombine.low %v190_v18, %v214_v29 }
  0xad   : > { %944 = vrot.lane.b32.xlu0 %v5559_v12, %s5342_s23  ;;  %946 = vrot.lane.b32.xlu1 %v4679_v13, %s5342_s23  ;;  %s5348_s23 = smov 64  }
  0xae   : > { %v250_v32 = vrot.slane %v243_v31, %v5586_v25  ;;  %v276_v42 = vrot.slane %v269_v34, %v5586_v25 }
  0xaf   : > { %v429_v35 = vpop.permute.xlu1 %428  ;;  %v226_v36 = vpop.permute.xlu0 %225 }
  0xb0   : > { %v251_v37 = vcombine.low %v242_v30, %v250_v32  ;;  %v277_v38 = vcombine.low %v202_v17, %v226_v36  ;;  %v252_v39 = vcombine.high %v242_v30, %v250_v32  ;;  %v5689_v36 = vld [vmem:[%s7126_s1 + $0xa] sm:$0x3] }
  0xb1   : > { %7145 = vst [vmem:[#allocation6_spill] sm:$0xff] %v5689_v36 }
  0xb2   : > { %v284_v40 = vrot.slane %v277_v38, %v5586_v25  ;;  %v259_v41 = vrot.slane %v251_v37, %v5599_v33  ;;  %v266_v51 = vrot.slane %v252_v39, %v5599_v33 }
  0xb3   : > { %v441_v43 = vpop.permute.xlu1 %440  ;;  %v435_v44 = vpop.permute.xlu0 %434 }
  0xb4   : > { %v285_v46 = vcombine.low %v276_v42, %v284_v40  ;;  %v286_v47 = vcombine.high %v276_v42, %v284_v40  ;;  %v267_v56 = vcombine.high %v259_v41, %v7131_v55  ;;  %v268_v7 = vcombine.high %v266_v51, %v7131_v55 }
  0xb5   : > { %v379_v15 = vshrl.u32 %v259_v41, 16  ;;  %v391_v17 = vshrl.u32 %v266_v51, 16 }
  0xb6   : > { %v293_v57 = vrot.slane %v285_v46, %v5599_v33  ;;  %v300_v58 = vrot.slane %v286_v47, %v5599_v33  ;;  %v385_v16 = vshrl.u32 %v267_v56, 16 }
  0xb7   : > { %v453_v59 = vpop.permute.xlu1 %452  ;;  %v447_v60 = vpop.permute.xlu0 %446 }
  0xb8   : > { %v301_v2 = vcombine.high %v293_v57, %v7131_v55  ;;  %v302_v3 = vcombine.high %v300_v58, %v7131_v55  ;;  %v380_v5 = vshrl.u32 %v293_v57, 16  ;;  %v392_v8 = vshrl.u32 %v300_v58, 16 }
  0xb9   : > { %v508_v13 = vcombine.low %v429_v35, %v453_v59  ;;  %v474_v14 = vcombine.low %v5440_v1, %v447_v60  ;;  %v5665_v22 = vpack.i.b16 %v300_v58, %v266_v51  ;;  %v5684_v35 = vld [vmem:[%s7126_s1 + $0x18] sm:$0x3]  ;;  %v5691_v37 = vpack.i.b16 %v293_v57, %v259_v41  ;;  %v5707_v41 = vld [vmem:[%s7126_s1 + $0xc] sm:$0x3] }
  0xba   : > { %v386_v18 = vshrl.u32 %v301_v2, 16  ;;  %v5667_v23 = vpack.i.b16 %v302_v3, %v268_v7  ;;  %v5671_v28 = vpack.i.b16 %v392_v8, %v391_v17  ;;  %v5673_v29 = vpack.i.b16 %v380_v5, %v379_v15  ;;  %7147 = vst [vmem:[#allocation8_spill] sm:$0xff] %v5707_v41 }
  0xbb   : > { %v465_v19 = vpop.permute.xlu1 %464  ;;  %v459_v21 = vpop.permute.xlu0 %458  ;;  %v5675_v30 = vpack.i.b16 %v301_v2, %v267_v56  ;;  %v515_v1 = vrot.slane %v508_v13, %v5586_v25  ;;  %v481_v31 = vrot.slane %v474_v14, %v5586_v25  ;;  %v398_v38 = vshrl.u32 %v302_v3, 16  ;;  %v5702_v56 = vld [vmem:[%s7126_s1 + $0x1a] sm:$0x3] }
  0xbc   : > { %v516_v24 = vcombine.low %v441_v43, %v465_v19  ;;  %v482_v26 = vcombine.low %v435_v44, %v459_v21  ;;  %v5669_v27 = vpack.i.b16 %v386_v18, %v385_v16  ;;  %7146 = vst [vmem:[#allocation7_spill] sm:$0xff] %v5702_v56  ;;  %v397_v57 = vshrl.u32 %v268_v7, 16 }
  0xbd   : > { %v4784_v39 = vcombine.low %v5673_v29, %v5675_v30  ;;  %v4786_v58 = vcombine.low %v5671_v28, %v5667_v23  ;;  %v5714_v59 = vsel %vm1162_vm0, %v5684_v35, 0  ;;  %v5718_v60 = vsel %vm1162_vm0, %v5689_v36, 0 }
  0xbe   : > { %v523_v32 = vrot.slane %v516_v24, %v5586_v25  ;;  %v489_v34 = vrot.slane %v482_v26, %v5586_v25  ;;  %v4785_v43 = vcombine.low %v5669_v27, %v5665_v22  ;;  %7148 = vst [vmem:[#allocation9_spill] sm:$0xff] %v5714_v59  ;;  %7149 = vst [vmem:[#allocation10_spill] sm:$0xff] %v5718_v60  ;;  %v1327_v8 = vshrl.u32 %v5691_v37, 16 }
  0xbf   : > { %v198_v40 = vpop.permute.xlu1 %197  ;;  %v5695_v42 = vpop.permute.xlu0 %191  ;;  %5045 = vmatprep.mubr.msk.bf16.mxu0 %vm1149_vm1, %v4784_v39  ;;  %v1330_v13 = vshll.u32 %v5691_v37, 16  ;;  %v5731_v16 = vsel %vm1162_vm0, %v5702_v56, 0  ;;  %v5735_v17 = vsel %vm1162_vm0, %v5707_v41, 0  ;;  %v5737_v18 = vpack.i.b16 %v398_v38, %v397_v57 }
  0xc0   : > { %v524_v44 = vcombine.low %v515_v1, %v523_v32  ;;  %v525_v46 = vcombine.high %v515_v1, %v523_v32  ;;  %v490_v47 = vcombine.low %v481_v31, %v489_v34  ;;  %v491_v51 = vcombine.high %v481_v31, %v489_v34  ;;  %5046 = vmatmul.mubr.msk.bf16.vlgmr.msra.gmra.mrb[0].mxu0 %vm1149_vm1, %v4785_v43 }
  0xc1   : > { %5049 = vmatprep.mubr.msk.bf16.mxu0 %vm1149_vm1, %v4786_v58  ;;  %5054 = vmatpush3.bf16.msra.mxu0 %v5631_v53  ;;  %7150 = vst [vmem:[#allocation11_spill] sm:$0xff] %v5731_v16  ;;  %7151 = vst [vmem:[#allocation12_spill] sm:$0xff] %v5735_v17 }
  0xc2   : > { %v532_v2 = vrot.slane %v524_v44, %v5599_v33  ;;  %v539_v3 = vrot.slane %v525_v46, %v5599_v33  ;;  %v498_v5 = vrot.slane %v490_v47, %v5599_v33  ;;  %v505_v7 = vrot.slane %v491_v51, %v5599_v33  ;;  %5253 = vmatprep.subr.msk.bf16.mxu0 %vm1162_vm0, %v5612_v48 }
  0xc3   : > { %v210_v14 = vpop.permute.xlu1 %209  ;;  %v204_v15 = vpop.permute.xlu0 %203  ;;  %v5750_v51 = vrot.slane %v1327_v8, 4  ;;  %v5752_v48 = vrot.slane %v1330_v13, 5 }
  0xc4   : > { %v540_v19 = vcombine.high %v532_v2, %v7131_v55  ;;  %v631_v21 = vshrl.u32 %v539_v3, 16  ;;  %v541_v53 = vcombine.high %v539_v3, %v7131_v55  ;;  %v619_v26 = vshrl.u32 %v532_v2, 16 }
  0xc5   : > { %v506_v1 = vcombine.high %v498_v5, %v7131_v55  ;;  %v618_v31 = vshrl.u32 %v498_v5, 16  ;;  %v507_v34 = vcombine.high %v505_v7, %v7131_v55  ;;  %v630_v38 = vshrl.u32 %v505_v7, 16 }
  0xc6   : > { %v625_v32 = vshrl.u32 %v540_v19, 16  ;;  %v328_v39 = vcombine.low %v5464_v4, %v210_v14  ;;  %v1341_v55 = vshrl.u32 %v5673_v29, 16  ;;  %v617_v14 = vpack.i.b16 %v532_v2, %v498_v5 }
  0xc7   : > { %v624_v43 = vshrl.u32 %v506_v1, 16  ;;  %v222_v44 = vpop.permute.xlu1 %221  ;;  %v216_v46 = vpop.permute.xlu0 %215  ;;  %v5754_v57 = vpack.i.b16 %v540_v19, %v506_v1  ;;  %v5756_v58 = vpack.i.b16 %v631_v21, %v630_v38  ;;  %v5762_v17 = vpack.i.b16 %v619_v26, %v618_v31 }
  0xc8   : > { %v336_v24 = vcombine.low %v198_v40, %v222_v44  ;;  %v335_v4 = vrot.slane %v328_v39, %v5586_v25  ;;  %v637_v16 = vshrl.u32 %v541_v53, 16  ;;  %v636_v47 = vshrl.u32 %v507_v34, 16 }
  0xc9   : > { %v5759_v20 = vpack.i.b16 %v625_v32, %v624_v43  ;;  %v352_v13 = vcombine.low %v5695_v42, %v216_v46  ;;  %v5766_v19 = vpack.i.b16 %v539_v3, %v505_v7  ;;  %v5768_v21 = vpack.i.b16 %v541_v53, %v507_v34 }
  0xca   : > { %v343_v8 = vrot.slane %v336_v24, %v5586_v25  ;;  %v4681_v40 = vcombine.low %v617_v14, %v5762_v17  ;;  %v1333_v42 = vor.u32 %v5752_v48, %v5750_v51  ;;  %v1344_v53 = vshll.u32 %v5673_v29, 16 }
  0xcb   : > { %v5771_v1 = vpop.permute.xlu1 %430  ;;  %v228_v32 = vpop.permute.xlu0 %227  ;;  %v4682_v2 = vcombine.low %v5754_v57, %v5759_v20  ;;  %v4683_v7 = vcombine.low %v5766_v19, %v5756_v58  ;;  %v1355_v31 = vshrl.u32 %v5675_v30, 16  ;;  %v359_v34 = vrot.slane %v352_v13, %v5586_v25 }
  0xcc   : > { %v360_v5 = vcombine.low %v204_v15, %v228_v32  ;;  %v344_v3 = vcombine.low %v335_v4, %v343_v8  ;;  %4965 = vmatprep.mubr.msk.bf16.mxu1 %vm1149_vm1, %v4681_v40  ;;  %v5786_v15 = vpack.i.b16 %v637_v16, %v636_v47  ;;  %v5791_v39 = vrot.slane %v1341_v55, 4 }
  0xcd   : > { %4966 = vmatmul.mubr.msk.bf16.vlgmr.msra.gmra.mrb[0].mxu1 %vm1149_vm1, %v4682_v2  ;;  %v1358_v16 = vshll.u32 %v5675_v30, 16  ;;  %v1369_v47 = vshrl.u32 %v5669_v27, 16  ;;  %v1372_v51 = vshll.u32 %v5669_v27, 16  ;;  %v1541_v48 = vshrl.u32 %v617_v14, 16 }
  0xce   : > { %v367_v38 = vrot.slane %v360_v5, %v5586_v25  ;;  %4969 = vmatprep.mubr.msk.bf16.mxu1 %vm1149_vm1, %v4683_v7  ;;  %4974 = vmatpush3.bf16.msra.mxu1 %v5627_v52  ;;  %v1383_v55 = vshrl.u32 %v5665_v22, 16  ;;  %v1386_v8 = vshll.u32 %v5665_v22, 16  ;;  %v351_v52 = vrot.slane %v344_v3, %v5599_v33 }
  0xcf   : > { %v443_v43 = vpop.permute.xlu1 %442  ;;  %v5794_v44 = vpop.permute.xlu0 %436  ;;  %5245 = vmatprep.subr.msk.bf16.mxu1 %vm1162_vm0, %v5607_v45  ;;  %v1544_v13 = vshll.u32 %v617_v14, 16  ;;  %v1346_v40 = vrot.slane %v1344_v53, 5  ;;  %v1357_v32 = vrot.slane %v1355_v31, 4  ;;  %v1360_v5 = vrot.slane %v1358_v16, 5 }
  0xd0   : > { %v368_v4 = vcombine.low %v359_v34, %v367_v38  ;;  %v1371_v7 = vrot.slane %v1369_v47, 4  ;;  %v1374_v24 = vrot.slane %v1372_v51, 5  ;;  %v4684_v34 = vcombine.low %v5768_v21, %v5786_v15 }
  0xd1   : > { %v4793_v45 = vcombine.low %v5762_v17, %v5754_v57  ;;  %v1397_v38 = vshrl.u32 %v5671_v28, 16  ;;  %v1400_v3 = vshll.u32 %v5671_v28, 16  ;;  %v5814_v14 = vrot.slane %v1541_v48, 4 }
  0xd2   : > { %v375_v2 = vrot.slane %v368_v4, %v5599_v33  ;;  %v1385_v31 = vrot.slane %v1383_v55, 4  ;;  %v1388_v4 = vrot.slane %v1386_v8, 5  ;;  %v5816_v16 = vrot.slane %v1544_v13, 5 }
  0xd3   : > { %v455_v46 = vpop.permute.xlu1 %454  ;;  %v449_v26 = vpop.permute.xlu0 %448  ;;  %v4794_v47 = vcombine.low %v5759_v20, %v5766_v19  ;;  %v5820_v51 = vrot.slane %v1333_v42, 4  ;;  %v1347_v41 = vor.u32 %v1346_v40, %v5791_v39  ;;  %v1361_v59 = vor.u32 %v1360_v5, %v1357_v32 }
  0xd4   : > { %v402_v53 = vpack.i.b16 %v375_v2, %v351_v52  ;;  %v1375_v48 = vor.u32 %v1374_v24, %v1371_v7  ;;  %v567_v52 = vcombine.low %v5494_v9, %v449_v26  ;;  %v7152_v55 = vcombine.low %v5691_v37, %v5673_v29 }
  0xd5   : > { %4970 = vmatmul.mubr.msk.bf16.gmra.mrb[4].mxu1 %vm1149_vm1, %v4684_v34  ;;  %v1399_v2 = vrot.slane %v1397_v38, 4  ;;  %v1402_v36 = vrot.slane %v1400_v3, 5  ;;  %v591_v39 = vcombine.low %v5771_v1, %v455_v46  ;;  %v1389_v24 = vor.u32 %v1388_v4, %v1385_v31 }
  0xd6   : > { %v4787_v60 = vcombine.low %v5737_v18, %v402_v53  ;;  %v2577_v56 = vshrl.u32 %v402_v53, 16  ;;  %4975 = vmatprep.mubr.msk.bf16.mxu1 %vm1149_vm1, %v7152_v55  ;;  %v2580_v42 = vshll.u32 %v402_v53, 16  ;;  %v1639_v37 = vshrl.u32 %v5786_v15, 16 }
  0xd7   : > { %v467_v8 = vpop.permute.xlu1 %466  ;;  %v461_v13 = vpop.permute.xlu0 %460  ;;  %v1642_v26 = vshll.u32 %v5786_v15, 16  ;;  %v5843_v7 = vrot.slane %v1347_v41, 4  ;;  %v598_v38 = vrot.slane %v591_v39, %v5586_v25  ;;  %v5847_v53 = vrot.slane %v1361_v59, 4 }
  0xd8   : > { %v599_v40 = vcombine.low %v443_v43, %v467_v8  ;;  %v575_v34 = vcombine.low %v5794_v44, %v461_v13  ;;  %5050 = vmatmul.mubr.msk.bf16.gmra.mrb[4].mxu0 %vm1149_vm1, %v4787_v60  ;;  %v2579_v9 = vrot.slane %v2577_v56, 4  ;;  %v2582_v29 = vrot.slane %v2580_v42, 5 }
  0xd9   : > { %5055 = vmatprep.mubr.msk.bf16.mxu0 %vm1149_vm1, %v4793_v45  ;;  %v1411_v43 = vshrl.u32 %v5667_v23, 16  ;;  %v1414_v60 = vshll.u32 %v5667_v23, 16  ;;  %v574_v44 = vrot.slane %v567_v52, %v5586_v25  ;;  %v1403_v45 = vor.u32 %v1402_v36, %v1399_v2 }
  0xda   : > { %v606_v1 = vrot.slane %v599_v40, %v5586_v25  ;;  %v582_v46 = vrot.slane %v575_v34, %v5586_v25  ;;  %v5849_v31 = vrot.slane %v1375_v48, 4  ;;  %v2583_v4 = vor.u32 %v2582_v29, %v2579_v9 }
  0xdb   : > { %v234_v5 = vpop.permute.xlu1 %233  ;;  %v232_v56 = vpop.permute.xlu0 %231  ;;  %v5851_v55 = vrot.slane %v1389_v24, 4  ;;  %v1641_v8 = vrot.slane %v1639_v37, 4  ;;  %v1644_v52 = vrot.slane %v1642_v26, 5  ;;  %v7153_v42 = vmov 0  }
  0xdc   : > { %v310_v3 = vrot.slane %v232_v56, %v5586_v25  ;;  %v607_v13 = vcombine.low %v598_v38, %v606_v1  ;;  %v7154_v41 = vcombine.low %v5675_v30, %v5669_v27  ;;  %v1413_v36 = vrot.slane %v1411_v43, 4 }
  0xdd   : > { %v1416_v2 = vrot.slane %v1414_v60, 5  ;;  %v583_v39 = vcombine.low %v574_v44, %v582_v46  ;;  %v7137_v59 = vmov 0.0   ;;  %v7155_v24 = vcombine.low %v5665_v22, %v5671_v28 }
  0xde   : > { %v311_v40 = vcombine.high %v310_v3, %v7153_v42  ;;  %4976 = vmatmul.mubr.msk.bf16.vlgmr.msra.gmra.mrb[0].mxu1 %vm1149_vm1, %v7154_v41  ;;  %v4801_v48 = vpack.i.b16 %v234_v5, %v7137_v59  ;;  %v318_v34 = vrot.slane %v310_v3, %v5599_v33  ;;  %v5867_v27 = vrot.slane %v1403_v45, 4 }
  0xdf   : > { %4979 = vmatprep.mubr.msk.bf16.mxu1 %vm1149_vm1, %v7155_v24  ;;  %v5864_v9 = vpop.permute.xlu1 %665  ;;  %v471_v29 = vpop.permute.xlu0 %470  ;;  %4984 = vmatpush3.bf16.msra.mxu1 %v5643_v61  ;;  %v1425_v26 = vshrl.u32 %v5737_v18, 16  ;;  %v1428_v1 = vshll.u32 %v5737_v18, 16  ;;  %v2584_v22 = vrot.slane %v2583_v4, 4  ;;  %v7156_v61 = vcombine.low %v5756_v58, %v5768_v21 }
  0xe0   : > { %v325_v30 = vrot.slane %v311_v40, %v5599_v33  ;;  %v549_v37 = vrot.slane %v471_v29, %v5586_v25  ;;  %5056 = vmatmul.mubr.msk.bf16.vlgmr.msra.gmra.mrb[0].mxu0 %vm1149_vm1, %v4794_v47  ;;  %v326_v28 = vcombine.high %v318_v34, %v7153_v42  ;;  %v406_v43 = vshrl.u32 %v318_v34, 16  ;;  %5246 = vmatprep.subr.msk.bf16.mxu1 %vm1162_vm0, %v5617_v49 }
  0xe1   : > { %5064 = vmatpush3.bf16.msra.mxu0 %v5647_v62  ;;  %5059 = vmatprep.mubr.msk.bf16.mxu0 %vm1149_vm1, %v7156_v61  ;;  %v1645_v60 = vor.u32 %v1644_v52, %v1641_v8  ;;  %v1417_v5 = vor.u32 %v1416_v2, %v1413_v36  ;;  %v614_v62 = vrot.slane %v607_v13, %v5599_v33  ;;  %v2588_v45 = vrot.slane %v4801_v48, 5 }
  0xe2   : > { %v327_v44 = vcombine.high %v325_v30, %v7153_v42  ;;  %v415_v46 = vshrl.u32 %v325_v30, 16  ;;  %v550_v47 = vcombine.high %v549_v37, %v7153_v42  ;;  %5254 = vmatprep.subr.msk.bf16.mxu0 %vm1162_vm0, %v5622_v50  ;;  %v590_v56 = vrot.slane %v583_v39, %v5599_v33 }
  0xe3   : > { %v411_v38 = vshrl.u32 %v326_v28, 16  ;;  %v5888_v3 = vpop.permute.xlu1 %677  ;;  %v5890_v4 = vpop.permute.xlu0 %671  ;;  %v4697_v49 = vpack.i.b16 %v318_v34, %v7137_v59  ;;  %v4701_v50 = vpack.i.b16 %v325_v30, %v7137_v59  ;;  %v5900_v52 = vrot.slane %v1425_v26, 4 }
  0xe4   : > { %v5902_v13 = vrot.slane %v1428_v1, 5  ;;  %v419_v40 = vshrl.u32 %v327_v44, 16  ;;  %v4698_v41 = vpack.i.b16 %v406_v43, %v7137_v59  ;;  %v4699_v36 = vpack.i.b16 %v326_v28, %v7137_v59 }
  0xe5   : > { %v557_v2 = vrot.slane %v549_v37, %v5599_v33  ;;  %v4700_v39 = vpack.i.b16 %v411_v38, %v7137_v59  ;;  %v4702_v48 = vpack.i.b16 %v415_v46, %v7137_v59  ;;  %v5910_v24 = vpack.i.b16 %v327_v44, %v7137_v59 }
  0xe6   : > { %v564_v34 = vrot.slane %v550_v47, %v5599_v33  ;;  %v7159_v29 = vcombine.low %v5667_v23, %v5737_v18  ;;  %v5917_v30 = vpack.i.b16 %v614_v62, %v590_v56  ;;  %v5921_v26 = vsel %vm5894_vm4, %v2584_v22, %v2588_v45 }
  0xe7   : > { %v690_v37 = vpop.permute.xlu1 %689  ;;  %v684_v1 = vpop.permute.xlu0 %683  ;;  %v5923_v28 = vrot.slane %v1645_v60, 4  ;;  %v1418_v43 = vrot.slane %v1417_v5, 4  ;;  %v1338_v61 = vrot.slane %v4697_v49, 5  ;;  %v565_v44 = vcombine.high %v557_v2, %v7153_v42 }
  0xe8   : > { %4980 = vmatmul.mubr.msk.bf16.gmra.mrb[4].mxu1 %vm1149_vm1, %v7159_v29  ;;  %v566_v46 = vcombine.high %v564_v34, %v7153_v42  ;;  %v1352_v18 = vrot.slane %v4698_v41, 5  ;;  %v1366_v47 = vrot.slane %v4699_v36, 5  ;;  %v1394_v62 = vrot.slane %v4701_v50, 5 }
  0xe9   : > { %v644_v56 = vshrl.u32 %v557_v2, 16  ;;  %v1380_v38 = vrot.slane %v4700_v39, 5  ;;  %v1408_v22 = vrot.slane %v4702_v48, 5  ;;  %v1422_v45 = vrot.slane %v5910_v24, 5 }
  0xea   : > { %v5931_v60 = vpack.i.b16 %v419_v40, %v7137_v59  ;;  %v652_v5 = vshrl.u32 %v564_v34, 16  ;;  %v5934_v49 = vpack.i.b16 %v557_v2, %v7137_v59  ;;  %v5937_v29 = vpack.i.b16 %v564_v34, %v7137_v59 }
  0xeb   : > { %v745_v32 = vcombine.low %v5864_v9, %v690_v37  ;;  %v702_v41 = vpop.permute.xlu1 %701  ;;  %v696_v36 = vpop.permute.xlu0 %695  ;;  %v648_v50 = vshrl.u32 %v565_v44, 16  ;;  %v656_v23 = vshrl.u32 %v566_v46, 16  ;;  %v711_v39 = vcombine.low %v5521_v10, %v684_v1 }
  0xec   : > { %v4796_v48 = vcombine.low %v5786_v15, %v5917_v30  ;;  %v5944_v40 = vpack.i.b16 %v644_v56, %v7137_v59  ;;  %v1339_v2 = vsel %vm5894_vm4, %v5820_v51, %v1338_v61  ;;  %v1353_v9 = vsel %vm5894_vm4, %v5843_v7, %v1352_v18 }
  0xed   : > { %v1367_v24 = vsel %vm5894_vm4, %v5847_v53, %v1366_v47  ;;  %v5956_v10 = vpack.i.b16 %v565_v44, %v7137_v59  ;;  %v4706_v15 = vcombine.low %v1339_v2, %v1353_v9  ;;  %v1381_v34 = vsel %vm5894_vm4, %v5849_v31, %v1380_v38 }
  0xee   : > { %5060 = vmatmul.mubr.msk.bf16.gmra.mrb[4].mxu0 %vm1149_vm1, %v4796_v48  ;;  %v4803_v37 = vcombine.low %v1353_v9, %v1367_v24  ;;  %v718_v51 = vrot.slane %v711_v39, %v5586_v25  ;;  %v4707_v1 = vcombine.low %v1367_v24, %v1381_v34  ;;  %v753_v7 = vcombine.low %v5888_v3, %v702_v41 }
  0xef   : > { %v719_v61 = vcombine.low %v5890_v4, %v696_v36  ;;  %v5965_v18 = vpop.permute.xlu1 %667  ;;  %v473_v53 = vpop.permute.xlu0 %472  ;;  %v1552_v44 = vrot.slane %v5934_v49, 5  ;;  %4985 = vmatprep.mubr.msk.bf16.mxu1 %vm1149_vm1, %v4706_v15  ;;  %v1395_v31 = vsel %vm5894_vm4, %v5851_v55, %v1394_v62  ;;  %v1409_v47 = vsel %vm5894_vm4, %v5867_v27, %v1408_v22 }
  0xf0   : > { %5065 = vmatprep.mubr.msk.bf16.mxu0 %vm1149_vm1, %v4803_v37  ;;  %v4721_v3 = vpack.i.b16 %v656_v23, %v7137_v59  ;;  %v752_v4 = vrot.slane %v745_v32, %v5586_v25  ;;  %v760_v56 = vrot.slane %v753_v7, %v5586_v25  ;;  %4986 = vmatmul.mubr.msk.bf16.vlgmr.msra.gmra.mrb[0].mxu1 %vm1149_vm1, %v4707_v1  ;;  %v2686_v55 = vshrl.u32 %v5917_v30, 16 }
  0xf1   : > { %v726_v38 = vrot.slane %v719_v61, %v5586_v25  ;;  %v4708_v41 = vcombine.low %v1395_v31, %v1409_v47  ;;  %v5982_v36 = vpack.i.b16 %v652_v5, %v7137_v59  ;;  %v2689_v62 = vshll.u32 %v5917_v30, 16  ;;  %4994 = vmatpush3.bf16.msra.mxu1 %v5651_v63 }
  0xf2   : > { %v5989_v27 = vsel %vm5894_vm4, %v1418_v43, %v1422_v45  ;;  %v761_v32 = vcombine.low %v752_v4, %v760_v56  ;;  %v762_v23 = vcombine.high %v752_v4, %v760_v56  ;;  %v5997_v2 = vpack.i.b16 %v648_v50, %v7137_v59  ;;  %5247 = vmatprep.subr.msk.bf16.mxu1 %vm1162_vm0, %v5636_v54 }
  0xf3   : > { %v727_v22 = vcombine.low %v718_v51, %v726_v38  ;;  %v728_v39 = vcombine.high %v718_v51, %v726_v38  ;;  %4989 = vmatprep.mubr.msk.bf16.mxu1 %vm1149_vm1, %v4708_v41  ;;  %v5992_v48 = vpop.permute.xlu1 %679  ;;  %v5994_v5 = vpop.permute.xlu0 %673  ;;  %v6000_v30 = vpack.i.b16 %v566_v46, %v7137_v59  ;;  %v4804_v63 = vcombine.low %v1381_v34, %v1395_v31 }
  0xf4   : > { %v1650_v9 = vrot.slane %v4721_v3, 5  ;;  %v769_v43 = vrot.slane %v761_v32, %v5599_v33  ;;  %v6006_v45 = vrot.slane %v762_v23, %v5599_v33  ;;  %v4805_v15 = vcombine.low %v1409_v47, %v5989_v27 }
  0xf5   : > { %v735_v24 = vrot.slane %v727_v22, %v5599_v33  ;;  %v1566_v50 = vrot.slane %v5944_v40, 5  ;;  %v1608_v37 = vrot.slane %v5937_v29, 5  ;;  %v6013_v46 = vrot.slane %v728_v39, %v5599_v33 }
  0xf6   : > { %v6016_v34 = vpack.i.b16 %v473_v53, %v7137_v59  ;;  %5066 = vmatmul.mubr.msk.bf16.vlgmr.msra.gmra.mrb[0].mxu0 %vm1149_vm1, %v4804_v63  ;;  %v1580_v54 = vrot.slane %v5956_v10, 5  ;;  %v6021_v1 = vrot.slane %v2686_v55, 4  ;;  %v6023_v7 = vrot.slane %v2689_v62, 5 }
  0xf7   : > { %5074 = vmatpush3.bf16.msra.mxu0 %v5655_v0  ;;  %5069 = vmatprep.mubr.msk.bf16.mxu0 %vm1149_vm1, %v4805_v15  ;;  %v6027_v61 = vpop.permute.xlu1 %691  ;;  %v6029_v31 = vpop.permute.xlu0 %685  ;;  %v6033_v47 = vcombine.high %v769_v43, %v7153_v42  ;;  %v6037_v3 = vcombine.high %v6006_v45, %v7153_v42  ;;  %v1436_v4 = vrot.slane %v5931_v60, 5  ;;  %v1594_v0 = vrot.slane %v5997_v2, 5 }
  0xf8   : > { %5255 = vmatprep.subr.msk.bf16.mxu0 %vm1162_vm0, %v5684_v35  ;;  %v856_v56 = vshrl.u32 %v769_v43, 16  ;;  %v855_v38 = vshrl.u32 %v735_v24, 16  ;;  %v6046_v41 = vsel %vm5894_vm4, %v5923_v28, %v1650_v9  ;;  %v6049_v55 = vcombine.high %v735_v24, %v7153_v42 }
  0xf9   : > { %v6053_v62 = vcombine.high %v6013_v46, %v7153_v42  ;;  %v7160_v35 = vor.u32 %v5902_v13, %v5900_v52  ;;  %v868_v23 = vshrl.u32 %v6006_v45, 16  ;;  %v867_v22 = vshrl.u32 %v6013_v46, 16 }
  0xfa   : > { %v7161_v39 = vor.u32 %v5816_v16, %v5814_v14  ;;  %v6068_v53 = vpack.i.b16 %v769_v43, %v735_v24  ;;  %v6072_v13 = vpack.i.b16 %v856_v56, %v855_v38  ;;  %v1555_v51 = vshrl.u32 %v5762_v17, 16 }
  0xfb   : > { %v1432_v32 = vrot.slane %v7160_v35, 4  ;;  %v704_v9 = vpop.permute.xlu1 %703  ;;  %v698_v15 = vpop.permute.xlu0 %697  ;;  %v1558_v14 = vshll.u32 %v5762_v17, 16  ;;  %v6079_v16 = vpack.i.b16 %v6033_v47, %v6049_v55  ;;  %v6084_v43 = vpack.i.b16 %v6037_v3, %v6053_v62 }
  0xfc   : > { %v1548_v63 = vrot.slane %v7161_v39, 4  ;;  %v1569_v17 = vshrl.u32 %v5754_v57, 16  ;;  %v804_v28 = vcombine.low %v5540_v11, %v6029_v31  ;;  %v812_v39 = vcombine.low %v5994_v5, %v698_v15 }
  0xfd   : > { %v1437_v52 = vsel %vm5894_vm4, %v1432_v32, %v1436_v4  ;;  %v6087_v4 = vpack.i.b16 %v868_v23, %v867_v22  ;;  %v1560_v56 = vrot.slane %v1558_v14, 5  ;;  %v1583_v23 = vshrl.u32 %v5759_v20, 16 }
  0xfe   : > { %v4709_v35 = vcombine.low %v5989_v27, %v1437_v52  ;;  %v4806_v24 = vcombine.low %v1437_v52, %v5921_v26  ;;  %v1557_v27 = vrot.slane %v1555_v51, 4  ;;  %v1572_v26 = vshll.u32 %v5754_v57, 16 }
  0xff   : > { %v6091_v38 = vpop.permute.xlu1 %908  ;;  %v6093_v32 = vpop.permute.xlu0 %902  ;;  %v1571_v51 = vrot.slane %v1569_v17, 4  ;;  %v1586_v52 = vshll.u32 %v5759_v20, 16  ;;  %v1585_v59 = vrot.slane %v1583_v23, 4  ;;  %v1597_v60 = vshrl.u32 %v5766_v19, 16 }
 0x100   : > { %4990 = vmatmul.mubr.msk.bf16.gmra.mrb[4].mxu1 %vm1149_vm1, %v4709_v35  ;;  %5070 = vmatmul.mubr.msk.bf16.gmra.mrb[4].mxu0 %vm1149_vm1, %v4806_v24  ;;  %v1561_v22 = vor.u32 %v1560_v56, %v1557_v27  ;;  %v836_v35 = vcombine.low %v5992_v48, %v704_v9  ;;  %v1574_v14 = vrot.slane %v1572_v26, 5  ;;  %v1553_v11 = vsel %vm5894_vm4, %v1548_v63, %v1552_v44 }
 0x101   : > { %v1588_v31 = vrot.slane %v1586_v52, 5  ;;  %v1600_v24 = vshll.u32 %v5766_v19, 16  ;;  %v828_v20 = vcombine.low %v5965_v18, %v6027_v61  ;;  %v1599_v9 = vrot.slane %v1597_v60, 4 }
 0x102   : > { %v1562_v57 = vrot.slane %v1561_v22, 4  ;;  %v1575_v48 = vor.u32 %v1574_v14, %v1571_v51  ;;  %v1611_v5 = vshrl.u32 %v5756_v58, 16  ;;  %v811_v44 = vrot.slane %v804_v28, %v5586_v25 }
 0x103   : > { %v921_v27 = vpop.permute.xlu1 %920  ;;  %v915_v56 = vpop.permute.xlu0 %914  ;;  %v1589_v63 = vor.u32 %v1588_v31, %v1585_v59  ;;  %v1602_v15 = vrot.slane %v1600_v24, 5  ;;  %v843_v26 = vrot.slane %v836_v35, %v5586_v25  ;;  %v819_v23 = vrot.slane %v812_v39, %v5586_v25 }
 0x104   : > { %v1567_v49 = vsel %vm5894_vm4, %v1562_v57, %v1566_v50  ;;  %v1576_v19 = vrot.slane %v1575_v48, 4  ;;  %v1613_v60 = vrot.slane %v1611_v5, 4  ;;  %v1614_v22 = vshll.u32 %v5756_v58, 16 }
 0x105   : > { %v4723_v17 = vcombine.low %v1553_v11, %v1567_v49  ;;  %v1590_v18 = vrot.slane %v1589_v63, 4  ;;  %v1603_v61 = vor.u32 %v1602_v15, %v1599_v9  ;;  %v835_v50 = vrot.slane %v828_v20, %v5586_v25 }
 0x106   : > { %v1581_v59 = vsel %vm5894_vm4, %v1576_v19, %v1580_v54  ;;  %v1625_v28 = vshrl.u32 %v5768_v21, 16  ;;  %v1628_v39 = vshll.u32 %v5768_v21, 16  ;;  %v1616_v14 = vrot.slane %v1614_v22, 5 }
 0x107   : > { %v933_v51 = vpop.permute.xlu1 %932  ;;  %v927_v40 = vpop.permute.xlu0 %926  ;;  %4995 = vmatprep.mubr.msk.bf16.mxu1 %vm1149_vm1, %v4723_v17  ;;  %v1595_v58 = vsel %vm5894_vm4, %v1590_v18, %v1594_v0  ;;  %v4813_v52 = vcombine.low %v1567_v49, %v1581_v59  ;;  %v1604_v35 = vrot.slane %v1603_v61, 4  ;;  %v844_v57 = vcombine.low %v835_v50, %v843_v26  ;;  %v7167_v26 = vld [vmem:[#allocation9_spill] sm:$0xff] }
 0x108   : > { %v4724_v11 = vcombine.low %v1581_v59, %v1595_v58  ;;  %v1627_v31 = vrot.slane %v1625_v28, 4  ;;  %v1630_v24 = vrot.slane %v1628_v39, 5  ;;  %v820_v10 = vcombine.low %v811_v44, %v819_v23 }
 0x109   : > { %5075 = vmatprep.mubr.msk.bf16.mxu0 %vm1149_vm1, %v4813_v52  ;;  %v1609_v21 = vsel %vm5894_vm4, %v1604_v35, %v1608_v37  ;;  %v1617_v54 = vor.u32 %v1616_v14, %v1613_v60  ;;  %v948_v2 = vcombine.low %v5559_v12, %v921_v27  ;;  %v956_v5 = vcombine.low %v6091_v38, %v933_v51 }
 0x10a   : > { %4996 = vmatmul.mubr.msk.bf16.vlgmr.msra.gmra.mrb[0].mxu1 %vm1149_vm1, %v4724_v11  ;;  %v4814_v48 = vcombine.low %v1595_v58, %v1609_v21  ;;  %v1631_v9 = vor.u32 %v1630_v24, %v1627_v31  ;;  %v982_v49 = vcombine.low %v6093_v32, %v927_v40  ;;  %v7162_v44 = vshrl.u32 %v6049_v55, 16  ;;  %v7169_v40 = vld [vmem:[#allocation7_spill] sm:$0xff] }
 0x10b   : > { %v6139_v20 = vpop.permute.xlu1 %904  ;;  %v939_v0 = vpop.permute.xlu0 %938  ;;  %v7163_v29 = vshrl.u32 %v6033_v47, 16  ;;  %v1618_v37 = vrot.slane %v1617_v54, 4  ;;  %5004 = vmatpush3.bf16.msra.mxu1 %v5661_v6  ;;  %v955_v12 = vrot.slane %v948_v2, %v5586_v25  ;;  %v7164_v15 = vor.u32 %v6023_v7, %v6021_v1  ;;  %v7165_v47 = vld [vmem:[#allocation6_spill] sm:$0xff] }
 0x10c   : > { %v990_v27 = vcombine.low %v915_v56, %v939_v0  ;;  %v851_v38 = vrot.slane %v844_v57, %v5599_v33  ;;  %5076 = vmatmul.mubr.msk.bf16.vlgmr.msra.gmra.mrb[0].mxu0 %vm1149_vm1, %v4814_v48  ;;  %v1632_v32 = vrot.slane %v1631_v9, 4  ;;  %v963_v55 = vrot.slane %v956_v5, %v5586_v25  ;;  %5248 = vmatprep.subr.msk.bf16.mxu1 %vm1162_vm0, %v7165_v47 }
 0x10d   : > { %v6148_v63 = vpack.i.b16 %v7163_v29, %v7162_v44  ;;  %v2693_v17 = vrot.slane %v7164_v15, 4  ;;  %v827_v19 = vrot.slane %v820_v10, %v5599_v33  ;;  %v7166_v6 = vrot.slane %v5982_v36, 5  ;;  %5084 = vmatpush3.bf16.msra.mxu0 %v7167_v26  ;;  %v5293_v26 = vld [vmem:[%s5422_s5 + $0x1c] sm:$0x1] }
 0x10e   : > { %v989_v1 = vrot.slane %v982_v49, %v5586_v25  ;;  %v997_v7 = vrot.slane %v990_v27, %v5586_v25  ;;  %v7168_v60 = vrot.slane %v6000_v30, 5  ;;  %v964_v36 = vcombine.low %v955_v12, %v963_v55  ;;  %5256 = vmatprep.subr.msk.bf16.mxu0 %vm1162_vm0, %v7169_v40  ;;  %v6185_v30 = vld [vmem:[%s7126_s1 + $0x1c] sm:$0x3] }
 0x10f   : > { %v1623_v56 = vsel %vm5894_vm4, %v1618_v37, %v7166_v6  ;;  %v6168_v23 = vpop.permute.xlu1 %916  ;;  %v6170_v18 = vpop.permute.xlu0 %910  ;;  %v965_v51 = vcombine.high %v955_v12, %v963_v55  ;;  %v7170_v50 = vrot.slane %v6016_v34, 5  ;;  %v7171_v52 = vshrl.u32 %v6053_v62, 16 }
 0x110   : > { %v4725_v61 = vcombine.low %v1609_v21, %v1623_v56  ;;  %v1637_v22 = vsel %vm5894_vm4, %v1632_v32, %v7168_v60  ;;  %v998_v39 = vcombine.low %v989_v1, %v997_v7  ;;  %v999_v58 = vcombine.high %v989_v1, %v997_v7 }
 0x111   : > { %v2698_v59 = vsel %vm5894_vm4, %v2693_v17, %v7170_v50  ;;  %v4815_v28 = vcombine.low %v1623_v56, %v1637_v22  ;;  %v7172_v35 = vshrl.u32 %v6037_v3, 16  ;;  %v4726_v34 = vcombine.low %v1637_v22, %v6046_v41 }
 0x112   : > { %4999 = vmatprep.mubr.msk.bf16.mxu1 %vm1149_vm1, %v4725_v61  ;;  %v972_v11 = vrot.slane %v964_v36, %v5599_v33  ;;  %v6197_v57 = vrot.slane %v965_v51, %v5599_v33  ;;  %v6199_v31 = vpack.i.b16 %v851_v38, %v827_v19  ;;  %v4732_v62 = vcombine.low %v6068_v53, %v6072_v13 }
 0x113   : > { %v6191_v14 = vpack.i.b16 %v7172_v35, %v7171_v52  ;;  %5079 = vmatprep.mubr.msk.bf16.mxu0 %vm1149_vm1, %v4815_v28  ;;  %v1006_v3 = vrot.slane %v998_v39, %v5599_v33  ;;  %v6206_v24 = vrot.slane %v999_v58, %v5599_v33  ;;  %v929_v10 = vpop.permute.xlu1 %928  ;;  %v923_v21 = vpop.permute.xlu0 %922  ;;  %v6210_v54 = vpack.i.b16 %v6006_v45, %v6013_v46 }
 0x114   : > { %v4816_v2 = vcombine.low %v6046_v41, %v2698_v59  ;;  %5000 = vmatmul.mubr.msk.bf16.gmra.mrb[4].mxu1 %vm1149_vm1, %v4726_v34  ;;  %v980_v0 = vcombine.high %v972_v11, %v7153_v42  ;;  %v6217_v48 = vsel %vm1162_vm0, %v6185_v30, 0  ;;  %v1959_v9 = vshrl.u32 %v6068_v53, 16  ;;  %v7173_v34 = vld [vmem:[#allocation10_spill] sm:$0xff] }
 0x115   : > { %5005 = vmatprep.mubr.msk.bf16.mxu1 %vm1149_vm1, %v4732_v62  ;;  %v4822_v5 = vcombine.low %v6072_v13, %v6079_v16  ;;  %v1015_v45 = vcombine.high %v6206_v24, %v7153_v42  ;;  %v4733_v46 = vcombine.low %v6079_v16, %v6148_v63  ;;  %v981_v41 = vcombine.high %v6197_v57, %v7153_v42 }
 0x116   : > { %5080 = vmatmul.mubr.msk.bf16.gmra.mrb[4].mxu0 %vm1149_vm1, %v4816_v2  ;;  %v1014_v49 = vcombine.high %v1006_v3, %v7153_v42  ;;  %v4734_v44 = vcombine.low %v6210_v54, %v6087_v4  ;;  %v4823_v29 = vcombine.low %v6148_v63, %v6210_v54  ;;  %v1093_v37 = vshrl.u32 %v1006_v3, 16 }
 0x117   : > { %5085 = vmatprep.mubr.msk.bf16.mxu0 %vm1149_vm1, %v4822_v5  ;;  %v4824_v12 = vcombine.low %v6087_v4, %v6084_v43  ;;  %v4735_v27 = vcombine.low %v6084_v43, %v6191_v14  ;;  %v941_v15 = vpop.permute.xlu1 %940  ;;  %v935_v17 = vpop.permute.xlu0 %934  ;;  %v4825_v38 = vcombine.low %v6191_v14, %v6199_v31  ;;  %v1092_v32 = vshrl.u32 %v972_v11, 16 }
 0x118   : > { %v1098_v55 = vshrl.u32 %v980_v0, 16  ;;  %v6242_v47 = vpack.i.b16 %v1006_v3, %v972_v11  ;;  %v2985_v19 = vshrl.u32 %v6199_v31, 16  ;;  %v1111_v6 = vshrl.u32 %v1015_v45, 16 }
 0x119   : > { %v1065_v56 = vcombine.low %v6139_v20, %v929_v10  ;;  %v1041_v1 = vcombine.low %v5293_v26, %v923_v21  ;;  %v1073_v7 = vcombine.low %v6168_v23, %v941_v15  ;;  %v1110_v61 = vshrl.u32 %v981_v41, 16 }
 0x11a   : > { %v1099_v60 = vshrl.u32 %v1014_v49, 16  ;;  %v6250_v22 = vpack.i.b16 %v6206_v24, %v6197_v57  ;;  %v1049_v36 = vcombine.low %v6170_v18, %v935_v17  ;;  %v6253_v51 = vpack.i.b16 %v1093_v37, %v1092_v32 }
 0x11b   : > { %v1105_v40 = vshrl.u32 %v6206_v24, 16  ;;  %v1048_v50 = vrot.slane %v1041_v1, %v5586_v25  ;;  %v1080_v20 = vrot.slane %v1073_v7, %v5586_v25  ;;  %v708_v59 = vpop.permute.xlu0 %707  ;;  %v6258_v28 = vpack.i.b16 %v1014_v49, %v980_v0  ;;  %v710_v62 = vpop.permute.xlu1 %709  ;;  %v7175_v0 = vld [vmem:[#allocation11_spill] sm:$0xff] }
 0x11c   : > { %5006 = vmatmul.mubr.msk.bf16.vlgmr.msra.gmra.mrb[0].mxu1 %vm1149_vm1, %v4733_v46  ;;  %v1056_v23 = vrot.slane %v1049_v36, %v5586_v25  ;;  %v2988_v39 = vshll.u32 %v6199_v31, 16  ;;  %v786_v58 = vrot.slane %v708_v59, %v5586_v25  ;;  %v1104_v18 = vshrl.u32 %v6197_v57, 16  ;;  %v7174_v57 = vld [vmem:[#allocation8_spill] sm:$0xff] }
 0x11d   : > { %v6265_v52 = vpack.i.b16 %v1015_v45, %v981_v41  ;;  %v6267_v35 = vpack.i.b16 %v1111_v6, %v1110_v61  ;;  %5009 = vmatprep.mubr.msk.bf16.mxu1 %vm1149_vm1, %v4734_v44  ;;  %5014 = vmatpush3.bf16.msra.mxu1 %v7173_v34  ;;  %v1072_v11 = vrot.slane %v1065_v56, %v5586_v25  ;;  %v2987_v24 = vrot.slane %v2985_v19, 4 }
 0x11e   : > { %v6272_v3 = vpack.i.b16 %v1099_v60, %v1098_v55  ;;  %5086 = vmatmul.mubr.msk.bf16.vlgmr.msra.gmra.mrb[0].mxu0 %vm1149_vm1, %v4823_v29  ;;  %v2990_v10 = vrot.slane %v2988_v39, 5  ;;  %v787_v21 = vcombine.high %v786_v58, %v7153_v42  ;;  %5249 = vmatprep.subr.msk.bf16.mxu1 %vm1162_vm0, %v7174_v57  ;;  %v1962_v2 = vshll.u32 %v6068_v53, 16 }
 0x11f   : > { %5094 = vmatpush3.bf16.msra.mxu0 %v7175_v0  ;;  %5089 = vmatprep.mubr.msk.bf16.mxu0 %vm1149_vm1, %v4824_v12  ;;  %v1081_v5 = vcombine.low %v1072_v11, %v1080_v20  ;;  %v1057_v45 = vcombine.low %v1048_v50, %v1056_v23  ;;  %v794_v46 = vrot.slane %v786_v58, %v5599_v33  ;;  %v945_v41 = vpop.permute.xlu0 %944  ;;  %v7176_v29 = vmov 0.0  }
 0x120   : > { %v6282_v49 = vpack.i.b16 %v1105_v40, %v1104_v18  ;;  %v4839_v37 = vpack.i.b16 %v710_v62, %v7176_v29  ;;  %v801_v15 = vrot.slane %v787_v21, %v5599_v33  ;;  %5257 = vmatprep.subr.msk.bf16.mxu0 %vm1162_vm0, %v6185_v30  ;;  %v4741_v12 = vcombine.low %v6242_v47, %v6253_v51 }
 0x121   : > { %v802_v32 = vcombine.high %v794_v46, %v7153_v42  ;;  %v2271_v55 = vshrl.u32 %v6267_v35, 16  ;;  %v4831_v19 = vcombine.low %v6253_v51, %v6258_v28  ;;  %v2991_v6 = vor.u32 %v2990_v10, %v2987_v24 }
 0x122   : > { %v881_v56 = vshrl.u32 %v794_v46, 16  ;;  %v1023_v26 = vrot.slane %v945_v41, %v5586_v25  ;;  %v1088_v1 = vrot.slane %v1081_v5, %v5599_v33  ;;  %v1064_v30 = vrot.slane %v1057_v45, %v5599_v33 }
 0x123   : > { %v6300_v7 = vpack.i.b16 %v794_v46, %v7176_v29  ;;  %v4742_v61 = vcombine.low %v6258_v28, %v6272_v3  ;;  %v2996_v60 = vrot.slane %v4839_v37, 5  ;;  %v803_v36 = vcombine.high %v801_v15, %v7153_v42 }
 0x124   : > { %5010 = vmatmul.mubr.msk.bf16.gmra.mrb[4].mxu1 %vm1149_vm1, %v4735_v27  ;;  %v889_v40 = vshrl.u32 %v801_v15, 16  ;;  %v4743_v50 = vcombine.low %v6250_v22, %v6282_v49  ;;  %v885_v20 = vshrl.u32 %v802_v32, 16  ;;  %v4832_v59 = vcombine.low %v6272_v3, %v6250_v22 }
 0x125   : > { %5015 = vmatprep.mubr.msk.bf16.mxu1 %vm1149_vm1, %v4741_v12  ;;  %v4833_v23 = vcombine.low %v6282_v49, %v6265_v52  ;;  %v6316_v39 = vrot.slane %v2271_v55, 4  ;;  %v2992_v27 = vrot.slane %v2991_v6, 4  ;;  %v6323_v58 = vpack.i.b16 %v881_v56, %v7176_v29  ;;  %v6368_v56 = vld [vmem:[%s7126_s1 + $0xe] sm:$0x3] }
 0x126   : > { %5090 = vmatmul.mubr.msk.bf16.gmra.mrb[4].mxu0 %vm1149_vm1, %v4825_v38  ;;  %v6326_v18 = vpack.i.b16 %v802_v32, %v7176_v29  ;;  %v1024_v34 = vcombine.high %v1023_v26, %v7153_v42  ;;  %v6329_v11 = vpack.i.b16 %v1088_v1, %v1064_v30  ;;  %v1970_v62 = vrot.slane %v6300_v7, 5 }
 0x127   : > { %5095 = vmatprep.mubr.msk.bf16.mxu0 %vm1149_vm1, %v4831_v19  ;;  %v6334_v24 = vpack.i.b16 %v801_v15, %v7176_v29  ;;  %v1031_v31 = vrot.slane %v1023_v26, %v5599_v33  ;;  %v6339_v38 = vsel %vm5894_vm4, %v2992_v27, %v2996_v60  ;;  %v893_v10 = vshrl.u32 %v803_v36, 16  ;;  %v7177_v27 = vld [vmem:[#allocation12_spill] sm:$0xff] }
 0x128   : > { %v6342_v21 = vpack.i.b16 %v889_v40, %v7176_v29  ;;  %v1038_v57 = vrot.slane %v1024_v34, %v5599_v33  ;;  %v6346_v0 = vpack.i.b16 %v885_v20, %v7176_v29  ;;  %v6349_v5 = vpack.i.b16 %v803_v36, %v7176_v29 }
 0x129   : > { %v1039_v45 = vcombine.high %v1031_v31, %v7153_v42  ;;  %v1118_v46 = vshrl.u32 %v1031_v31, 16  ;;  %v1984_v41 = vrot.slane %v6323_v58, 5  ;;  %v1998_v37 = vrot.slane %v6326_v18, 5 }
 0x12a   : > { %v1126_v15 = vshrl.u32 %v1038_v57, 16  ;;  %v2274_v12 = vshll.u32 %v6267_v35, 16  ;;  %v6357_v55 = vcombine.high %v1038_v57, %v7153_v42  ;;  %v6360_v19 = vpack.i.b16 %v1031_v31, %v7176_v29 }
 0x12b   : > { %v6363_v6 = vpack.i.b16 %v1038_v57, %v7176_v29  ;;  %v6372_v1 = vpack.i.b16 %v893_v10, %v7176_v29  ;;  %v6376_v30 = vpack.i.b16 %v1118_v46, %v7176_v29  ;;  %v6379_v60 = vpack.i.b16 %v1039_v45, %v7176_v29 }
 0x12c   : > { %5016 = vmatmul.mubr.msk.bf16.vlgmr.msra.gmra.mrb[0].mxu1 %vm1149_vm1, %v4742_v61  ;;  %v1122_v20 = vshrl.u32 %v1039_v45, 16  ;;  %v4744_v34 = vcombine.low %v6265_v52, %v6267_v35  ;;  %v4850_v61 = vld [vmem:[%s7126_s1 + $0x1e] sm:$0x3]  ;;  %v6391_v31 = vpack.i.b16 %v1126_v15, %v7176_v29  ;;  %v6394_v10 = vrot.slane %v2274_v12, 5 }
 0x12d   : > { %5019 = vmatprep.mubr.msk.bf16.mxu1 %vm1149_vm1, %v4743_v50  ;;  %5024 = vmatpush3.bf16.msra.mxu1 %v7177_v27  ;;  %v3094_v57 = vshrl.u32 %v6329_v11, 16  ;;  %v6405_v15 = vpack.i.b16 %v6357_v55, %v7176_v29  ;;  %v1961_v50 = vrot.slane %v1959_v9, 4  ;;  %v1964_v45 = vrot.slane %v1962_v2, 5 }
 0x12e   : > { %5096 = vmatmul.mubr.msk.bf16.vlgmr.msra.gmra.mrb[0].mxu0 %vm1149_vm1, %v4832_v59  ;;  %5250 = vmatprep.subr.msk.bf16.mxu1 %vm1162_vm0, %v6368_v56  ;;  %v6417_v27 = vpack.i.b16 %v1122_v20, %v7176_v29  ;;  %v1973_v46 = vshrl.u32 %v6072_v13, 16  ;;  %v1990_v40 = vshll.u32 %v6079_v16, 16  ;;  %v2001_v9 = vshrl.u32 %v6148_v63, 16 }
 0x12f   : > { %5104 = vmatpush3.bf16.msra.mxu0 %v6217_v48  ;;  %5099 = vmatprep.mubr.msk.bf16.mxu0 %vm1149_vm1, %v4833_v23  ;;  %v1976_v48 = vshll.u32 %v6072_v13, 16  ;;  %v1987_v23 = vshrl.u32 %v6079_v16, 16  ;;  %v1965_v12 = vor.u32 %v1964_v45, %v1961_v50  ;;  %v4834_v53 = vcombine.low %v6267_v35, %v6329_v11 }
 0x130   : > { %5258 = vmatprep.subr.msk.bf16.mxu0 %vm1162_vm0, %v4850_v61  ;;  %v1975_v2 = vrot.slane %v1973_v46, 4  ;;  %v1992_v44 = vrot.slane %v1990_v40, 5  ;;  %v2003_v13 = vrot.slane %v2001_v9, 4  ;;  %v2004_v32 = vshll.u32 %v6148_v63, 16 }
 0x131   : > { %v1978_v26 = vrot.slane %v1976_v48, 5  ;;  %v1989_v20 = vrot.slane %v1987_v23, 4  ;;  %v1966_v17 = vrot.slane %v1965_v12, 4  ;;  %v6429_v36 = vrot.slane %v3094_v57, 4 }
 0x132   : > { %v2015_v16 = vshrl.u32 %v6210_v54, 16  ;;  %v2018_v45 = vshll.u32 %v6210_v54, 16  ;;  %v2226_v59 = vrot.slane %v6417_v27, 5  ;;  %v2032_v54 = vshll.u32 %v6087_v4, 16 }
 0x133   : > { %v1979_v50 = vor.u32 %v1978_v26, %v1975_v2  ;;  %v1971_v35 = vsel %vm5894_vm4, %v1966_v17, %v1970_v62  ;;  %v1993_v40 = vor.u32 %v1992_v44, %v1989_v20  ;;  %v2029_v26 = vshrl.u32 %v6087_v4, 16 }
 0x134   : > { %5020 = vmatmul.mubr.msk.bf16.gmra.mrb[4].mxu1 %vm1149_vm1, %v4744_v34  ;;  %v2006_v34 = vrot.slane %v2004_v32, 5  ;;  %v2017_v63 = vrot.slane %v2015_v16, 4  ;;  %v2020_v57 = vrot.slane %v2018_v45, 5  ;;  %v2311_v23 = vsel %vm1162_vm0, %v6368_v56, 0 }
 0x135   : > { %v1980_v46 = vrot.slane %v1979_v50, 4  ;;  %v1994_v12 = vrot.slane %v1993_v40, 4  ;;  %v2031_v44 = vrot.slane %v2029_v26, 4  ;;  %v3127_v62 = vsel %vm1162_vm0, %v4850_v61, 0 }
 0x136   : > { %5100 = vmatmul.mubr.msk.bf16.gmra.mrb[4].mxu0 %vm1149_vm1, %v4834_v53  ;;  %v2007_v48 = vor.u32 %v2006_v34, %v2003_v13  ;;  %v2021_v17 = vor.u32 %v2020_v57, %v2017_v63  ;;  %v2034_v4 = vrot.slane %v2032_v54, 5  ;;  %v2043_v56 = vshrl.u32 %v6084_v43, 16 }
 0x137   : > { %v1985_v7 = vsel %vm5894_vm4, %v1980_v46, %v1984_v41  ;;  %v1999_v9 = vsel %vm5894_vm4, %v1994_v12, %v1998_v37  ;;  %v2046_v58 = vshll.u32 %v6084_v43, 16  ;;  %v7178_v41 = vrot.slane %v6346_v0, 5 }
 0x138   : > { %v4758_v32 = vcombine.low %v1971_v35, %v1985_v7  ;;  %v2008_v53 = vrot.slane %v2007_v48, 4  ;;  %v4841_v2 = vcombine.low %v1985_v7, %v1999_v9  ;;  %v2022_v20 = vrot.slane %v2021_v17, 4 }
 0x139   : > { %v2035_v13 = vor.u32 %v2034_v4, %v2031_v44  ;;  %v2057_v18 = vshrl.u32 %v6191_v14, 16  ;;  %v2060_v37 = vshll.u32 %v6191_v14, 16  ;;  %v7179_v16 = vrot.slane %v6334_v24, 5 }
 0x13a   : > { %5025 = vmatprep.mubr.msk.bf16.mxu1 %vm1149_vm1, %v4758_v32  ;;  %v2013_v61 = vsel %vm5894_vm4, %v2008_v53, %v7178_v41  ;;  %5105 = vmatprep.mubr.msk.bf16.mxu0 %vm1149_vm1, %v4841_v2  ;;  %v2045_v45 = vrot.slane %v2043_v56, 4  ;;  %v2048_v35 = vrot.slane %v2046_v58, 5  ;;  %v2068_v57 = vrot.slane %v6372_v1, 5 }
 0x13b   : > { %v4759_v50 = vcombine.low %v1999_v9, %v2013_v61  ;;  %v2027_v43 = vsel %vm5894_vm4, %v2022_v20, %v7179_v16  ;;  %v2036_v40 = vrot.slane %v2035_v13, 4  ;;  %v2059_v34 = vrot.slane %v2057_v18, 4 }
 0x13c   : > { %v4842_v0 = vcombine.low %v2013_v61, %v2027_v43  ;;  %v2062_v46 = vrot.slane %v2060_v37, 5  ;;  %v2049_v63 = vor.u32 %v2048_v35, %v2045_v45  ;;  %v7180_v14 = vshrl.u32 %v6242_v47, 16 }
 0x13d   : > { %5026 = vmatmul.mubr.msk.bf16.vlgmr.msra.gmra.mrb[0].mxu1 %vm1149_vm1, %v4759_v50  ;;  %v7181_v12 = vshll.u32 %v6242_v47, 16  ;;  %v7182_v48 = vrot.slane %v6342_v21, 5  ;;  %v2187_v17 = vshrl.u32 %v6253_v51, 16  ;;  %v2190_v44 = vshll.u32 %v6253_v51, 16 }
 0x13e   : > { %v2175_v26 = vrot.slane %v7180_v14, 4  ;;  %5034 = vmatpush3.bf16.msra.mxu1 %v2311_v23  ;;  %5106 = vmatmul.mubr.msk.bf16.vlgmr.msra.gmra.mrb[0].mxu0 %vm1149_vm1, %v4842_v0  ;;  %v2063_v7 = vor.u32 %v2062_v46, %v2059_v34  ;;  %v2050_v32 = vrot.slane %v2049_v63, 4  ;;  %v2201_v47 = vshrl.u32 %v6258_v28, 16 }
 0x13f   : > { %v2178_v24 = vrot.slane %v7181_v12, 5  ;;  %v2041_v54 = vsel %vm5894_vm4, %v2036_v40, %v7182_v48  ;;  %5114 = vmatpush3.bf16.msra.mxu0 %v3127_v62  ;;  %v2189_v4 = vrot.slane %v2187_v17, 4  ;;  %v2192_v21 = vrot.slane %v2190_v44, 5 }
 0x140   : > { %v4760_v1 = vcombine.low %v2027_v43, %v2041_v54  ;;  %v2064_v53 = vrot.slane %v2063_v7, 4  ;;  %v2204_v2 = vshll.u32 %v6258_v28, 16  ;;  %v7183_v23 = vrot.slane %v6349_v5, 5 }
 0x141   : > { %v2179_v9 = vor.u32 %v2178_v24, %v2175_v26  ;;  %v2203_v51 = vrot.slane %v2201_v47, 4  ;;  %v2215_v62 = vshrl.u32 %v6272_v3, 16  ;;  %v2193_v61 = vor.u32 %v2192_v21, %v2189_v4  ;;  %v947_v24 = vpop.permute.xlu1 %946 }
 0x142   : > { %5029 = vmatprep.mubr.msk.bf16.mxu1 %vm1149_vm1, %v4760_v1  ;;  %v2055_v20 = vsel %vm5894_vm4, %v2050_v32, %v7183_v23  ;;  %v2069_v41 = vsel %vm5894_vm4, %v2064_v53, %v2068_v57  ;;  %v2206_v13 = vrot.slane %v2204_v2, 5  ;;  %v7184_v28 = vrot.slane %v6360_v19, 5 }
 0x143   : > { %v2180_v56 = vrot.slane %v2179_v9, 4  ;;  %v4843_v58 = vcombine.low %v2041_v54, %v2055_v20  ;;  %v4761_v18 = vcombine.low %v2055_v20, %v2069_v41  ;;  %v4844_v5 = vcombine.low %v2069_v41, %v6339_v38 }
 0x144   : > { %v2217_v50 = vrot.slane %v2215_v62, 4  ;;  %v2194_v16 = vrot.slane %v2193_v61, 4  ;;  %v2207_v43 = vor.u32 %v2206_v13, %v2203_v51  ;;  %v2218_v45 = vshll.u32 %v6272_v3, 16 }
 0x145   : > { %v2185_v37 = vsel %vm5894_vm4, %v2180_v56, %v7184_v28  ;;  %5109 = vmatprep.mubr.msk.bf16.mxu0 %vm1149_vm1, %v4843_v58  ;;  %v2229_v35 = vshrl.u32 %v6250_v22, 16  ;;  %5030 = vmatmul.mubr.msk.bf16.gmra.mrb[4].mxu1 %vm1149_vm1, %v4761_v18  ;;  %v2232_v40 = vshll.u32 %v6250_v22, 16  ;;  %v2243_v19 = vshrl.u32 %v6282_v49, 16 }
 0x146   : > { %v2246_v0 = vshll.u32 %v6282_v49, 16  ;;  %v2257_v34 = vshrl.u32 %v6265_v52, 16  ;;  %v7185_v38 = vrot.slane %v6376_v30, 5  ;;  %5110 = vmatmul.mubr.msk.bf16.gmra.mrb[4].mxu0 %vm1149_vm1, %v4844_v5  ;;  %v2208_v3 = vrot.slane %v2207_v43, 4  ;;  %v7191_v43 = vld [vmem:[#allocation5_spill] sm:$0xff] }
 0x147   : > { %v2220_v63 = vrot.slane %v2218_v45, 5  ;;  %v2231_v57 = vrot.slane %v2229_v35, 4  ;;  %v2234_v26 = vrot.slane %v2232_v40, 5  ;;  %v2245_v12 = vrot.slane %v2243_v19, 4 }
 0x148   : > { %v2199_v46 = vsel %vm5894_vm4, %v2194_v16, %v7185_v38  ;;  %v2248_v22 = vrot.slane %v2246_v0, 5  ;;  %v7186_v48 = vrot.slane %v6379_v60, 5  ;;  %v2259_v30 = vrot.slane %v2257_v34, 4 }
 0x149   : > { %v4775_v14 = vcombine.low %v2185_v37, %v2199_v46  ;;  %v2221_v54 = vor.u32 %v2220_v63, %v2217_v50  ;;  %v2260_v7 = vshll.u32 %v6265_v52, 16  ;;  %v7187_v17 = vshll.u32 %v6329_v11, 16 }
 0x14a   : > { %v2213_v49 = vsel %vm5894_vm4, %v2208_v3, %v7186_v48  ;;  %v2235_v32 = vor.u32 %v2234_v26, %v2231_v57  ;;  %v2249_v9 = vor.u32 %v2248_v22, %v2245_v12  ;;  %v7188_v47 = vshrl.u32 %v6357_v55, 16 }
 0x14b   : > { %v3099_v44 = vrot.slane %v7187_v17, 5  ;;  %5035 = vmatprep.mubr.msk.bf16.mxu1 %vm1149_vm1, %v4775_v14  ;;  %v4851_v1 = vcombine.low %v2199_v46, %v2213_v49  ;;  %v2222_v60 = vrot.slane %v2221_v54, 4  ;;  %v2262_v4 = vrot.slane %v2260_v7, 5  ;;  %v6558_v14 = vld [vmem:[#allocation2] ss:$0 sm:$0xff] }
 0x14c   : > { %v4773_v53 = vpack.i.b16 %v7188_v47, %v7176_v29  ;;  %v4849_v21 = vpack.i.b16 %v947_v24, %v7176_v29  ;;  %v2236_v2 = vrot.slane %v2235_v32, 4  ;;  %v2250_v52 = vrot.slane %v2249_v9, 4 }
 0x14d   : > { %5115 = vmatprep.mubr.msk.bf16.mxu0 %vm1149_vm1, %v4851_v1  ;;  %v2268_v11 = vrot.slane %v6405_v15, 5  ;;  %v2277_v23 = vor.u32 %v6394_v10, %v6316_v39  ;;  %v2227_v20 = vsel %vm5894_vm4, %v2222_v60, %v2226_v59  ;;  %v2263_v55 = vor.u32 %v2262_v4, %v2259_v30 }
 0x14e   : > { %v3100_v56 = vor.u32 %v3099_v44, %v6429_v36  ;;  %v4776_v51 = vcombine.low %v2213_v49, %v2227_v20  ;;  %v7189_v29 = vrot.slane %v6363_v6, 5  ;;  %v7190_v58 = vrot.slane %v6391_v31, 5 }
 0x14f   : > { %v2282_v39 = vrot.slane %v4773_v53, 5  ;;  %v2264_v41 = vrot.slane %v2263_v55, 4  ;;  %v2278_v59 = vrot.slane %v2277_v23, 4  ;;  %v3105_v61 = vrot.slane %v4849_v21, 5 }
 0x150   : > { %v2241_v62 = vsel %vm5894_vm4, %v2236_v2, %v7189_v29  ;;  %v2255_v15 = vsel %vm5894_vm4, %v2250_v52, %v7190_v58  ;;  %5036 = vmatmul.mubr.msk.bf16.vlgmr.msra.gmra.mrb[0].mxu1 %vm1149_vm1, %v4776_v51  ;;  %v3101_v36 = vrot.slane %v3100_v56, 4  ;;  %v5347_v5 = vmov 1966171168  }
 0x151   : > { %v4777_v10 = vcombine.low %v2241_v62, %v2255_v15  ;;  %v4852_v27 = vcombine.low %v2227_v20, %v2241_v62  ;;  %v2269_v6 = vsel %vm5894_vm4, %v2264_v41, %v2268_v11  ;;  %v2283_v13 = vsel %vm5894_vm4, %v2278_v59, %v2282_v39 }
 0x152   : > { %v4853_v31 = vcombine.low %v2255_v15, %v2269_v6  ;;  %v3106_v18 = vsel %vm5894_vm4, %v3101_v36, %v3105_v61  ;;  %v4778_v28 = vcombine.low %v2269_v6, %v2283_v13  ;;  %v3238_v50 = vunpack.c.l.s4 %v5347_v5 }
 0x153   : > { %5039 = vmatprep.mubr.msk.bf16.mxu1 %vm1149_vm1, %v4777_v10  ;;  %5116 = vmatmul.mubr.msk.bf16.vlgmr.msra.gmra.mrb[0].mxu0 %vm1149_vm1, %v4852_v27  ;;  %v4854_v37 = vcombine.low %v2283_v13, %v3106_v18  ;;  %v3605_v53 = vrot.slane %v7153_v42, 7 }
 0x154   : > { %5119 = vmatprep.mubr.msk.bf16.mxu0 %vm1149_vm1, %v4853_v31  ;;  %v3239_v16 = vunpack.c.0.s8 %v3238_v50 }
 0x155   : > { %v3645_v62 = vsel %vm6563_vm12, 0, %v3605_v53 }
 0x156   : > { %v6549_v45 = vsub.s32 %v3239_v16, %v7191_v43  ;;  %v6598_v50 = vsel %vm6572_vm14, %v3645_v62, 0 }
 0x158   : > { %5040 = vmatmul.mubr.msk.bf16.gmra.mrb[4].mxu1 %vm1149_vm1, %v4778_v28  ;;  %v4260_v35 = vrot.slane %v7153_v42, %v6549_v45 }
 0x15a   : > { %v4267_v40 = vrot.slane %v4260_v35, %v6549_v45 }
 0x15b   : > { %5120 = vmatmul.mubr.msk.bf16.gmra.mrb[4].mxu0 %vm1149_vm1, %v4854_v37  ;;  %vm3745_vm1 = vcmask 523264  }
 0x15c   : > { %v4284_v19 = vunpack.c.l.b16 %v4267_v40 }
 0x15e   : > { %v4310_v8 = vrot.slane %v4284_v19, 7  ;;  %v4312_v0 = vrot.slane %v4284_v19, 6  ;;  %v4314_v38 = vrot.slane %v4284_v19, 5 }
 0x160   : > { %v4311_v34 = vsel %vm3577_vm5, %v4310_v8, %v4284_v19  ;;  %v4461_v46 = vsel %vm3574_vm6, %v4310_v8, %v4284_v19 }
 0x161   : > { %v4313_v3 = vsel %vm3580_vm7, %v4312_v0, %v4311_v34  ;;  %v4462_v63 = vsel %vm3577_vm5, %v4312_v0, %v4461_v46 }
 0x162   : > { %v4315_v26 = vsel %vm4290_vm8, %v4314_v38, %v4313_v3  ;;  %v4463_v54 = vsel %vm3580_vm7, %v4314_v38, %v4462_v63 }
 0x163   : > { %v4320_v44 = vpack.c.b16 %v4315_v26, %v4315_v26  ;;  %v4468_v21 = vpack.c.b16 %v4463_v54, %v4463_v54 }
 0x165   : > { %v6578_v55 = vsel %vm6563_vm12, 0, %v4320_v44  ;;  %v6583_v27 = vsel %vm1162_vm0, %v4468_v21, 0 }
 0x166   : > { %v4332_v31 = vsel %vm6572_vm14, %v6578_v55, 0 }
 0x223   : > { %v5037_v57 = vpop.f32.mrb[0].mxu1 }
 0x224   : > { %v2347_v12 = vpop.f32.mrb[1].mxu1 }
 0x225   : > { %v5038_v24 = vpop.f32.mrb[2].mxu1 }
 0x226   : > { %v5117_v22 = vpop.f32.mrb[0].mxu0  ;;  %v2350_v30 = vpop.f32.mrb[3].mxu1 }
 0x227   : > { %v5123_v48 = vadd.f32 %v5117_v22, %v5037_v57  ;;  %v3163_v49 = vpop.f32.mrb[1].mxu0 }
 0x228   : > { %v5124_v7 = vadd.f32 %v3163_v49, %v2347_v12  ;;  %v5118_v17 = vpop.f32.mrb[2].mxu0 }
 0x229   : > { %v3211_v1 = vadd.f32 %v5123_v48, %v6558_v14  ;;  %v5125_v32 = vadd.f32 %v5118_v17, %v5038_v24  ;;  %v3166_v9 = vpop.f32.mrb[3].mxu0 }
 0x22a   : > { %v3209_v60 = vadd.f32 %v5124_v7, %v6558_v14  ;;  %v5126_v4 = vadd.f32 %v3166_v9, %v2350_v30 }
 0x22b   : > { %v3219_v2 = vmax.f32 %v3211_v1, 0.0  ;;  %v3212_v52 = vadd.f32 %v5125_v32, %v6558_v14  ;;  %v5041_v29 = vpop.f32.mrb[4].mxu1 }
 0x22c   : > { %v3217_v11 = vmax.f32 %v3209_v60, 0.0  ;;  %v3210_v23 = vadd.f32 %v5126_v4, %v6558_v14  ;;  %v2363_v39 = vpop.f32.mrb[5].mxu1 }
 0x22d   : > { %v3227_v56 = vpack.c.bf16 %v3219_v2, %v3219_v2  ;;  %v3220_v51 = vmax.f32 %v3212_v52, 0.0  ;;  %v6586_v6 = vpop.f32.mrb[6].mxu1 }
 0x22e   : > { %v3225_v58 = vpack.c.bf16 %v3217_v11, %v3217_v11  ;;  %v3218_v15 = vmax.f32 %v3210_v23, 0.0  ;;  %v5121_v10 = vpop.f32.mrb[4].mxu0  ;;  %v6592_v28 = vpop.f32.mrb[7].mxu1 }
 0x22f   : > { %v3963_v41 = vrot.slane %v3227_v56, %v6549_v45  ;;  %v3228_v59 = vpack.c.bf16 %v3220_v51, %v3220_v51  ;;  %v5127_v36 = vadd.f32 %v5121_v10, %v5041_v29  ;;  %v3179_v61 = vpop.f32.mrb[5].mxu0 }
 0x230   : > { %v3939_v13 = vrot.slane %v3225_v58, %v6549_v45  ;;  %v3226_v18 = vpack.c.bf16 %v3218_v15, %v3218_v15  ;;  %v5128_v37 = vadd.f32 %v3179_v61, %v2363_v39  ;;  %v6594_v5 = vpop.f32.mrb[6].mxu0 }
 0x231   : > { %v3964_v16 = vcombine.high %v3963_v41, %v3963_v41  ;;  %v3971_v43 = vrot.slane %v3963_v41, %v6549_v45  ;;  %v3267_v35 = vrot.slane %v3228_v59, %v6549_v45  ;;  %v6603_v40 = vadd.f32 %v5127_v36, %v6558_v14  ;;  %v6605_v19 = vpop.f32.mrb[7].mxu0 }
 0x232   : > { %v3940_v8 = vcombine.high %v3939_v13, %v3939_v13  ;;  %v3947_v0 = vrot.slane %v3939_v13, %v6549_v45  ;;  %v6609_v34 = vrot.slane %v3226_v18, %v6549_v45  ;;  %v6612_v38 = vadd.f32 %v5128_v37, %v6558_v14 }
 0x233   : > { %v3978_v46 = vrot.slane %v3964_v16, %v6549_v45  ;;  %v3979_v3 = vcombine.high %v3971_v43, %v3971_v43  ;;  %v4092_v63 = vrot.slane %v3971_v43, %v6549_v45  ;;  %v3268_v57 = vcombine.high %v3267_v35, %v3267_v35 }
 0x234   : > { %v3954_v26 = vrot.slane %v3940_v8, %v6549_v45  ;;  %v3955_v12 = vcombine.high %v3947_v0, %v3947_v0  ;;  %v4036_v22 = vrot.slane %v3947_v0, %v6549_v45  ;;  %v3275_v24 = vrot.slane %v3267_v35, %v6549_v45 }
 0x235   : > { %v3980_v48 = vcombine.high %v3978_v46, %v3978_v46  ;;  %v4099_v49 = vrot.slane %v4092_v63, %v6549_v45  ;;  %v4106_v54 = vrot.slane %v3978_v46, %v6549_v45  ;;  %v4120_v30 = vrot.slane %v3979_v3, %v6549_v45 }
 0x236   : > { %v3956_v7 = vcombine.high %v3954_v26, %v3954_v26  ;;  %v4043_v17 = vrot.slane %v4036_v22, %v6549_v45  ;;  %v4050_v44 = vrot.slane %v3954_v26, %v6549_v45  ;;  %v4064_v1 = vrot.slane %v3955_v12, %v6549_v45 }
 0x237   : > { %v4113_v32 = vrot.slane %v4106_v54, %v6549_v45  ;;  %v4127_v9 = vrot.slane %v4120_v30, %v6549_v45  ;;  %v4134_v53 = vrot.slane %v3980_v48, %v6549_v45  ;;  %v4272_v60 = vunpack.c.l.b16 %v4099_v49 }
 0x238   : > { %v4057_v4 = vrot.slane %v4050_v44, %v6549_v45  ;;  %v4071_v21 = vrot.slane %v4064_v1, %v6549_v45  ;;  %v4078_v2 = vrot.slane %v3956_v7, %v6549_v45  ;;  %v4268_v52 = vunpack.c.l.b16 %v4043_v17 }
 0x239   : > { %v4141_v11 = vrot.slane %v4134_v53, %v6549_v45  ;;  %v4273_v23 = vunpack.c.l.b16 %v4113_v32  ;;  %v4274_v56 = vunpack.c.l.b16 %v4127_v9  ;;  %v3282_v51 = vrot.slane %v3268_v57, %v6549_v45 }
 0x23a   : > { %v4085_v29 = vrot.slane %v4078_v2, %v6549_v45  ;;  %v4269_v62 = vunpack.c.l.b16 %v4057_v4  ;;  %v4270_v58 = vunpack.c.l.b16 %v4071_v21  ;;  %v3283_v15 = vcombine.high %v3275_v24, %v3275_v24 }
 0x23b   : > { %v6634_v39 = vunpack.c.l.b16 %v4141_v11  ;;  %v4292_v10 = vrot.slane %v4273_v23, 7  ;;  %v4294_v41 = vrot.slane %v4274_v56, 6  ;;  %v3284_v59 = vcombine.high %v3282_v51, %v3282_v51 }
 0x23c   : > { %v6636_v36 = vunpack.c.l.b16 %v4085_v29  ;;  %v4285_v61 = vrot.slane %v4269_v62, 7  ;;  %v4287_v13 = vrot.slane %v4270_v58, 6  ;;  %v3395_v18 = vrot.slane %v3275_v24, %v6549_v45 }
 0x23d   : > { %v4293_v37 = vsel %vm3577_vm5, %v4292_v10, %v4272_v60  ;;  %v4296_v16 = vrot.slane %v6634_v39, 5  ;;  %v4452_v43 = vsel %vm3574_vm6, %v4292_v10, %v4272_v60  ;;  %v3409_v35 = vrot.slane %v3282_v51, %v6549_v45 }
 0x23e   : > { %v6644_v8 = vsel %vm3580_vm7, %v4294_v41, %v4293_v37  ;;  %v6647_v0 = vsel %vm3577_vm5, %v4294_v41, %v4452_v43  ;;  %v4286_v46 = vsel %vm3577_vm5, %v4285_v61, %v4268_v52  ;;  %v4289_v3 = vrot.slane %v6636_v36, 5 }
 0x23f   : > { %v6652_v63 = vsel %vm3580_vm7, %v4287_v13, %v4286_v46  ;;  %v4449_v57 = vsel %vm3574_vm6, %v4285_v61, %v4268_v52  ;;  %v3402_v26 = vrot.slane %v3395_v18, %v6549_v45  ;;  %v3416_v12 = vrot.slane %v3409_v35, %v6549_v45 }
 0x240   : > { %v6658_v22 = vsel %vm3577_vm5, %v4287_v13, %v4449_v57  ;;  %v3423_v24 = vrot.slane %v3283_v15, %v6549_v45  ;;  %v3437_v48 = vrot.slane %v3284_v59, %v6549_v45  ;;  %v3244_v49 = vcombine.high %v6609_v34, %v6609_v34 }
 0x241   : > { %v3561_v54 = vunpack.c.l.b16 %v3402_v26  ;;  %v3562_v30 = vunpack.c.l.b16 %v3416_v12  ;;  %v3251_v7 = vrot.slane %v6609_v34, %v6549_v45  ;;  %v3223_v17 = vmax.f32 %v6603_v40, 0.0 }
 0x242   : > { %v3430_v44 = vrot.slane %v3423_v24, %v6549_v45  ;;  %v3444_v1 = vrot.slane %v3437_v48, %v6549_v45  ;;  %v3258_v32 = vrot.slane %v3244_v49, %v6549_v45  ;;  %v3221_v9 = vmax.f32 %v6612_v38, 0.0 }
 0x243   : > { %v3582_v53 = vrot.slane %v3561_v54, 1  ;;  %v3781_v60 = vrot.slane %v3562_v30, 7  ;;  %v3259_v4 = vcombine.high %v3251_v7, %v3251_v7  ;;  %v3339_v21 = vrot.slane %v3251_v7, %v6549_v45 }
 0x244   : > { %v3563_v2 = vunpack.c.l.b16 %v3430_v44  ;;  %v6672_v52 = vunpack.c.l.b16 %v3444_v1  ;;  %v3260_v11 = vcombine.high %v3258_v32, %v3258_v32  ;;  %v3353_v34 = vrot.slane %v3258_v32, %v6549_v45 }
 0x245   : > { %v3583_v40 = vsel %vm3574_vm6, %v3562_v30, %v3582_v53  ;;  %v3782_v23 = vsel %vm3574_vm6, %v3781_v60, %v3561_v54  ;;  %v3346_v56 = vrot.slane %v3339_v21, %v6549_v45  ;;  %v3367_v51 = vrot.slane %v3259_v4, %v6549_v45 }
 0x246   : > { %v3584_v38 = vrot.slane %v3563_v2, 7  ;;  %v3586_v29 = vrot.slane %v6672_v52, 6  ;;  %v3783_v62 = vrot.slane %v3563_v2, 6  ;;  %v3785_v58 = vrot.slane %v6672_v52, 5 }
 0x247   : > { %v3360_v15 = vrot.slane %v3353_v34, %v6549_v45  ;;  %v3374_v10 = vrot.slane %v3367_v51, %v6549_v45  ;;  %v3381_v41 = vrot.slane %v3260_v11, %v6549_v45  ;;  %v3557_v59 = vunpack.c.l.b16 %v3346_v56 }
 0x248   : > { %v3585_v61 = vsel %vm3577_vm5, %v3584_v38, %v3583_v40  ;;  %v6686_v13 = vsel %vm3577_vm5, %v3783_v62, %v3782_v23  ;;  %v3231_v18 = vpack.c.bf16 %v3223_v17, %v3223_v17  ;;  %v3229_v37 = vpack.c.bf16 %v3221_v9, %v3221_v9 }
 0x249   : > { %v6689_v43 = vsel %vm3580_vm7, %v3586_v29, %v3585_v61  ;;  %v3388_v35 = vrot.slane %v3381_v41, %v6549_v45  ;;  %v3558_v46 = vunpack.c.l.b16 %v3360_v15  ;;  %v3559_v57 = vunpack.c.l.b16 %v3374_v10 }
 0x24a   : > { %v3573_v26 = vrot.slane %v3557_v59, 1  ;;  %v4011_v12 = vrot.slane %v3231_v18, %v6549_v45  ;;  %v3987_v24 = vrot.slane %v3229_v37, %v6549_v45  ;;  %v5129_v48 = vadd.f32 %v6594_v5, %v6586_v6 }
 0x24b   : > { %v6696_v49 = vunpack.c.l.b16 %v3388_v35  ;;  %v3576_v54 = vrot.slane %v3559_v57, 7  ;;  %v3775_v30 = vrot.slane %v3558_v46, 7  ;;  %v3777_v7 = vrot.slane %v3559_v57, 6 }
 0x24c   : > { %v3575_v17 = vsel %vm3574_vm6, %v3558_v46, %v3573_v26  ;;  %v4012_v44 = vcombine.high %v4011_v12, %v4011_v12  ;;  %v4019_v1 = vrot.slane %v4011_v12, %v6549_v45  ;;  %v3988_v32 = vcombine.high %v3987_v24, %v3987_v24 }
 0x24d   : > { %v3578_v9 = vsel %vm3577_vm5, %v3576_v54, %v3575_v17  ;;  %v3579_v53 = vrot.slane %v6696_v49, 6  ;;  %v3776_v60 = vsel %vm3574_vm6, %v3775_v30, %v3557_v59  ;;  %v3779_v4 = vrot.slane %v6696_v49, 5 }
 0x24e   : > { %v6705_v6 = vsel %vm3577_vm5, %v3777_v7, %v3776_v60  ;;  %v4026_v5 = vrot.slane %v4012_v44, %v6549_v45  ;;  %v4027_v21 = vcombine.high %v4019_v1, %v4019_v1  ;;  %v4204_v2 = vrot.slane %v4019_v1, %v6549_v45 }
 0x24f   : > { %v6710_v11 = vsel %vm3580_vm7, %v3579_v53, %v3578_v9  ;;  %v3995_v34 = vrot.slane %v3987_v24, %v6549_v45  ;;  %v4002_v40 = vrot.slane %v3988_v32, %v6549_v45  ;;  %v3216_v23 = vadd.f32 %v5129_v48, %v6558_v14 }
 0x250   : > { %v4028_v56 = vcombine.high %v4026_v5, %v4026_v5  ;;  %v4211_v51 = vrot.slane %v4204_v2, %v6549_v45  ;;  %v4218_v38 = vrot.slane %v4026_v5, %v6549_v45  ;;  %v4232_v29 = vrot.slane %v4027_v21, %v6549_v45 }
 0x251   : > { %v4003_v62 = vcombine.high %v3995_v34, %v3995_v34  ;;  %v4004_v15 = vcombine.high %v4002_v40, %v4002_v40  ;;  %v4148_v10 = vrot.slane %v3995_v34, %v6549_v45  ;;  %v4162_v41 = vrot.slane %v4002_v40, %v6549_v45 }
 0x252   : > { %v4225_v59 = vrot.slane %v4218_v38, %v6549_v45  ;;  %v4239_v61 = vrot.slane %v4232_v29, %v6549_v45  ;;  %v4246_v18 = vrot.slane %v4028_v56, %v6549_v45  ;;  %v4280_v37 = vunpack.c.l.b16 %v4211_v51 }
 0x253   : > { %v4155_v35 = vrot.slane %v4148_v10, %v6549_v45  ;;  %v4169_v46 = vrot.slane %v4162_v41, %v6549_v45  ;;  %v4176_v57 = vrot.slane %v4003_v62, %v6549_v45  ;;  %v4190_v26 = vrot.slane %v4004_v15, %v6549_v45 }
 0x254   : > { %v4253_v12 = vrot.slane %v4246_v18, %v6549_v45  ;;  %v4281_v24 = vunpack.c.l.b16 %v4225_v59  ;;  %v4282_v48 = vunpack.c.l.b16 %v4239_v61  ;;  %v3224_v54 = vmax.f32 %v3216_v23, 0.0 }
 0x255   : > { %v4183_v30 = vrot.slane %v4176_v57, %v6549_v45  ;;  %v4197_v7 = vrot.slane %v4190_v26, %v6549_v45  ;;  %v4276_v17 = vunpack.c.l.b16 %v4155_v35  ;;  %v4277_v44 = vunpack.c.l.b16 %v4169_v46 }
 0x256   : > { %v6730_v1 = vunpack.c.l.b16 %v4253_v12  ;;  %v4304_v32 = vrot.slane %v4281_v24, 7  ;;  %v4306_v9 = vrot.slane %v4282_v48, 6  ;;  %v3232_v53 = vpack.c.bf16 %v3224_v54, %v3224_v54 }
 0x257   : > { %v4278_v60 = vunpack.c.l.b16 %v4183_v30  ;;  %v6732_v5 = vunpack.c.l.b16 %v4197_v7  ;;  %v4298_v21 = vrot.slane %v4277_v44, 7  ;;  %v5130_v2 = vadd.f32 %v6605_v19, %v6592_v28 }
 0x258   : > { %v4305_v34 = vsel %vm3577_vm5, %v4304_v32, %v4280_v37  ;;  %v4308_v40 = vrot.slane %v6730_v1, 5  ;;  %v4458_v23 = vsel %vm3574_vm6, %v4304_v32, %v4280_v37  ;;  %v3315_v56 = vrot.slane %v3232_v53, %v6549_v45 }
 0x259   : > { %v6741_v51 = vsel %vm3580_vm7, %v4306_v9, %v4305_v34  ;;  %v4459_v38 = vsel %vm3577_vm5, %v4306_v9, %v4458_v23  ;;  %v4299_v29 = vsel %vm3577_vm5, %v4298_v21, %v4276_v17  ;;  %v4300_v62 = vrot.slane %v4278_v60, 6 }
 0x25a   : > { %v4302_v15 = vrot.slane %v6732_v5, 5  ;;  %v4455_v28 = vsel %vm3574_vm6, %v4298_v21, %v4276_v17  ;;  %v3316_v19 = vcombine.high %v3315_v56, %v3315_v56  ;;  %v3323_v10 = vrot.slane %v3315_v56, %v6549_v45 }
 0x25b   : > { %v6749_v41 = vsel %vm3580_vm7, %v4300_v62, %v4299_v29  ;;  %v4456_v59 = vsel %vm3577_vm5, %v4300_v62, %v4455_v28  ;;  %v3214_v61 = vadd.f32 %v5130_v2, %v6558_v14  ;;  %v4451_v18 = vsel %vm3580_vm7, %v4289_v3, %v6658_v22 }
 0x25c   : > { %v3330_v37 = vrot.slane %v3316_v19, %v6549_v45  ;;  %v3331_v35 = vcombine.high %v3323_v10, %v3323_v10  ;;  %v3507_v46 = vrot.slane %v3323_v10, %v6549_v45  ;;  %v4454_v57 = vsel %vm3580_vm7, %v4296_v16, %v6647_v0 }
 0x25d   : > { %v3222_v26 = vmax.f32 %v3214_v61, 0.0  ;;  %v4457_v14 = vsel %vm3580_vm7, %v4302_v15, %v4456_v59  ;;  %v4460_v12 = vsel %vm3580_vm7, %v4308_v40, %v4459_v38  ;;  %v4464_v22 = vpack.c.b16 %v4451_v18, %v4451_v18 }
 0x25e   : > { %v3332_v24 = vcombine.high %v3330_v37, %v3330_v37  ;;  %v3514_v48 = vrot.slane %v3507_v46, %v6549_v45  ;;  %v3521_v54 = vrot.slane %v3330_v37, %v6549_v45  ;;  %v3535_v30 = vrot.slane %v3331_v35, %v6549_v45 }
 0x25f   : > { %v3230_v7 = vpack.c.bf16 %v3222_v26, %v3222_v26  ;;  %v4465_v17 = vpack.c.b16 %v4454_v57, %v4454_v57  ;;  %v4466_v0 = vpack.c.b16 %v4457_v14, %v4457_v14  ;;  %v4467_v44 = vpack.c.b16 %v4460_v12, %v4460_v12 }
 0x260   : > { %v3528_v32 = vrot.slane %v3521_v54, %v6549_v45  ;;  %v3542_v9 = vrot.slane %v3535_v30, %v6549_v45  ;;  %v3549_v53 = vrot.slane %v3332_v24, %v6549_v45  ;;  %v3569_v60 = vunpack.c.l.b16 %v3514_v48 }
 0x261   : > { %v3291_v21 = vrot.slane %v3230_v7, %v6549_v45  ;;  %v4470_v2 = vsel %vm1162_vm0, %v4464_v22, 0  ;;  %v4473_v34 = vsel %vm1162_vm0, %v4465_v17, 0  ;;  %v4475_v23 = vsel %vm1162_vm0, %v4466_v0, 0 }
 0x262   : > { %v3556_v56 = vrot.slane %v3549_v53, %v6549_v45  ;;  %v3570_v38 = vunpack.c.l.b16 %v3528_v32  ;;  %v3571_v29 = vunpack.c.l.b16 %v3542_v9  ;;  %v3594_v62 = vrot.slane %v3569_v60, 1 }
 0x263   : > { %v3292_v28 = vcombine.high %v3291_v21, %v3291_v21  ;;  %v3299_v19 = vrot.slane %v3291_v21, %v6549_v45  ;;  %v4477_v10 = vsel %vm1162_vm0, %v4467_v44, 0  ;;  %v4481_v59 = vcombine.low %v4470_v2, %v6583_v27 }
 0x264   : > { %v6783_v61 = vunpack.c.l.b16 %v3556_v56  ;;  %v3595_v18 = vsel %vm3574_vm6, %v3570_v38, %v3594_v62  ;;  %v3596_v37 = vrot.slane %v3571_v29, 7  ;;  %v3793_v35 = vrot.slane %v3570_v38, 7 }
 0x265   : > { %v3795_v46 = vrot.slane %v3571_v29, 6  ;;  %v3306_v57 = vrot.slane %v3292_v28, %v6549_v45  ;;  %v3307_v26 = vcombine.high %v3299_v19, %v3299_v19  ;;  %v3451_v14 = vrot.slane %v3299_v19, %v6549_v45 }
 0x266   : > { %v3597_v12 = vsel %vm3577_vm5, %v3596_v37, %v3595_v18  ;;  %v3598_v22 = vrot.slane %v6783_v61, 6  ;;  %v3794_v24 = vsel %vm3574_vm6, %v3793_v35, %v3569_v60  ;;  %v3797_v27 = vrot.slane %v6783_v61, 5 }
 0x267   : > { %v6793_v48 = vsel %vm3577_vm5, %v3795_v46, %v3794_v24  ;;  %v3308_v54 = vcombine.high %v3306_v57, %v3306_v57  ;;  %v3458_v30 = vrot.slane %v3451_v14, %v6549_v45  ;;  %v3465_v7 = vrot.slane %v3306_v57, %v6549_v45 }
 0x268   : > { %v3599_v17 = vsel %vm3580_vm7, %v3598_v22, %v3597_v12  ;;  %v3479_v0 = vrot.slane %v3307_v26, %v6549_v45  ;;  %v6800_v44 = vrot.slane %v4481_v59, %v5586_v25  ;;  %v6803_v32 = vrot.slane %v4475_v23, %v5586_v25 }
 0x269   : > { %v6805_v9 = vpack.c.b16 %v3599_v17, %v3599_v17  ;;  %v3472_v53 = vrot.slane %v3465_v7, %v6549_v45  ;;  %v3493_v60 = vrot.slane %v3308_v54, %v6549_v45  ;;  %v3565_v21 = vunpack.c.l.b16 %v3458_v30 }
 0x26a   : > { %v3486_v2 = vrot.slane %v3479_v0, %v6549_v45  ;;  %v4497_v56 = vcombine.low %v6800_v44, %v6803_v32  ;;  %v6813_v38 = vrot.slane %v4473_v34, %v5586_v25  ;;  %v6816_v29 = vrot.slane %v4477_v10, %v5586_v25 }
 0x26b   : > { %v3500_v23 = vrot.slane %v3493_v60, %v6549_v45  ;;  %v3566_v62 = vunpack.c.l.b16 %v3472_v53  ;;  %v3588_v28 = vrot.slane %v3565_v21, 1  ;;  %v4291_v19 = vsel %vm4290_vm8, %v4289_v3, %v6652_v63 }
 0x26c   : > { %v3567_v59 = vunpack.c.l.b16 %v3486_v2  ;;  %v6824_v18 = vrot.slane %v4497_v56, %v5599_v33  ;;  %v4530_v34 = vcombine.low %v6813_v38, %v6816_v29  ;;  %v4297_v10 = vsel %vm4290_vm8, %v4296_v16, %v6644_v8 }
 0x26d   : > { %v3568_v45 = vunpack.c.l.b16 %v3500_v23  ;;  %v3589_v37 = vsel %vm3574_vm6, %v3566_v62, %v3588_v28  ;;  %v3787_v35 = vrot.slane %v3566_v62, 7  ;;  %v4303_v36 = vsel %vm4290_vm8, %v4302_v15, %v6749_v41 }
 0x26e   : > { %v3590_v3 = vrot.slane %v3567_v59, 7  ;;  %v3789_v63 = vrot.slane %v3567_v59, 6  ;;  %v6838_v46 = vrot.slane %v4530_v34, %v5599_v33  ;;  %v4550_v57 = vshrl.u32 %v6824_v18, 16 }
 0x26f   : > { %v3592_v26 = vrot.slane %v3568_v45, 6  ;;  %v3788_v39 = vsel %vm3574_vm6, %v3787_v35, %v3565_v21  ;;  %v3791_v16 = vrot.slane %v3568_v45, 5  ;;  %v4309_v8 = vsel %vm4290_vm8, %v4308_v40, %v6741_v51 }
 0x270   : > { %v3591_v5 = vsel %vm3577_vm5, %v3590_v3, %v3589_v37  ;;  %v3790_v15 = vsel %vm3577_vm5, %v3789_v63, %v3788_v39  ;;  %v4551_v41 = vshrl.u32 %v6838_v46, 16  ;;  %v4316_v14 = vpack.c.b16 %v4291_v19, %v4291_v19 }
 0x271   : > { %v6850_v12 = vsel %vm3580_vm7, %v3592_v26, %v3591_v5  ;;  %v4317_v22 = vpack.c.b16 %v4297_v10, %v4297_v10  ;;  %v4318_v24 = vpack.c.b16 %v4303_v36, %v4303_v36  ;;  %v4319_v54 = vpack.c.b16 %v4309_v8, %v4309_v8 }
 0x272   : > { %v4552_v30 = vpack.i.b16 %v4551_v41, %v4550_v57  ;;  %v4326_v7 = vsel %vm6563_vm12, 0, %v4316_v14  ;;  %v3780_v1 = vsel %vm3580_vm7, %v3779_v4, %v6705_v6  ;;  %v3786_v40 = vsel %vm3580_vm7, %v3785_v58, %v6686_v13 }
 0x273   : > { %v4327_v51 = vsel %vm6563_vm12, 0, %v4317_v22  ;;  %v4328_v17 = vsel %vm6563_vm12, 0, %v4318_v24  ;;  %v4329_v0 = vsel %vm6563_vm12, 0, %v4319_v54  ;;  %v4331_v53 = vsel %vm6572_vm14, %v4326_v7, 0 }
 0x274   : > { %4565 = vrot.lane.b32.xlu1 %v4552_v30, %s5348_s23  ;;  %v4333_v52 = vcombine.low %v4331_v53, %v4332_v31  ;;  %v4341_v58 = vsel %vm6572_vm14, %v4328_v17, 0  ;;  %v4366_v13 = vsel %vm6572_vm14, %v4327_v51, 0  ;;  %v4374_v49 = vsel %vm6572_vm14, %v4329_v0, 0 }
 0x275   : > { %v4348_v4 = vrot.slane %v4341_v58, %v5586_v25  ;;  %v4373_v6 = vrot.slane %v4366_v13, %v5586_v25  ;;  %v4381_v60 = vrot.slane %v4374_v49, %v5586_v25  ;;  %v3792_v21 = vsel %vm3580_vm7, %v3791_v16, %v3790_v15 }
 0x276   : > { %v4340_v55 = vrot.slane %v4333_v52, %v5586_v25  ;;  %v3798_v31 = vsel %vm3580_vm7, %v3797_v27, %v6793_v48  ;;  %v3799_v2 = vpack.c.b16 %v3780_v1, %v3780_v1  ;;  %v3800_v56 = vpack.c.b16 %v3786_v40, %v3786_v40 }
 0x277   : > { %v4382_v23 = vcombine.low %v4373_v6, %v4381_v60  ;;  %v3801_v62 = vpack.c.b16 %v3792_v21, %v3792_v21  ;;  %v3802_v28 = vpack.c.b16 %v3798_v31, %v3798_v31  ;;  %v4383_v19 = vcombine.high %v4373_v6, %v4381_v60 }
 0x278   : > { %v4349_v59 = vcombine.low %v4340_v55, %v4348_v4  ;;  %v3805_v34 = vsel %vm1162_vm0, %v3799_v2, 0  ;;  %v3807_v10 = vsel %vm1162_vm0, %v3800_v56, 0  ;;  %v4350_v45 = vcombine.high %v4340_v55, %v4348_v4 }
 0x279   : > { %v6893_v37 = vrot.slane %v4382_v23, %v5599_v33  ;;  %v3809_v35 = vsel %vm1162_vm0, %v3801_v62, 0  ;;  %v3811_v61 = vsel %vm1162_vm0, %v3802_v28, 0  ;;  %v3828_v27 = vrot.slane %v3807_v10, %v5586_v25 }
 0x27a   : > { %v6899_v48 = vrot.slane %v4349_v59, %v5599_v33  ;;  %v3813_v36 = vcombine.low %v7153_v42, %v3811_v61  ;;  %v3853_v3 = vrot.slane %v3805_v34, %v5586_v25  ;;  %v3861_v63 = vrot.slane %v3809_v35, %v5586_v25 }
 0x27b   : > { %v4403_v57 = vshrl.u32 %v6893_v37, 16  ;;  %v6906_v26 = vrot.slane %v4350_v45, %v5599_v33  ;;  %v6909_v39 = vrot.slane %v4383_v19, %v5599_v33  ;;  %v6913_v16 = vcombine.high %v6893_v37, %v7153_v42 }
 0x27c   : > { %v4402_v8 = vshrl.u32 %v6899_v48, 16  ;;  %v3820_v5 = vrot.slane %v3813_v36, %v5586_v25  ;;  %v3862_v15 = vcombine.low %v3853_v3, %v3861_v63  ;;  %v3863_v41 = vcombine.high %v3853_v3, %v3861_v63 }
 0x27d   : > { %v4414_v14 = vshrl.u32 %v6906_v26, 16  ;;  %v4415_v22 = vshrl.u32 %v6909_v39, 16  ;;  %v6921_v24 = vcombine.high %v6899_v48, %v7153_v42  ;;  %v4409_v54 = vshrl.u32 %v6913_v16, 16 }
 0x27e   : > { %v4404_v30 = vpack.i.b16 %v4403_v57, %v4402_v8  ;;  %v3829_v7 = vcombine.low %v3820_v5, %v3828_v27  ;;  %v6925_v1 = vrot.slane %v3862_v15, %v5599_v33  ;;  %v3830_v40 = vcombine.high %v3820_v5, %v3828_v27 }
 0x27f   : > { %v4416_v51 = vpack.i.b16 %v4415_v22, %v4414_v14  ;;  %v6928_v17 = vrot.slane %v3863_v41, %v5599_v33  ;;  %v4408_v0 = vshrl.u32 %v6921_v24, 16  ;;  %v3600_v53 = vpack.c.b16 %v6710_v11, %v6710_v11 }
 0x280   : > { %4417 = vrot.lane.b32.xlu0 %v4404_v30, %s5348_s23  ;;  %v6935_v52 = vrot.slane %v3829_v7, %v5599_v33  ;;  %v3883_v58 = vshrl.u32 %v6925_v1, 16  ;;  %v6939_v13 = vrot.slane %v3830_v40, %v5599_v33  ;;  %v6943_v49 = vcombine.high %v6925_v1, %v7153_v42 }
 0x281   : > { %v3895_v4 = vshrl.u32 %v6928_v17, 16  ;;  %v4410_v6 = vpack.i.b16 %v4409_v54, %v4408_v0  ;;  %v3601_v11 = vpack.c.b16 %v6689_v43, %v6689_v43  ;;  %v3602_v60 = vpack.c.b16 %v6850_v12, %v6850_v12 }
 0x282   : > { %v3882_v21 = vshrl.u32 %v6935_v52, 16  ;;  %v3894_v55 = vshrl.u32 %v6939_v13, 16  ;;  %v6954_v31 = vcombine.high %v6935_v52, %v7153_v42  ;;  %v3889_v2 = vshrl.u32 %v6943_v49, 16 }
 0x283   : > { %v3610_v56 = vshrl.u32 %v3600_v53, 16  ;;  %v3613_v23 = vshll.u32 %v3600_v53, 16  ;;  %v3617_v62 = vshrl.u32 %v3601_v11, 16  ;;  %v3620_v28 = vshll.u32 %v3601_v11, 16 }
 0x284   : > { %v3884_v19 = vpack.i.b16 %v3883_v58, %v3882_v21  ;;  %4421 = vrot.lane.b32.xlu0 %v4416_v51, %s5348_s23  ;;  %v3896_v43 = vpack.i.b16 %v3895_v4, %v3894_v55  ;;  %v3888_v12 = vshrl.u32 %v6954_v31, 16  ;;  %v3624_v59 = vshrl.u32 %v3602_v60, 16 }
 0x285   : > { %v3612_v34 = vrot.slane %v3610_v56, 7  ;;  %v3619_v10 = vrot.slane %v3617_v62, 7  ;;  %v3627_v45 = vshll.u32 %v3602_v60, 16  ;;  %v3631_v35 = vshrl.u32 %v6805_v9, 16 }
 0x286   : > { %3897 = vrot.lane.b32.xlu1 %v3884_v19, %s5348_s23  ;;  %v3890_v61 = vpack.i.b16 %v3889_v2, %v3888_v12  ;;  %v3626_v27 = vrot.slane %v3624_v59, 7  ;;  %v3634_v36 = vshll.u32 %v6805_v9, 16  ;;  %v4498_v3 = vcombine.high %v6800_v44, %v6803_v32 }
 0x287   : > { %v3615_v63 = vor.u32 %v3613_v23, %v3612_v34  ;;  %v3622_v57 = vor.u32 %v3620_v28, %v3619_v10  ;;  %v3633_v8 = vrot.slane %v3631_v35, 7  ;;  %v4531_v5 = vcombine.high %v6813_v38, %v6816_v29 }
 0x288   : > { %3899 = vrot.lane.b32.xlu0 %v3890_v61, %s5348_s23  ;;  %v3629_v15 = vor.u32 %v3627_v45, %v3626_v27  ;;  %v6968_v41 = vrot.slane %v4498_v3, %v5599_v33  ;;  %v6972_v14 = vcombine.high %v6824_v18, %v7153_v42  ;;  %v6976_v9 = vcombine.high %v6838_v46, %v7153_v42 }
 0x289   : > { %v3636_v44 = vor.u32 %v3634_v36, %v3633_v8  ;;  %v3646_v32 = vsel %vm6563_vm12, 0, %v3615_v63  ;;  %v3647_v38 = vsel %vm6563_vm12, 0, %v3622_v57  ;;  %v6983_v29 = vrot.slane %v4531_v5, %v5599_v33 }
 0x28a   : > { %3901 = vrot.lane.b32.xlu1 %v3896_v43, %s5348_s23  ;;  %v3648_v22 = vsel %vm6563_vm12, 0, %v3629_v15  ;;  %v3663_v54 = vsel %vm6572_vm14, %v3647_v38, 0  ;;  %v3688_v30 = vsel %vm6572_vm14, %v3646_v32, 0  ;;  %v4562_v7 = vshrl.u32 %v6968_v41, 16  ;;  %v4872_v15 = vld [vmem:[%s7058_s27 + $0x20] sm:$0x7] }
 0x28b   : > { %v3649_v40 = vsel %vm6563_vm12, 0, %v3636_v44  ;;  %v3670_v51 = vrot.slane %v3663_v54, %v5586_v25  ;;  %v3695_v0 = vrot.slane %v3688_v30, %v5586_v25  ;;  %v3696_v53 = vsel %vm6572_vm14, %v3648_v22, 0 }
 0x28c   : > { %v3654_v58 = vsel %vm6572_vm14, %v3649_v40, 0  ;;  %v3703_v4 = vrot.slane %v3696_v53, %v5586_v25  ;;  %v4563_v11 = vshrl.u32 %v6983_v29, 16  ;;  %v4556_v60 = vshrl.u32 %v6972_v14, 16  ;;  %v4864_v40 = vld [vmem:[%s7058_s27 + $0xc] sm:$0x77] }
 0x28d   : > { %v3655_v21 = vcombine.low %v6598_v50, %v3654_v58  ;;  %v4557_v47 = vshrl.u32 %v6976_v9, 16  ;;  %v4549_v55 = vpack.i.b16 %v6838_v46, %v6824_v18  ;;  %v4401_v2 = vpack.i.b16 %v6893_v37, %v6899_v48  ;;  %v4866_v58 = vld [vmem:[%s7058_s27 + $0x14] sm:$0x7] }
 0x28e   : > { %4419 = vrot.lane.b32.xlu1 %v4410_v6, %s5348_s23  ;;  %v3704_v56 = vcombine.low %v3695_v0, %v3703_v4  ;;  %v3705_v23 = vcombine.high %v3695_v0, %v3703_v4  ;;  %v4564_v62 = vpack.i.b16 %v4563_v11, %v4562_v7  ;;  %v3881_v28 = vpack.i.b16 %v6925_v1, %v6935_v52 }
 0x28f   : > { %v3662_v19 = vrot.slane %v3655_v21, %v5586_v25  ;;  %v4558_v43 = vpack.i.b16 %v4557_v47, %v4556_v60  ;;  %v4413_v50 = vpack.i.b16 %v6909_v39, %v6906_v26  ;;  %v3893_v12 = vpack.i.b16 %v6928_v17, %v6939_v13 }
 0x290   : > { %v7019_v59 = vrot.slane %v3704_v56, %v5599_v33  ;;  %v7022_v6 = vrot.slane %v3705_v23, %v5599_v33  ;;  %v3887_v1 = vpack.i.b16 %v6943_v49, %v6954_v31  ;;  %v4407_v25 = vpack.i.b16 %v6913_v16, %v6921_v24  ;;  %v4870_v23 = vld [vmem:[%s7058_s27 + $0x18] sm:$0x77] }
 0x291   : > { %v3671_v34 = vcombine.low %v3662_v19, %v3670_v51  ;;  %v3672_v10 = vcombine.high %v3662_v19, %v3670_v51  ;;  %v4561_v39 = vpack.i.b16 %v6983_v29, %v6968_v41  ;;  %v4555_v49 = vpack.i.b16 %v6976_v9, %v6972_v14 }
 0x292   : > { %v3725_v52 = vshrl.u32 %v7019_v59, 16  ;;  %v7031_v26 = vcombine.high %v7019_v59, %v7153_v42  ;;  %v3737_v45 = vshrl.u32 %v7022_v6, 16  ;;  %vm3766_vm0 = vsmask.f32 6400 }
 0x293   : > { %v3679_v17 = vrot.slane %v3671_v34, %v5599_v33  ;;  %v7037_v13 = vrot.slane %v3672_v10, %v5599_v33  ;;  %vm3767_vm2 = vmand %vm3765_vm15, %vm3766_vm0 }
 0x294   : > { %v3731_v16 = vshrl.u32 %v7031_v26, 16  ;;  %vm7068_vm3 = vmor %vm3767_vm2, %vm6572_vm14 }
 0x295   : > { %v3724_v24 = vshrl.u32 %v3679_v17, 16  ;;  %v3680_v31 = vcombine.high %v3679_v17, %v7153_v42  ;;  %v3736_v35 = vshrl.u32 %v7037_v13, 16  ;;  %v3723_v61 = vpack.i.b16 %v7019_v59, %v3679_v17  ;;  %v3769_v59 = vld [vmem:[%s7058_s27] sm:$0x77] }
 0x296   : > { %v3735_v27 = vpack.i.b16 %v7022_v6, %v7037_v13  ;;  %v3772_v6 = vld [vmem:[%s7058_s27 + $0x8] sm:$0x7] }
 0x297   : > { %v3726_v33 = vpack.i.b16 %v3725_v52, %v3724_v24  ;;  %v3730_v36 = vshrl.u32 %v3680_v31, 16  ;;  %v3738_v3 = vpack.i.b16 %v3737_v45, %v3736_v35  ;;  %v3729_v63 = vpack.i.b16 %v7031_v26, %v3680_v31  ;;  %v4878_v52 = vld [vmem:[%s7058_s27 + $0x2c] sm:$0x7]  ;;  %v4876_v24 = vld [vmem:[%s7058_s27 + $0x24] sm:$0x77] }
 0x299   : > { %3739 = vrot.lane.b32.xlu0 %v3726_v33, %s5348_s23  ;;  %v3732_v57 = vpack.i.b16 %v3731_v16, %v3730_v36 }
 0x29b   : > { %3741 = vrot.lane.b32.xlu1 %v3732_v57, %s5348_s23 }
 0x29d   : > { %3743 = vrot.lane.b32.xlu0 %v3738_v3, %s5348_s23 }
 0x29f   : > { %4569 = vrot.lane.b32.xlu1 %v4564_v62, %s5348_s23 }
 0x2a1   : > { %4567 = vrot.lane.b32.xlu0 %v4558_v43, %s5348_s23 }
 0x2e6   : > { %v4566_v42 = vpop.permute.xlu1 %4565 }
 0x2e7   : > { %v4573_v16 = vsel %vm3745_vm1, %v4549_v55, %v4566_v42 }
 0x2f2   : > { %v4418_v8 = vpop.permute.xlu0 %4417 }
 0x2f3   : > { %v4425_v56 = vsel %vm3745_vm1, %v4401_v2, %v4418_v8 }
 0x2f6   : > { %v4422_v5 = vpop.permute.xlu0 %4421 }
 0x2f7   : > { %v4431_v44 = vsel %vm3745_vm1, %v4413_v50, %v4422_v5 }
 0x2f8   : > { %v3898_v32 = vpop.permute.xlu1 %3897  ;;  %v4869_v38 = vcombine.low %v4431_v44, %v4431_v44 }
 0x2f9   : > { %v3905_v30 = vsel %vm3745_vm1, %v3881_v28, %v3898_v32 }
 0x2fa   : > { %v4447_v22 = vsel %vm6572_vm14, %v4869_v38, %v4872_v15  ;;  %v3900_v54 = vpop.permute.xlu0 %3899 }
 0x2fb   : > { %4873 = vst [vmem:[%s7058_s27 + $0x20] sm:$0x7] %v4447_v22  ;;  %v3908_v51 = vsel %vm3745_vm1, %v3887_v1, %v3900_v54 }
 0x2fc   : > { %v3902_v0 = vpop.permute.xlu1 %3901  ;;  %v4862_v53 = vcombine.low %v3905_v30, %v3908_v51 }
 0x2fd   : > { %v3911_v4 = vsel %vm3745_vm1, %v3893_v12, %v3902_v0 }
 0x2fe   : > { %v4863_v11 = vcombine.low %v3911_v4, %v3911_v4  ;;  %v3924_v60 = vsel %vm7068_vm3, %v4862_v53, %v4864_v40 }
 0x2ff   : > { %4865 = vst [vmem:[%s7058_s27 + $0xc] sm:$0x77] %v3924_v60 }
 0x300   : > { %v3927_v21 = vsel %vm6572_vm14, %v4863_v11, %v4866_v58  ;;  %v4420_v47 = vpop.permute.xlu1 %4419 }
 0x301   : > { %4867 = vst [vmem:[%s7058_s27 + $0x14] sm:$0x7] %v3927_v21  ;;  %v4428_v62 = vsel %vm3745_vm1, %v4407_v25, %v4420_v47 }
 0x302   : > { %v4868_v28 = vcombine.low %v4425_v56, %v4428_v62 }
 0x304   : > { %v4444_v19 = vsel %vm7068_vm3, %v4868_v28, %v4870_v23 }
 0x305   : > { %4871 = vst [vmem:[%s7058_s27 + $0x18] sm:$0x77] %v4444_v19 }
 0x30b   : > { %v3740_v43 = vpop.permute.xlu0 %3739 }
 0x30c   : > { %v3748_v12 = vsel %vm3745_vm1, %v3723_v61, %v3740_v43 }
 0x30d   : > { %v3742_v50 = vpop.permute.xlu1 %3741 }
 0x30e   : > { %v3751_v37 = vsel %vm3745_vm1, %v3729_v63, %v3742_v50 }
 0x30f   : > { %v4860_v48 = vcombine.low %v3748_v12, %v3751_v37  ;;  %v3744_v2 = vpop.permute.xlu0 %3743 }
 0x310   : > { %v3754_v34 = vsel %vm3745_vm1, %v3735_v27, %v3744_v2 }
 0x311   : > { %v3770_v10 = vsel %vm7068_vm3, %v4860_v48, %v3769_v59  ;;  %v4861_v1 = vcombine.low %v3754_v34, %v3754_v34  ;;  %v4570_v25 = vpop.permute.xlu1 %4569 }
 0x312   : > { %3771 = vst [vmem:[%s7058_s27] sm:$0x77] %v3770_v10  ;;  %v4579_v26 = vsel %vm3745_vm1, %v4561_v39, %v4570_v25 }
 0x313   : > { %v3773_v17 = vsel %vm6572_vm14, %v4861_v1, %v3772_v6  ;;  %v4875_v13 = vcombine.low %v4579_v26, %v4579_v26  ;;  %v4568_v45 = vpop.permute.xlu0 %4567 }
 0x314   : > { %3774 = vst [vmem:[%s7058_s27 + $0x8] sm:$0x7] %v3773_v17  ;;  %v4576_v31 = vsel %vm3745_vm1, %v4555_v49, %v4568_v45 }
 0x315   : > { %v4595_v41 = vsel %vm6572_vm14, %v4875_v13, %v4878_v52  ;;  %v4874_v29 = vcombine.low %v4573_v16, %v4576_v31 }
 0x316   : > { %4879 = vst [vmem:[%s7058_s27 + $0x2c] sm:$0x7] %v4595_v41 }
 0x317   : > { %v4592_v39 = vsel %vm7068_vm3, %v4874_v29, %v4876_v24 }
 0x318   : > { %4877 = vst [vmem:[%s7058_s27 + $0x24] sm:$0x77] %v4592_v39 }
 0x319 PF: > { %s14_s12 = sadd.s32 1, %s5332_s12  }
 0x31a   : > { %p11_p2 = scmp.ge.s32.totalorder %s14_s12, 4  }
 0x31c   :  { %13 = sbr.rel (!%p11_p2) target bundleno = 1 (0x1), region = 88 }
 0x323   :  { %4618 = vsyncpa [#allocation3], 1 }
 0x324   :  { %4620 = vsyncpa [#allocation3 + $0x1], 1 }

// kernel: ac_discriminator_forward.6
= control target key start
LH: loop header
LB: loop body
LE: loop exit
PB: predicated region body
PF: predicated region fallthrough
CT: control target
= control target key end

     0   :  { %s4240_s12 = smov 0   ;;  %s5339_s0 = inlined_call_operand.vmem [shape: bf16[2,4,3,384], index: 0, kind: input, shape index: {}]   ;;  %s5340_s1 = inlined_call_operand.vmem [shape: bf16[16,128,256], index: 1, kind: input, shape index: {}]   ;;  %s5341_s2 = inlined_call_operand.vmem [shape: f32[1,256], index: 2, kind: input, shape index: {}]   ;;  %s5342_s3 = inlined_call_operand.vmem [shape: bf16[2,4,2,512], index: 3, kind: output, shape index: {}]  }
   0x1 LB: > { %s3284_s13 = sadd.s32 4294967295, %s4214_s12   ;;  %p3288_p0 = scmp.ge.s32.totalorder %s4214_s12, 1  ;;  %s4214_s12 = sphi %s4240_s12, %s13_s12  }
   0x2   : > { %p137_p1 = scmp.lt.s32.totalorder %s4214_s12, 3 }
   0x4   : > { %p138_p2 = pnand %p3288_p0, %p137_p1 }
   0x5   : > { %v3824_v0 = vld [vmem:[%s5340_s1 + $0x84] ss:$8 sps:$4 sm:$0xff] (!%p138_p2)   ;;  %v4216_v2 = vmov (!%p138_p2), 0   ;;  %v3828_v3 = vld [vmem:[%s5340_s1 + $0x80] ss:$8 sps:$4 sm:$0xff] (!%p138_p2)   ;;  %p160_p3 = scmp.lt.s32.totalorder (!%p138_p2), %s3284_s13, 1  ;;  %v179_v20 = vlaneseq (!%p138_p2) }
   0x6   : > { %141 = sbr.rel (%p138_p2) target bundleno = 512 (0x200), region = 32  ;;  %v3826_v1 = vld [vmem:[%s5340_s1 + $0x4] ss:$8 sps:$4 sm:$0xff] (!%p138_p2)   ;;  %462 = vmatprep.mubr.bf16.mxu0 (!%p138_p2), %v4216_v2  ;;  %599 = vmatprep.mubr.bf16.mxu1 (!%p138_p2), %v4216_v2  ;;  %v3829_v4 = vld [vmem:[%s5340_s1] ss:$8 sps:$4 sm:$0xff] (!%p138_p2)   ;;  %vm3078_vm15 = vcmask (!%p138_p2), 1040384  }
   0x7   : > { %430 = vmatprep.subr.bf16.mxu0 (!%p138_p2), %v3824_v0  ;;  %567 = vmatprep.subr.bf16.mxu1 (!%p138_p2), %v3826_v1  ;;  %v3830_v5 = vld [vmem:[%s5340_s1 + $0x94] ss:$8 sps:$4 sm:$0xff] (!%p138_p2)   ;;  %v3834_v7 = vld [vmem:[%s5340_s1 + $0x90] ss:$8 sps:$4 sm:$0xff] (!%p138_p2)   ;;  %v3836_v9 = vld [vmem:[%s5340_s1 + $0xa4] ss:$8 sps:$4 sm:$0xff] (!%p138_p2)  }
   0x8   : > { %431 = vmatpush1.bf16.msra.mxu0 (!%p138_p2), %v3828_v3  ;;  %568 = vmatpush1.bf16.msra.mxu1 (!%p138_p2), %v3829_v4  ;;  %v3832_v6 = vld [vmem:[%s5340_s1 + $0x14] ss:$8 sps:$4 sm:$0xff] (!%p138_p2)   ;;  %v3835_v8 = vld [vmem:[%s5340_s1 + $0x10] ss:$8 sps:$4 sm:$0xff] (!%p138_p2)   ;;  %v3838_v10 = vld [vmem:[%s5340_s1 + $0x24] ss:$8 sps:$4 sm:$0xff] (!%p138_p2)  }
   0x9   : > { %432 = vmatprep.subr.bf16.mxu0 (!%p138_p2), %v3830_v5  ;;  %569 = vmatprep.subr.bf16.mxu1 (!%p138_p2), %v3832_v6  ;;  %v3840_v11 = vld [vmem:[%s5340_s1 + $0xa0] ss:$8 sps:$4 sm:$0xff] (!%p138_p2)   ;;  %v3842_v13 = vld [vmem:[%s5340_s1 + $0xb4] ss:$8 sps:$4 sm:$0xff] (!%p138_p2)   ;;  %v3846_v15 = vld [vmem:[%s5340_s1 + $0xb0] ss:$8 sps:$4 sm:$0xff] (!%p138_p2)  }
   0xa   : > { %v3841_v12 = vld [vmem:[%s5340_s1 + $0x20] ss:$8 sps:$4 sm:$0xff] (!%p138_p2)   ;;  %v3844_v14 = vld [vmem:[%s5340_s1 + $0x34] ss:$8 sps:$4 sm:$0xff] (!%p138_p2)   ;;  %v3847_v16 = vld [vmem:[%s5340_s1 + $0x30] ss:$8 sps:$4 sm:$0xff] (!%p138_p2)  }
   0xb   : > { %v3848_v17 = vld [vmem:[%s5340_s1 + $0xc4] ss:$8 sps:$4 sm:$0xff] (!%p138_p2)   ;;  %v4217_v18 = vmov (!%p138_p2), 1934713408   ;;  %v3852_v22 = vld [vmem:[%s5340_s1 + $0xc0] ss:$8 sps:$4 sm:$0xff] (!%p138_p2)  }
   0xc   : > { %433 = vmatpush1.bf16.msra.mxu0 (!%p138_p2), %v3834_v7  ;;  %570 = vmatpush1.bf16.msra.mxu1 (!%p138_p2), %v3835_v8  ;;  %v177_v19 = vunpack.c.l.s4 (!%p138_p2), %v4217_v18  ;;  %v3850_v21 = vld [vmem:[%s5340_s1 + $0x44] ss:$8 sps:$4 sm:$0xff] (!%p138_p2)   ;;  %v3853_v23 = vld [vmem:[%s5340_s1 + $0x40] ss:$8 sps:$4 sm:$0xff] (!%p138_p2)   ;;  %v3854_v24 = vld [vmem:[%s5340_s1 + $0xd4] ss:$8 sps:$4 sm:$0xff] (!%p138_p2)  }
   0xd   : > { %434 = vmatprep.subr.bf16.mxu0 %v3836_v9  ;;  %571 = vmatprep.subr.bf16.mxu1 %v3838_v10  ;;  %s5350_s13 = smov (!%p160_p3, %s3284_s13), 1  ;;  %v4320_v26 = vshrl.u32 %v179_v20, 7  ;;  %v3856_v27 = vld [vmem:[%s5340_s1 + $0x54] ss:$8 sps:$4 sm:$0xff]   ;;  %v3858_v28 = vld [vmem:[%s5340_s1 + $0xd0] ss:$8 sps:$4 sm:$0xff]  }
   0xe   : > { %s3811_s25 = smul.u32 24, %s5350_s13  ;;  %v178_v25 = vunpack.c.0.s8 %v177_v19  ;;  %v3859_v29 = vld [vmem:[%s5340_s1 + $0x50] ss:$8 sps:$4 sm:$0xff]   ;;  %v3860_v30 = vld [vmem:[%s5340_s1 + $0xe4] ss:$8 sps:$4 sm:$0xff]   ;;  %s3290_s8 = sshll.u32 %s5350_s13, 4 }
   0xf   : > { %v3862_v32 = vld [vmem:[%s5340_s1 + $0x64] ss:$8 sps:$4 sm:$0xff]   ;;  %v4218_v34 = vmov 1966171168   ;;  %v3864_v41 = vld [vmem:[%s5340_s1 + $0xe0] ss:$8 sps:$4 sm:$0xff]   ;;  %s168_s10 = scalar_lea.vmem %s5342_s3, %s3290_s8 }
  0x10   : > { %435 = vmatpush1.bf16.msra.mxu0 %v3840_v11  ;;  %572 = vmatpush1.bf16.msra.mxu1 %v3841_v12  ;;  %s4328_s9 = scalar_lea.vmem %s5339_s0, %s3811_s25  ;;  %v4340_v31 = vsub.s32 %v178_v25, %v4320_v26  ;;  %v336_v35 = vunpack.c.l.s4 %v4218_v34  ;;  %v3865_v42 = vld [vmem:[%s5340_s1 + $0x60] ss:$8 sps:$4 sm:$0xff]   ;;  %v3866_v43 = vld [vmem:[%s5340_s1 + $0xf4] ss:$8 sps:$4 sm:$0xff]   ;;  %v3870_v53 = vld [vmem:[%s5340_s1 + $0xf0] ss:$8 sps:$4 sm:$0xff]  }
  0x11   : > { %436 = vmatprep.subr.bf16.mxu0 %v3842_v13  ;;  %573 = vmatprep.subr.bf16.mxu1 %v3844_v14  ;;  %v3291_v33 = vld [vmem:[%s4328_s9 + $0x6] sm:$0x3f]  ;;  %v170_v36 = vld [vmem:[%s4328_s9] sm:$0x3f]  ;;  %v3868_v47 = vld [vmem:[%s5340_s1 + $0x74] ss:$8 sps:$4 sm:$0xff]  }
  0x12   : > { %v205_v37 = vrot.slane %v3291_v33, 2  ;;  %v206_v38 = vrot.slane %v3291_v33, 4  ;;  %v172_v39 = vrot.slane %v170_v36, 2  ;;  %v173_v40 = vrot.slane %v170_v36, 4  ;;  %v3871_v55 = vld [vmem:[%s5340_s1 + $0x70] ss:$8 sps:$4 sm:$0xff]  }
  0x13   : > { %v337_v51 = vunpack.c.0.s8 %v336_v35  ;;  %v3874_v60 = vld [vmem:[%s5340_s1 + $0x104] ss:$8 sps:$4 sm:$0xff]   ;;  %vm624_vm0 = vsmask.f32 256  ;;  %v3872_v11 = vld [vmem:[%s5340_s1 + $0x100] ss:$8 sps:$4 sm:$0xff]  }
  0x14   : > { %437 = vmatpush1.bf16.msra.mxu0 %v3846_v15  ;;  %574 = vmatpush1.bf16.msra.mxu1 %v3847_v16  ;;  %v208_v44 = vcombine.low %v3291_v33, %v206_v38  ;;  %v224_v45 = vrot.slane %v205_v37, %v4340_v31  ;;  %v175_v46 = vcombine.low %v170_v36, %v173_v40  ;;  %v3877_v61 = vld [vmem:[%s5340_s1 + $0x184] ss:$8 sps:$4 sm:$0xff]   ;;  %vm625_vm1 = vsmask.f32 1284  ;;  %v3875_v14 = vld [vmem:[%s5340_s1 + $0x180] ss:$8 sps:$4 sm:$0xff]  }
  0x15   : > { %438 = vmatprep.subr.bf16.mxu0 %v3848_v17  ;;  %575 = vmatprep.subr.bf16.mxu1 %v3850_v21  ;;  %v191_v48 = vrot.slane %v172_v39, %v4340_v31  ;;  %v4380_v1 = vsub.s32 %v337_v51, %v4320_v26  ;;  %v3880_v15 = vld [vmem:[%s5340_s1 + $0x114] ss:$8 sps:$4 sm:$0xff]   ;;  %v3878_v20 = vld [vmem:[%s5340_s1 + $0x110] ss:$8 sps:$4 sm:$0xff]   ;;  %vm4416_vm2 = vmor %vm624_vm0, %vm625_vm1  ;;  %vm627_vm3 = vsmask.f32 2312 }
  0x16   : > { %v215_v49 = vrot.slane %v208_v44, %v4340_v31  ;;  %v230_v50 = vshrl.u32 %v224_v45, 16  ;;  %v182_v52 = vrot.slane %v175_v46, %v4340_v31  ;;  %v225_v7 = vcombine.high %v224_v45, %v4216_v2  ;;  %v3883_v18 = vld [vmem:[%s5340_s1 + $0x194] ss:$8 sps:$4 sm:$0xff]   ;;  %vm628_vm6 = vmor %vm4416_vm2, %vm627_vm3  ;;  %v3890_v36 = vld [vmem:[%s5340_s1 + $0x130] ss:$8 sps:$4 sm:$0xff]  }
  0x17   : > { %v197_v54 = vshrl.u32 %v191_v48, 16  ;;  %v192_v63 = vcombine.high %v191_v48, %v4216_v2  ;;  %vm629_vm4 = vsmask.f32 3340  ;;  %vm631_vm5 = vsmask.f32 4368  ;;  %vm5288_vm1 = vmand %vm3078_vm15, %vm624_vm0 }
  0x18   : > { %439 = vmatpush1.bf16.msra.mxu0 %v3852_v22  ;;  %576 = vmatpush1.bf16.msra.mxu1 %v3853_v23  ;;  %v228_v56 = vpack.i.b16 %v224_v45, %v215_v49  ;;  %v229_v57 = vshrl.u32 %v215_v49, 16  ;;  %v196_v58 = vshrl.u32 %v182_v52, 16  ;;  %v195_v59 = vpack.i.b16 %v191_v48, %v182_v52  ;;  %v3881_v22 = vld [vmem:[%s5340_s1 + $0x190] ss:$8 sps:$4 sm:$0xff]   ;;  %v3886_v23 = vld [vmem:[%s5340_s1 + $0x124] ss:$8 sps:$4 sm:$0xff]   ;;  %vm630_vm8 = vmor %vm628_vm6, %vm629_vm4 }
  0x19   : > { %440 = vmatprep.subr.bf16.mxu0 %v3854_v24  ;;  %577 = vmatprep.subr.bf16.mxu1 %v3856_v27  ;;  %v183_v62 = vcombine.high %v182_v52, %v4216_v2  ;;  %v216_v6 = vcombine.high %v215_v49, %v4216_v2  ;;  %v3889_v24 = vld [vmem:[%s5340_s1 + $0x1a4] ss:$8 sps:$4 sm:$0xff]   ;;  %v3884_v27 = vld [vmem:[%s5340_s1 + $0x120] ss:$8 sps:$4 sm:$0xff]   ;;  %vm633_vm7 = vsmask.f32 5396  ;;  %vm632_vm9 = vmor %vm630_vm8, %vm631_vm5 }
  0x1a   : > { %v4377_v0 = vpack.i.b16 %v230_v50, %v229_v57  ;;  %v4382_v3 = vpack.i.b16 %v197_v54, %v196_v58  ;;  %v614_v25 = vrot.slane %v195_v59, %v4380_v1  ;;  %v3895_v34 = vld [vmem:[%s5340_s1 + $0x1b4] ss:$8 sps:$4 sm:$0xff]   ;;  %vm634_vm10 = vmor %vm632_vm9, %vm633_vm7  ;;  %vm635_vm11 = vsmask.f32 6424  ;;  %v3893_v37 = vld [vmem:[%s5340_s1 + $0x1b0] ss:$8 sps:$4 sm:$0xff]  }
  0x1b   : > { %v4384_v4 = vpack.i.b16 %v192_v63, %v183_v62  ;;  %v4404_v16 = vpack.i.b16 %v225_v7, %v216_v6  ;;  %v3898_v40 = vld [vmem:[%s5340_s1 + $0x144] ss:$8 sps:$4 sm:$0xff]   ;;  %vm636_vm12 = vmor %vm634_vm10, %vm635_vm11  ;;  %vm637_vm13 = vsmask.f32 7452  ;;  %v3896_v45 = vld [vmem:[%s5340_s1 + $0x140] ss:$8 sps:$4 sm:$0xff]  }
  0x1c   : > { %441 = vmatpush1.bf16.msra.mxu0 %v3858_v28  ;;  %578 = vmatpush1.bf16.msra.mxu1 %v3859_v29  ;;  %v334_v5 = vcombine.low %v228_v56, %v4377_v0  ;;  %v471_v8 = vcombine.low %v195_v59, %v4382_v3  ;;  %v622_v28 = vrot.slane %v4382_v3, %v4380_v1  ;;  %v3887_v29 = vld [vmem:[%s5340_s1 + $0x1a0] ss:$8 sps:$4 sm:$0xff]   ;;  %vm4474_vm14 = vmor %vm636_vm12, %vm637_vm13  ;;  %v3905_v57 = vld [vmem:[%s5340_s1 + $0x1d0] ss:$8 sps:$4 sm:$0xff]  }
  0x1d   : > { %442 = vmatprep.subr.bf16.mxu0 %v3860_v30  ;;  %579 = vmatprep.subr.bf16.mxu1 %v3862_v32  ;;  %v1712_v12 = vcombine.low %v4382_v3, %v4384_v4  ;;  %v1868_v19 = vcombine.low %v4377_v0, %v4404_v16  ;;  %v3892_v30 = vld [vmem:[%s5340_s1 + $0x134] ss:$8 sps:$4 sm:$0xff]   ;;  %v819_v32 = vrot.slane %v228_v56, %v4380_v1  ;;  %v3899_v46 = vld [vmem:[%s5340_s1 + $0x1c0] ss:$8 sps:$4 sm:$0xff]   ;;  %v3902_v56 = vld [vmem:[%s5340_s1 + $0x150] ss:$8 sps:$4 sm:$0xff]  }
  0x1e   : > { %v341_v9 = vrot.slane %v334_v5, %v4380_v1  ;;  %v478_v10 = vrot.slane %v471_v8, %v4380_v1  ;;  %v827_v33 = vrot.slane %v4377_v0, %v4380_v1  ;;  %v615_v35 = vcombine.high %v614_v25, %v614_v25  ;;  %v3913_v6 = vld [vmem:[%s5340_s1 + $0x1e4] ss:$8 sps:$4 sm:$0xff]   ;;  %v3908_v7 = vld [vmem:[%s5340_s1 + $0x160] ss:$8 sps:$4 sm:$0xff]   ;;  %v3917_v21 = vld [vmem:[%s5340_s1 + $0x1f0] ss:$8 sps:$4 sm:$0xff]  }
  0x1f   : > { %v623_v38 = vcombine.high %v622_v28, %v622_v28  ;;  %v820_v39 = vcombine.high %v819_v32, %v819_v32  ;;  %v649_v48 = vshrl.u32 %v622_v28, 16  ;;  %v830_v50 = vshrl.u32 %v819_v32, 16  ;;  %v3920_v28 = vld [vmem:[%s5340_s1 + $0x200] ss:$8 sps:$4 sm:$0xff]   ;;  %v4027_v52 = vld [vmem:[%s5340_s1 + $0x494] ss:$8 sps:$4 sm:$0xff]  }
  0x20   : > { %443 = vmatpush1.bf16.msra.mxu0 %v3864_v41  ;;  %580 = vmatpush1.bf16.msra.mxu1 %v3865_v42  ;;  %v348_v13 = vrot.slane %v341_v9, %v4380_v1  ;;  %v485_v17 = vrot.slane %v478_v10, %v4380_v1  ;;  %v828_v41 = vcombine.high %v827_v33, %v827_v33  ;;  %v640_v42 = vshrl.u32 %v614_v25, 16  ;;  %v3911_v9 = vld [vmem:[%s5340_s1 + $0x1e0] ss:$8 sps:$4 sm:$0xff]   ;;  %v3922_v25 = vld [vmem:[%s5340_s1 + $0x204] ss:$8 sps:$4 sm:$0xff]  }
  0x21   : > { %444 = vmatprep.subr.bf16.mxu0 %v3866_v43  ;;  %581 = vmatprep.subr.bf16.mxu1 %v3868_v47  ;;  %v3901_v43 = vld [vmem:[%s5340_s1 + $0x1c4] ss:$8 sps:$4 sm:$0xff]   ;;  %v645_v44 = vshll.u32 %v615_v35, 16  ;;  %v3904_v47 = vld [vmem:[%s5340_s1 + $0x154] ss:$8 sps:$4 sm:$0xff]   ;;  %v654_v49 = vshll.u32 %v623_v38, 16  ;;  %v2186_v5 = vrot.slane %v4404_v16, %v4380_v1 }
  0x22   : > { %v835_v51 = vshll.u32 %v820_v39, 16  ;;  %v844_v54 = vshll.u32 %v828_v41, 16  ;;  %v3292_v38 = vld [vmem:[%s4328_s9 + $0xc] sm:$0x3f]  ;;  %v3293_v39 = vld [vmem:[%s4328_s9 + $0x12] sm:$0x3f] }
  0x23   : > { %v647_v58 = vsel %vm4474_vm14, %v640_v42, %v645_v44  ;;  %v4491_v59 = vsel %vm4474_vm14, %v649_v48, %v654_v49  ;;  %v238_v41 = vrot.slane %v3292_v38, 2  ;;  %v239_v42 = vrot.slane %v3292_v38, 4  ;;  %v4069_v3 = vld [vmem:[%s5340_s1 + $0x584] ss:$8 sps:$4 sm:$0xff]   ;;  %v4067_v16 = vld [vmem:[%s5340_s1 + $0x580] ss:$8 sps:$4 sm:$0xff]  }
  0x24   : > { %445 = vmatpush1.bf16.msra.mxu0 %v3870_v53  ;;  %582 = vmatpush1.bf16.msra.mxu1 %v3871_v55  ;;  %v839_v53 = vshrl.u32 %v827_v33, 16  ;;  %v3907_v55 = vld [vmem:[%s5340_s1 + $0x1d4] ss:$8 sps:$4 sm:$0xff]   ;;  %v837_v62 = vsel %vm4474_vm14, %v830_v50, %v835_v51  ;;  %v674_v8 = vcombine.low %v647_v58, %v4491_v59  ;;  %v3923_v33 = vld [vmem:[%s5340_s1 + $0x280] ss:$8 sps:$4 sm:$0xff]   ;;  %v272_v44 = vrot.slane %v3293_v39, 4 }
  0x25   : > { %770 = vmatprep.subr.bf16.mxu0 %v3874_v60  ;;  %960 = vmatprep.subr.bf16.mxu1 %v3877_v61  ;;  %v2013_v60 = vrot.slane %v4384_v4, %v4380_v1  ;;  %v3910_v61 = vld [vmem:[%s5340_s1 + $0x164] ss:$8 sps:$4 sm:$0xff]   ;;  %v3926_v50 = vld [vmem:[%s5340_s1 + $0x210] ss:$8 sps:$4 sm:$0xff]  }
  0x26   : > { %v4502_v63 = vsel %vm4474_vm14, %v839_v53, %v844_v54  ;;  %v274_v48 = vcombine.low %v3293_v39, %v272_v44  ;;  %v3929_v51 = vld [vmem:[%s5340_s1 + $0x290] ss:$8 sps:$4 sm:$0xff]   ;;  %v3934_v53 = vld [vmem:[%s5340_s1 + $0x224] ss:$8 sps:$4 sm:$0xff]   ;;  %v3952_v44 = vld [vmem:[%s5340_s1 + $0x254] ss:$8 sps:$4 sm:$0xff]  }
  0x27   : > { %463 = vmatmul.mubr.bf16.vlgmr.msra.gmra.mrb[0].mxu0 %v348_v13  ;;  %600 = vmatmul.mubr.bf16.vlgmr.msra.gmra.mrb[0].mxu1 %v485_v17  ;;  %v864_v10 = vcombine.low %v837_v62, %v4502_v63  ;;  %v2014_v13 = vcombine.high %v2013_v60, %v2013_v60  ;;  %v3914_v17 = vld [vmem:[%s5340_s1 + $0x170] ss:$8 sps:$4 sm:$0xff]   ;;  %v3937_v58 = vld [vmem:[%s5340_s1 + $0x2a4] ss:$8 sps:$4 sm:$0xff]  }
  0x28   : > { %771 = vmatpush1.bf16.msra.mxu0 %v3872_v11  ;;  %961 = vmatpush1.bf16.msra.mxu1 %v3875_v14  ;;  %v3916_v11 = vld [vmem:[%s5340_s1 + $0x174] ss:$8 sps:$4 sm:$0xff]   ;;  %v2187_v14 = vcombine.high %v2186_v5, %v2186_v5 }
  0x29   : > { %772 = vmatprep.subr.bf16.mxu0 %v3880_v15  ;;  %962 = vmatprep.subr.bf16.mxu1 %v3883_v18  ;;  %v3919_v15 = vld [vmem:[%s5340_s1 + $0x1f4] ss:$8 sps:$4 sm:$0xff]   ;;  %v681_v18 = vrot.slane %v674_v8, %v4380_v1 }
  0x2a   : > { %802 = vmatprep.mubr.bf16.mxu0 %v4216_v2  ;;  %992 = vmatprep.mubr.bf16.mxu1 %v4216_v2 }
  0x2b   : > { %v688_v32 = vrot.slane %v681_v18, %v4380_v1 }
  0x2c   : > { %773 = vmatpush1.bf16.msra.mxu0 %v3878_v20  ;;  %963 = vmatpush1.bf16.msra.mxu1 %v3881_v22  ;;  %v2016_v20 = vshrl.u32 %v2013_v60, 16  ;;  %v871_v22 = vrot.slane %v864_v10, %v4380_v1  ;;  %v3932_v60 = vld [vmem:[%s5340_s1 + $0x220] ss:$8 sps:$4 sm:$0xff]  }
  0x2d   : > { %774 = vmatprep.subr.bf16.mxu0 %v3886_v23  ;;  %964 = vmatprep.subr.bf16.mxu1 %v3889_v24  ;;  %v2021_v23 = vshll.u32 %v2014_v13, 16  ;;  %v2189_v24 = vshrl.u32 %v2186_v5, 16 }
  0x30   : > { %775 = vmatpush1.bf16.msra.mxu0 %v3884_v27  ;;  %965 = vmatpush1.bf16.msra.mxu1 %v3887_v29  ;;  %v2194_v27 = vshll.u32 %v2187_v14, 16  ;;  %v3925_v29 = vld [vmem:[%s5340_s1 + $0x284] ss:$8 sps:$4 sm:$0xff]   ;;  %v3938_v14 = vld [vmem:[%s5340_s1 + $0x230] ss:$8 sps:$4 sm:$0xff]  }
  0x31   : > { %776 = vmatprep.subr.bf16.mxu0 %v3892_v30  ;;  %966 = vmatprep.subr.bf16.mxu1 %v3895_v34  ;;  %v4542_v30 = vsel %vm4474_vm14, %v2016_v20, %v2021_v23  ;;  %v3928_v34 = vld [vmem:[%s5340_s1 + $0x214] ss:$8 sps:$4 sm:$0xff]  }
  0x32   : > { %v2041_v35 = vcombine.low %v4491_v59, %v4542_v30  ;;  %v4114_v59 = vld [vmem:[%s5340_s1 + $0x604] ss:$8 sps:$4 sm:$0xff]  }
  0x33   : > { %v4117_v30 = vld [vmem:[%s5340_s1 + $0x684] ss:$8 sps:$4 sm:$0xff]  }
  0x34   : > { %777 = vmatpush1.bf16.msra.mxu0 %v3890_v36  ;;  %967 = vmatpush1.bf16.msra.mxu1 %v3893_v37  ;;  %v4555_v36 = vsel %vm4474_vm14, %v2189_v24, %v2194_v27  ;;  %v878_v37 = vrot.slane %v871_v22, %v4380_v1 }
  0x35   : > { %778 = vmatprep.subr.bf16.mxu0 %v3898_v40  ;;  %968 = vmatprep.subr.bf16.mxu1 %v3901_v43  ;;  %v2214_v40 = vcombine.low %v4502_v63, %v4555_v36  ;;  %v271_v43 = vrot.slane %v3293_v39, 2  ;;  %v4112_v36 = vld [vmem:[%s5340_s1 + $0x600] ss:$8 sps:$4 sm:$0xff]  }
  0x37   : > { %v4569_v49 = vrot.slane %v271_v43, %v4340_v31 }
  0x38   : > { %779 = vmatpush1.bf16.msra.mxu0 %v3896_v45  ;;  %969 = vmatpush1.bf16.msra.mxu1 %v3899_v46  ;;  %v3931_v45 = vld [vmem:[%s5340_s1 + $0x294] ss:$8 sps:$4 sm:$0xff]   ;;  %v241_v46 = vcombine.low %v3292_v38, %v239_v42 }
  0x39   : > { %780 = vmatprep.subr.bf16.mxu0 %v3904_v47  ;;  %970 = vmatprep.subr.bf16.mxu1 %v3907_v55  ;;  %v4566_v47 = vrot.slane %v238_v41, %v4340_v31  ;;  %v3947_v41 = vld [vmem:[%s5340_s1 + $0x2c0] ss:$8 sps:$4 sm:$0xff]  }
  0x3a   : > { %v4581_v54 = vrot.slane %v241_v46, %v4340_v31 }
  0x3b   : > { %v263_v55 = vshrl.u32 %v4566_v47, 16 }
  0x3c   : > { %781 = vmatpush1.bf16.msra.mxu0 %v3902_v56  ;;  %971 = vmatpush1.bf16.msra.mxu1 %v3905_v57  ;;  %v4585_v56 = vrot.slane %v274_v48, %v4340_v31  ;;  %v296_v57 = vshrl.u32 %v4569_v49, 16  ;;  %v262_v31 = vshrl.u32 %v4581_v54, 16  ;;  %v3955_v48 = vld [vmem:[%s5340_s1 + $0x2d4] ss:$8 sps:$4 sm:$0xff]  }
  0x3d   : > { %782 = vmatprep.subr.bf16.mxu0 %v3910_v61  ;;  %972 = vmatprep.subr.bf16.mxu1 %v3913_v6  ;;  %v4598_v61 = vpack.i.b16 %v4566_v47, %v4581_v54  ;;  %v3935_v6 = vld [vmem:[%s5340_s1 + $0x2a0] ss:$8 sps:$4 sm:$0xff]  }
  0x3e   : > { %v4603_v62 = vpack.i.b16 %v4569_v49, %v4585_v56  ;;  %v295_v5 = vshrl.u32 %v4585_v56, 16  ;;  %v4612_v8 = vpack.i.b16 %v263_v55, %v262_v31  ;;  %v3956_v31 = vld [vmem:[%s5340_s1 + $0x260] ss:$8 sps:$4 sm:$0xff]  }
  0x40   : > { %783 = vmatpush1.bf16.msra.mxu0 %v3908_v7  ;;  %973 = vmatpush1.bf16.msra.mxu1 %v3911_v9  ;;  %v3940_v7 = vld [vmem:[%s5340_s1 + $0x234] ss:$8 sps:$4 sm:$0xff]   ;;  %v1321_v9 = vrot.slane %v4598_v61, %v4380_v1  ;;  %v4616_v10 = vpack.i.b16 %v296_v57, %v295_v5  ;;  %v1511_v13 = vrot.slane %v4603_v62, %v4380_v1  ;;  %v3953_v57 = vld [vmem:[%s5340_s1 + $0x2d0] ss:$8 sps:$4 sm:$0xff]  }
  0x41   : > { %784 = vmatprep.subr.bf16.mxu0 %v3916_v11  ;;  %974 = vmatprep.subr.bf16.mxu1 %v3919_v15  ;;  %v3943_v11 = vld [vmem:[%s5340_s1 + $0x2b4] ss:$8 sps:$4 sm:$0xff]   ;;  %v1020_v15 = vcombine.low %v4598_v61, %v4612_v8  ;;  %v1329_v20 = vrot.slane %v4612_v8, %v4380_v1  ;;  %v3961_v61 = vld [vmem:[%s5340_s1 + $0x2e4] ss:$8 sps:$4 sm:$0xff]  }
  0x42   : > { %v1322_v18 = vcombine.high %v1321_v9, %v1321_v9  ;;  %v1332_v22 = vshrl.u32 %v1321_v9, 16  ;;  %v1512_v23 = vcombine.high %v1511_v13, %v1511_v13  ;;  %v1519_v24 = vrot.slane %v4616_v10, %v4380_v1  ;;  %v3964_v5 = vld [vmem:[%s5340_s1 + $0x274] ss:$8 sps:$4 sm:$0xff]  }
  0x43   : > { %v1330_v27 = vcombine.high %v1329_v20, %v1329_v20  ;;  %v258_v9 = vcombine.high %v4566_v47, %v4216_v2 }
  0x44   : > { %785 = vmatpush1.bf16.msra.mxu0 %v3914_v17  ;;  %975 = vmatpush1.bf16.msra.mxu1 %v3917_v21  ;;  %v1176_v17 = vcombine.low %v4603_v62, %v4616_v10  ;;  %v3941_v21 = vld [vmem:[%s5340_s1 + $0x2b0] ss:$8 sps:$4 sm:$0xff]   ;;  %v1527_v42 = vshll.u32 %v1512_v23, 16  ;;  %v1531_v43 = vshrl.u32 %v1519_v24, 16  ;;  %v3959_v62 = vld [vmem:[%s5340_s1 + $0x2e0] ss:$8 sps:$4 sm:$0xff]  }
  0x45   : > { %1116 = vmatprep.subr.bf16.mxu0 %v3922_v25  ;;  %1272 = vmatprep.subr.bf16.mxu1 %v3925_v29  ;;  %v3946_v25 = vld [vmem:[%s5340_s1 + $0x244] ss:$8 sps:$4 sm:$0xff]   ;;  %v1346_v39 = vshll.u32 %v1330_v27, 16  ;;  %v3968_v23 = vld [vmem:[%s5340_s1 + $0x300] ss:$8 sps:$4 sm:$0xff]  }
  0x46   : > { %v3949_v29 = vld [vmem:[%s5340_s1 + $0x2c4] ss:$8 sps:$4 sm:$0xff]   ;;  %v3976_v27 = vld [vmem:[%s5340_s1 + $0x314] ss:$8 sps:$4 sm:$0xff]  }
  0x47   : > { %803 = vmatmul.mubr.bf16.vlgmr.msra.gmra.mrb[4].mxu0 %v688_v32  ;;  %993 = vmatmul.mubr.bf16.vlgmr.msra.gmra.mrb[4].mxu1 %v878_v37  ;;  %v1341_v32 = vshrl.u32 %v1329_v20, 16  ;;  %v3944_v37 = vld [vmem:[%s5340_s1 + $0x240] ss:$8 sps:$4 sm:$0xff]   ;;  %v1183_v20 = vrot.slane %v1176_v17, %v4380_v1 }
  0x48   : > { %1117 = vmatpush1.bf16.msra.mxu0 %v3920_v28  ;;  %1273 = vmatpush1.bf16.msra.mxu1 %v3923_v33  ;;  %v1337_v28 = vshll.u32 %v1322_v18, 16  ;;  %v1520_v33 = vcombine.high %v1519_v24, %v1519_v24  ;;  %v1027_v18 = vrot.slane %v1020_v15, %v4380_v1 }
  0x49   : > { %1118 = vmatprep.subr.bf16.mxu0 %v3928_v34  ;;  %1274 = vmatprep.subr.bf16.mxu1 %v3931_v45  ;;  %v1522_v34 = vshrl.u32 %v1511_v13, 16  ;;  %v4658_v45 = vsel %vm4474_vm14, %v1341_v32, %v1346_v39  ;;  %v291_v13 = vcombine.high %v4569_v49, %v4216_v2  ;;  %v3970_v49 = vld [vmem:[%s5340_s1 + $0x304] ss:$8 sps:$4 sm:$0xff]   ;;  %v1190_v24 = vrot.slane %v1183_v20, %v4380_v1  ;;  %v3977_v32 = vld [vmem:[%s5340_s1 + $0x390] ss:$8 sps:$4 sm:$0xff]  }
  0x4a   : > { %1148 = vmatprep.mubr.bf16.mxu0 %v4216_v2  ;;  %1304 = vmatprep.mubr.bf16.mxu1 %v4216_v2  ;;  %v4648_v38 = vsel %vm4474_vm14, %v1332_v22, %v1337_v28  ;;  %v1536_v46 = vshll.u32 %v1520_v33, 16  ;;  %v1034_v22 = vrot.slane %v1027_v18, %v4380_v1  ;;  %v3979_v28 = vld [vmem:[%s5340_s1 + $0x394] ss:$8 sps:$4 sm:$0xff]   ;;  %v3982_v33 = vld [vmem:[%s5340_s1 + $0x324] ss:$8 sps:$4 sm:$0xff]  }
  0x4b   : > { %v3983_v39 = vld [vmem:[%s5340_s1 + $0x3a0] ss:$8 sps:$4 sm:$0xff]   ;;  %v4015_v20 = vld [vmem:[%s5340_s1 + $0x3f4] ss:$8 sps:$4 sm:$0xff]  }
  0x4c   : > { %1119 = vmatpush1.bf16.msra.mxu0 %v3926_v50  ;;  %1275 = vmatpush1.bf16.msra.mxu1 %v3929_v51  ;;  %v1366_v50 = vcombine.low %v4648_v38, %v4658_v45  ;;  %v4667_v51 = vsel %vm4474_vm14, %v1522_v34, %v1527_v42  ;;  %v4674_v55 = vsel %vm4474_vm14, %v1531_v43, %v1536_v46  ;;  %v3985_v34 = vld [vmem:[%s5340_s1 + $0x3a4] ss:$8 sps:$4 sm:$0xff]   ;;  %v3991_v42 = vld [vmem:[%s5340_s1 + $0x3b4] ss:$8 sps:$4 sm:$0xff]   ;;  %v3986_v43 = vld [vmem:[%s5340_s1 + $0x330] ss:$8 sps:$4 sm:$0xff]  }
  0x4d   : > { %1120 = vmatprep.subr.bf16.mxu0 %v3934_v53  ;;  %1276 = vmatprep.subr.bf16.mxu1 %v3937_v58  ;;  %v3950_v53 = vld [vmem:[%s5340_s1 + $0x250] ss:$8 sps:$4 sm:$0xff]   ;;  %v1556_v58 = vcombine.low %v4667_v51, %v4674_v55  ;;  %v3994_v46 = vld [vmem:[%s5340_s1 + $0x344] ss:$8 sps:$4 sm:$0xff]  }
  0x4e   : > { %v4018_v38 = vld [vmem:[%s5340_s1 + $0x404] ss:$8 sps:$4 sm:$0xff]  }
  0x50   : > { %1121 = vmatpush1.bf16.msra.mxu0 %v3932_v60  ;;  %1277 = vmatpush1.bf16.msra.mxu1 %v3935_v6  ;;  %v3958_v60 = vld [vmem:[%s5340_s1 + $0x264] ss:$8 sps:$4 sm:$0xff]   ;;  %v3967_v6 = vld [vmem:[%s5340_s1 + $0x2f4] ss:$8 sps:$4 sm:$0xff]  }
  0x51   : > { %1122 = vmatprep.subr.bf16.mxu0 %v3940_v7  ;;  %1278 = vmatprep.subr.bf16.mxu1 %v3943_v11  ;;  %v249_v7 = vcombine.high %v4581_v54, %v4216_v2  ;;  %v282_v11 = vcombine.high %v4585_v56, %v4216_v2  ;;  %v3965_v54 = vld [vmem:[%s5340_s1 + $0x2f0] ss:$8 sps:$4 sm:$0xff]   ;;  %v3973_v56 = vld [vmem:[%s5340_s1 + $0x384] ss:$8 sps:$4 sm:$0xff]  }
  0x53   : > { %v4715_v47 = vpack.i.b16 %v258_v9, %v249_v7  ;;  %v4009_v9 = vld [vmem:[%s5340_s1 + $0x3e4] ss:$8 sps:$4 sm:$0xff]  }
  0x54   : > { %1123 = vmatpush1.bf16.msra.mxu0 %v3938_v14  ;;  %1279 = vmatpush1.bf16.msra.mxu1 %v3941_v21  ;;  %v3962_v14 = vld [vmem:[%s5340_s1 + $0x270] ss:$8 sps:$4 sm:$0xff]   ;;  %v4717_v21 = vpack.i.b16 %v291_v13, %v282_v11  ;;  %v4004_v11 = vld [vmem:[%s5340_s1 + $0x360] ss:$8 sps:$4 sm:$0xff]  }
  0x55   : > { %1124 = vmatprep.subr.bf16.mxu0 %v3946_v25  ;;  %1280 = vmatprep.subr.bf16.mxu1 %v3949_v29  ;;  %v2370_v15 = vcombine.low %v4612_v8, %v4715_v47  ;;  %v3971_v25 = vld [vmem:[%s5340_s1 + $0x380] ss:$8 sps:$4 sm:$0xff]   ;;  %v3974_v29 = vld [vmem:[%s5340_s1 + $0x310] ss:$8 sps:$4 sm:$0xff]   ;;  %v4162_v8 = vld [vmem:[%s5340_s1 + $0x704] ss:$8 sps:$4 sm:$0xff]  }
  0x56   : > { %v2526_v17 = vcombine.low %v4616_v10, %v4717_v21  ;;  %v2844_v7 = vrot.slane %v4717_v21, %v4380_v1  ;;  %v4007_v13 = vld [vmem:[%s5340_s1 + $0x3e0] ss:$8 sps:$4 sm:$0xff]  }
  0x57   : > { %v4160_v21 = vld [vmem:[%s5340_s1 + $0x700] ss:$8 sps:$4 sm:$0xff]  }
  0x58   : > { %1125 = vmatpush1.bf16.msra.mxu0 %v3944_v37  ;;  %1281 = vmatpush1.bf16.msra.mxu1 %v3947_v41  ;;  %v3980_v37 = vld [vmem:[%s5340_s1 + $0x320] ss:$8 sps:$4 sm:$0xff]   ;;  %v3988_v41 = vld [vmem:[%s5340_s1 + $0x334] ss:$8 sps:$4 sm:$0xff]  }
  0x59   : > { %1126 = vmatprep.subr.bf16.mxu0 %v3952_v44  ;;  %1282 = vmatprep.subr.bf16.mxu1 %v3955_v48  ;;  %v3989_v44 = vld [vmem:[%s5340_s1 + $0x3b0] ss:$8 sps:$4 sm:$0xff]   ;;  %v3997_v48 = vld [vmem:[%s5340_s1 + $0x3c4] ss:$8 sps:$4 sm:$0xff]  }
  0x5c   : > { %1127 = vmatpush1.bf16.msra.mxu0 %v3950_v53  ;;  %1283 = vmatpush1.bf16.msra.mxu1 %v3953_v57  ;;  %v3992_v53 = vld [vmem:[%s5340_s1 + $0x340] ss:$8 sps:$4 sm:$0xff]  }
  0x5d   : > { %1128 = vmatprep.subr.bf16.mxu0 %v3958_v60  ;;  %1284 = vmatprep.subr.bf16.mxu1 %v3961_v61  ;;  %v3995_v57 = vld [vmem:[%s5340_s1 + $0x3c0] ss:$8 sps:$4 sm:$0xff]   ;;  %v4000_v60 = vld [vmem:[%s5340_s1 + $0x354] ss:$8 sps:$4 sm:$0xff]  }
  0x5e   : > { %v4003_v61 = vld [vmem:[%s5340_s1 + $0x3d4] ss:$8 sps:$4 sm:$0xff]  }
  0x60   : > { %1129 = vmatpush1.bf16.msra.mxu0 %v3956_v31  ;;  %1285 = vmatpush1.bf16.msra.mxu1 %v3959_v62  ;;  %v3998_v31 = vld [vmem:[%s5340_s1 + $0x350] ss:$8 sps:$4 sm:$0xff]  }
  0x61   : > { %1130 = vmatprep.subr.bf16.mxu0 %v3964_v5  ;;  %1286 = vmatprep.subr.bf16.mxu1 %v3967_v6  ;;  %v4001_v62 = vld [vmem:[%s5340_s1 + $0x3d0] ss:$8 sps:$4 sm:$0xff]   ;;  %v4006_v5 = vld [vmem:[%s5340_s1 + $0x364] ss:$8 sps:$4 sm:$0xff]   ;;  %v2671_v6 = vrot.slane %v4715_v47, %v4380_v1 }
  0x62   : > { %v4165_v47 = vld [vmem:[%s5340_s1 + $0x784] ss:$8 sps:$4 sm:$0xff]  }
  0x63   : > { %v2672_v18 = vcombine.high %v2671_v6, %v2671_v6 }
  0x64   : > { %1131 = vmatpush1.bf16.msra.mxu0 %v3962_v14  ;;  %1287 = vmatpush1.bf16.msra.mxu1 %v3965_v54  ;;  %v4012_v14 = vld [vmem:[%s5340_s1 + $0x374] ss:$8 sps:$4 sm:$0xff]   ;;  %v2845_v54 = vcombine.high %v2844_v7, %v2844_v7 }
  0x65   : > { %1462 = vmatprep.subr.bf16.mxu0 %v3970_v49  ;;  %1652 = vmatprep.subr.bf16.mxu1 %v3973_v56  ;;  %v4010_v49 = vld [vmem:[%s5340_s1 + $0x370] ss:$8 sps:$4 sm:$0xff]   ;;  %v1373_v56 = vrot.slane %v1366_v50, %v4380_v1 }
  0x66   : > { %v2852_v50 = vshll.u32 %v2845_v54, 16  ;;  %v4057_v54 = vld [vmem:[%s5340_s1 + $0x4e4] ss:$8 sps:$4 sm:$0xff]  }
  0x67   : > { %1149 = vmatmul.mubr.bf16.vlgmr.msra.gmra.mrb[8].mxu0 %v1034_v22  ;;  %1305 = vmatmul.mubr.bf16.vlgmr.msra.gmra.mrb[8].mxu1 %v1190_v24  ;;  %v2674_v22 = vshrl.u32 %v2671_v6, 16  ;;  %v1563_v24 = vrot.slane %v1556_v58, %v4380_v1  ;;  %v1380_v51 = vrot.slane %v1373_v56, %v4380_v1  ;;  %v4016_v58 = vld [vmem:[%s5340_s1 + $0x400] ss:$8 sps:$4 sm:$0xff]   ;;  %v4060_v56 = vld [vmem:[%s5340_s1 + $0x474] ss:$8 sps:$4 sm:$0xff]  }
  0x68   : > { %1463 = vmatpush1.bf16.msra.mxu0 %v3968_v23  ;;  %1653 = vmatpush1.bf16.msra.mxu1 %v3971_v25  ;;  %v4013_v23 = vld [vmem:[%s5340_s1 + $0x3f0] ss:$8 sps:$4 sm:$0xff]   ;;  %v2679_v25 = vshll.u32 %v2672_v18, 16  ;;  %v4040_v6 = vld [vmem:[%s5340_s1 + $0x440] ss:$8 sps:$4 sm:$0xff]  }
  0x69   : > { %1464 = vmatprep.subr.bf16.mxu0 %v3976_v27  ;;  %1654 = vmatprep.subr.bf16.mxu1 %v3979_v28  ;;  %v2847_v27 = vshrl.u32 %v2844_v7, 16  ;;  %v4021_v28 = vld [vmem:[%s5340_s1 + $0x484] ss:$8 sps:$4 sm:$0xff]   ;;  %v4043_v7 = vld [vmem:[%s5340_s1 + $0x4c0] ss:$8 sps:$4 sm:$0xff]  }
  0x6a   : > { %1494 = vmatprep.mubr.bf16.mxu0 %v4216_v2  ;;  %1684 = vmatprep.mubr.bf16.mxu1 %v4216_v2  ;;  %v4054_v18 = vld [vmem:[%s5340_s1 + $0x464] ss:$8 sps:$4 sm:$0xff]  }
  0x6c   : > { %1465 = vmatpush1.bf16.msra.mxu0 %v3974_v29  ;;  %1655 = vmatpush1.bf16.msra.mxu1 %v3977_v32  ;;  %v4843_v29 = vsel %vm4474_vm14, %v2674_v22, %v2679_v25  ;;  %v4063_v22 = vld [vmem:[%s5340_s1 + $0x4f4] ss:$8 sps:$4 sm:$0xff]   ;;  %v4061_v25 = vld [vmem:[%s5340_s1 + $0x4f0] ss:$8 sps:$4 sm:$0xff]  }
  0x6d   : > { %1466 = vmatprep.subr.bf16.mxu0 %v3982_v33  ;;  %1656 = vmatprep.subr.bf16.mxu1 %v3985_v34  ;;  %v2699_v32 = vcombine.low %v4658_v45, %v4843_v29  ;;  %v4853_v33 = vsel %vm4474_vm14, %v2847_v27, %v2852_v50  ;;  %v1570_v34 = vrot.slane %v1563_v24, %v4380_v1  ;;  %v4075_v50 = vld [vmem:[%s5340_s1 + $0x594] ss:$8 sps:$4 sm:$0xff]  }
  0x6e   : > { %v1719_v24 = vrot.slane %v1712_v12, %v4380_v1  ;;  %v1875_v27 = vrot.slane %v1868_v19, %v4380_v1  ;;  %v4064_v12 = vld [vmem:[%s5340_s1 + $0x500] ss:$8 sps:$4 sm:$0xff]   ;;  %v4072_v19 = vld [vmem:[%s5340_s1 + $0x514] ss:$8 sps:$4 sm:$0xff]  }
  0x70   : > { %1467 = vmatpush1.bf16.msra.mxu0 %v3980_v37  ;;  %1657 = vmatpush1.bf16.msra.mxu1 %v3983_v39  ;;  %v4019_v37 = vld [vmem:[%s5340_s1 + $0x480] ss:$8 sps:$4 sm:$0xff]   ;;  %v2872_v39 = vcombine.low %v4674_v55, %v4853_v33  ;;  %v1726_v4 = vrot.slane %v1719_v24, %v4380_v1  ;;  %v1882_v0 = vrot.slane %v1875_v27, %v4380_v1  ;;  %v4126_v24 = vld [vmem:[%s5340_s1 + $0x624] ss:$8 sps:$4 sm:$0xff]  }
  0x71   : > { %1468 = vmatprep.subr.bf16.mxu0 %v3988_v41  ;;  %1658 = vmatprep.subr.bf16.mxu1 %v3991_v42  ;;  %v4024_v41 = vld [vmem:[%s5340_s1 + $0x414] ss:$8 sps:$4 sm:$0xff]   ;;  %v4022_v42 = vld [vmem:[%s5340_s1 + $0x410] ss:$8 sps:$4 sm:$0xff]   ;;  %v4124_v27 = vld [vmem:[%s5340_s1 + $0x620] ss:$8 sps:$4 sm:$0xff]  }
  0x74   : > { %1469 = vmatpush1.bf16.msra.mxu0 %v3986_v43  ;;  %1659 = vmatpush1.bf16.msra.mxu1 %v3989_v44  ;;  %v4025_v43 = vld [vmem:[%s5340_s1 + $0x490] ss:$8 sps:$4 sm:$0xff]   ;;  %v4030_v44 = vld [vmem:[%s5340_s1 + $0x424] ss:$8 sps:$4 sm:$0xff]  }
  0x75   : > { %1470 = vmatprep.subr.bf16.mxu0 %v3994_v46  ;;  %1660 = vmatprep.subr.bf16.mxu1 %v3997_v48  ;;  %v4033_v46 = vld [vmem:[%s5340_s1 + $0x4a4] ss:$8 sps:$4 sm:$0xff]   ;;  %v4028_v48 = vld [vmem:[%s5340_s1 + $0x420] ss:$8 sps:$4 sm:$0xff]  }
  0x78   : > { %1471 = vmatpush1.bf16.msra.mxu0 %v3992_v53  ;;  %1661 = vmatpush1.bf16.msra.mxu1 %v3995_v57  ;;  %v4031_v53 = vld [vmem:[%s5340_s1 + $0x4a0] ss:$8 sps:$4 sm:$0xff]   ;;  %v4036_v57 = vld [vmem:[%s5340_s1 + $0x434] ss:$8 sps:$4 sm:$0xff]  }
  0x79   : > { %1472 = vmatprep.subr.bf16.mxu0 %v4000_v60  ;;  %1662 = vmatprep.subr.bf16.mxu1 %v4003_v61  ;;  %v4039_v60 = vld [vmem:[%s5340_s1 + $0x4b4] ss:$8 sps:$4 sm:$0xff]   ;;  %v4034_v61 = vld [vmem:[%s5340_s1 + $0x430] ss:$8 sps:$4 sm:$0xff]  }
  0x7c   : > { %1473 = vmatpush1.bf16.msra.mxu0 %v3998_v31  ;;  %1663 = vmatpush1.bf16.msra.mxu1 %v4001_v62  ;;  %v4037_v31 = vld [vmem:[%s5340_s1 + $0x4b0] ss:$8 sps:$4 sm:$0xff]   ;;  %v4042_v62 = vld [vmem:[%s5340_s1 + $0x444] ss:$8 sps:$4 sm:$0xff]  }
  0x7d   : > { %1474 = vmatprep.subr.bf16.mxu0 %v4006_v5  ;;  %1664 = vmatprep.subr.bf16.mxu1 %v4009_v9  ;;  %v4045_v5 = vld [vmem:[%s5340_s1 + $0x4c4] ss:$8 sps:$4 sm:$0xff]   ;;  %v4048_v9 = vld [vmem:[%s5340_s1 + $0x454] ss:$8 sps:$4 sm:$0xff]  }
  0x80   : > { %1475 = vmatpush1.bf16.msra.mxu0 %v4004_v11  ;;  %1665 = vmatpush1.bf16.msra.mxu1 %v4007_v13  ;;  %v4051_v11 = vld [vmem:[%s5340_s1 + $0x4d4] ss:$8 sps:$4 sm:$0xff]   ;;  %v4046_v13 = vld [vmem:[%s5340_s1 + $0x450] ss:$8 sps:$4 sm:$0xff]  }
  0x81   : > { %1476 = vmatprep.subr.bf16.mxu0 %v4012_v14  ;;  %1666 = vmatprep.subr.bf16.mxu1 %v4015_v20  ;;  %v4049_v14 = vld [vmem:[%s5340_s1 + $0x4d0] ss:$8 sps:$4 sm:$0xff]   ;;  %v4052_v20 = vld [vmem:[%s5340_s1 + $0x460] ss:$8 sps:$4 sm:$0xff]  }
  0x84   : > { %1477 = vmatpush1.bf16.msra.mxu0 %v4010_v49  ;;  %1667 = vmatpush1.bf16.msra.mxu1 %v4013_v23  ;;  %v4055_v49 = vld [vmem:[%s5340_s1 + $0x4e0] ss:$8 sps:$4 sm:$0xff]   ;;  %v4058_v23 = vld [vmem:[%s5340_s1 + $0x470] ss:$8 sps:$4 sm:$0xff]  }
  0x85   : > { %1808 = vmatprep.subr.bf16.mxu0 %v4018_v38  ;;  %1964 = vmatprep.subr.bf16.mxu1 %v4021_v28  ;;  %v4066_v38 = vld [vmem:[%s5340_s1 + $0x504] ss:$8 sps:$4 sm:$0xff]   ;;  %v4070_v28 = vld [vmem:[%s5340_s1 + $0x510] ss:$8 sps:$4 sm:$0xff]  }
  0x87   : > { %1495 = vmatmul.mubr.bf16.vlgmr.msra.gmra.mrb[12].mxu0 %v1380_v51  ;;  %1685 = vmatmul.mubr.bf16.vlgmr.msra.gmra.mrb[12].mxu1 %v1570_v34  ;;  %v4073_v51 = vld [vmem:[%s5340_s1 + $0x590] ss:$8 sps:$4 sm:$0xff]   ;;  %v4081_v34 = vld [vmem:[%s5340_s1 + $0x5a4] ss:$8 sps:$4 sm:$0xff]  }
  0x88   : > { %1809 = vmatpush1.bf16.msra.mxu0 %v4016_v58  ;;  %1965 = vmatpush1.bf16.msra.mxu1 %v4019_v37  ;;  %v4078_v58 = vld [vmem:[%s5340_s1 + $0x524] ss:$8 sps:$4 sm:$0xff]   ;;  %v4076_v37 = vld [vmem:[%s5340_s1 + $0x520] ss:$8 sps:$4 sm:$0xff]  }
  0x89   : > { %1810 = vmatprep.subr.bf16.mxu0 %v4024_v41  ;;  %1966 = vmatprep.subr.bf16.mxu1 %v4027_v52  ;;  %v4079_v41 = vld [vmem:[%s5340_s1 + $0x5a0] ss:$8 sps:$4 sm:$0xff]   ;;  %v4084_v52 = vld [vmem:[%s5340_s1 + $0x534] ss:$8 sps:$4 sm:$0xff]  }
  0x8a   : > { %1840 = vmatprep.mubr.bf16.mxu0 %v4216_v2  ;;  %1996 = vmatprep.mubr.bf16.mxu1 %v4216_v2 }
  0x8c   : > { %1811 = vmatpush1.bf16.msra.mxu0 %v4022_v42  ;;  %1967 = vmatpush1.bf16.msra.mxu1 %v4025_v43  ;;  %v4087_v42 = vld [vmem:[%s5340_s1 + $0x5b4] ss:$8 sps:$4 sm:$0xff]   ;;  %v4082_v43 = vld [vmem:[%s5340_s1 + $0x530] ss:$8 sps:$4 sm:$0xff]  }
  0x8d   : > { %1812 = vmatprep.subr.bf16.mxu0 %v4030_v44  ;;  %1968 = vmatprep.subr.bf16.mxu1 %v4033_v46  ;;  %v4085_v44 = vld [vmem:[%s5340_s1 + $0x5b0] ss:$8 sps:$4 sm:$0xff]   ;;  %v4090_v46 = vld [vmem:[%s5340_s1 + $0x544] ss:$8 sps:$4 sm:$0xff]  }
  0x90   : > { %1813 = vmatpush1.bf16.msra.mxu0 %v4028_v48  ;;  %1969 = vmatpush1.bf16.msra.mxu1 %v4031_v53  ;;  %v4093_v48 = vld [vmem:[%s5340_s1 + $0x5c4] ss:$8 sps:$4 sm:$0xff]   ;;  %v4088_v53 = vld [vmem:[%s5340_s1 + $0x540] ss:$8 sps:$4 sm:$0xff]  }
  0x91   : > { %1814 = vmatprep.subr.bf16.mxu0 %v4036_v57  ;;  %1970 = vmatprep.subr.bf16.mxu1 %v4039_v60  ;;  %v4091_v57 = vld [vmem:[%s5340_s1 + $0x5c0] ss:$8 sps:$4 sm:$0xff]   ;;  %v4096_v60 = vld [vmem:[%s5340_s1 + $0x554] ss:$8 sps:$4 sm:$0xff]  }
  0x94   : > { %1815 = vmatpush1.bf16.msra.mxu0 %v4034_v61  ;;  %1971 = vmatpush1.bf16.msra.mxu1 %v4037_v31  ;;  %v4099_v61 = vld [vmem:[%s5340_s1 + $0x5d4] ss:$8 sps:$4 sm:$0xff]   ;;  %v4094_v31 = vld [vmem:[%s5340_s1 + $0x550] ss:$8 sps:$4 sm:$0xff]  }
  0x95   : > { %1816 = vmatprep.subr.bf16.mxu0 %v4042_v62  ;;  %1972 = vmatprep.subr.bf16.mxu1 %v4045_v5  ;;  %v4097_v62 = vld [vmem:[%s5340_s1 + $0x5d0] ss:$8 sps:$4 sm:$0xff]   ;;  %v4102_v5 = vld [vmem:[%s5340_s1 + $0x564] ss:$8 sps:$4 sm:$0xff]  }
  0x98   : > { %1817 = vmatpush1.bf16.msra.mxu0 %v4040_v6  ;;  %1973 = vmatpush1.bf16.msra.mxu1 %v4043_v7  ;;  %v4105_v6 = vld [vmem:[%s5340_s1 + $0x5e4] ss:$8 sps:$4 sm:$0xff]   ;;  %v4100_v7 = vld [vmem:[%s5340_s1 + $0x560] ss:$8 sps:$4 sm:$0xff]  }
  0x99   : > { %1818 = vmatprep.subr.bf16.mxu0 %v4048_v9  ;;  %1974 = vmatprep.subr.bf16.mxu1 %v4051_v11  ;;  %v4103_v9 = vld [vmem:[%s5340_s1 + $0x5e0] ss:$8 sps:$4 sm:$0xff]   ;;  %v4108_v11 = vld [vmem:[%s5340_s1 + $0x574] ss:$8 sps:$4 sm:$0xff]  }
  0x9c   : > { %1819 = vmatpush1.bf16.msra.mxu0 %v4046_v13  ;;  %1975 = vmatpush1.bf16.msra.mxu1 %v4049_v14  ;;  %v4111_v13 = vld [vmem:[%s5340_s1 + $0x5f4] ss:$8 sps:$4 sm:$0xff]   ;;  %v2048_v14 = vrot.slane %v2041_v35, %v4380_v1 }
  0x9d   : > { %1820 = vmatprep.subr.bf16.mxu0 %v4054_v18  ;;  %1976 = vmatprep.subr.bf16.mxu1 %v4057_v54  ;;  %v4106_v18 = vld [vmem:[%s5340_s1 + $0x570] ss:$8 sps:$4 sm:$0xff]   ;;  %v2221_v54 = vrot.slane %v2214_v40, %v4380_v1  ;;  %v4115_v40 = vld [vmem:[%s5340_s1 + $0x680] ss:$8 sps:$4 sm:$0xff]  }
  0x9e   : > { %v2055_v35 = vrot.slane %v2048_v14, %v4380_v1  ;;  %v4183_v14 = vld [vmem:[%s5340_s1 + $0x7b4] ss:$8 sps:$4 sm:$0xff]  }
  0x9f   : > { %v2228_v63 = vrot.slane %v2221_v54, %v4380_v1  ;;  %v4181_v54 = vld [vmem:[%s5340_s1 + $0x7b0] ss:$8 sps:$4 sm:$0xff]  }
  0xa0   : > { %1821 = vmatpush1.bf16.msra.mxu0 %v4052_v20  ;;  %1977 = vmatpush1.bf16.msra.mxu1 %v4055_v49  ;;  %v4109_v20 = vld [vmem:[%s5340_s1 + $0x5f0] ss:$8 sps:$4 sm:$0xff]   ;;  %v4120_v49 = vld [vmem:[%s5340_s1 + $0x614] ss:$8 sps:$4 sm:$0xff]  }
  0xa1   : > { %1822 = vmatprep.subr.bf16.mxu0 %v4060_v56  ;;  %1978 = vmatprep.subr.bf16.mxu1 %v4063_v22  ;;  %v4123_v56 = vld [vmem:[%s5340_s1 + $0x694] ss:$8 sps:$4 sm:$0xff]   ;;  %v4118_v22 = vld [vmem:[%s5340_s1 + $0x610] ss:$8 sps:$4 sm:$0xff]  }
  0xa4   : > { %1823 = vmatpush1.bf16.msra.mxu0 %v4058_v23  ;;  %1979 = vmatpush1.bf16.msra.mxu1 %v4061_v25  ;;  %v4121_v23 = vld [vmem:[%s5340_s1 + $0x690] ss:$8 sps:$4 sm:$0xff]   ;;  %v4129_v25 = vld [vmem:[%s5340_s1 + $0x6a4] ss:$8 sps:$4 sm:$0xff]  }
  0xa5   : > { %2137 = vmatprep.subr.bf16.mxu0 %v4066_v38  ;;  %2310 = vmatprep.subr.bf16.mxu1 %v4069_v3  ;;  %v4127_v38 = vld [vmem:[%s5340_s1 + $0x6a0] ss:$8 sps:$4 sm:$0xff]   ;;  %v4132_v3 = vld [vmem:[%s5340_s1 + $0x634] ss:$8 sps:$4 sm:$0xff]  }
  0xa7   : > { %1841 = vmatmul.mubr.bf16.vlgmr.msra.gmra.mrb[16].mxu0 %v1726_v4  ;;  %1997 = vmatmul.mubr.bf16.vlgmr.msra.gmra.mrb[16].mxu1 %v1882_v0  ;;  %v4135_v4 = vld [vmem:[%s5340_s1 + $0x6b4] ss:$8 sps:$4 sm:$0xff]   ;;  %v4133_v0 = vld [vmem:[%s5340_s1 + $0x6b0] ss:$8 sps:$4 sm:$0xff]  }
  0xa8   : > { %2138 = vmatpush1.bf16.msra.mxu0 %v4064_v12  ;;  %2311 = vmatpush1.bf16.msra.mxu1 %v4067_v16  ;;  %v4130_v12 = vld [vmem:[%s5340_s1 + $0x630] ss:$8 sps:$4 sm:$0xff]   ;;  %v4138_v16 = vld [vmem:[%s5340_s1 + $0x644] ss:$8 sps:$4 sm:$0xff]  }
  0xa9   : > { %2139 = vmatprep.subr.bf16.mxu0 %v4072_v19  ;;  %2312 = vmatprep.subr.bf16.mxu1 %v4075_v50  ;;  %v4141_v19 = vld [vmem:[%s5340_s1 + $0x6c4] ss:$8 sps:$4 sm:$0xff]   ;;  %v4136_v50 = vld [vmem:[%s5340_s1 + $0x640] ss:$8 sps:$4 sm:$0xff]  }
  0xaa   : > { %2169 = vmatprep.mubr.bf16.mxu0 %v4216_v2  ;;  %2342 = vmatprep.mubr.bf16.mxu1 %v4216_v2 }
  0xac   : > { %2140 = vmatpush1.bf16.msra.mxu0 %v4070_v28  ;;  %2313 = vmatpush1.bf16.msra.mxu1 %v4073_v51  ;;  %v4139_v28 = vld [vmem:[%s5340_s1 + $0x6c0] ss:$8 sps:$4 sm:$0xff]   ;;  %v4144_v51 = vld [vmem:[%s5340_s1 + $0x654] ss:$8 sps:$4 sm:$0xff]  }
  0xad   : > { %2141 = vmatprep.subr.bf16.mxu0 %v4078_v58  ;;  %2314 = vmatprep.subr.bf16.mxu1 %v4081_v34  ;;  %v4147_v58 = vld [vmem:[%s5340_s1 + $0x6d4] ss:$8 sps:$4 sm:$0xff]   ;;  %v4142_v34 = vld [vmem:[%s5340_s1 + $0x650] ss:$8 sps:$4 sm:$0xff]  }
  0xb0   : > { %2142 = vmatpush1.bf16.msra.mxu0 %v4076_v37  ;;  %2315 = vmatpush1.bf16.msra.mxu1 %v4079_v41  ;;  %v4145_v37 = vld [vmem:[%s5340_s1 + $0x6d0] ss:$8 sps:$4 sm:$0xff]   ;;  %v4150_v41 = vld [vmem:[%s5340_s1 + $0x664] ss:$8 sps:$4 sm:$0xff]  }
  0xb1   : > { %2143 = vmatprep.subr.bf16.mxu0 %v4084_v52  ;;  %2316 = vmatprep.subr.bf16.mxu1 %v4087_v42  ;;  %v4153_v52 = vld [vmem:[%s5340_s1 + $0x6e4] ss:$8 sps:$4 sm:$0xff]   ;;  %v4148_v42 = vld [vmem:[%s5340_s1 + $0x660] ss:$8 sps:$4 sm:$0xff]  }
  0xb4   : > { %2144 = vmatpush1.bf16.msra.mxu0 %v4082_v43  ;;  %2317 = vmatpush1.bf16.msra.mxu1 %v4085_v44  ;;  %v4151_v43 = vld [vmem:[%s5340_s1 + $0x6e0] ss:$8 sps:$4 sm:$0xff]   ;;  %v4156_v44 = vld [vmem:[%s5340_s1 + $0x674] ss:$8 sps:$4 sm:$0xff]  }
  0xb5   : > { %2145 = vmatprep.subr.bf16.mxu0 %v4090_v46  ;;  %2318 = vmatprep.subr.bf16.mxu1 %v4093_v48  ;;  %v4159_v46 = vld [vmem:[%s5340_s1 + $0x6f4] ss:$8 sps:$4 sm:$0xff]   ;;  %v2377_v48 = vrot.slane %v2370_v15, %v4380_v1 }
  0xb7   : > { %v2384_v15 = vrot.slane %v2377_v48, %v4380_v1 }
  0xb8   : > { %2146 = vmatpush1.bf16.msra.mxu0 %v4088_v53  ;;  %2319 = vmatpush1.bf16.msra.mxu1 %v4091_v57  ;;  %v4154_v53 = vld [vmem:[%s5340_s1 + $0x670] ss:$8 sps:$4 sm:$0xff]   ;;  %v2533_v57 = vrot.slane %v2526_v17, %v4380_v1  ;;  %v4163_v17 = vld [vmem:[%s5340_s1 + $0x780] ss:$8 sps:$4 sm:$0xff]  }
  0xb9   : > { %2147 = vmatprep.subr.bf16.mxu0 %v4096_v60  ;;  %2320 = vmatprep.subr.bf16.mxu1 %v4099_v61  ;;  %v4157_v60 = vld [vmem:[%s5340_s1 + $0x6f0] ss:$8 sps:$4 sm:$0xff]   ;;  %v4168_v61 = vld [vmem:[%s5340_s1 + $0x714] ss:$8 sps:$4 sm:$0xff]  }
  0xba   : > { %v2540_v10 = vrot.slane %v2533_v57, %v4380_v1 }
  0xbc   : > { %2148 = vmatpush1.bf16.msra.mxu0 %v4094_v31  ;;  %2321 = vmatpush1.bf16.msra.mxu1 %v4097_v62  ;;  %v4171_v31 = vld [vmem:[%s5340_s1 + $0x794] ss:$8 sps:$4 sm:$0xff]   ;;  %v4166_v62 = vld [vmem:[%s5340_s1 + $0x710] ss:$8 sps:$4 sm:$0xff]  }
  0xbd   : > { %2149 = vmatprep.subr.bf16.mxu0 %v4102_v5  ;;  %2322 = vmatprep.subr.bf16.mxu1 %v4105_v6  ;;  %v4169_v5 = vld [vmem:[%s5340_s1 + $0x790] ss:$8 sps:$4 sm:$0xff]   ;;  %v4174_v6 = vld [vmem:[%s5340_s1 + $0x724] ss:$8 sps:$4 sm:$0xff]  }
  0xc0   : > { %2150 = vmatpush1.bf16.msra.mxu0 %v4100_v7  ;;  %2323 = vmatpush1.bf16.msra.mxu1 %v4103_v9  ;;  %v4177_v7 = vld [vmem:[%s5340_s1 + $0x7a4] ss:$8 sps:$4 sm:$0xff]   ;;  %v4172_v9 = vld [vmem:[%s5340_s1 + $0x720] ss:$8 sps:$4 sm:$0xff]  }
  0xc1   : > { %2151 = vmatprep.subr.bf16.mxu0 %v4108_v11  ;;  %2324 = vmatprep.subr.bf16.mxu1 %v4111_v13  ;;  %v4175_v11 = vld [vmem:[%s5340_s1 + $0x7a0] ss:$8 sps:$4 sm:$0xff]   ;;  %v4180_v13 = vld [vmem:[%s5340_s1 + $0x734] ss:$8 sps:$4 sm:$0xff]  }
  0xc4   : > { %2152 = vmatpush1.bf16.msra.mxu0 %v4106_v18  ;;  %2325 = vmatpush1.bf16.msra.mxu1 %v4109_v20  ;;  %v4178_v18 = vld [vmem:[%s5340_s1 + $0x730] ss:$8 sps:$4 sm:$0xff]   ;;  %v4186_v20 = vld [vmem:[%s5340_s1 + $0x744] ss:$8 sps:$4 sm:$0xff]  }
  0xc5   : > { %2466 = vmatprep.subr.bf16.mxu0 %v4114_v59  ;;  %2622 = vmatprep.subr.bf16.mxu1 %v4117_v30  ;;  %v4189_v59 = vld [vmem:[%s5340_s1 + $0x7c4] ss:$8 sps:$4 sm:$0xff]   ;;  %v4184_v30 = vld [vmem:[%s5340_s1 + $0x740] ss:$8 sps:$4 sm:$0xff]  }
  0xc7   : > { %2170 = vmatmul.mubr.bf16.vlgmr.msra.gmra.mrb[20].mxu0 %v2055_v35  ;;  %2343 = vmatmul.mubr.bf16.vlgmr.msra.gmra.mrb[20].mxu1 %v2228_v63  ;;  %v4187_v35 = vld [vmem:[%s5340_s1 + $0x7c0] ss:$8 sps:$4 sm:$0xff]   ;;  %v4192_v63 = vld [vmem:[%s5340_s1 + $0x754] ss:$8 sps:$4 sm:$0xff]  }
  0xc8   : > { %2467 = vmatpush1.bf16.msra.mxu0 %v4112_v36  ;;  %2623 = vmatpush1.bf16.msra.mxu1 %v4115_v40  ;;  %v4195_v36 = vld [vmem:[%s5340_s1 + $0x7d4] ss:$8 sps:$4 sm:$0xff]   ;;  %v4190_v40 = vld [vmem:[%s5340_s1 + $0x750] ss:$8 sps:$4 sm:$0xff]  }
  0xc9   : > { %2468 = vmatprep.subr.bf16.mxu0 %v4120_v49  ;;  %2624 = vmatprep.subr.bf16.mxu1 %v4123_v56  ;;  %v4193_v49 = vld [vmem:[%s5340_s1 + $0x7d0] ss:$8 sps:$4 sm:$0xff]   ;;  %v4198_v56 = vld [vmem:[%s5340_s1 + $0x764] ss:$8 sps:$4 sm:$0xff]  }
  0xca   : > { %2498 = vmatprep.mubr.bf16.mxu0 %v4216_v2  ;;  %2654 = vmatprep.mubr.bf16.mxu1 %v4216_v2 }
  0xcc   : > { %2469 = vmatpush1.bf16.msra.mxu0 %v4118_v22  ;;  %2625 = vmatpush1.bf16.msra.mxu1 %v4121_v23  ;;  %v4201_v23 = vld [vmem:[%s5340_s1 + $0x7e4] ss:$8 sps:$4 sm:$0xff]  }
  0xcd   : > { %2470 = vmatprep.subr.bf16.mxu0 %v4126_v24  ;;  %2626 = vmatprep.subr.bf16.mxu1 %v4129_v25 }
  0xd0   : > { %2471 = vmatpush1.bf16.msra.mxu0 %v4124_v27  ;;  %2627 = vmatpush1.bf16.msra.mxu1 %v4127_v38 }
  0xd1   : > { %2472 = vmatprep.subr.bf16.mxu0 %v4132_v3  ;;  %2628 = vmatprep.subr.bf16.mxu1 %v4135_v4  ;;  %v4196_v4 = vld [vmem:[%s5340_s1 + $0x760] ss:$8 sps:$4 sm:$0xff]  }
  0xd4   : > { %2473 = vmatpush1.bf16.msra.mxu0 %v4130_v12  ;;  %2629 = vmatpush1.bf16.msra.mxu1 %v4133_v0 }
  0xd5   : > { %2474 = vmatprep.subr.bf16.mxu0 %v4138_v16  ;;  %2630 = vmatprep.subr.bf16.mxu1 %v4141_v19  ;;  %v4199_v19 = vld [vmem:[%s5340_s1 + $0x7e0] ss:$8 sps:$4 sm:$0xff]  }
  0xd8   : > { %2475 = vmatpush1.bf16.msra.mxu0 %v4136_v50  ;;  %2631 = vmatpush1.bf16.msra.mxu1 %v4139_v28  ;;  %v4204_v50 = vld [vmem:[%s5340_s1 + $0x774] ss:$8 sps:$4 sm:$0xff]  }
  0xd9   : > { %2476 = vmatprep.subr.bf16.mxu0 %v4144_v51  ;;  %2632 = vmatprep.subr.bf16.mxu1 %v4147_v58  ;;  %v4207_v51 = vld [vmem:[%s5340_s1 + $0x7f4] ss:$8 sps:$4 sm:$0xff]   ;;  %v2706_v58 = vrot.slane %v2699_v32, %v4380_v1 }
  0xdb   : > { %v2713_v45 = vrot.slane %v2706_v58, %v4380_v1 }
  0xdc   : > { %2477 = vmatpush1.bf16.msra.mxu0 %v4142_v34  ;;  %2633 = vmatpush1.bf16.msra.mxu1 %v4145_v37  ;;  %v4202_v34 = vld [vmem:[%s5340_s1 + $0x770] ss:$8 sps:$4 sm:$0xff]   ;;  %v2879_v37 = vrot.slane %v2872_v39, %v4380_v1 }
  0xdd   : > { %2478 = vmatprep.subr.bf16.mxu0 %v4150_v41  ;;  %2634 = vmatprep.subr.bf16.mxu1 %v4153_v52  ;;  %v4205_v41 = vld [vmem:[%s5340_s1 + $0x7f0] ss:$8 sps:$4 sm:$0xff]  }
  0xde   : > { %v2886_v29 = vrot.slane %v2879_v37, %v4380_v1 }
  0xe0   : > { %2479 = vmatpush1.bf16.msra.mxu0 %v4148_v42  ;;  %2635 = vmatpush1.bf16.msra.mxu1 %v4151_v43 }
  0xe1   : > { %2480 = vmatprep.subr.bf16.mxu0 %v4156_v44  ;;  %2636 = vmatprep.subr.bf16.mxu1 %v4159_v46 }
  0xe4   : > { %2481 = vmatpush1.bf16.msra.mxu0 %v4154_v53  ;;  %2637 = vmatpush1.bf16.msra.mxu1 %v4157_v60 }
  0xe5   : > { %2795 = vmatprep.subr.bf16.mxu0 %v4162_v8  ;;  %2968 = vmatprep.subr.bf16.mxu1 %v4165_v47 }
  0xe7   : > { %2499 = vmatmul.mubr.bf16.vlgmr.msra.gmra.mrb[24].mxu0 %v2384_v15  ;;  %2655 = vmatmul.mubr.bf16.vlgmr.msra.gmra.mrb[24].mxu1 %v2540_v10 }
  0xe8   : > { %2796 = vmatpush1.bf16.msra.mxu0 %v4160_v21  ;;  %2969 = vmatpush1.bf16.msra.mxu1 %v4163_v17 }
  0xe9   : > { %2797 = vmatprep.subr.bf16.mxu0 %v4168_v61  ;;  %2970 = vmatprep.subr.bf16.mxu1 %v4171_v31 }
  0xea   : > { %2827 = vmatprep.mubr.bf16.mxu0 %v4216_v2  ;;  %3000 = vmatprep.mubr.bf16.mxu1 %v4216_v2 }
  0xec   : > { %2798 = vmatpush1.bf16.msra.mxu0 %v4166_v62  ;;  %2971 = vmatpush1.bf16.msra.mxu1 %v4169_v5 }
  0xed   : > { %2799 = vmatprep.subr.bf16.mxu0 %v4174_v6  ;;  %2972 = vmatprep.subr.bf16.mxu1 %v4177_v7 }
  0xf0   : > { %2800 = vmatpush1.bf16.msra.mxu0 %v4172_v9  ;;  %2973 = vmatpush1.bf16.msra.mxu1 %v4175_v11 }
  0xf1   : > { %2801 = vmatprep.subr.bf16.mxu0 %v4180_v13  ;;  %2974 = vmatprep.subr.bf16.mxu1 %v4183_v14 }
  0xf4   : > { %2802 = vmatpush1.bf16.msra.mxu0 %v4178_v18  ;;  %2975 = vmatpush1.bf16.msra.mxu1 %v4181_v54 }
  0xf5   : > { %2803 = vmatprep.subr.bf16.mxu0 %v4186_v20  ;;  %2976 = vmatprep.subr.bf16.mxu1 %v4189_v59 }
  0xf8   : > { %2804 = vmatpush1.bf16.msra.mxu0 %v4184_v30  ;;  %2977 = vmatpush1.bf16.msra.mxu1 %v4187_v35 }
  0xf9   : > { %2805 = vmatprep.subr.bf16.mxu0 %v4192_v63  ;;  %2978 = vmatprep.subr.bf16.mxu1 %v4195_v36 }
  0xfa   : > { %v464_v22 = vpop.f32.mrb[0].mxu0  ;;  %v601_v24 = vpop.f32.mrb[0].mxu1 }
  0xfb   : > { %v466_v25 = vpop.f32.mrb[1].mxu0  ;;  %v602_v27 = vadd.f32 %v601_v24, %v464_v22  ;;  %v603_v38 = vpop.f32.mrb[1].mxu1 }
  0xfc   : > { %v468_v3 = vpop.f32.mrb[2].mxu0  ;;  %2806 = vmatpush1.bf16.msra.mxu0 %v4190_v40  ;;  %v604_v12 = vadd.f32 %v603_v38, %v466_v25  ;;  %v605_v0 = vpop.f32.mrb[2].mxu1  ;;  %2979 = vmatpush1.bf16.msra.mxu1 %v4193_v49 }
  0xfd   : > { %v469_v16 = vpop.f32.mrb[3].mxu0  ;;  %2807 = vmatprep.subr.bf16.mxu0 %v4198_v56  ;;  %v606_v28 = vpop.f32.mrb[3].mxu1  ;;  %2980 = vmatprep.subr.bf16.mxu1 %v4201_v23 }
 0x100   : > { %2808 = vmatpush1.bf16.msra.mxu0 %v4196_v4  ;;  %2981 = vmatpush1.bf16.msra.mxu1 %v4199_v19 }
 0x101   : > { %2809 = vmatprep.subr.bf16.mxu0 %v4204_v50  ;;  %2982 = vmatprep.subr.bf16.mxu1 %v4207_v51 }
 0x104   : > { %2810 = vmatpush1.bf16.msra.mxu0 %v4202_v34  ;;  %2983 = vmatpush1.bf16.msra.mxu1 %v4205_v41 }
 0x107   : > { %2828 = vmatmul.mubr.bf16.vlgmr.msra.gmra.mrb[28].mxu0 %v2713_v45  ;;  %3001 = vmatmul.mubr.bf16.vlgmr.msra.gmra.mrb[28].mxu1 %v2886_v29 }
 0x11a   : > { %v804_v32 = vpop.f32.mrb[4].mxu0  ;;  %v994_v42 = vpop.f32.mrb[4].mxu1 }
 0x11b   : > { %v811_v52 = vadd.f32 %v804_v32, %v602_v27  ;;  %v806_v55 = vpop.f32.mrb[5].mxu0  ;;  %v996_v39 = vpop.f32.mrb[5].mxu1 }
 0x11c   : > { %v812_v33 = vadd.f32 %v806_v55, %v604_v12  ;;  %v808_v43 = vpop.f32.mrb[6].mxu0  ;;  %v998_v46 = vpop.f32.mrb[6].mxu1 }
 0x11d   : > { %v1001_v44 = vadd.f32 %v994_v42, %v811_v52  ;;  %v809_v48 = vpop.f32.mrb[7].mxu0  ;;  %v999_v57 = vpop.f32.mrb[7].mxu1 }
 0x11e   : > { %v1002_v53 = vadd.f32 %v996_v39, %v812_v33  ;;  %v3015_v57 = vsub.s32 0, %v4320_v26 }
 0x13a   : > { %v1150_v60 = vpop.f32.mrb[8].mxu0  ;;  %v1306_v47 = vpop.f32.mrb[8].mxu1 }
 0x13b   : > { %v1157_v8 = vadd.f32 %v1150_v60, %v1001_v44  ;;  %v1152_v15 = vpop.f32.mrb[9].mxu0  ;;  %v1308_v21 = vpop.f32.mrb[9].mxu1  ;;  %v3011_v60 = vld [vmem:[%s5341_s2] sm:$0x3] }
 0x13c   : > { %v1158_v10 = vadd.f32 %v1152_v15, %v1002_v53  ;;  %v1154_v17 = vpop.f32.mrb[10].mxu0  ;;  %v1310_v31 = vpop.f32.mrb[10].mxu1 }
 0x13d   : > { %v1313_v61 = vadd.f32 %v1306_v47, %v1157_v8  ;;  %v1155_v62 = vpop.f32.mrb[11].mxu0  ;;  %v1311_v6 = vpop.f32.mrb[11].mxu1  ;;  %v3019_v8 = vsub.s32 1, %v4320_v26  ;;  %v4219_v47 = vmov 1983009808  }
 0x13e   : > { %v1314_v5 = vadd.f32 %v1308_v21, %v1158_v10  ;;  %v3029_v15 = vunpack.c.l.s4 %v4219_v47 }
 0x13f   : > { %v3020_v6 = vrot.slane %v3011_v60, %v3019_v8 }
 0x15a   : > { %v1496_v7 = vpop.f32.mrb[12].mxu0  ;;  %v1686_v11 = vpop.f32.mrb[12].mxu1 }
 0x15b   : > { %v1503_v9 = vadd.f32 %v1496_v7, %v1313_v61  ;;  %v1498_v13 = vpop.f32.mrb[13].mxu0  ;;  %v1688_v18 = vpop.f32.mrb[13].mxu1  ;;  %v3016_v61 = vrot.slane %v3011_v60, %v3015_v57  ;;  %v3030_v7 = vunpack.c.0.s8 %v3029_v15 }
 0x15c   : > { %v1504_v14 = vadd.f32 %v1498_v13, %v1314_v5  ;;  %v1500_v54 = vpop.f32.mrb[14].mxu0  ;;  %v1690_v59 = vpop.f32.mrb[14].mxu1 }
 0x15d   : > { %v1693_v20 = vadd.f32 %v1686_v11, %v1503_v9  ;;  %v1501_v30 = vpop.f32.mrb[15].mxu0  ;;  %v1691_v63 = vpop.f32.mrb[15].mxu1 }
 0x15e   : > { %v1694_v35 = vadd.f32 %v1688_v18, %v1504_v14  ;;  %v3033_v30 = vsub.s32 %v3030_v7, %v4320_v26 }
 0x17a   : > { %v1842_v36 = vpop.f32.mrb[16].mxu0  ;;  %v1998_v49 = vpop.f32.mrb[16].mxu1 }
 0x17b   : > { %v1849_v40 = vadd.f32 %v1842_v36, %v1693_v20  ;;  %v1844_v56 = vpop.f32.mrb[17].mxu0  ;;  %v2000_v23 = vpop.f32.mrb[17].mxu1 }
 0x17c   : > { %v1850_v22 = vadd.f32 %v1844_v56, %v1694_v35  ;;  %v1846_v24 = vpop.f32.mrb[18].mxu0  ;;  %v2002_v27 = vpop.f32.mrb[18].mxu1 }
 0x17d   : > { %v2005_v25 = vadd.f32 %v1998_v49, %v1849_v40  ;;  %v1847_v38 = vpop.f32.mrb[19].mxu0  ;;  %v2003_v4 = vpop.f32.mrb[19].mxu1 }
 0x17e   : > { %v2006_v3 = vadd.f32 %v2000_v23, %v1850_v22 }
 0x19a   : > { %v2171_v12 = vpop.f32.mrb[20].mxu0  ;;  %v2344_v16 = vpop.f32.mrb[20].mxu1 }
 0x19b   : > { %v2178_v0 = vadd.f32 %v2171_v12, %v2005_v25  ;;  %v2173_v19 = vpop.f32.mrb[21].mxu0  ;;  %v2346_v28 = vpop.f32.mrb[21].mxu1 }
 0x19c   : > { %v2179_v50 = vadd.f32 %v2173_v19, %v2006_v3  ;;  %v2175_v51 = vpop.f32.mrb[22].mxu0  ;;  %v2348_v34 = vpop.f32.mrb[22].mxu1 }
 0x19d   : > { %v2351_v58 = vadd.f32 %v2344_v16, %v2178_v0  ;;  %v2176_v37 = vpop.f32.mrb[23].mxu0  ;;  %v2349_v45 = vpop.f32.mrb[23].mxu1 }
 0x19e   : > { %v2352_v41 = vadd.f32 %v2346_v28, %v2179_v50 }
 0x1ba   : > { %v2500_v29 = vpop.f32.mrb[24].mxu0  ;;  %v2656_v52 = vpop.f32.mrb[24].mxu1 }
 0x1bb   : > { %v2507_v32 = vadd.f32 %v2500_v29, %v2351_v58  ;;  %v2502_v42 = vpop.f32.mrb[25].mxu0  ;;  %v2658_v33 = vpop.f32.mrb[25].mxu1 }
 0x1bc   : > { %v2508_v55 = vadd.f32 %v2502_v42, %v2352_v41  ;;  %v2504_v39 = vpop.f32.mrb[26].mxu0  ;;  %v2660_v44 = vpop.f32.mrb[26].mxu1 }
 0x1bd   : > { %v2663_v43 = vadd.f32 %v2656_v52, %v2507_v32  ;;  %v2505_v46 = vpop.f32.mrb[27].mxu0  ;;  %v2661_v53 = vpop.f32.mrb[27].mxu1 }
 0x1be   : > { %v2664_v48 = vadd.f32 %v2658_v33, %v2508_v55 }
 0x1da   : > { %v2829_v10 = vpop.f32.mrb[28].mxu0  ;;  %v3002_v17 = vpop.f32.mrb[28].mxu1 }
 0x1db   : > { %v2836_v21 = vadd.f32 %v2829_v10, %v2663_v43  ;;  %v2831_v31 = vpop.f32.mrb[29].mxu0  ;;  %v3004_v5 = vpop.f32.mrb[29].mxu1 }
 0x1dc   : > { %v2837_v62 = vadd.f32 %v2831_v31, %v2664_v48  ;;  %v2833_v9 = vpop.f32.mrb[30].mxu0  ;;  %v3006_v13 = vpop.f32.mrb[30].mxu1 }
 0x1dd   : > { %v3009_v11 = vadd.f32 %v3002_v17, %v2836_v21  ;;  %v2834_v14 = vpop.f32.mrb[31].mxu0  ;;  %v3007_v54 = vpop.f32.mrb[31].mxu1 }
 0x1de   : > { %v3010_v18 = vadd.f32 %v3004_v5, %v2837_v62 }
 0x1df   : > { %v3023_v20 = vadd.f32 %v3016_v61, %v3009_v11 }
 0x1e0   : > { %v3024_v59 = vadd.f32 %v3020_v6, %v3010_v18 }
 0x1e2   : > { %v3027_v35 = vcombine.low %v3023_v20, %v3024_v59 }
 0x1e4   : > { %v3034_v63 = vrot.slane %v3027_v35, %v3033_v30 }
 0x1e6   : > { %v3035_v36 = vcombine.high %v3034_v63, %v3034_v63  ;;  %v3042_v40 = vrot.slane %v3034_v63, %v3033_v30 }
 0x1e8   : > { %v3043_v56 = vcombine.high %v3042_v40, %v3042_v40  ;;  %v3050_v22 = vrot.slane %v3035_v36, %v3033_v30  ;;  %v3056_v23 = vpack.c.bf16 %v3042_v40, %v3042_v40 }
 0x1ea   : > { %v3051_v24 = vcombine.high %v3050_v22, %v3050_v22  ;;  %v3057_v25 = vpack.c.bf16 %v3043_v56, %v3043_v56  ;;  %v3058_v27 = vpack.c.bf16 %v3050_v22, %v3050_v22  ;;  %v3157_v38 = vsel %vm5288_vm1, 0, %v3056_v23 }
 0x1eb   : > { %v3160_v26 = vpack.i.b16 %v4216_v2, %v3157_v38  ;;  %v3161_v3 = vshrl.u32 %v3157_v38, 16  ;;  %v3194_v4 = vsel %vm5288_vm1, %v3056_v23, 0 }
 0x1ec   : > { %v3059_v12 = vpack.c.bf16 %v3051_v24, %v3051_v24  ;;  %v3061_v0 = vshrl.u32 %v3058_v27, 16  ;;  %v3119_v16 = vsel %vm5288_vm1, %v3058_v27, 0  ;;  %v3158_v19 = vsel %vm5288_vm1, 0, %v3057_v25 }
 0x1ed   : > { %v3122_v50 = vpack.i.b16 %v3119_v16, %v4216_v2  ;;  %v3124_v28 = vshrl.u32 %v3119_v16, 16  ;;  %v3162_v51 = vpack.i.b16 %v4216_v2, %v3161_v3  ;;  %v3164_v58 = vpack.i.b16 %v4216_v2, %v3158_v19 }
 0x1ee   : > { %v3064_v34 = vshrl.u32 %v3059_v12, 16  ;;  %v3070_v37 = vshll.u32 %v3061_v0, 16  ;;  %v3120_v41 = vsel %vm5288_vm1, %v3059_v12, 0  ;;  %v3165_v45 = vshrl.u32 %v3158_v19, 16 }
 0x1ef   : > { %v3125_v29 = vpack.i.b16 %v3124_v28, %v4216_v2  ;;  %v3127_v32 = vpack.i.b16 %v3120_v41, %v4216_v2  ;;  %v3128_v52 = vshrl.u32 %v3120_v41, 16  ;;  %v3167_v42 = vcombine.low %v3160_v26, %v3164_v58 }
 0x1f0   : > { %v3073_v55 = vshll.u32 %v3064_v34, 16  ;;  %v3081_v33 = vsel %vm5288_vm1, 0, %v3070_v37  ;;  %v3166_v39 = vpack.i.b16 %v4216_v2, %v3165_v45  ;;  %v3195_v43 = vsel %vm5288_vm1, %v3057_v25, 0 }
 0x1f1   : > { %v3085_v44 = vpack.i.b16 %v3081_v33, %v4216_v2  ;;  %v3087_v46 = vshrl.u32 %v3081_v33, 16  ;;  %v3129_v48 = vpack.i.b16 %v3128_v52, %v4216_v2  ;;  %v3130_v53 = vcombine.low %v3122_v50, %v3127_v32 }
 0x1f2   : > { %v3082_v57 = vsel %vm5288_vm1, 0, %v3073_v55  ;;  %v3168_v60 = vcombine.low %v3162_v51, %v3166_v39  ;;  %v3175_v8 = vrot.slane %v3167_v42, %v4380_v1  ;;  %v3197_v47 = vpack.i.b16 %v4216_v2, %v3194_v4 }
 0x1f3   : > { %v3088_v15 = vpack.i.b16 %v3087_v46, %v4216_v2  ;;  %v3090_v10 = vpack.i.b16 %v3082_v57, %v4216_v2  ;;  %v3091_v21 = vshrl.u32 %v3082_v57, 16  ;;  %v3131_v17 = vcombine.low %v3125_v29, %v3129_v48 }
 0x1f4   : > { %v3138_v61 = vrot.slane %v3130_v53, %v4380_v1  ;;  %v3182_v31 = vrot.slane %v3168_v60, %v4380_v1  ;;  %v3198_v62 = vshrl.u32 %v3194_v4, 16  ;;  %v3201_v5 = vpack.i.b16 %v4216_v2, %v3195_v43 }
 0x1f5   : > { %v3092_v6 = vpack.i.b16 %v3091_v21, %v4216_v2  ;;  %v3093_v7 = vcombine.low %v3085_v44, %v3090_v10  ;;  %v3145_v9 = vrot.slane %v3131_v17, %v4380_v1  ;;  %v3202_v11 = vshrl.u32 %v3195_v43, 16 }
 0x1f6   : > { %v3183_v13 = vcombine.low %v3175_v8, %v3182_v31  ;;  %v3199_v14 = vpack.i.b16 %v4216_v2, %v3198_v62  ;;  %v3204_v59 = vcombine.low %v3197_v47, %v3201_v5 }
 0x1f7   : > { %v3094_v18 = vcombine.low %v3088_v15, %v3092_v6  ;;  %v3146_v54 = vcombine.low %v3138_v61, %v3145_v9  ;;  %v3203_v20 = vpack.i.b16 %v4216_v2, %v3202_v11  ;;  %v3101_v30 = vrot.slane %v3093_v7, %v4380_v1 }
 0x1f8   : > { %3809 = vst.sshfl [vmem:[%s168_s10 + $0x8] sm:$0x55 pattern:$0x73625140] %v3183_v13  ;;  %v3212_v40 = vrot.slane %v3204_v59, %v4380_v1 }
 0x1f9   : > { %v3108_v35 = vrot.slane %v3094_v18, %v4380_v1  ;;  %3808 = vst.sshfl [vmem:[%s168_s10 + $0x4] sm:$0x55 pattern:$0x73625140] %v3146_v54  ;;  %v3205_v63 = vcombine.low %v3199_v14, %v3203_v20 }
 0x1fb   : > { %v3109_v36 = vcombine.low %v3101_v30, %v3108_v35  ;;  %v3219_v49 = vrot.slane %v3205_v63, %v4380_v1 }
 0x1fd   : > { %3802 = vst.sshfl [vmem:[%s168_s10] sm:$0x55 pattern:$0x73625140] %v3109_v36  ;;  %v3220_v56 = vcombine.low %v3212_v40, %v3219_v49 }
 0x1ff   : > { %3810 = vst.sshfl [vmem:[%s168_s10 + $0xc] sm:$0x55 pattern:$0x73625140] %v3220_v56 }
 0x200 PF: > { %s13_s12 = sadd.s32 1, %s4214_s12  }
 0x201   : > { %p10_p4 = scmp.ge.s32.totalorder %s13_s12, 4  }
 0x203   :  { %12 = sbr.rel (!%p10_p4) target bundleno = 1 (0x1), region = 83 }

// kernel: ac_discriminator_forward.7
= control target key start
LH: loop header
LB: loop body
LE: loop exit
PB: predicated region body
PF: predicated region fallthrough
CT: control target
= control target key end

     0   :  { %s3313_s0 = inlined_call_operand.vmem [shape: bf16[2,4,2,512], index: 0, kind: input, shape index: {}]   ;;  %s3314_s1 = inlined_call_operand.vmem [shape: bf16[256,1024], index: 1, kind: input, shape index: {}]   ;;  %s3315_s2 = inlined_call_operand.vmem [shape: f32[1,1024], index: 2, kind: input, shape index: {}]   ;;  %s3316_s3 = inlined_call_operand.vmem [shape: f32[1,1024], index: 3, kind: input, shape index: {}]   ;;  %s3317_s4 = inlined_call_operand.<no memory space> [shape: f32[1,1], index: 4, kind: input, shape index: {}]   ;;  %s3318_s5 = inlined_call_operand.vmem [shape: bf16[1024,128], index: 5, kind: input, shape index: {}]   ;;  %s3319_s6 = inlined_call_operand.vmem [shape: f32[1,128], index: 6, kind: input, shape index: {}]   ;;  %s3320_s7 = inlined_call_operand.vmem [shape: s32[2,1], index: 7, kind: input, shape index: {}]   ;;  %s3321_s8 = inlined_call_operand.vmem [shape: f32[2,1], index: 8, kind: output, shape index: {0}]   ;;  %s3322_s9 = inlined_call_operand.hbm [shape: f32[1,1], index: 9, kind: output, shape index: {1}]  }
   0x1   :  { %v15_v0 = vstv %s3317_s4 }
   0x2   :  { %16 = vst [vmem:[#allocation2] sm:$0x1] %v15_v0 }
   0x3   :  { %v199_v1 = vld [vmem:[%s3314_s1] sm:$0xff]  ;;  %v200_v3 = vld [vmem:[%s3314_s1 + $0x8] sm:$0xff]  ;;  %v2403_v27 = vmov 1983009808   ;;  %v3323_v29 = vlaneseq  ;;  %vm377_vm0 = vcmask 1041409  }
   0x4   :  { %v203_v2 = vld [vmem:[%s3314_s1 + $0x20] sm:$0xff]  ;;  %v204_v5 = vld [vmem:[%s3314_s1 + $0x28] sm:$0xff]  ;;  %v64_v28 = vunpack.c.l.s4 %v2403_v27 }
   0x5   :  { %v2007_v4 = vcombine.high %v199_v1, %v203_v2  ;;  %v2006_v6 = vcombine.low %v199_v1, %v203_v2  ;;  %v207_v7 = vld [vmem:[%s3314_s1 + $0x40] sm:$0xff]  ;;  %v2009_v9 = vcombine.high %v200_v3, %v204_v5  ;;  %v2008_v10 = vcombine.low %v200_v3, %v204_v5  ;;  %v208_v12 = vld [vmem:[%s3314_s1 + $0x48] sm:$0xff] }
   0x6   :  { %v211_v8 = vld [vmem:[%s3314_s1 + $0x60] sm:$0xff]  ;;  %v212_v13 = vld [vmem:[%s3314_s1 + $0x68] sm:$0xff]  ;;  %v65_v40 = vunpack.c.0.s8 %v64_v28  ;;  %v2532_v41 = vshrl.u32 %v3323_v29, 7 }
   0x7   :  { %v2015_v11 = vcombine.high %v207_v7, %v211_v8  ;;  %v215_v14 = vld [vmem:[%s3314_s1 + $0x80] sm:$0xff]  ;;  %1024 = vmatprep.subr.bf16.mxu0 %v2007_v4  ;;  %v2017_v15 = vcombine.high %v208_v12, %v212_v13  ;;  %v216_v17 = vld [vmem:[%s3314_s1 + $0x88] sm:$0xff]  ;;  %1065 = vmatprep.subr.bf16.mxu1 %v2009_v9  ;;  %v2014_v19 = vcombine.low %v207_v7, %v211_v8 }
   0x8   :  { %v219_v16 = vld [vmem:[%s3314_s1 + $0xa0] sm:$0xff]  ;;  %v220_v18 = vld [vmem:[%s3314_s1 + $0xa8] sm:$0xff]  ;;  %1025 = vmatpush1.bf16.msra.mxu0 %v2006_v6  ;;  %1066 = vmatpush1.bf16.msra.mxu1 %v2008_v10  ;;  %v2016_v20 = vcombine.low %v208_v12, %v212_v13  ;;  %v2597_v60 = vsub.s32 %v65_v40, %v2532_v41 }
   0x9   :  { %1026 = vmatprep.subr.bf16.mxu0 %v2015_v11  ;;  %v2023_v21 = vcombine.high %v215_v14, %v219_v16  ;;  %1067 = vmatprep.subr.bf16.mxu1 %v2017_v15  ;;  %v2025_v22 = vcombine.high %v216_v17, %v220_v18  ;;  %v223_v23 = vld [vmem:[%s3314_s1 + $0xc0] sm:$0xff]  ;;  %v224_v25 = vld [vmem:[%s3314_s1 + $0xc8] sm:$0xff]  ;;  %v2022_v30 = vcombine.low %v215_v14, %v219_v16 }
   0xa   :  { %v227_v24 = vld [vmem:[%s3314_s1 + $0xe0] sm:$0xff]  ;;  %v228_v26 = vld [vmem:[%s3314_s1 + $0xe8] sm:$0xff]  ;;  %v2024_v31 = vcombine.low %v216_v17, %v220_v18 }
   0xb   :  { %v2031_v32 = vcombine.high %v223_v23, %v227_v24  ;;  %v2033_v33 = vcombine.high %v224_v25, %v228_v26  ;;  %v231_v34 = vld [vmem:[%s3314_s1 + $0x100] sm:$0xff]  ;;  %v2516_v36 = vld [vmem:[%s3314_s1 + $0x108] sm:$0xff]  ;;  %v2030_v42 = vcombine.low %v223_v23, %v227_v24  ;;  %v2032_v46 = vcombine.low %v224_v25, %v228_v26 }
   0xc   :  { %1027 = vmatpush1.bf16.msra.mxu0 %v2014_v19  ;;  %1068 = vmatpush1.bf16.msra.mxu1 %v2016_v20  ;;  %v235_v35 = vld [vmem:[%s3314_s1 + $0x120] sm:$0xff]  ;;  %v236_v37 = vld [vmem:[%s3314_s1 + $0x128] sm:$0xff] }
   0xd   :  { %1028 = vmatprep.subr.bf16.mxu0 %v2023_v21  ;;  %1069 = vmatprep.subr.bf16.mxu1 %v2025_v22  ;;  %v2524_v38 = vld [vmem:[%s3314_s1 + $0x140] sm:$0xff]  ;;  %v2537_v43 = vld [vmem:[%s3314_s1 + $0x148] sm:$0xff]  ;;  %v2039_v47 = vcombine.high %v231_v34, %v235_v35  ;;  %v2041_v51 = vcombine.high %v2516_v36, %v236_v37  ;;  %v2038_v55 = vcombine.low %v231_v34, %v235_v35 }
   0xe   :  { %v2529_v39 = vld [vmem:[%s3314_s1 + $0x160] sm:$0xff]  ;;  %v2542_v44 = vld [vmem:[%s3314_s1 + $0x168] sm:$0xff]  ;;  %v2040_v56 = vcombine.low %v2516_v36, %v236_v37  ;;  %v2217_v36 = vld [vmem:[%s3313_s0 + $0x10] sm:$0xff]  }
   0xf   :  { %v2547_v45 = vld [vmem:[%s3314_s1 + $0x180] sm:$0xff]  ;;  %v2557_v49 = vld [vmem:[%s3314_s1 + $0x188] sm:$0xff]  ;;  %v2047_v61 = vcombine.high %v2524_v38, %v2529_v39  ;;  %v2049_v62 = vcombine.high %v2537_v43, %v2542_v44  ;;  %v2046_v63 = vcombine.low %v2524_v38, %v2529_v39  ;;  %v2048_v0 = vcombine.low %v2537_v43, %v2542_v44  ;;  %v2218_v37 = vld [vmem:[%s3313_s0 + $0x18] sm:$0xff]  }
  0x10   :  { %1029 = vmatpush1.bf16.msra.mxu0 %v2022_v30  ;;  %1070 = vmatpush1.bf16.msra.mxu1 %v2024_v31  ;;  %v2552_v48 = vld [vmem:[%s3314_s1 + $0x1a0] sm:$0xff]  ;;  %v2562_v50 = vld [vmem:[%s3314_s1 + $0x1a8] sm:$0xff]  ;;  %v2210_v40 = vunpack.c.l.bf16 %v2217_v36  ;;  %v2214_v44 = vunpack.c.l.bf16 %v2218_v37 }
  0x11   :  { %1030 = vmatprep.subr.bf16.mxu0 %v2031_v32  ;;  %1071 = vmatprep.subr.bf16.mxu1 %v2033_v33  ;;  %v2568_v52 = vld [vmem:[%s3314_s1 + $0x1c0] sm:$0xff]  ;;  %v2578_v54 = vld [vmem:[%s3314_s1 + $0x1c8] sm:$0xff]  ;;  %v2055_v4 = vcombine.high %v2547_v45, %v2552_v48  ;;  %v2057_v5 = vcombine.high %v2557_v49, %v2562_v50  ;;  %v2054_v6 = vcombine.low %v2547_v45, %v2552_v48 }
  0x12   :  { %v2573_v53 = vld [vmem:[%s3314_s1 + $0x1e0] sm:$0xff]  ;;  %v2584_v57 = vld [vmem:[%s3314_s1 + $0x1e8] sm:$0xff]  ;;  %v2056_v10 = vcombine.low %v2557_v49, %v2562_v50 }
  0x13   :  { %v2589_v58 = vld [vmem:[%s3314_s1 + $0x200] sm:$0xff]  ;;  %v2610_v1 = vld [vmem:[%s3314_s1 + $0x208] sm:$0xff]  ;;  %v2063_v11 = vcombine.high %v2568_v52, %v2573_v53  ;;  %v2065_v12 = vcombine.high %v2578_v54, %v2584_v57  ;;  %v2062_v13 = vcombine.low %v2568_v52, %v2573_v53  ;;  %v2064_v16 = vcombine.low %v2578_v54, %v2584_v57 }
  0x14   :  { %v2594_v59 = vld [vmem:[%s3314_s1 + $0x220] sm:$0xff]  ;;  %1031 = vmatpush1.bf16.msra.mxu0 %v2030_v42  ;;  %v2615_v2 = vld [vmem:[%s3314_s1 + $0x228] sm:$0xff]  ;;  %1072 = vmatpush1.bf16.msra.mxu1 %v2032_v46  ;;  %v2211_v42 = vunpack.c.h.bf16 %v2217_v36  ;;  %v2215_v46 = vunpack.c.h.bf16 %v2218_v37 }
  0x15   :  { %v2620_v3 = vld [vmem:[%s3314_s1 + $0x240] sm:$0xff]  ;;  %1032 = vmatprep.subr.bf16.mxu0 %v2039_v47  ;;  %v2636_v8 = vld [vmem:[%s3314_s1 + $0x248] sm:$0xff]  ;;  %1073 = vmatprep.subr.bf16.mxu1 %v2041_v51  ;;  %v2071_v17 = vcombine.high %v2589_v58, %v2594_v59  ;;  %v2073_v18 = vcombine.high %v2610_v1, %v2615_v2  ;;  %v2070_v19 = vcombine.low %v2589_v58, %v2594_v59 }
  0x16   :  { %v2631_v7 = vld [vmem:[%s3314_s1 + $0x260] sm:$0xff]  ;;  %v2641_v9 = vld [vmem:[%s3314_s1 + $0x268] sm:$0xff]  ;;  %v2072_v22 = vcombine.low %v2610_v1, %v2615_v2  ;;  %v98_v37 = vcombine.high %v2214_v44, %v2215_v46 }
  0x17   :  { %v2654_v14 = vld [vmem:[%s3314_s1 + $0x280] sm:$0xff]  ;;  %v2672_v20 = vld [vmem:[%s3314_s1 + $0x288] sm:$0xff]  ;;  %v2079_v23 = vcombine.high %v2620_v3, %v2631_v7  ;;  %v2081_v24 = vcombine.high %v2636_v8, %v2641_v9  ;;  %v2078_v25 = vcombine.low %v2620_v3, %v2631_v7  ;;  %v2080_v26 = vcombine.low %v2636_v8, %v2641_v9 }
  0x18   :  { %v2659_v15 = vld [vmem:[%s3314_s1 + $0x2a0] sm:$0xff]  ;;  %v2677_v21 = vld [vmem:[%s3314_s1 + $0x2a8] sm:$0xff]  ;;  %1033 = vmatpush1.bf16.msra.mxu0 %v2038_v55  ;;  %1074 = vmatpush1.bf16.msra.mxu1 %v2040_v56  ;;  %v126_v45 = vrot.slane %v98_v37, %v2597_v60 }
  0x19   :  { %1034 = vmatprep.subr.bf16.mxu0 %v2047_v61  ;;  %v2087_v27 = vcombine.high %v2654_v14, %v2659_v15  ;;  %v2086_v28 = vcombine.low %v2654_v14, %v2659_v15  ;;  %v2201_v30 = vld [vmem:[%s3313_s0] sm:$0xff]   ;;  %v2216_v31 = vld [vmem:[%s3313_s0 + $0x8] sm:$0xff]   ;;  %1075 = vmatprep.subr.bf16.mxu1 %v2049_v62  ;;  %v2089_v32 = vcombine.high %v2672_v20, %v2677_v21 }
  0x1a   :  { %v2088_v33 = vcombine.low %v2672_v20, %v2677_v21  ;;  %v2202_v34 = vunpack.c.l.bf16 %v2201_v30  ;;  %v2203_v35 = vunpack.c.h.bf16 %v2201_v30  ;;  %v2206_v38 = vunpack.c.l.bf16 %v2216_v31  ;;  %v2712_v43 = vld [vmem:[%s3314_s1 + $0x2c0] sm:$0xff]  ;;  %v2722_v56 = vld [vmem:[%s3314_s1 + $0x2c8] sm:$0xff] }
  0x1b   :  { %v2207_v39 = vunpack.c.h.bf16 %v2216_v31  ;;  %v2717_v55 = vld [vmem:[%s3314_s1 + $0x2e0] sm:$0xff]  ;;  %v2727_v61 = vld [vmem:[%s3314_s1 + $0x2e8] sm:$0xff]  ;;  %v95_v30 = vcombine.low %v2210_v40, %v2211_v42  ;;  %v96_v31 = vcombine.high %v2210_v40, %v2211_v42 }
  0x1c   :  { %1035 = vmatpush1.bf16.msra.mxu0 %v2046_v63  ;;  %v59_v47 = vcombine.low %v2202_v34, %v2203_v35  ;;  %v60_v51 = vcombine.high %v2202_v34, %v2203_v35  ;;  %1076 = vmatpush1.bf16.msra.mxu1 %v2048_v0  ;;  %v97_v34 = vcombine.low %v2214_v44, %v2215_v46  ;;  %v295_v3 = vld [vmem:[%s3314_s1 + $0x300] sm:$0xff]  ;;  %v304_v20 = vld [vmem:[%s3314_s1 + $0x348] sm:$0xff] }
  0x1d   :  { %1036 = vmatprep.subr.bf16.mxu0 %v2055_v4  ;;  %v61_v62 = vcombine.low %v2206_v38, %v2207_v39  ;;  %v62_v63 = vcombine.high %v2206_v38, %v2207_v39  ;;  %1077 = vmatprep.subr.bf16.mxu1 %v2057_v5  ;;  %v105_v29 = vrot.slane %v95_v30, %v2597_v60  ;;  %v299_v7 = vld [vmem:[%s3314_s1 + $0x320] sm:$0xff]  ;;  %v308_v21 = vld [vmem:[%s3314_s1 + $0x368] sm:$0xff] }
  0x1e   :  { %v69_v0 = vrot.slane %v59_v47, %v2597_v60  ;;  %v76_v4 = vrot.slane %v60_v51, %v2597_v60  ;;  %v2095_v5 = vcombine.high %v2712_v43, %v2717_v55  ;;  %v2097_v38 = vcombine.high %v2722_v56, %v2727_v61  ;;  %v307_v15 = vld [vmem:[%s3314_s1 + $0x360] sm:$0xff] }
  0x1f   :  { %v83_v35 = vrot.slane %v61_v62, %v2597_v60  ;;  %v90_v36 = vrot.slane %v62_v63, %v2597_v60  ;;  %v112_v39 = vrot.slane %v96_v31, %v2597_v60  ;;  %v119_v40 = vrot.slane %v97_v34, %v2597_v60 }
  0x20   :  { %1037 = vmatpush1.bf16.msra.mxu0 %v2054_v6  ;;  %1078 = vmatpush1.bf16.msra.mxu1 %v2056_v10  ;;  %v2103_v14 = vcombine.high %v295_v3, %v299_v7 }
  0x21   :  { %1038 = vmatprep.subr.bf16.mxu0 %v2063_v11  ;;  %v92_v42 = vcombine.high %v69_v0, %v83_v35  ;;  %v94_v44 = vcombine.high %v76_v4, %v90_v36  ;;  %1079 = vmatprep.subr.bf16.mxu1 %v2065_v12  ;;  %v128_v48 = vcombine.high %v105_v29, %v119_v40 }
  0x22   :  { %v91_v6 = vcombine.low %v69_v0, %v83_v35  ;;  %v93_v46 = vcombine.low %v76_v4, %v90_v36  ;;  %v127_v47 = vcombine.low %v105_v29, %v119_v40  ;;  %v130_v51 = vcombine.high %v112_v39, %v126_v45 }
  0x23   :  { %v145_v62 = vrot.slane %v92_v42, 4  ;;  %v157_v63 = vrot.slane %v94_v44, 4  ;;  %v129_v30 = vcombine.low %v112_v39, %v126_v45  ;;  %v169_v49 = vrot.slane %v128_v48, 4 }
  0x24   :  { %1039 = vmatpush1.bf16.msra.mxu0 %v2062_v13  ;;  %v139_v50 = vrot.slane %v91_v6, 4  ;;  %v151_v10 = vrot.slane %v93_v46, 4  ;;  %v163_v60 = vrot.slane %v127_v47, 4  ;;  %1080 = vmatpush1.bf16.msra.mxu1 %v2064_v16  ;;  %v181_v12 = vrot.slane %v130_v51, 4 }
  0x25   :  { %1040 = vmatprep.subr.bf16.mxu0 %v2071_v17  ;;  %v146_v29 = vadd.f32 %v145_v62, %v92_v42  ;;  %v158_v11 = vadd.f32 %v157_v63, %v94_v44  ;;  %v175_v0 = vrot.slane %v129_v30, 4  ;;  %1081 = vmatprep.subr.bf16.mxu1 %v2073_v18  ;;  %v170_v52 = vadd.f32 %v169_v49, %v128_v48 }
  0x26   :  { %v140_v53 = vadd.f32 %v139_v50, %v91_v6  ;;  %v152_v13 = vadd.f32 %v151_v10, %v93_v46  ;;  %v164_v4 = vadd.f32 %v163_v60, %v127_v47  ;;  %v182_v54 = vadd.f32 %v181_v12, %v130_v51  ;;  %v303_v10 = vld [vmem:[%s3314_s1 + $0x340] sm:$0xff] }
  0x27   :  { %v147_v31 = vrot.slane %v146_v29, 2  ;;  %v159_v34 = vrot.slane %v158_v11, 2  ;;  %v176_v57 = vadd.f32 %v175_v0, %v129_v30  ;;  %v171_v16 = vrot.slane %v170_v52, 2 }
  0x28   :  { %1041 = vmatpush1.bf16.msra.mxu0 %v2070_v19  ;;  %v141_v17 = vrot.slane %v140_v53, 2  ;;  %v153_v35 = vrot.slane %v152_v13, 2  ;;  %v165_v36 = vrot.slane %v164_v4, 2  ;;  %1082 = vmatpush1.bf16.msra.mxu1 %v2072_v22  ;;  %v183_v39 = vrot.slane %v182_v54, 2 }
  0x29   :  { %1042 = vmatprep.subr.bf16.mxu0 %v2079_v23  ;;  %v148_v18 = vadd.f32 %v147_v31, %v146_v29  ;;  %v160_v37 = vadd.f32 %v159_v34, %v158_v11  ;;  %v177_v40 = vrot.slane %v176_v57, 2  ;;  %1083 = vmatprep.subr.bf16.mxu1 %v2081_v24  ;;  %v172_v58 = vadd.f32 %v171_v16, %v170_v52  ;;  %v315_v52 = vld [vmem:[%s3314_s1 + $0x3a0] sm:$0xff]  ;;  %v312_v31 = vld [vmem:[%s3314_s1 + $0x388] sm:$0xff] }
  0x2a   :  { %v142_v59 = vadd.f32 %v141_v17, %v140_v53  ;;  %v154_v19 = vadd.f32 %v153_v35, %v152_v13  ;;  %v166_v42 = vadd.f32 %v165_v36, %v164_v4  ;;  %v184_v1 = vadd.f32 %v183_v39, %v182_v54  ;;  %v316_v34 = vld [vmem:[%s3314_s1 + $0x3a8] sm:$0xff]  ;;  %v319_v16 = vld [vmem:[%s3314_s1 + $0x3c0] sm:$0xff] }
  0x2b   :  { %v149_v44 = vrot.slane %v148_v18, 1  ;;  %v161_v45 = vrot.slane %v160_v37, 1  ;;  %v178_v2 = vadd.f32 %v177_v40, %v176_v57  ;;  %v173_v22 = vrot.slane %v172_v58, 1 }
  0x2c   :  { %1043 = vmatpush1.bf16.msra.mxu0 %v2078_v25  ;;  %v143_v23 = vrot.slane %v142_v59, 1  ;;  %v155_v48 = vrot.slane %v154_v19, 1  ;;  %v167_v6 = vrot.slane %v166_v42, 1  ;;  %1084 = vmatpush1.bf16.msra.mxu1 %v2080_v26  ;;  %v185_v47 = vrot.slane %v184_v1, 1 }
  0x2d   :  { %1044 = vmatprep.subr.bf16.mxu0 %v2087_v27  ;;  %v150_v24 = vadd.f32 %v149_v44, %v148_v18  ;;  %v162_v46 = vadd.f32 %v161_v45, %v160_v37  ;;  %v179_v51 = vrot.slane %v178_v2, 1  ;;  %1085 = vmatprep.subr.bf16.mxu1 %v2089_v32  ;;  %v174_v8 = vadd.f32 %v173_v22, %v172_v58  ;;  %v296_v27 = vld [vmem:[%s3314_s1 + $0x308] sm:$0xff]  ;;  %v323_v37 = vld [vmem:[%s3314_s1 + $0x3e0] sm:$0xff] }
  0x2e   :  { %v144_v9 = vadd.f32 %v143_v23, %v142_v59  ;;  %v156_v25 = vadd.f32 %v155_v48, %v154_v19  ;;  %v168_v26 = vadd.f32 %v167_v6, %v166_v42  ;;  %v300_v32 = vld [vmem:[%s3314_s1 + $0x328] sm:$0xff]  ;;  %v186_v62 = vadd.f32 %v185_v47, %v184_v1  ;;  %v201_v1 = vld [vmem:[%s3314_s1 + $0x10] sm:$0xff]  ;;  %v202_v6 = vld [vmem:[%s3314_s1 + $0x18] sm:$0xff] }
  0x2f   :  { %v188_v63 = vadd.f32 %v162_v46, %v150_v24  ;;  %v180_v30 = vadd.f32 %v179_v51, %v178_v2  ;;  %v2094_v49 = vcombine.low %v2712_v43, %v2717_v55  ;;  %v2096_v50 = vcombine.low %v2722_v56, %v2727_v61  ;;  %v320_v58 = vld [vmem:[%s3314_s1 + $0x3c8] sm:$0xff]  ;;  %v205_v23 = vld [vmem:[%s3314_s1 + $0x30] sm:$0xff]  ;;  %v206_v24 = vld [vmem:[%s3314_s1 + $0x38] sm:$0xff] }
  0x30   :  { %1045 = vmatpush1.bf16.msra.mxu0 %v2086_v28  ;;  %v187_v60 = vadd.f32 %v156_v25, %v144_v9  ;;  %1086 = vmatpush1.bf16.msra.mxu1 %v2088_v33  ;;  %v190_v28 = vadd.f32 %v186_v62, %v174_v8  ;;  %v2105_v12 = vcombine.high %v296_v27, %v300_v32  ;;  %v324_v19 = vld [vmem:[%s3314_s1 + $0x3e8] sm:$0xff]  ;;  %v209_v51 = vld [vmem:[%s3314_s1 + $0x50] sm:$0xff]  ;;  %v210_v25 = vld [vmem:[%s3314_s1 + $0x58] sm:$0xff] }
  0x31   :  { %1046 = vmatprep.subr.bf16.mxu0 %v2095_v5  ;;  %v192_v29 = vmul.f32 0.25, %v188_v63  ;;  %v189_v11 = vadd.f32 %v180_v30, %v168_v26  ;;  %1087 = vmatprep.subr.bf16.mxu1 %v2097_v38  ;;  %v2102_v55 = vcombine.low %v295_v3, %v299_v7  ;;  %v311_v5 = vld [vmem:[%s3314_s1 + $0x380] sm:$0xff]  ;;  %v2104_v61 = vcombine.low %v296_v27, %v300_v32  ;;  %v213_v8 = vld [vmem:[%s3314_s1 + $0x70] sm:$0xff]  ;;  %v214_v27 = vld [vmem:[%s3314_s1 + $0x78] sm:$0xff] }
  0x32   :  { %v194_v33 = vmul.f32 0.25, %v190_v28  ;;  %v191_v0 = vmul.f32 0.25, %v187_v60  ;;  %v2111_v38 = vcombine.high %v303_v10, %v307_v15  ;;  %v2113_v4 = vcombine.high %v304_v20, %v308_v21  ;;  %v217_v62 = vld [vmem:[%s3314_s1 + $0x90] sm:$0xff]  ;;  %v222_v60 = vld [vmem:[%s3314_s1 + $0xb8] sm:$0xff] }
  0x33   :  { %v196_v43 = vpack.c.bf16 %v192_v29, %v192_v29  ;;  %v193_v56 = vmul.f32 0.25, %v189_v11  ;;  %v2110_v57 = vcombine.low %v303_v10, %v307_v15  ;;  %v2112_v36 = vcombine.low %v304_v20, %v308_v21  ;;  %v218_v10 = vld [vmem:[%s3314_s1 + $0x98] sm:$0xff]  ;;  %v225_v29 = vld [vmem:[%s3314_s1 + $0xd0] sm:$0xff] }
  0x34   :  { %1047 = vmatpush1.bf16.msra.mxu0 %v2094_v49  ;;  %1088 = vmatpush1.bf16.msra.mxu1 %v2096_v50  ;;  %v198_v53 = vpack.c.bf16 %v194_v33, %v194_v33  ;;  %v195_v17 = vpack.c.bf16 %v191_v0, %v191_v0  ;;  %v2119_v18 = vcombine.high %v311_v5, %v315_v52  ;;  %v221_v49 = vld [vmem:[%s3314_s1 + $0xb0] sm:$0xff]  ;;  %v226_v20 = vld [vmem:[%s3314_s1 + $0xd8] sm:$0xff] }
  0x35   :  { %1048 = vmatprep.subr.bf16.mxu0 %v2103_v14  ;;  %v374_v13 = vunpack.c.l.b16 %v196_v43  ;;  %1089 = vmatprep.subr.bf16.mxu1 %v2105_v12  ;;  %v197_v35 = vpack.c.bf16 %v193_v56, %v193_v56  ;;  %v2121_v40 = vcombine.high %v312_v31, %v316_v34  ;;  %v2118_v42 = vcombine.low %v311_v5, %v315_v52  ;;  %v229_v12 = vld [vmem:[%s3314_s1 + $0xf0] sm:$0xff]  ;;  %v230_v21 = vld [vmem:[%s3314_s1 + $0xf8] sm:$0xff] }
  0x36   :  { %v376_v54 = vunpack.c.l.b16 %v198_v53  ;;  %v373_v44 = vunpack.c.l.b16 %v195_v17  ;;  %v2120_v2 = vcombine.low %v312_v31, %v316_v34  ;;  %v2127_v22 = vcombine.high %v319_v16, %v323_v37  ;;  %v233_v43 = vld [vmem:[%s3314_s1 + $0x110] sm:$0xff]  ;;  %v234_v56 = vld [vmem:[%s3314_s1 + $0x118] sm:$0xff] }
  0x37   :  { %v375_v45 = vunpack.c.l.b16 %v197_v35  ;;  %v2129_v48 = vcombine.high %v320_v58, %v324_v19  ;;  %v2126_v46 = vcombine.low %v319_v16, %v323_v37  ;;  %v2128_v3 = vcombine.low %v320_v58, %v324_v19  ;;  %v241_v53 = vld [vmem:[%s3314_s1 + $0x150] sm:$0xff]  ;;  %v242_v34 = vld [vmem:[%s3314_s1 + $0x158] sm:$0xff] }
  0x38   :  { %1049 = vmatpush1.bf16.msra.mxu0 %v2102_v55  ;;  %1090 = vmatpush1.bf16.msra.mxu1 %v2104_v61  ;;  %v379_v39 = vsel %vm377_vm0, %v376_v54, %v374_v13  ;;  %v2011_v7 = vcombine.high %v201_v1, %v205_v23  ;;  %v2013_v9 = vcombine.high %v202_v6, %v206_v24  ;;  %v237_v55 = vld [vmem:[%s3314_s1 + $0x130] sm:$0xff]  ;;  %v238_v61 = vld [vmem:[%s3314_s1 + $0x138] sm:$0xff] }
  0x39   :  { %1050 = vmatprep.subr.bf16.mxu0 %v2111_v38  ;;  %1091 = vmatprep.subr.bf16.mxu1 %v2113_v4  ;;  %v381_v59 = vpack.c.b16 %v379_v39, %v379_v39  ;;  %v378_v47 = vsel %vm377_vm0, %v375_v45, %v373_v44  ;;  %v2010_v32 = vcombine.low %v201_v1, %v205_v23  ;;  %v245_v13 = vld [vmem:[%s3314_s1 + $0x170] sm:$0xff]  ;;  %v246_v54 = vld [vmem:[%s3314_s1 + $0x178] sm:$0xff] }
  0x3a   :  { %v2873_v26 = vpack.c.b16 %v378_v47, %v378_v47  ;;  %v2012_v63 = vcombine.low %v202_v6, %v206_v24  ;;  %v2019_v30 = vcombine.high %v209_v51, %v213_v8  ;;  %v2021_v50 = vcombine.high %v210_v25, %v214_v27  ;;  %v249_v17 = vld [vmem:[%s3314_s1 + $0x190] sm:$0xff]  ;;  %v250_v37 = vld [vmem:[%s3314_s1 + $0x198] sm:$0xff] }
  0x3b   :  { %1056 = vmatprep.mubr.bf16.mxu0 %v381_v59  ;;  %1097 = vmatprep.mubr.bf16.mxu1 %v381_v59  ;;  %v2018_v14 = vcombine.low %v209_v51, %v213_v8  ;;  %v2020_v15 = vcombine.low %v210_v25, %v214_v27  ;;  %v2027_v28 = vcombine.high %v217_v62, %v221_v49  ;;  %v253_v35 = vld [vmem:[%s3314_s1 + $0x1b0] sm:$0xff]  ;;  %v254_v39 = vld [vmem:[%s3314_s1 + $0x1b8] sm:$0xff] }
  0x3c   :  { %1051 = vmatpush1.bf16.msra.mxu0 %v2110_v57  ;;  %1092 = vmatpush1.bf16.msra.mxu1 %v2112_v36  ;;  %v2029_v11 = vcombine.high %v218_v10, %v222_v60  ;;  %v2026_v33 = vcombine.low %v217_v62, %v221_v49  ;;  %v2028_v5 = vcombine.low %v218_v10, %v222_v60  ;;  %v261_v19 = vld [vmem:[%s3314_s1 + $0x1f0] sm:$0xff]  ;;  %v258_v45 = vld [vmem:[%s3314_s1 + $0x1d8] sm:$0xff] }
  0x3d   :  { %1052 = vmatprep.subr.bf16.mxu0 %v2119_v18  ;;  %1093 = vmatprep.subr.bf16.mxu1 %v2121_v40  ;;  %v2035_v0 = vcombine.high %v225_v29, %v229_v12  ;;  %v2037_v38 = vcombine.high %v226_v20, %v230_v21  ;;  %v2034_v52 = vcombine.low %v225_v29, %v229_v12  ;;  %v262_v1 = vld [vmem:[%s3314_s1 + $0x1f8] sm:$0xff]  ;;  %v265_v23 = vld [vmem:[%s3314_s1 + $0x210] sm:$0xff] }
  0x3e   :  { %v2036_v4 = vcombine.low %v226_v20, %v230_v21  ;;  %v2043_v31 = vcombine.high %v233_v43, %v237_v55  ;;  %v2045_v57 = vcombine.high %v234_v56, %v238_v61  ;;  %v2042_v16 = vcombine.low %v233_v43, %v237_v55  ;;  %v270_v47 = vld [vmem:[%s3314_s1 + $0x238] sm:$0xff]  ;;  %v277_v8 = vld [vmem:[%s3314_s1 + $0x270] sm:$0xff] }
  0x3f   :  { %v2044_v36 = vcombine.low %v234_v56, %v238_v61  ;;  %v2051_v18 = vcombine.high %v241_v53, %v245_v13  ;;  %v2053_v40 = vcombine.high %v242_v34, %v246_v54  ;;  %v2050_v58 = vcombine.low %v241_v53, %v245_v13  ;;  %v274_v27 = vld [vmem:[%s3314_s1 + $0x258] sm:$0xff] }
  0x40   :  { %1053 = vmatpush1.bf16.msra.mxu0 %v2118_v42  ;;  %1094 = vmatpush1.bf16.msra.mxu1 %v2120_v2  ;;  %v2052_v42 = vcombine.low %v242_v34, %v246_v54  ;;  %v2059_v44 = vcombine.high %v249_v17, %v253_v35  ;;  %v2061_v2 = vcombine.high %v250_v37, %v254_v39 }
  0x41   :  { %1054 = vmatprep.subr.bf16.mxu0 %v2127_v22  ;;  %1095 = vmatprep.subr.bf16.mxu1 %v2129_v48  ;;  %v2058_v22 = vcombine.low %v249_v17, %v253_v35  ;;  %v269_v48 = vld [vmem:[%s3314_s1 + $0x230] sm:$0xff]  ;;  %v2060_v6 = vcombine.low %v250_v37, %v254_v39  ;;  %v2069_v51 = vcombine.high %v258_v45, %v262_v1 }
  0x42   :  { %v2075_v25 = vcombine.high %v265_v23, %v269_v48 }
  0x44   :  { %1055 = vmatpush1.bf16.msra.mxu0 %v2126_v46  ;;  %1096 = vmatpush1.bf16.msra.mxu1 %v2128_v3  ;;  %v266_v46 = vld [vmem:[%s3314_s1 + $0x218] sm:$0xff] }
  0x45   :  { %1106 = vmatprep.subr.bf16.mxu0 %v2011_v7  ;;  %1147 = vmatprep.subr.bf16.mxu1 %v2013_v9  ;;  %v273_v7 = vld [vmem:[%s3314_s1 + $0x250] sm:$0xff]  ;;  %v2068_v9 = vcombine.low %v258_v45, %v262_v1  ;;  %v2077_v62 = vcombine.high %v266_v46, %v270_v47 }
  0x46   :  { %v2083_v49 = vcombine.high %v273_v7, %v277_v8 }
  0x47   :  { %1057 = vmatmul.mubr.bf16.vlgmr.msra.gmra.mrb[0].mxu0 %v2873_v26  ;;  %1098 = vmatmul.mubr.bf16.vlgmr.msra.gmra.mrb[0].mxu1 %v2873_v26 }
  0x48   :  { %1107 = vmatpush1.bf16.msra.mxu0 %v2010_v32  ;;  %1148 = vmatpush1.bf16.msra.mxu1 %v2012_v63  ;;  %v278_v32 = vld [vmem:[%s3314_s1 + $0x278] sm:$0xff]  ;;  %v2074_v63 = vcombine.low %v265_v23, %v269_v48 }
  0x49   :  { %1108 = vmatprep.subr.bf16.mxu0 %v2019_v30  ;;  %1149 = vmatprep.subr.bf16.mxu1 %v2021_v50  ;;  %v2076_v30 = vcombine.low %v266_v46, %v270_v47 }
  0x4a   :  { %1138 = vmatprep.mubr.bf16.mxu0 %v381_v59  ;;  %1179 = vmatprep.mubr.bf16.mxu1 %v381_v59  ;;  %v257_v59 = vld [vmem:[%s3314_s1 + $0x1d0] sm:$0xff] }
  0x4b   :  { %v2067_v24 = vcombine.high %v257_v59, %v261_v19  ;;  %v2066_v3 = vcombine.low %v257_v59, %v261_v19 }
  0x4c   :  { %1109 = vmatpush1.bf16.msra.mxu0 %v2018_v14  ;;  %1150 = vmatpush1.bf16.msra.mxu1 %v2020_v15 }
  0x4d   :  { %1110 = vmatprep.subr.bf16.mxu0 %v2027_v28  ;;  %1151 = vmatprep.subr.bf16.mxu1 %v2029_v11 }
  0x50   :  { %1111 = vmatpush1.bf16.msra.mxu0 %v2026_v33  ;;  %1152 = vmatpush1.bf16.msra.mxu1 %v2028_v5 }
  0x51   :  { %1112 = vmatprep.subr.bf16.mxu0 %v2035_v0  ;;  %1153 = vmatprep.subr.bf16.mxu1 %v2037_v38 }
  0x54   :  { %1113 = vmatpush1.bf16.msra.mxu0 %v2034_v52  ;;  %1154 = vmatpush1.bf16.msra.mxu1 %v2036_v4 }
  0x55   :  { %1114 = vmatprep.subr.bf16.mxu0 %v2043_v31  ;;  %1155 = vmatprep.subr.bf16.mxu1 %v2045_v57 }
  0x58   :  { %1115 = vmatpush1.bf16.msra.mxu0 %v2042_v16  ;;  %1156 = vmatpush1.bf16.msra.mxu1 %v2044_v36 }
  0x59   :  { %1116 = vmatprep.subr.bf16.mxu0 %v2051_v18  ;;  %1157 = vmatprep.subr.bf16.mxu1 %v2053_v40 }
  0x5c   :  { %1117 = vmatpush1.bf16.msra.mxu0 %v2050_v58  ;;  %1158 = vmatpush1.bf16.msra.mxu1 %v2052_v42 }
  0x5d   :  { %1118 = vmatprep.subr.bf16.mxu0 %v2059_v44  ;;  %1159 = vmatprep.subr.bf16.mxu1 %v2061_v2 }
  0x60   :  { %1119 = vmatpush1.bf16.msra.mxu0 %v2058_v22  ;;  %1160 = vmatpush1.bf16.msra.mxu1 %v2060_v6 }
  0x61   :  { %1120 = vmatprep.subr.bf16.mxu0 %v2067_v24  ;;  %1161 = vmatprep.subr.bf16.mxu1 %v2069_v51 }
  0x64   :  { %1121 = vmatpush1.bf16.msra.mxu0 %v2066_v3  ;;  %1162 = vmatpush1.bf16.msra.mxu1 %v2068_v9 }
  0x65   :  { %1122 = vmatprep.subr.bf16.mxu0 %v2075_v25 }
  0x66   :  { %17 = vsyncpa [#allocation4], 0  ;;  %1163 = vmatprep.subr.bf16.mxu1 %v2077_v62  ;;  %v2085_v50 = vcombine.high %v274_v27, %v278_v32  ;;  %v281_v10 = vld [vmem:[%s3314_s1 + $0x290] sm:$0xff]  ;;  %v282_v14 = vld [vmem:[%s3314_s1 + $0x298] sm:$0xff]  ;;  %v2082_v28 = vcombine.low %v273_v7, %v277_v8  ;;  %v2084_v29 = vcombine.low %v274_v27, %v278_v32  ;;  %vm1238_vm1 = vcmask 1041408   ;;  %s2405_s11 = smov [#allocation3]  }
  0x67   :  { %v285_v60 = vld [vmem:[%s3314_s1 + $0x2b0] sm:$0xff]  ;;  %v286_v15 = vld [vmem:[%s3314_s1 + $0x2b8] sm:$0xff]  ;;  %v2311_v3 = vld [vmem:[%s3318_s5 + $0x40] sm:$0xff]   ;;  %vm1264_vm3 = vcmask 1024   ;;  %s1996_s12 = sshll.u32 %s2405_s11, 4  ;;  %vm1986_vm4 = vcmask 0   ;;  %s1997_s12 = int_to_ptr.vmem [resolvable:$true] %s1996_s12 }
  0x68   :  { %1123 = vmatpush1.bf16.msra.mxu0 %v2074_v63  ;;  %1164 = vmatpush1.bf16.msra.mxu1 %v2076_v30  ;;  %v2091_v11 = vcombine.high %v281_v10, %v285_v60  ;;  %v2093_v12 = vcombine.high %v282_v14, %v286_v15  ;;  %v289_v20 = vld [vmem:[%s3314_s1 + $0x2d0] sm:$0xff]  ;;  %v290_v33 = vld [vmem:[%s3314_s1 + $0x2d8] sm:$0xff]  ;;  %v2090_v55 = vcombine.low %v281_v10, %v285_v60  ;;  %v2312_v7 = vld [vmem:[%s3318_s5 + $0xc0] sm:$0xff]   ;;  %s2379_s13 = scalar_lea.vmem %s1997_s12, 16  ;;  %p2384_p1 = scmp.lt.s32.totalorder %s1997_s12, %s1997_s12 }
  0x69   :  { %1124 = vmatprep.subr.bf16.mxu0 %v2083_v49  ;;  %1165 = vmatprep.subr.bf16.mxu1 %v2085_v50  ;;  %v293_v21 = vld [vmem:[%s3314_s1 + $0x2f0] sm:$0xff]  ;;  %v294_v43 = vld [vmem:[%s3314_s1 + $0x2f8] sm:$0xff]  ;;  %v2092_v5 = vcombine.low %v282_v14, %v286_v15  ;;  %v2313_v8 = vld [vmem:[%s3318_s5] sm:$0xff]   ;;  %p2380_p0 = scmp.ne.s32.totalorder %s1997_s12, %s2379_s13 }
  0x6a   :  { %v2099_v0 = vcombine.high %v289_v20, %v293_v21  ;;  %v2101_v56 = vcombine.high %v290_v33, %v294_v43  ;;  %v297_v61 = vld [vmem:[%s3314_s1 + $0x310] sm:$0xff]  ;;  %v298_v52 = vld [vmem:[%s3314_s1 + $0x318] sm:$0xff]  ;;  %v2098_v13 = vcombine.low %v289_v20, %v293_v21  ;;  %v2100_v4 = vcombine.low %v290_v33, %v294_v43  ;;  %v2314_v9 = vld [vmem:[%s3318_s5 + $0x80] sm:$0xff]  }
  0x6b   :  { %v301_v38 = vld [vmem:[%s3314_s1 + $0x330] sm:$0xff]  ;;  %v302_v53 = vld [vmem:[%s3314_s1 + $0x338] sm:$0xff]  ;;  %v2315_v25 = vld [vmem:[%s3318_s5 + $0x48] sm:$0xff]  }
  0x6c   :  { %1125 = vmatpush1.bf16.msra.mxu0 %v2082_v28  ;;  %1166 = vmatpush1.bf16.msra.mxu1 %v2084_v29  ;;  %v2107_v31 = vcombine.high %v297_v61, %v301_v38  ;;  %v2109_v34 = vcombine.high %v298_v52, %v302_v53  ;;  %v305_v54 = vld [vmem:[%s3314_s1 + $0x350] sm:$0xff]  ;;  %v306_v16 = vld [vmem:[%s3314_s1 + $0x358] sm:$0xff]  ;;  %v2106_v35 = vcombine.low %v297_v61, %v301_v38  ;;  %v2316_v27 = vld [vmem:[%s3318_s5 + $0xc8] sm:$0xff]  }
  0x6d   :  { %1126 = vmatprep.subr.bf16.mxu0 %v2091_v11  ;;  %1167 = vmatprep.subr.bf16.mxu1 %v2093_v12  ;;  %v309_v57 = vld [vmem:[%s3314_s1 + $0x370] sm:$0xff]  ;;  %v310_v17 = vld [vmem:[%s3314_s1 + $0x378] sm:$0xff]  ;;  %v2108_v36 = vcombine.low %v298_v52, %v302_v53  ;;  %v2317_v32 = vld [vmem:[%s3318_s5 + $0x8] sm:$0xff]  }
  0x6e   :  { %v2115_v18 = vcombine.high %v305_v54, %v309_v57  ;;  %v2117_v37 = vcombine.high %v306_v16, %v310_v17  ;;  %v313_v39 = vld [vmem:[%s3314_s1 + $0x390] sm:$0xff]  ;;  %v314_v58 = vld [vmem:[%s3314_s1 + $0x398] sm:$0xff]  ;;  %v2114_v19 = vcombine.low %v305_v54, %v309_v57  ;;  %v2116_v42 = vcombine.low %v306_v16, %v310_v17  ;;  %v2318_v62 = vld [vmem:[%s3318_s5 + $0x88] sm:$0xff]  }
  0x6f   :  { %v317_v40 = vld [vmem:[%s3314_s1 + $0x3b0] sm:$0xff]  ;;  %v318_v59 = vld [vmem:[%s3314_s1 + $0x3b8] sm:$0xff]  ;;  %v2327_v15 = vld [vmem:[%s3318_s5 + $0x60] sm:$0xff]   ;;  %v335_v54 = vsub.s32 1, %v2532_v41  ;;  %v343_v57 = vsub.s32 3, %v2532_v41 }
  0x70   :  { %1127 = vmatpush1.bf16.msra.mxu0 %v2090_v55  ;;  %1168 = vmatpush1.bf16.msra.mxu1 %v2092_v5  ;;  %v2123_v44 = vcombine.high %v313_v39, %v317_v40  ;;  %v2125_v45 = vcombine.high %v314_v58, %v318_v59  ;;  %v321_v1 = vld [vmem:[%s3314_s1 + $0x3d0] sm:$0xff]  ;;  %v322_v22 = vld [vmem:[%s3314_s1 + $0x3d8] sm:$0xff]  ;;  %v2122_v48 = vcombine.low %v313_v39, %v317_v40  ;;  %v2328_v28 = vld [vmem:[%s3318_s5 + $0xe0] sm:$0xff]  }
  0x71   :  { %1128 = vmatprep.subr.bf16.mxu0 %v2099_v0  ;;  %1169 = vmatprep.subr.bf16.mxu1 %v2101_v56  ;;  %v325_v2 = vld [vmem:[%s3314_s1 + $0x3f0] sm:$0xff]  ;;  %v326_v23 = vld [vmem:[%s3314_s1 + $0x3f8] sm:$0xff]  ;;  %v2124_v6 = vcombine.low %v314_v58, %v318_v59  ;;  %v2329_v29 = vld [vmem:[%s3318_s5 + $0x20] sm:$0xff]  }
  0x72   :  { %v2131_v24 = vcombine.high %v321_v1, %v325_v2  ;;  %v2133_v46 = vcombine.high %v322_v22, %v326_v23  ;;  %v2130_v47 = vcombine.low %v321_v1, %v325_v2  ;;  %v2132_v51 = vcombine.low %v322_v22, %v326_v23  ;;  %v2319_v63 = vld [vmem:[%s3318_s5 + $0x50] sm:$0xff]   ;;  %v2323_v50 = vld [vmem:[%s3318_s5 + $0x58] sm:$0xff]   ;;  %v2330_v11 = vld [vmem:[%s3318_s5 + $0xa0] sm:$0xff]  }
  0x73   :  { %v2321_v30 = vld [vmem:[%s3318_s5 + $0x10] sm:$0xff]   ;;  %v2324_v10 = vld [vmem:[%s3318_s5 + $0xd8] sm:$0xff]   ;;  %v2331_v12 = vld [vmem:[%s3318_s5 + $0x68] sm:$0xff]  }
  0x74   :  { %1129 = vmatpush1.bf16.msra.mxu0 %v2098_v13  ;;  %1170 = vmatpush1.bf16.msra.mxu1 %v2100_v4  ;;  %v2322_v49 = vld [vmem:[%s3318_s5 + $0x90] sm:$0xff]   ;;  %v2325_v60 = vld [vmem:[%s3318_s5 + $0x18] sm:$0xff]   ;;  %v2332_v20 = vld [vmem:[%s3318_s5 + $0xe8] sm:$0xff]   ;;  %v331_v4 = vsub.s32 0, %v2532_v41 }
  0x75   :  { %1130 = vmatprep.subr.bf16.mxu0 %v2107_v31  ;;  %1171 = vmatprep.subr.bf16.mxu1 %v2109_v34  ;;  %v2326_v14 = vld [vmem:[%s3318_s5 + $0x98] sm:$0xff]   ;;  %v2333_v21 = vld [vmem:[%s3318_s5 + $0x28] sm:$0xff]   ;;  %v2335_v43 = vld [vmem:[%s3318_s5 + $0x70] sm:$0xff]   ;;  %v339_v34 = vsub.s32 2, %v2532_v41 }
  0x76   :  { %v2334_v33 = vld [vmem:[%s3318_s5 + $0xa8] sm:$0xff]   ;;  %v2336_v55 = vld [vmem:[%s3318_s5 + $0xf0] sm:$0xff]   ;;  %v2339_v56 = vld [vmem:[%s3318_s5 + $0x78] sm:$0xff]  }
  0x77   :  { %v2337_v5 = vld [vmem:[%s3318_s5 + $0x30] sm:$0xff]   ;;  %v2340_v61 = vld [vmem:[%s3318_s5 + $0xf8] sm:$0xff]   ;;  %v2343_v53 = vld [vmem:[%s3318_s5 + $0x140] sm:$0xff]  }
  0x78   :  { %1131 = vmatpush1.bf16.msra.mxu0 %v2106_v35  ;;  %1172 = vmatpush1.bf16.msra.mxu1 %v2108_v36  ;;  %v2338_v0 = vld [vmem:[%s3318_s5 + $0xb0] sm:$0xff]   ;;  %v2341_v38 = vld [vmem:[%s3318_s5 + $0x38] sm:$0xff]   ;;  %v2344_v13 = vld [vmem:[%s3318_s5 + $0x1c0] sm:$0xff]  }
  0x79   :  { %1132 = vmatprep.subr.bf16.mxu0 %v2115_v18  ;;  %1173 = vmatprep.subr.bf16.mxu1 %v2117_v37  ;;  %v2342_v52 = vld [vmem:[%s3318_s5 + $0xb8] sm:$0xff]   ;;  %v3156_v31 = vld [vmem:[%s3315_s2] sm:$0xff] }
  0x7a   :  { %v3164_v16 = vld [vmem:[%s3316_s3] sm:$0xff]  ;;  %v332_v17 = vrot.slane %v3156_v31, %v331_v4  ;;  %v340_v35 = vrot.slane %v3156_v31, %v339_v34  ;;  %v336_v36 = vrot.slane %v3156_v31, %v335_v54  ;;  %v344_v37 = vrot.slane %v3156_v31, %v343_v57 }
  0x7b   :  { %v1193_v18 = vrot.slane %v3164_v16, %v331_v4  ;;  %v1201_v40 = vrot.slane %v3164_v16, %v339_v34  ;;  %v1197_v58 = vrot.slane %v3164_v16, %v335_v54  ;;  %v2367_v4 = vld [vmem:[%s3318_s5 + $0x170] sm:$0xff]  }
  0x7c   :  { %1133 = vmatpush1.bf16.msra.mxu0 %v2114_v19  ;;  %1174 = vmatpush1.bf16.msra.mxu1 %v2116_v42  ;;  %v2368_v34 = vld [vmem:[%s3318_s5 + $0x1f0] sm:$0xff]  }
  0x7d   :  { %1134 = vmatprep.subr.bf16.mxu0 %v2123_v44  ;;  %1175 = vmatprep.subr.bf16.mxu1 %v2125_v45  ;;  %v1205_v44 = vrot.slane %v3164_v16, %v343_v57  ;;  %v2369_v54 = vld [vmem:[%s3318_s5 + $0x130] sm:$0xff]  }
  0x7e   :  { %v2370_v57 = vld [vmem:[%s3318_s5 + $0x1b0] sm:$0xff]  }
  0x80   :  { %1135 = vmatpush1.bf16.msra.mxu0 %v2122_v48  ;;  %1176 = vmatpush1.bf16.msra.mxu1 %v2124_v6 }
  0x81   :  { %1136 = vmatprep.subr.bf16.mxu0 %v2131_v24  ;;  %1177 = vmatprep.subr.bf16.mxu1 %v2133_v46 }
  0x84   :  { %1137 = vmatpush1.bf16.msra.mxu0 %v2130_v47  ;;  %1178 = vmatpush1.bf16.msra.mxu1 %v2132_v51 }
  0x85   :  { %2219 = vmatprep.subr.bf16.mxu0 %v2311_v3  ;;  %2241 = vmatprep.subr.bf16.mxu1 %v2312_v7 }
  0x87   :  { %1139 = vmatmul.mubr.bf16.vlgmr.msra.gmra.mrb[4].mxu0 %v2873_v26  ;;  %1180 = vmatmul.mubr.bf16.vlgmr.msra.gmra.mrb[4].mxu1 %v2873_v26  ;;  %v2320_v26 = vld [vmem:[%s3318_s5 + $0xd0] sm:$0xff]  }
  0x88   :  { %2220 = vmatpush3.bf16.msra.mxu0 %v2313_v8  ;;  %2242 = vmatpush3.bf16.msra.mxu1 %v2314_v9  ;;  %v2345_v9 = vld [vmem:[%s3318_s5 + $0x100] sm:$0xff]  }
  0x89   :  { %2221 = vmatprep.subr.bf16.mxu0 %v2315_v25  ;;  %2243 = vmatprep.subr.bf16.mxu1 %v2316_v27 }
  0x8c   :  { %2222 = vmatpush3.bf16.msra.mxu0 %v2317_v32  ;;  %2244 = vmatpush3.bf16.msra.mxu1 %v2318_v62  ;;  %v2346_v62 = vld [vmem:[%s3318_s5 + $0x180] sm:$0xff]  }
  0x8d   :  { %2223 = vmatprep.subr.bf16.mxu0 %v2319_v63  ;;  %2245 = vmatprep.subr.bf16.mxu1 %v2320_v26  ;;  %v2347_v63 = vld [vmem:[%s3318_s5 + $0x148] sm:$0xff]  }
  0x90   :  { %2224 = vmatpush3.bf16.msra.mxu0 %v2321_v30  ;;  %2246 = vmatpush3.bf16.msra.mxu1 %v2322_v49  ;;  %v2348_v49 = vld [vmem:[%s3318_s5 + $0x1c8] sm:$0xff]  }
  0x91   :  { %2225 = vmatprep.subr.bf16.mxu0 %v2323_v50  ;;  %2247 = vmatprep.subr.bf16.mxu1 %v2324_v10  ;;  %v2349_v10 = vld [vmem:[%s3318_s5 + $0x108] sm:$0xff]  }
  0x94   :  { %2226 = vmatpush3.bf16.msra.mxu0 %v2325_v60  ;;  %2248 = vmatpush3.bf16.msra.mxu1 %v2326_v14  ;;  %v2350_v14 = vld [vmem:[%s3318_s5 + $0x188] sm:$0xff]  }
  0x95   :  { %2227 = vmatprep.subr.bf16.mxu0 %v2327_v15  ;;  %2249 = vmatprep.subr.bf16.mxu1 %v2328_v28  ;;  %v2351_v15 = vld [vmem:[%s3318_s5 + $0x150] sm:$0xff]  }
  0x98   :  { %2228 = vmatpush3.bf16.msra.mxu0 %v2329_v29  ;;  %2250 = vmatpush3.bf16.msra.mxu1 %v2330_v11  ;;  %v2352_v29 = vld [vmem:[%s3318_s5 + $0x1d0] sm:$0xff]  }
  0x99   :  { %2229 = vmatprep.subr.bf16.mxu0 %v2331_v12  ;;  %2251 = vmatprep.subr.bf16.mxu1 %v2332_v20  ;;  %v2353_v12 = vld [vmem:[%s3318_s5 + $0x110] sm:$0xff]  }
  0x9a   :  { %v2354_v20 = vld [vmem:[%s3318_s5 + $0x190] sm:$0xff]  }
  0x9c   :  { %2230 = vmatpush3.bf16.msra.mxu0 %v2333_v21  ;;  %2252 = vmatpush3.bf16.msra.mxu1 %v2334_v33  ;;  %v2355_v21 = vld [vmem:[%s3318_s5 + $0x158] sm:$0xff]  }
  0x9d   :  { %2231 = vmatprep.subr.bf16.mxu0 %v2335_v43  ;;  %2253 = vmatprep.subr.bf16.mxu1 %v2336_v55  ;;  %v2356_v33 = vld [vmem:[%s3318_s5 + $0x1d8] sm:$0xff]  }
  0x9e   :  { %v2357_v43 = vld [vmem:[%s3318_s5 + $0x118] sm:$0xff]  }
  0x9f   :  { %v2358_v55 = vld [vmem:[%s3318_s5 + $0x198] sm:$0xff]  }
  0xa0   :  { %2232 = vmatpush3.bf16.msra.mxu0 %v2337_v5  ;;  %2254 = vmatpush3.bf16.msra.mxu1 %v2338_v0  ;;  %v2359_v5 = vld [vmem:[%s3318_s5 + $0x160] sm:$0xff]  }
  0xa1   :  { %2233 = vmatprep.subr.bf16.mxu0 %v2339_v56  ;;  %2255 = vmatprep.subr.bf16.mxu1 %v2340_v61  ;;  %v2360_v0 = vld [vmem:[%s3318_s5 + $0x1e0] sm:$0xff]  }
  0xa2   :  { %v2361_v56 = vld [vmem:[%s3318_s5 + $0x120] sm:$0xff]  }
  0xa3   :  { %v2362_v61 = vld [vmem:[%s3318_s5 + $0x1a0] sm:$0xff]  }
  0xa4   :  { %2234 = vmatpush3.bf16.msra.mxu0 %v2341_v38  ;;  %2256 = vmatpush3.bf16.msra.mxu1 %v2342_v52  ;;  %v2363_v38 = vld [vmem:[%s3318_s5 + $0x168] sm:$0xff]  }
  0xa5   :  { %2263 = vmatprep.subr.bf16.mxu0 %v2343_v53  ;;  %2285 = vmatprep.subr.bf16.mxu1 %v2344_v13  ;;  %v2364_v52 = vld [vmem:[%s3318_s5 + $0x1e8] sm:$0xff]  }
  0xa6   :  { %v2365_v53 = vld [vmem:[%s3318_s5 + $0x128] sm:$0xff]  }
  0xa7   :  { %v2366_v13 = vld [vmem:[%s3318_s5 + $0x1a8] sm:$0xff]  }
 0x11a   :  { %v1058_v39 = vpop.f32.mrb[0].mxu0  ;;  %v1099_v19 = vpop.f32.mrb[0].mxu1 }
 0x11b   :  { %v1059_v59 = vadd.f32 %v1058_v39, %v332_v17  ;;  %v1060_v42 = vpop.f32.mrb[1].mxu0  ;;  %v1100_v45 = vadd.f32 %v1099_v19, %v340_v35  ;;  %v1101_v2 = vpop.f32.mrb[1].mxu1  ;;  %v2371_v17 = vld [vmem:[%s3318_s5 + $0x178] sm:$0xff]   ;;  %v355_v39 = vsub.s32 6, %v2532_v41 }
 0x11c   :  { %v1061_v1 = vadd.f32 %v1060_v42, %v336_v36  ;;  %v1062_v22 = vpop.f32.mrb[2].mxu0  ;;  %v1102_v6 = vadd.f32 %v1101_v2, %v344_v37  ;;  %v1103_v24 = vpop.f32.mrb[2].mxu1  ;;  %v2372_v35 = vld [vmem:[%s3318_s5 + $0x1f8] sm:$0xff]   ;;  %v347_v37 = vsub.s32 4, %v2532_v41 }
 0x11d   :  { %v1230_v23 = vmul.f32 %v1193_v18, %v1059_v59  ;;  %v1266_v48 = vpack.c.bf16 %v1059_v59, %v1059_v59  ;;  %v1063_v46 = vpop.f32.mrb[3].mxu0  ;;  %v1232_v47 = vmul.f32 %v1201_v40, %v1100_v45  ;;  %v1268_v51 = vpack.c.bf16 %v1100_v45, %v1100_v45  ;;  %v1104_v8 = vpop.f32.mrb[3].mxu1  ;;  %v2373_v36 = vld [vmem:[%s3318_s5 + $0x138] sm:$0xff]  }
 0x11e   :  { %v1231_v3 = vmul.f32 %v1197_v58, %v1061_v1  ;;  %v1267_v7 = vpack.c.bf16 %v1061_v1, %v1061_v1  ;;  %v1233_v27 = vmul.f32 %v1205_v44, %v1102_v6  ;;  %v1269_v32 = vpack.c.bf16 %v1102_v6, %v1102_v6  ;;  %v2374_v18 = vld [vmem:[%s3318_s5 + $0x1b8] sm:$0xff]  }
 0x11f   :  { %v1239_v25 = vsel %vm1238_vm1, %v1230_v23, 0.0  ;;  %v1242_v26 = vsel %vm1238_vm1, %v1232_v47, 0.0  ;;  %v351_v40 = vsub.s32 5, %v2532_v41  ;;  %v359_v58 = vsub.s32 7, %v2532_v41 }
 0x120   :  { %v1240_v30 = vsel %vm1238_vm1, %v1231_v3, 0.0  ;;  %1825 = vmatprep.mubr.bf16.mxu0 %v1267_v7  ;;  %1865 = vmatprep.mubr.bf16.mxu1 %v1269_v32  ;;  %v1244_v28 = vsel %vm1238_vm1, %v1233_v27, 0.0  ;;  %v348_v59 = vrot.slane %v3156_v31, %v347_v37  ;;  %v356_v19 = vrot.slane %v3156_v31, %v355_v39 }
 0x121   :  { %v1241_v50 = vadd.f32 %v1240_v30, %v1239_v25  ;;  %1826 = vmatmul.mubr.bf16.vlgmr.msra.gmra.mrb[8].mxu0 %v1266_v48  ;;  %1866 = vmatmul.mubr.bf16.vlgmr.msra.gmra.mrb[8].mxu1 %v1268_v51  ;;  %v352_v42 = vrot.slane %v3156_v31, %v351_v40  ;;  %v1209_v44 = vrot.slane %v3164_v16, %v347_v37 }
 0x122   :  { %2264 = vmatpush3.bf16.msra.mxu0 %v2345_v9  ;;  %2286 = vmatpush3.bf16.msra.mxu1 %v2346_v62  ;;  %v360_v45 = vrot.slane %v3156_v31, %v359_v58  ;;  %v1217_v2 = vrot.slane %v3164_v16, %v355_v39  ;;  %v1213_v22 = vrot.slane %v3164_v16, %v351_v40 }
 0x123   :  { %v1243_v60 = vadd.f32 %v1242_v26, %v1241_v50  ;;  %2265 = vmatprep.subr.bf16.mxu0 %v2347_v63  ;;  %2287 = vmatprep.subr.bf16.mxu1 %v2348_v49  ;;  %v1221_v41 = vrot.slane %v3164_v16, %v359_v58  ;;  %v1967_v58 = vld [vmem:[%s3320_s7] sm:$0x3] }
 0x125   :  { %v3202_v11 = vadd.f32 %v1244_v28, %v1243_v60 }
 0x126   :  { %2266 = vmatpush3.bf16.msra.mxu0 %v2349_v10  ;;  %2288 = vmatpush3.bf16.msra.mxu1 %v2350_v14 }
 0x127   :  { %2267 = vmatprep.subr.bf16.mxu0 %v2351_v15  ;;  %2289 = vmatprep.subr.bf16.mxu1 %v2352_v29  ;;  %v2404_v29 = vmov 0  }
 0x128   :  { %2310 = vset.pattern.permute.xlu0 %v2404_v29 }
 0x12a   :  { %2268 = vmatpush3.bf16.msra.mxu0 %v2353_v12  ;;  %2290 = vmatpush3.bf16.msra.mxu1 %v2354_v20 }
 0x12b   :  { %2269 = vmatprep.subr.bf16.mxu0 %v2355_v21  ;;  %2291 = vmatprep.subr.bf16.mxu1 %v2356_v33 }
 0x12e   :  { %2270 = vmatpush3.bf16.msra.mxu0 %v2357_v43  ;;  %2292 = vmatpush3.bf16.msra.mxu1 %v2358_v55 }
 0x12f   :  { %2271 = vmatprep.subr.bf16.mxu0 %v2359_v5  ;;  %2293 = vmatprep.subr.bf16.mxu1 %v2360_v0 }
 0x132   :  { %2272 = vmatpush3.bf16.msra.mxu0 %v2361_v56  ;;  %2294 = vmatpush3.bf16.msra.mxu1 %v2362_v61 }
 0x133   :  { %2273 = vmatprep.subr.bf16.mxu0 %v2363_v38  ;;  %2295 = vmatprep.subr.bf16.mxu1 %v2364_v52 }
 0x136   :  { %2274 = vmatpush3.bf16.msra.mxu0 %v2365_v53  ;;  %2296 = vmatpush3.bf16.msra.mxu1 %v2366_v13 }
 0x137   :  { %2275 = vmatprep.subr.bf16.mxu0 %v2367_v4  ;;  %2297 = vmatprep.subr.bf16.mxu1 %v2368_v34 }
 0x13a   :  { %2276 = vmatpush3.bf16.msra.mxu0 %v2369_v54  ;;  %2298 = vmatpush3.bf16.msra.mxu1 %v2370_v57 }
 0x13b   :  { %2277 = vmatprep.subr.bf16.mxu0 %v2371_v17  ;;  %2299 = vmatprep.subr.bf16.mxu1 %v2372_v35 }
 0x13e   :  { %2278 = vmatpush3.bf16.msra.mxu0 %v2373_v36  ;;  %2300 = vmatpush3.bf16.msra.mxu1 %v2374_v18 }
 0x15a   :  { %v1140_v1 = vpop.f32.mrb[4].mxu0  ;;  %v1181_v48 = vpop.f32.mrb[4].mxu1 }
 0x15b   :  { %v1141_v23 = vadd.f32 %v1140_v1, %v348_v59  ;;  %v1142_v6 = vpop.f32.mrb[5].mxu0  ;;  %v1182_v24 = vadd.f32 %v1181_v48, %v356_v19  ;;  %v1183_v47 = vpop.f32.mrb[5].mxu1 }
 0x15c   :  { %v1143_v46 = vadd.f32 %v1142_v6, %v352_v42  ;;  %v1144_v51 = vpop.f32.mrb[6].mxu0  ;;  %v1184_v7 = vadd.f32 %v1183_v47, %v360_v45  ;;  %v1185_v8 = vpop.f32.mrb[6].mxu1 }
 0x15d   :  { %v1234_v3 = vmul.f32 %v1209_v44, %v1141_v23  ;;  %v1145_v9 = vpop.f32.mrb[7].mxu0  ;;  %v1236_v25 = vmul.f32 %v1217_v2, %v1182_v24  ;;  %v1272_v31 = vpack.c.bf16 %v1182_v24, %v1182_v24  ;;  %v1186_v62 = vpop.f32.mrb[7].mxu1  ;;  %v1270_v26 = vpack.c.bf16 %v1141_v23, %v1141_v23  ;;  %v2134_v24 = vld [vmem:[#allocation2] ss:$0 sm:$0xff] }
 0x15e   :  { %v1235_v27 = vmul.f32 %v1213_v22, %v1143_v46  ;;  %v1271_v32 = vpack.c.bf16 %v1143_v46, %v1143_v46  ;;  %v1237_v30 = vmul.f32 %v1221_v41, %v1184_v7  ;;  %v1273_v49 = vpack.c.bf16 %v1184_v7, %v1184_v7 }
 0x15f   :  { %v1246_v63 = vsel %vm1238_vm1, %v1234_v3, 0.0  ;;  %v1250_v60 = vsel %vm1238_vm1, %v1236_v25, 0.0  ;;  %v3324_v44 = vlaneseq }
 0x160   :  { %v1247_v16 = vadd.f32 %v1246_v63, %v3202_v11  ;;  %v1248_v50 = vsel %vm1238_vm1, %v1235_v27, 0.0  ;;  %1905 = vmatprep.mubr.bf16.mxu0 %v1271_v32  ;;  %1945 = vmatprep.mubr.bf16.mxu1 %v1273_v49  ;;  %v1252_v15 = vsel %vm1238_vm1, %v1237_v30, 0.0  ;;  %v2135_v11 = vld [vmem:[%s3319_s6] ss:$0 sm:$0xff] }
 0x161   :  { %1906 = vmatmul.mubr.bf16.vlgmr.msra.gmra.mrb[12].mxu0 %v1270_v26  ;;  %1946 = vmatmul.mubr.bf16.vlgmr.msra.gmra.mrb[12].mxu1 %v1272_v31  ;;  %v1966_v45 = vand.u32 127, %v3324_v44 }
 0x162   :  { %v1249_v10 = vadd.f32 %v1248_v50, %v1247_v16 }
 0x164   :  { %v1251_v14 = vadd.f32 %v1250_v60, %v1249_v10 }
 0x166   :  { %v1253_v28 = vadd.f32 %v1252_v15, %v1251_v14 }
 0x1f4   :  { %v2235_v12 = vpop.f32.mrb[8].mxu0  ;;  %v2257_v20 = vpop.f32.mrb[8].mxu1 }
 0x1f5   :  { %v2236_v21 = vpop.f32.mrb[9].mxu0  ;;  %v2258_v43 = vpop.f32.mrb[9].mxu1 }
 0x1f6   :  { %v2237_v33 = vadd.f32 %v2236_v21, %v2235_v12  ;;  %v2238_v55 = vpop.f32.mrb[10].mxu0  ;;  %v2259_v5 = vadd.f32 %v2258_v43, %v2257_v20  ;;  %v2260_v0 = vpop.f32.mrb[10].mxu1 }
 0x1f7   :  { %v2239_v56 = vpop.f32.mrb[11].mxu0  ;;  %v2261_v38 = vpop.f32.mrb[11].mxu1 }
 0x1f8   :  { %v1828_v61 = vadd.f32 %v2237_v33, %v2135_v11 }
 0x1fa   :  { %v1868_v52 = vadd.f32 %v2259_v5, %v1828_v61 }
 0x234   :  { %v2279_v53 = vpop.f32.mrb[12].mxu0  ;;  %v2301_v13 = vpop.f32.mrb[12].mxu1 }
 0x235   :  { %v2280_v4 = vpop.f32.mrb[13].mxu0  ;;  %v2302_v54 = vpop.f32.mrb[13].mxu1 }
 0x236   :  { %v2281_v34 = vadd.f32 %v2280_v4, %v2279_v53  ;;  %v2282_v57 = vpop.f32.mrb[14].mxu0  ;;  %v2303_v17 = vadd.f32 %v2302_v54, %v2301_v13  ;;  %v2304_v35 = vpop.f32.mrb[14].mxu1 }
 0x237   :  { %v2283_v36 = vpop.f32.mrb[15].mxu0  ;;  %v2305_v37 = vpop.f32.mrb[15].mxu1 }
 0x238   :  { %v1908_v18 = vadd.f32 %v2281_v34, %v1868_v52 }
 0x23a   :  { %v1948_v39 = vadd.f32 %v2303_v17, %v1908_v18 }
 0x23c   :  { %v1953_v40 = vsel %vm1238_vm1, %v1948_v39, -inf }
 0x23d   :  { %1954 = vmax.xlane.f32.xlu0 %v1953_v40 }
 0x253   :  { %1969 = vperm.xlu0 %2310, %v1967_v58  }
 0x2ca   :  { %v1955_v59 = vpop.xlane.xlu0 %1954 }
 0x2cb   :  { %v1956_v19 = vsub.f32 %v1948_v39, %v1955_v59 }
 0x2cd   :  { %v1957_v42 = vmul.f32 1.442695, %v1956_v19 }
 0x2cf   :  { %2375 = vpow2.f32 %v1957_v42 }
 0x2d2   :  { %v1970_v1 = vpop.permute.xlu0 %1969 }
 0x2d3   :  { %vm1971_vm2 = vcmp.eq.s32.totalorder %v1966_v45, %v1970_v1 }
 0x2d4   :  { %v1972_v23 = vsel %vm1971_vm2, %v1948_v39, 0.0 }
 0x2d5   :  { %v1973_v48 = vsel %vm1238_vm1, %v1972_v23, 0.0 }
 0x2d9   :  { %v2376_v2 = vpop.eup %2375 }
 0x2da   :  { %v1959_v22 = vsel %vm1238_vm1, %v2376_v2, 0.0 }
 0x2db   :  { %1960 = vadd.xlane.f32.xlu1 %v1959_v22 }
 0x2df   :  { %1974 = vadd.xlane.f32.xlu1 %v1973_v48 }
 0x2e3   :  { %1254 = vadd.xlane.f32.xlu1 %v1253_v28 }
 0x368   :  { %v1961_v6 = vpop.xlane.xlu1 %1960 }
 0x369   :  { %2377 = vlog2.f32 %v1961_v6 }
 0x36c   :  { %v1975_v41 = vpop.xlane.xlu1 %1974 }
 0x370   :  { %v1255_v46 = vpop.xlane.xlu1 %1254 }
 0x371   :  { %v1263_v47 = vadd.f32 %v2134_v24, %v1255_v46 }
 0x373   :  { %v2378_v51 = vpop.eup %2377  ;;  %1265 = vst.msk [vmem:[%s3321_s8] sm:$0x3] %vm1264_vm3, %v1263_v47  ;;  %s2383_s8 = scalar_lea.vmem %s1997_s12, 32 }
 0x374   :  { %v1963_v3 = vmul.f32 0.6931472, %v2378_v51  ;;  %p2385_p2 = scmp.lt.s32.totalorder %s2383_s8, %s2379_s13 }
 0x376   :  { %v1964_v7 = vadd.f32 %v1963_v3, %v1955_v59  ;;  %p2386_p3 = por %p2385_p2, %p2384_p1 }
 0x378   :  { %v1976_v8 = vsub.f32 %v1964_v7, %v1975_v41  ;;  %p2387_p4 = pnand %p2386_p3, %p2380_p0 }
 0x37a   :  { %v1977_v9 = vsel %vm1238_vm1, %v1976_v8, 0.0 }
 0x37b   :  { %v1978_v25 = vrot.slane %v1977_v9, 4 }
 0x37d   :  { %v1979_v31 = vadd.f32 %v1978_v25, %v1977_v9 }
 0x37f   :  { %v1980_v27 = vrot.slane %v1979_v31, 2 }
 0x381   :  { %v1981_v32 = vadd.f32 %v1980_v27, %v1979_v31 }
 0x383   :  { %v1982_v62 = vrot.slane %v1981_v32, 1 }
 0x385   :  { %v1983_v63 = vadd.f32 %v1982_v62, %v1981_v32 }
 0x387   :  { %v1985_v26 = vmul.f32 0.5, %v1983_v63 }
 0x389   :  { %1987 = vst.msk [vmem:[#allocation3] sm:$0x1] %vm1986_vm4, %v1985_v26 }
 0x38a   :  { %2390 = shalt.err (!%p2387_p4)
}
 0x38b   :  { %s2391_s16 = scalar_lea.hbm %s3322_s9, 16 }
 0x38c   :  { %p2392_p5 = scmp.ne.s32.totalorder %s3322_s9, %s2391_s16  ;;  %p2395_p6 = scmp.lt.u32.totalorder %s2391_s16, %s3322_s9 }
 0x38e   :  { %p2397_p7 = pnand %p2395_p6, %p2392_p5 }
 0x390   :  { %2400 = shalt.err (!%p2397_p7)
}
 0x391   :  { %1999 = dma.vmem_to_hbm [thread:$0]  %s1997_s12, 16, %s3322_s9, [#allocation4]  }
 0x392   :  { %2401 = dma.done.wait [#allocation4], 16  }
 0x393   :  { %2402 = vsyncadd [#allocation4], 4294967280 }
 0x394   :  { %2005 = vsyncpa [#allocation4], 1 }

</bundles_post_ra>
